<compile_context>
chip_gen: v6e
topology: v6e:2x2x1
jax: 0.10.0
libtpu: 0.0.40
codegen_flags: <defaults>
</compile_context>

<pallas_src>
import functools

import jax
import jax.numpy as jnp
from jax import lax
from jax.experimental import pallas as pl
from jax.experimental.pallas import tpu as pltpu


# ---------------------------------------------------------------------------
# In-kernel circular-shift helpers.
# Planes are (P, Hp, Wp): Hp on the sublane axis, Wp on the lane axis.
# ---------------------------------------------------------------------------

def _roll2(v2, s, axis):
    """2-D circular roll: result[n] = v2[n - s] along `axis` (1 <= s < size)."""
    n = v2.shape[axis]
    aligned = (n % 128 == 0) if axis == 1 else (n % 8 == 0)
    if aligned:
        return pltpu.roll(v2, shift=s, axis=axis)
    # TODO(synk): unaligned fallback is 2 slices + 1 concat per shift; a
    # build-halo-once scheme would be cheaper, but with only 2*ksize shifts per
    # pass this path is already ~6x better than the old per-tap fallback.
    if axis == 1:
        return jnp.concatenate([v2[:, n - s:], v2[:, :n - s]], axis=1)
    return jnp.concatenate([v2[n - s:, :], v2[:n - s, :]], axis=0)


def _cshift(v, d, axis):
    """Per-plane circular shift of (P, Hp, Wp): result[p, .., n, ..] = v[p, .., n + d, ..]
    along `axis` in {1 (sublane), 2 (lane)}.  Static d; uses the XLU rotate slot
    when the shifted axis is tile-aligned."""
    n = v.shape[axis]
    s = (-d) % n
    if s == 0:
        return v
    num_planes = v.shape[0]
    return jnp.stack([_roll2(v[i], s, axis - 1) for i in range(num_planes)], axis=0)


# ---------------------------------------------------------------------------
# Kernel: one grid step solves P independent (Hp, Wp) planes with 20 CG steps.
# ---------------------------------------------------------------------------

def _deblur_cg_kernel(kern_ref, sigma_ref, mask_ref, x_ref, out_ref, *,
                      ksize, n_iters):
    # kern_ref : SMEM (ksize, ksize) f32  -- blur PSF (scalar taps)
    # sigma_ref: SMEM (B*C,)         f32  -- per-plane noise std (per-image, repeated)
    # mask_ref : VMEM (Hp, Wp)       f32  -- interior mask of the padded domain
    # x_ref    : VMEM (P, Hp, Wp)    f32  -- replicate-padded blur planes
    # out_ref  : VMEM (P, Hp, Wp)    f32  -- padded result (cropped in the wrapper)
    P, Hp, Wp = x_ref.shape
    psize = ksize // 2

    xin = x_ref[...]                         # (P, Hp, Wp)
    mask = mask_ref[...][None, :, :]         # (1, Hp, Wp), broadcasts over planes

    # Per-plane sigma: P scalar SMEM reads, splat to full planes ONCE (loop
    # invariant; JAX does not CSE broadcasts inside the fori_loop body).
    base = pl.program_id(0) * P
    sigma_b = jnp.concatenate(
        [jnp.full((1, Hp, Wp), sigma_ref[base + i], dtype=jnp.float32)
         for i in range(P)], axis=0)
    sigma4_b = 4.0 * sigma_b

    # PSF taps: scalar SMEM reads hoisted once before the CG loop.
    kw = [[kern_ref[i, j] for j in range(ksize)] for i in range(ksize)]
    offs = tuple(range(-psize, psize + 1))

    def stencil(v, flip, want_cols=False):
        """Circular 'same' correlation (flip=False) / convolution (flip=True)
        with the PSF, in 2*ksize rolls: ksize lane shifts of v shared across all
        kernel rows, weighted row-partials on the VPU, then ksize sublane shifts
        of the partial sums."""
        cols = {d: _cshift(v, d, axis=2) for d in offs}          # ksize lane rolls
        acc = None
        for i in range(ksize):
            dr = (psize - i) if flip else (i - psize)
            part = None
            for j in range(ksize):
                dc = (psize - j) if flip else (j - psize)
                term = kw[i][j] * cols[dc]
                part = term if part is None else part + term
            rolled = _cshift(part, dr, axis=1)                   # 1 sublane roll / row
            acc = rolled if acc is None else acc + rolled
        if want_cols:
            return acc, cols
        return acc

    def a_op(v):
        # dual_conv(v, K, mask) + sigma*(dual_conv(v, g1, 1) + dual_conv(v, g2, 1)).
        # The g1/g2 regularizer is fused into the [-1,2,-1] autocorrelation
        # Laplacian; its +/-1 lane neighbours reuse the conv pass' column shifts.
        kv, cols = stencil(v, flip=True, want_cols=True)
        t0 = stencil(mask * kv, flip=False)
        if psize >= 1:
            lft, rgt = cols[1], cols[-1]
        else:
            lft, rgt = _cshift(v, 1, 2), _cshift(v, -1, 2)
        nbrs = lft + rgt + _cshift(v, 1, 1) + _cshift(v, -1, 1)
        return t0 + sigma4_b * v - sigma_b * nbrs

    def inner(a, b):
        # vector_inner_product3 reduces over (-2, -1): per-plane (P, 1, 1) result.
        s = jnp.sum(a * b, axis=2, keepdims=True)
        return jnp.sum(s, axis=1, keepdims=True)

    b_rhs = stencil(xin * mask, flip=False)
    x = xin
    r = b_rhs - a_op(x)

    # --- CG iteration 0 (p = r) ---
    rho = inner(r, r)
    p = r
    q = a_op(p)
    alp = rho / inner(p, q)
    x = x + alp * p
    r = r - alp * q

    # --- CG iterations 1 .. n_iters-1 ---
    def body(_, carry):
        x, r, p, rho_1 = carry
        rho = inner(r, r)
        beta = rho / rho_1
        p = r + beta * p
        q = a_op(p)
        alp = rho / inner(p, q)
        x = x + alp * p
        r = r - alp * q
        return (x, r, p, rho)

    x, r, p, rho = lax.fori_loop(1, n_iters, body, (x, r, p, rho))

    # Lane-dense, tile-aligned padded writeback; the crop happens in XLA.
    out_ref[...] = x


# ---------------------------------------------------------------------------
# Wrapper helpers
# ---------------------------------------------------------------------------

def median_pool2d_5x5_same(x):
    """MedianPool2d(kernel_size=5, stride=1, same=True): reflect pad 2, 5x5 median.

    TODO(synk): MedianPool2d is not defined in the snippet; assumed the standard
    reflect-pad + unfold + median implementation (25 odd samples -> jnp.median
    matches torch.median)."""
    B, C, H, W = x.shape
    xp = jnp.pad(x, ((0, 0), (0, 0), (2, 2), (2, 2)), mode="reflect")
    wins = jnp.stack([xp[:, :, i:i + H, j:j + W]
                      for i in range(5) for j in range(5)], axis=-1)
    return jnp.median(wins, axis=-1)


def _vmem_capacity_bytes():
    try:
        cap = getattr(pltpu.get_tpu_info(), "vmem_capacity_bytes", None)
        if cap:
            return int(cap)
    except Exception:
        pass
    return 64 * 2 ** 20  # conservative (v7x-sized) fallback


def _choose_plane_batch(n_planes, plane_bytes, cap_bytes):
    """Largest divisor P of n_planes with P <= 8, >= 2 grid steps when possible,
    and an estimated per-step working set that fits the VMEM cap."""
    limit = 8 if n_planes < 2 else max(1, min(8, n_planes // 2))
    best = 1
    for p in range(1, n_planes + 1):
        if p > limit or 28 * p * plane_bytes > cap_bytes:
            break
        if n_planes % p == 0:
            best = p
    return best


@functools.partial(jax.jit, static_argnames=("n_iters",))
def l2_nondeblur_cg_forward(blur, kernel, n_iters=20):
    """Forward of L2NonDeblurCG: deconv_func(blur, kernel, sigma(noise))."""
    B, C, H, W = blur.shape
    ksize = kernel.shape[-1]
    assert ksize % 2 == 1, "only support odd kernel size!"
    psize = ksize // 2
    Hp, Wp = H + 2 * psize, W + 2 * psize
    n_planes = B * C

    blur = blur.astype(jnp.float32)

    # sigma (the only cross-channel coupling) is a plain XLA reduction; the
    # kernel receives it as a per-plane SMEM scalar.
    noise = blur - median_pool2d_5x5_same(blur)
    mean = jnp.mean(noise, axis=(1, 2, 3), keepdims=True)
    sigma_img = jnp.sqrt(jnp.sum((noise - mean) ** 2, axis=(1, 2, 3), keepdims=True)
                         / (C * H * W - 1)).reshape((B,))
    sigma_planes = jnp.repeat(sigma_img, C)                    # (B*C,) per plane

    xpad = jnp.pad(blur, ((0, 0), (0, 0), (psize, psize), (psize, psize)),
                   mode="edge")                                # F.pad(mode='replicate')
    xplanes = xpad.reshape(n_planes, Hp, Wp)

    # Interior mask of the replicate-padded domain (mask_beta == 1 is fused away).
    mask2d = jnp.pad(jnp.ones((H, W), jnp.float32),
                     ((psize, psize), (psize, psize)))

    # TODO(synk): auto_crop_kernel is an identity for PSFs without '-1' sentinel
    # entries (true for any real, normalized PSF), so it is not re-implemented.
    k2d = kernel.reshape(ksize, ksize).astype(jnp.float32)

    # Per-generation VMEM budget: ~3/4 of physical (48 MiB on v7x, ~96 MiB on
    # v5e/v6e); per-step working set ~ (ksize + ~20) live f32 plane-blocks.
    plane_bytes = Hp * Wp * 4
    cap = (_vmem_capacity_bytes() * 3) // 4
    P = _choose_plane_batch(n_planes, plane_bytes, cap)
    # TODO(synk): planes too large for VMEM at P=1 would need a spatially tiled
    # (or bf16-state) CG variant; not implemented here.
    need = (28 * P + 8) * plane_bytes + (2 << 20)
    vmem_limit = int(min(cap, max(32 << 20, need)))
    num_blocks = n_planes // P

    kern_fn = functools.partial(_deblur_cg_kernel, ksize=ksize, n_iters=n_iters)
    out_pad = pl.pallas_call(
        kern_fn,
        out_shape=jax.ShapeDtypeStruct((n_planes, Hp, Wp), jnp.float32),
        grid_spec=pltpu.PrefetchScalarGridSpec(
            num_scalar_prefetch=0,
            grid=(num_blocks,),
            in_specs=[
                pl.BlockSpec(memory_space=pltpu.MemorySpace.SMEM),   # PSF taps
                pl.BlockSpec(memory_space=pltpu.MemorySpace.SMEM),   # sigma per plane
                pl.BlockSpec((Hp, Wp), lambda g: (0, 0)),            # interior mask
                pl.BlockSpec((P, Hp, Wp), lambda g: (g, 0, 0)),      # padded planes
            ],
            out_specs=pl.BlockSpec((P, Hp, Wp), lambda g: (g, 0, 0)),
        ),
        compiler_params=pltpu.CompilerParams(
            dimension_semantics=("parallel",),
            vmem_limit_bytes=vmem_limit,
        ),
    )(k2d, sigma_planes, mask2d, xplanes)

    # Lane-dense padded output from the kernel; crop + reshape in XLA.
    out = out_pad[:, psize:psize + H, psize:psize + W].reshape(B, C, H, W)
    return out


# ---------------------------------------------------------------------------
# Pure-JAX (non-Pallas) reference with the original pad/slice circular-conv math
# and explicit (un-fused) g1/g2 dual convolutions — cross-checks the kernel's
# roll-based 2k-shift stencils, the Laplacian fusion and the plane batching.
# ---------------------------------------------------------------------------

_G1_TAPS = ((1, 1, -1.0), (1, 2, 1.0))   # [[0,0,0],[0,-1,1],[0,0,0]]
_G2_TAPS = ((1, 1, -1.0), (2, 1, 1.0))   # [[0,0,0],[0,-1,0],[0,1,0]]


def _circular_pad4(x, c):
    x = jnp.concatenate([x[:, :, -c:, :], x, x[:, :, :c, :]], axis=2)
    x = jnp.concatenate([x[:, :, :, -c:], x, x[:, :, :, :c]], axis=3)
    return x


def _circ_corr4(x, taps, c):
    H, W = x.shape[-2], x.shape[-1]
    xp = _circular_pad4(x, c)
    acc = None
    for (ji, jj, w) in taps:
        piece = w * xp[:, :, ji:ji + H, jj:jj + W]
        acc = piece if acc is None else acc + piece
    return acc


def _circ_conv4(x, taps, c):
    H, W = x.shape[-2], x.shape[-1]
    xp = _circular_pad4(x, c)
    acc = None
    for (ji, jj, w) in taps:
        a, b = 2 * c - ji, 2 * c - jj
        piece = w * xp[:, :, a:a + H, b:b + W]
        acc = piece if acc is None else acc + piece
    return acc


def _reference_forward(blur, kernel, n_iters=20):
    B, C, H, W = blur.shape
    ksize = kernel.shape[-1]
    psize = ksize // 2
    Hp, Wp = H + 2 * psize, W + 2 * psize

    blur = blur.astype(jnp.float32)
    noise = blur - median_pool2d_5x5_same(blur)
    mean = jnp.mean(noise, axis=(1, 2, 3), keepdims=True)
    sigma = jnp.sqrt(jnp.sum((noise - mean) ** 2, axis=(1, 2, 3), keepdims=True)
                     / (C * H * W - 1))
    xpad = jnp.pad(blur, ((0, 0), (0, 0), (psize, psize), (psize, psize)),
                   mode="edge")
    k2d = kernel.reshape(ksize, ksize).astype(jnp.float32)
    ktaps = tuple((i, j, k2d[i, j]) for i in range(ksize) for j in range(ksize))

    row = jnp.arange(Hp)[:, None]
    col = jnp.arange(Wp)[None, :]
    mask = (((row >= psize) & (row < Hp - psize)
             & (col >= psize) & (col < Wp - psize))
            .astype(jnp.float32)[None, None])

    def a_op(v):
        t0 = _circ_corr4(mask * _circ_conv4(v, ktaps, psize), ktaps, psize)
        t1 = _circ_corr4(_circ_conv4(v, _G1_TAPS, 1), _G1_TAPS, 1)
        t2 = _circ_corr4(_circ_conv4(v, _G2_TAPS, 1), _G2_TAPS, 1)
        return t0 + sigma * t1 + sigma * t2

    def inner(a, b):
        return jnp.sum(a * b, axis=(-2, -1), keepdims=True)

    b_rhs = _circ_corr4(xpad * mask, ktaps, psize)
    x = xpad
    r = b_rhs - a_op(x)
    p = rho_1 = None
    for i in range(n_iters):
        rho = inner(r, r)
        p = r if i == 0 else r + (rho / rho_1) * p
        q = a_op(p)
        alp = rho / inner(p, q)
        x = x + alp * p
        r = r - alp * q
        rho_1 = rho
    return x[:, :, psize:Hp - psize, psize:Wp - psize]


if __name__ == "__main__":
    key = jax.random.PRNGKey(0)
    # Spatial size chosen so the padded CG plane is (16, 128): sublane- and
    # lane-aligned, so every roll / store in the 20-iteration solve is dense.
    # B*C = 6 planes -> P = 3 planes per grid step, 2 grid steps (megacore-friendly).
    B, C, H, W = 2, 3, 12, 124
    ksize = 5

    blur = jax.random.uniform(key, (B, C, H, W), dtype=jnp.float32)
    # Deterministic normalized 5x5 Gaussian-like PSF (positive entries, so the
    # module's auto_crop_kernel would be a no-op).
    g = jnp.exp(-0.5 * ((jnp.arange(ksize) - ksize // 2) / 1.2) ** 2)
    psf = jnp.outer(g, g)
    psf = (psf / jnp.sum(psf)).reshape(1, 1, ksize, ksize).astype(jnp.float32)

    out = l2_nondeblur_cg_forward(blur, psf)
    out = jax.block_until_ready(out)

    ref = _reference_forward(blur, psf)
    assert out.shape == (B, C, H, W)
    assert bool(jnp.all(jnp.isfinite(out)))
    assert bool(jnp.allclose(out, ref, rtol=5e-2, atol=5e-2))

    print("KERNEL_OK")
</pallas_src>

<mosaic_0001>
module attributes {stable_mosaic.version = 11 : i64} {
  func.func @_deblur_cg_kernel(%arg0: i32, %arg1: memref<5x5xf32, #tpu.memory_space<smem>>, %arg2: memref<6xf32, #tpu.memory_space<smem>>, %arg3: memref<16x128xf32, #tpu.memory_space<vmem>>, %arg4: memref<3x16x128xf32, #tpu.memory_space<vmem>>, %arg5: memref<3x16x128xf32, #tpu.memory_space<vmem>>) attributes {dimension_semantics = [#tpu.dimension_semantics<parallel>], iteration_bounds = array<i64: 2>, scalar_prefetch = 0 : i64, scratch_operands = 0 : i64, tpu.core_type = #tpu.core_type<tc>, window_params = [{transform_indices = @transform_0, window_bounds = array<i64: 5, 5>}, {transform_indices = @transform_1, window_bounds = array<i64: 6>}, {pipeline_mode = #tpu.pipeline_mode<synchronous>, transform_indices = @transform_2, window_bounds = array<i64: 16, 128>}, {transform_indices = @transform_3, window_bounds = array<i64: 3, 16, 128>}, {transform_indices = @transform_4, window_bounds = array<i64: 3, 16, 128>}]} {
    %c0 = arith.constant 0 : index
    %c0_0 = arith.constant 0 : index
    %c0_1 = arith.constant 0 : index
    %0 = vector.load %arg4[%c0, %c0_0, %c0_1] : memref<3x16x128xf32, #tpu.memory_space<vmem>>, vector<3x16x128xf32>
    %c0_2 = arith.constant 0 : index
    %c0_3 = arith.constant 0 : index
    %1 = vector.load %arg3[%c0_2, %c0_3] : memref<16x128xf32, #tpu.memory_space<vmem>>, vector<16x128xf32>
    %2 = vector.shape_cast %1 : vector<16x128xf32> to vector<1x16x128xf32>
    %c3_i32 = arith.constant 3 : i32
    %3 = arith.muli %arg0, %c3_i32 : i32
    %c0_i32 = arith.constant 0 : i32
    %4 = arith.addi %3, %c0_i32 : i32
    %5 = arith.index_cast %4 : i32 to index
    %6 = memref.load %arg2[%5] : memref<6xf32, #tpu.memory_space<smem>>
    %7 = vector.broadcast %6 : f32 to vector<1x16x128xf32>
    %c1_i32 = arith.constant 1 : i32
    %8 = arith.addi %3, %c1_i32 : i32
    %9 = arith.index_cast %8 : i32 to index
    %10 = memref.load %arg2[%9] : memref<6xf32, #tpu.memory_space<smem>>
    %11 = vector.broadcast %10 : f32 to vector<1x16x128xf32>
    %c2_i32 = arith.constant 2 : i32
    %12 = arith.addi %3, %c2_i32 : i32
    %13 = arith.index_cast %12 : i32 to index
    %14 = memref.load %arg2[%13] : memref<6xf32, #tpu.memory_space<smem>>
    %15 = vector.broadcast %14 : f32 to vector<1x16x128xf32>
    %16 = tpu.concatenate %7, %11, %15 in 0 : vector<1x16x128xf32>, vector<1x16x128xf32>, vector<1x16x128xf32> -> vector<3x16x128xf32>
    %cst = arith.constant 4.000000e+00 : f32
    %17 = vector.broadcast %cst : f32 to vector<3x16x128xf32>
    %18 = arith.mulf %17, %16 : vector<3x16x128xf32>
    %c0_4 = arith.constant 0 : index
    %c0_5 = arith.constant 0 : index
    %19 = memref.load %arg1[%c0_4, %c0_5] : memref<5x5xf32, #tpu.memory_space<smem>>
    %c0_6 = arith.constant 0 : index
    %c1 = arith.constant 1 : index
    %20 = memref.load %arg1[%c0_6, %c1] : memref<5x5xf32, #tpu.memory_space<smem>>
    %c0_7 = arith.constant 0 : index
    %c2 = arith.constant 2 : index
    %21 = memref.load %arg1[%c0_7, %c2] : memref<5x5xf32, #tpu.memory_space<smem>>
    %c0_8 = arith.constant 0 : index
    %c3 = arith.constant 3 : index
    %22 = memref.load %arg1[%c0_8, %c3] : memref<5x5xf32, #tpu.memory_space<smem>>
    %c0_9 = arith.constant 0 : index
    %c4 = arith.constant 4 : index
    %23 = memref.load %arg1[%c0_9, %c4] : memref<5x5xf32, #tpu.memory_space<smem>>
    %c1_10 = arith.constant 1 : index
    %c0_11 = arith.constant 0 : index
    %24 = memref.load %arg1[%c1_10, %c0_11] : memref<5x5xf32, #tpu.memory_space<smem>>
    %c1_12 = arith.constant 1 : index
    %c1_13 = arith.constant 1 : index
    %25 = memref.load %arg1[%c1_12, %c1_13] : memref<5x5xf32, #tpu.memory_space<smem>>
    %c1_14 = arith.constant 1 : index
    %c2_15 = arith.constant 2 : index
    %26 = memref.load %arg1[%c1_14, %c2_15] : memref<5x5xf32, #tpu.memory_space<smem>>
    %c1_16 = arith.constant 1 : index
    %c3_17 = arith.constant 3 : index
    %27 = memref.load %arg1[%c1_16, %c3_17] : memref<5x5xf32, #tpu.memory_space<smem>>
    %c1_18 = arith.constant 1 : index
    %c4_19 = arith.constant 4 : index
    %28 = memref.load %arg1[%c1_18, %c4_19] : memref<5x5xf32, #tpu.memory_space<smem>>
    %c2_20 = arith.constant 2 : index
    %c0_21 = arith.constant 0 : index
    %29 = memref.load %arg1[%c2_20, %c0_21] : memref<5x5xf32, #tpu.memory_space<smem>>
    %c2_22 = arith.constant 2 : index
    %c1_23 = arith.constant 1 : index
    %30 = memref.load %arg1[%c2_22, %c1_23] : memref<5x5xf32, #tpu.memory_space<smem>>
    %c2_24 = arith.constant 2 : index
    %c2_25 = arith.constant 2 : index
    %31 = memref.load %arg1[%c2_24, %c2_25] : memref<5x5xf32, #tpu.memory_space<smem>>
    %c2_26 = arith.constant 2 : index
    %c3_27 = arith.constant 3 : index
    %32 = memref.load %arg1[%c2_26, %c3_27] : memref<5x5xf32, #tpu.memory_space<smem>>
    %c2_28 = arith.constant 2 : index
    %c4_29 = arith.constant 4 : index
    %33 = memref.load %arg1[%c2_28, %c4_29] : memref<5x5xf32, #tpu.memory_space<smem>>
    %c3_30 = arith.constant 3 : index
    %c0_31 = arith.constant 0 : index
    %34 = memref.load %arg1[%c3_30, %c0_31] : memref<5x5xf32, #tpu.memory_space<smem>>
    %c3_32 = arith.constant 3 : index
    %c1_33 = arith.constant 1 : index
    %35 = memref.load %arg1[%c3_32, %c1_33] : memref<5x5xf32, #tpu.memory_space<smem>>
    %c3_34 = arith.constant 3 : index
    %c2_35 = arith.constant 2 : index
    %36 = memref.load %arg1[%c3_34, %c2_35] : memref<5x5xf32, #tpu.memory_space<smem>>
    %c3_36 = arith.constant 3 : index
    %c3_37 = arith.constant 3 : index
    %37 = memref.load %arg1[%c3_36, %c3_37] : memref<5x5xf32, #tpu.memory_space<smem>>
    %c3_38 = arith.constant 3 : index
    %c4_39 = arith.constant 4 : index
    %38 = memref.load %arg1[%c3_38, %c4_39] : memref<5x5xf32, #tpu.memory_space<smem>>
    %c4_40 = arith.constant 4 : index
    %c0_41 = arith.constant 0 : index
    %39 = memref.load %arg1[%c4_40, %c0_41] : memref<5x5xf32, #tpu.memory_space<smem>>
    %c4_42 = arith.constant 4 : index
    %c1_43 = arith.constant 1 : index
    %40 = memref.load %arg1[%c4_42, %c1_43] : memref<5x5xf32, #tpu.memory_space<smem>>
    %c4_44 = arith.constant 4 : index
    %c2_45 = arith.constant 2 : index
    %41 = memref.load %arg1[%c4_44, %c2_45] : memref<5x5xf32, #tpu.memory_space<smem>>
    %c4_46 = arith.constant 4 : index
    %c3_47 = arith.constant 3 : index
    %42 = memref.load %arg1[%c4_46, %c3_47] : memref<5x5xf32, #tpu.memory_space<smem>>
    %c4_48 = arith.constant 4 : index
    %c4_49 = arith.constant 4 : index
    %43 = memref.load %arg1[%c4_48, %c4_49] : memref<5x5xf32, #tpu.memory_space<smem>>
    %44 = vector.broadcast %2 : vector<1x16x128xf32> to vector<3x16x128xf32>
    %45 = arith.mulf %0, %44 : vector<3x16x128xf32>
    %46 = vector.extract_strided_slice %45 {offsets = [0, 0, 0], sizes = [1, 16, 128], strides = [1, 1, 1]} : vector<3x16x128xf32> to vector<1x16x128xf32>
    %47 = vector.shape_cast %46 : vector<1x16x128xf32> to vector<16x128xf32>
    %c2_i32_50 = arith.constant 2 : i32
    %48 = tpu.dynamic_rotate %47 by %c2_i32_50 dim 1 : vector<16x128xf32>, i32 -> vector<16x128xf32>
    %49 = vector.extract_strided_slice %45 {offsets = [1, 0, 0], sizes = [1, 16, 128], strides = [1, 1, 1]} : vector<3x16x128xf32> to vector<1x16x128xf32>
    %50 = vector.shape_cast %49 : vector<1x16x128xf32> to vector<16x128xf32>
    %c2_i32_51 = arith.constant 2 : i32
    %51 = tpu.dynamic_rotate %50 by %c2_i32_51 dim 1 : vector<16x128xf32>, i32 -> vector<16x128xf32>
    %52 = vector.extract_strided_slice %45 {offsets = [2, 0, 0], sizes = [1, 16, 128], strides = [1, 1, 1]} : vector<3x16x128xf32> to vector<1x16x128xf32>
    %53 = vector.shape_cast %52 : vector<1x16x128xf32> to vector<16x128xf32>
    %c2_i32_52 = arith.constant 2 : i32
    %54 = tpu.dynamic_rotate %53 by %c2_i32_52 dim 1 : vector<16x128xf32>, i32 -> vector<16x128xf32>
    %55 = vector.shape_cast %48 : vector<16x128xf32> to vector<1x16x128xf32>
    %56 = vector.shape_cast %51 : vector<16x128xf32> to vector<1x16x128xf32>
    %57 = vector.shape_cast %54 : vector<16x128xf32> to vector<1x16x128xf32>
    %58 = tpu.concatenate %55, %56, %57 in 0 : vector<1x16x128xf32>, vector<1x16x128xf32>, vector<1x16x128xf32> -> vector<3x16x128xf32>
    %59 = vector.extract_strided_slice %45 {offsets = [0, 0, 0], sizes = [1, 16, 128], strides = [1, 1, 1]} : vector<3x16x128xf32> to vector<1x16x128xf32>
    %60 = vector.shape_cast %59 : vector<1x16x128xf32> to vector<16x128xf32>
    %c1_i32_53 = arith.constant 1 : i32
    %61 = tpu.dynamic_rotate %60 by %c1_i32_53 dim 1 : vector<16x128xf32>, i32 -> vector<16x128xf32>
    %62 = vector.extract_strided_slice %45 {offsets = [1, 0, 0], sizes = [1, 16, 128], strides = [1, 1, 1]} : vector<3x16x128xf32> to vector<1x16x128xf32>
    %63 = vector.shape_cast %62 : vector<1x16x128xf32> to vector<16x128xf32>
    %c1_i32_54 = arith.constant 1 : i32
    %64 = tpu.dynamic_rotate %63 by %c1_i32_54 dim 1 : vector<16x128xf32>, i32 -> vector<16x128xf32>
    %65 = vector.extract_strided_slice %45 {offsets = [2, 0, 0], sizes = [1, 16, 128], strides = [1, 1, 1]} : vector<3x16x128xf32> to vector<1x16x128xf32>
    %66 = vector.shape_cast %65 : vector<1x16x128xf32> to vector<16x128xf32>
    %c1_i32_55 = arith.constant 1 : i32
    %67 = tpu.dynamic_rotate %66 by %c1_i32_55 dim 1 : vector<16x128xf32>, i32 -> vector<16x128xf32>
    %68 = vector.shape_cast %61 : vector<16x128xf32> to vector<1x16x128xf32>
    %69 = vector.shape_cast %64 : vector<16x128xf32> to vector<1x16x128xf32>
    %70 = vector.shape_cast %67 : vector<16x128xf32> to vector<1x16x128xf32>
    %71 = tpu.concatenate %68, %69, %70 in 0 : vector<1x16x128xf32>, vector<1x16x128xf32>, vector<1x16x128xf32> -> vector<3x16x128xf32>
    %72 = vector.extract_strided_slice %45 {offsets = [0, 0, 0], sizes = [1, 16, 128], strides = [1, 1, 1]} : vector<3x16x128xf32> to vector<1x16x128xf32>
    %73 = vector.shape_cast %72 : vector<1x16x128xf32> to vector<16x128xf32>
    %c127_i32 = arith.constant 127 : i32
    %74 = tpu.dynamic_rotate %73 by %c127_i32 dim 1 : vector<16x128xf32>, i32 -> vector<16x128xf32>
    %75 = vector.extract_strided_slice %45 {offsets = [1, 0, 0], sizes = [1, 16, 128], strides = [1, 1, 1]} : vector<3x16x128xf32> to vector<1x16x128xf32>
    %76 = vector.shape_cast %75 : vector<1x16x128xf32> to vector<16x128xf32>
    %c127_i32_56 = arith.constant 127 : i32
    %77 = tpu.dynamic_rotate %76 by %c127_i32_56 dim 1 : vector<16x128xf32>, i32 -> vector<16x128xf32>
    %78 = vector.extract_strided_slice %45 {offsets = [2, 0, 0], sizes = [1, 16, 128], strides = [1, 1, 1]} : vector<3x16x128xf32> to vector<1x16x128xf32>
    %79 = vector.shape_cast %78 : vector<1x16x128xf32> to vector<16x128xf32>
    %c127_i32_57 = arith.constant 127 : i32
    %80 = tpu.dynamic_rotate %79 by %c127_i32_57 dim 1 : vector<16x128xf32>, i32 -> vector<16x128xf32>
    %81 = vector.shape_cast %74 : vector<16x128xf32> to vector<1x16x128xf32>
    %82 = vector.shape_cast %77 : vector<16x128xf32> to vector<1x16x128xf32>
    %83 = vector.shape_cast %80 : vector<16x128xf32> to vector<1x16x128xf32>
    %84 = tpu.concatenate %81, %82, %83 in 0 : vector<1x16x128xf32>, vector<1x16x128xf32>, vector<1x16x128xf32> -> vector<3x16x128xf32>
    %85 = vector.extract_strided_slice %45 {offsets = [0, 0, 0], sizes = [1, 16, 128], strides = [1, 1, 1]} : vector<3x16x128xf32> to vector<1x16x128xf32>
    %86 = vector.shape_cast %85 : vector<1x16x128xf32> to vector<16x128xf32>
    %c126_i32 = arith.constant 126 : i32
    %87 = tpu.dynamic_rotate %86 by %c126_i32 dim 1 : vector<16x128xf32>, i32 -> vector<16x128xf32>
    %88 = vector.extract_strided_slice %45 {offsets = [1, 0, 0], sizes = [1, 16, 128], strides = [1, 1, 1]} : vector<3x16x128xf32> to vector<1x16x128xf32>
    %89 = vector.shape_cast %88 : vector<1x16x128xf32> to vector<16x128xf32>
    %c126_i32_58 = arith.constant 126 : i32
    %90 = tpu.dynamic_rotate %89 by %c126_i32_58 dim 1 : vector<16x128xf32>, i32 -> vector<16x128xf32>
    %91 = vector.extract_strided_slice %45 {offsets = [2, 0, 0], sizes = [1, 16, 128], strides = [1, 1, 1]} : vector<3x16x128xf32> to vector<1x16x128xf32>
    %92 = vector.shape_cast %91 : vector<1x16x128xf32> to vector<16x128xf32>
    %c126_i32_59 = arith.constant 126 : i32
    %93 = tpu.dynamic_rotate %92 by %c126_i32_59 dim 1 : vector<16x128xf32>, i32 -> vector<16x128xf32>
    %94 = vector.shape_cast %87 : vector<16x128xf32> to vector<1x16x128xf32>
    %95 = vector.shape_cast %90 : vector<16x128xf32> to vector<1x16x128xf32>
    %96 = vector.shape_cast %93 : vector<16x128xf32> to vector<1x16x128xf32>
    %97 = tpu.concatenate %94, %95, %96 in 0 : vector<1x16x128xf32>, vector<1x16x128xf32>, vector<1x16x128xf32> -> vector<3x16x128xf32>
    %98 = vector.broadcast %19 : f32 to vector<3x16x128xf32>
    %99 = arith.mulf %98, %58 : vector<3x16x128xf32>
    %100 = vector.broadcast %20 : f32 to vector<3x16x128xf32>
    %101 = arith.mulf %100, %71 : vector<3x16x128xf32>
    %102 = arith.addf %99, %101 : vector<3x16x128xf32>
    %103 = vector.broadcast %21 : f32 to vector<3x16x128xf32>
    %104 = arith.mulf %103, %45 : vector<3x16x128xf32>
    %105 = arith.addf %102, %104 : vector<3x16x128xf32>
    %106 = vector.broadcast %22 : f32 to vector<3x16x128xf32>
    %107 = arith.mulf %106, %84 : vector<3x16x128xf32>
    %108 = arith.addf %105, %107 : vector<3x16x128xf32>
    %109 = vector.broadcast %23 : f32 to vector<3x16x128xf32>
    %110 = arith.mulf %109, %97 : vector<3x16x128xf32>
    %111 = arith.addf %108, %110 : vector<3x16x128xf32>
    %112 = vector.extract_strided_slice %111 {offsets = [0, 0, 0], sizes = [1, 16, 128], strides = [1, 1, 1]} : vector<3x16x128xf32> to vector<1x16x128xf32>
    %113 = vector.shape_cast %112 : vector<1x16x128xf32> to vector<16x128xf32>
    %c2_i32_60 = arith.constant 2 : i32
    %114 = tpu.dynamic_rotate %113 by %c2_i32_60 dim 0 : vector<16x128xf32>, i32 -> vector<16x128xf32>
    %115 = vector.extract_strided_slice %111 {offsets = [1, 0, 0], sizes = [1, 16, 128], strides = [1, 1, 1]} : vector<3x16x128xf32> to vector<1x16x128xf32>
    %116 = vector.shape_cast %115 : vector<1x16x128xf32> to vector<16x128xf32>
    %c2_i32_61 = arith.constant 2 : i32
    %117 = tpu.dynamic_rotate %116 by %c2_i32_61 dim 0 : vector<16x128xf32>, i32 -> vector<16x128xf32>
    %118 = vector.extract_strided_slice %111 {offsets = [2, 0, 0], sizes = [1, 16, 128], strides = [1, 1, 1]} : vector<3x16x128xf32> to vector<1x16x128xf32>
    %119 = vector.shape_cast %118 : vector<1x16x128xf32> to vector<16x128xf32>
    %c2_i32_62 = arith.constant 2 : i32
    %120 = tpu.dynamic_rotate %119 by %c2_i32_62 dim 0 : vector<16x128xf32>, i32 -> vector<16x128xf32>
    %121 = vector.shape_cast %114 : vector<16x128xf32> to vector<1x16x128xf32>
    %122 = vector.shape_cast %117 : vector<16x128xf32> to vector<1x16x128xf32>
    %123 = vector.shape_cast %120 : vector<16x128xf32> to vector<1x16x128xf32>
    %124 = tpu.concatenate %121, %122, %123 in 0 : vector<1x16x128xf32>, vector<1x16x128xf32>, vector<1x16x128xf32> -> vector<3x16x128xf32>
    %125 = vector.broadcast %24 : f32 to vector<3x16x128xf32>
    %126 = arith.mulf %125, %58 : vector<3x16x128xf32>
    %127 = vector.broadcast %25 : f32 to vector<3x16x128xf32>
    %128 = arith.mulf %127, %71 : vector<3x16x128xf32>
    %129 = arith.addf %126, %128 : vector<3x16x128xf32>
    %130 = vector.broadcast %26 : f32 to vector<3x16x128xf32>
    %131 = arith.mulf %130, %45 : vector<3x16x128xf32>
    %132 = arith.addf %129, %131 : vector<3x16x128xf32>
    %133 = vector.broadcast %27 : f32 to vector<3x16x128xf32>
    %134 = arith.mulf %133, %84 : vector<3x16x128xf32>
    %135 = arith.addf %132, %134 : vector<3x16x128xf32>
    %136 = vector.broadcast %28 : f32 to vector<3x16x128xf32>
    %137 = arith.mulf %136, %97 : vector<3x16x128xf32>
    %138 = arith.addf %135, %137 : vector<3x16x128xf32>
    %139 = vector.extract_strided_slice %138 {offsets = [0, 0, 0], sizes = [1, 16, 128], strides = [1, 1, 1]} : vector<3x16x128xf32> to vector<1x16x128xf32>
    %140 = vector.shape_cast %139 : vector<1x16x128xf32> to vector<16x128xf32>
    %c1_i32_63 = arith.constant 1 : i32
    %141 = tpu.dynamic_rotate %140 by %c1_i32_63 dim 0 : vector<16x128xf32>, i32 -> vector<16x128xf32>
    %142 = vector.extract_strided_slice %138 {offsets = [1, 0, 0], sizes = [1, 16, 128], strides = [1, 1, 1]} : vector<3x16x128xf32> to vector<1x16x128xf32>
    %143 = vector.shape_cast %142 : vector<1x16x128xf32> to vector<16x128xf32>
    %c1_i32_64 = arith.constant 1 : i32
    %144 = tpu.dynamic_rotate %143 by %c1_i32_64 dim 0 : vector<16x128xf32>, i32 -> vector<16x128xf32>
    %145 = vector.extract_strided_slice %138 {offsets = [2, 0, 0], sizes = [1, 16, 128], strides = [1, 1, 1]} : vector<3x16x128xf32> to vector<1x16x128xf32>
    %146 = vector.shape_cast %145 : vector<1x16x128xf32> to vector<16x128xf32>
    %c1_i32_65 = arith.constant 1 : i32
    %147 = tpu.dynamic_rotate %146 by %c1_i32_65 dim 0 : vector<16x128xf32>, i32 -> vector<16x128xf32>
    %148 = vector.shape_cast %141 : vector<16x128xf32> to vector<1x16x128xf32>
    %149 = vector.shape_cast %144 : vector<16x128xf32> to vector<1x16x128xf32>
    %150 = vector.shape_cast %147 : vector<16x128xf32> to vector<1x16x128xf32>
    %151 = tpu.concatenate %148, %149, %150 in 0 : vector<1x16x128xf32>, vector<1x16x128xf32>, vector<1x16x128xf32> -> vector<3x16x128xf32>
    %152 = arith.addf %124, %151 : vector<3x16x128xf32>
    %153 = vector.broadcast %29 : f32 to vector<3x16x128xf32>
    %154 = arith.mulf %153, %58 : vector<3x16x128xf32>
    %155 = vector.broadcast %30 : f32 to vector<3x16x128xf32>
    %156 = arith.mulf %155, %71 : vector<3x16x128xf32>
    %157 = arith.addf %154, %156 : vector<3x16x128xf32>
    %158 = vector.broadcast %31 : f32 to vector<3x16x128xf32>
    %159 = arith.mulf %158, %45 : vector<3x16x128xf32>
    %160 = arith.addf %157, %159 : vector<3x16x128xf32>
    %161 = vector.broadcast %32 : f32 to vector<3x16x128xf32>
    %162 = arith.mulf %161, %84 : vector<3x16x128xf32>
    %163 = arith.addf %160, %162 : vector<3x16x128xf32>
    %164 = vector.broadcast %33 : f32 to vector<3x16x128xf32>
    %165 = arith.mulf %164, %97 : vector<3x16x128xf32>
    %166 = arith.addf %163, %165 : vector<3x16x128xf32>
    %167 = arith.addf %152, %166 : vector<3x16x128xf32>
    %168 = vector.broadcast %34 : f32 to vector<3x16x128xf32>
    %169 = arith.mulf %168, %58 : vector<3x16x128xf32>
    %170 = vector.broadcast %35 : f32 to vector<3x16x128xf32>
    %171 = arith.mulf %170, %71 : vector<3x16x128xf32>
    %172 = arith.addf %169, %171 : vector<3x16x128xf32>
    %173 = vector.broadcast %36 : f32 to vector<3x16x128xf32>
    %174 = arith.mulf %173, %45 : vector<3x16x128xf32>
    %175 = arith.addf %172, %174 : vector<3x16x128xf32>
    %176 = vector.broadcast %37 : f32 to vector<3x16x128xf32>
    %177 = arith.mulf %176, %84 : vector<3x16x128xf32>
    %178 = arith.addf %175, %177 : vector<3x16x128xf32>
    %179 = vector.broadcast %38 : f32 to vector<3x16x128xf32>
    %180 = arith.mulf %179, %97 : vector<3x16x128xf32>
    %181 = arith.addf %178, %180 : vector<3x16x128xf32>
    %182 = vector.extract_strided_slice %181 {offsets = [0, 0, 0], sizes = [1, 16, 128], strides = [1, 1, 1]} : vector<3x16x128xf32> to vector<1x16x128xf32>
    %183 = vector.shape_cast %182 : vector<1x16x128xf32> to vector<16x128xf32>
    %c15_i32 = arith.constant 15 : i32
    %184 = tpu.dynamic_rotate %183 by %c15_i32 dim 0 : vector<16x128xf32>, i32 -> vector<16x128xf32>
    %185 = vector.extract_strided_slice %181 {offsets = [1, 0, 0], sizes = [1, 16, 128], strides = [1, 1, 1]} : vector<3x16x128xf32> to vector<1x16x128xf32>
    %186 = vector.shape_cast %185 : vector<1x16x128xf32> to vector<16x128xf32>
    %c15_i32_66 = arith.constant 15 : i32
    %187 = tpu.dynamic_rotate %186 by %c15_i32_66 dim 0 : vector<16x128xf32>, i32 -> vector<16x128xf32>
    %188 = vector.extract_strided_slice %181 {offsets = [2, 0, 0], sizes = [1, 16, 128], strides = [1, 1, 1]} : vector<3x16x128xf32> to vector<1x16x128xf32>
    %189 = vector.shape_cast %188 : vector<1x16x128xf32> to vector<16x128xf32>
    %c15_i32_67 = arith.constant 15 : i32
    %190 = tpu.dynamic_rotate %189 by %c15_i32_67 dim 0 : vector<16x128xf32>, i32 -> vector<16x128xf32>
    %191 = vector.shape_cast %184 : vector<16x128xf32> to vector<1x16x128xf32>
    %192 = vector.shape_cast %187 : vector<16x128xf32> to vector<1x16x128xf32>
    %193 = vector.shape_cast %190 : vector<16x128xf32> to vector<1x16x128xf32>
    %194 = tpu.concatenate %191, %192, %193 in 0 : vector<1x16x128xf32>, vector<1x16x128xf32>, vector<1x16x128xf32> -> vector<3x16x128xf32>
    %195 = arith.addf %167, %194 : vector<3x16x128xf32>
    %196 = vector.broadcast %39 : f32 to vector<3x16x128xf32>
    %197 = arith.mulf %196, %58 : vector<3x16x128xf32>
    %198 = vector.broadcast %40 : f32 to vector<3x16x128xf32>
    %199 = arith.mulf %198, %71 : vector<3x16x128xf32>
    %200 = arith.addf %197, %199 : vector<3x16x128xf32>
    %201 = vector.broadcast %41 : f32 to vector<3x16x128xf32>
    %202 = arith.mulf %201, %45 : vector<3x16x128xf32>
    %203 = arith.addf %200, %202 : vector<3x16x128xf32>
    %204 = vector.broadcast %42 : f32 to vector<3x16x128xf32>
    %205 = arith.mulf %204, %84 : vector<3x16x128xf32>
    %206 = arith.addf %203, %205 : vector<3x16x128xf32>
    %207 = vector.broadcast %43 : f32 to vector<3x16x128xf32>
    %208 = arith.mulf %207, %97 : vector<3x16x128xf32>
    %209 = arith.addf %206, %208 : vector<3x16x128xf32>
    %210 = vector.extract_strided_slice %209 {offsets = [0, 0, 0], sizes = [1, 16, 128], strides = [1, 1, 1]} : vector<3x16x128xf32> to vector<1x16x128xf32>
    %211 = vector.shape_cast %210 : vector<1x16x128xf32> to vector<16x128xf32>
    %c14_i32 = arith.constant 14 : i32
    %212 = tpu.dynamic_rotate %211 by %c14_i32 dim 0 : vector<16x128xf32>, i32 -> vector<16x128xf32>
    %213 = vector.extract_strided_slice %209 {offsets = [1, 0, 0], sizes = [1, 16, 128], strides = [1, 1, 1]} : vector<3x16x128xf32> to vector<1x16x128xf32>
    %214 = vector.shape_cast %213 : vector<1x16x128xf32> to vector<16x128xf32>
    %c14_i32_68 = arith.constant 14 : i32
    %215 = tpu.dynamic_rotate %214 by %c14_i32_68 dim 0 : vector<16x128xf32>, i32 -> vector<16x128xf32>
    %216 = vector.extract_strided_slice %209 {offsets = [2, 0, 0], sizes = [1, 16, 128], strides = [1, 1, 1]} : vector<3x16x128xf32> to vector<1x16x128xf32>
    %217 = vector.shape_cast %216 : vector<1x16x128xf32> to vector<16x128xf32>
    %c14_i32_69 = arith.constant 14 : i32
    %218 = tpu.dynamic_rotate %217 by %c14_i32_69 dim 0 : vector<16x128xf32>, i32 -> vector<16x128xf32>
    %219 = vector.shape_cast %212 : vector<16x128xf32> to vector<1x16x128xf32>
    %220 = vector.shape_cast %215 : vector<16x128xf32> to vector<1x16x128xf32>
    %221 = vector.shape_cast %218 : vector<16x128xf32> to vector<1x16x128xf32>
    %222 = tpu.concatenate %219, %220, %221 in 0 : vector<1x16x128xf32>, vector<1x16x128xf32>, vector<1x16x128xf32> -> vector<3x16x128xf32>
    %223 = arith.addf %195, %222 : vector<3x16x128xf32>
    %224 = vector.extract_strided_slice %0 {offsets = [0, 0, 0], sizes = [1, 16, 128], strides = [1, 1, 1]} : vector<3x16x128xf32> to vector<1x16x128xf32>
    %225 = vector.shape_cast %224 : vector<1x16x128xf32> to vector<16x128xf32>
    %c2_i32_70 = arith.constant 2 : i32
    %226 = tpu.dynamic_rotate %225 by %c2_i32_70 dim 1 : vector<16x128xf32>, i32 -> vector<16x128xf32>
    %227 = vector.extract_strided_slice %0 {offsets = [1, 0, 0], sizes = [1, 16, 128], strides = [1, 1, 1]} : vector<3x16x128xf32> to vector<1x16x128xf32>
    %228 = vector.shape_cast %227 : vector<1x16x128xf32> to vector<16x128xf32>
    %c2_i32_71 = arith.constant 2 : i32
    %229 = tpu.dynamic_rotate %228 by %c2_i32_71 dim 1 : vector<16x128xf32>, i32 -> vector<16x128xf32>
    %230 = vector.extract_strided_slice %0 {offsets = [2, 0, 0], sizes = [1, 16, 128], strides = [1, 1, 1]} : vector<3x16x128xf32> to vector<1x16x128xf32>
    %231 = vector.shape_cast %230 : vector<1x16x128xf32> to vector<16x128xf32>
    %c2_i32_72 = arith.constant 2 : i32
    %232 = tpu.dynamic_rotate %231 by %c2_i32_72 dim 1 : vector<16x128xf32>, i32 -> vector<16x128xf32>
    %233 = vector.shape_cast %226 : vector<16x128xf32> to vector<1x16x128xf32>
    %234 = vector.shape_cast %229 : vector<16x128xf32> to vector<1x16x128xf32>
    %235 = vector.shape_cast %232 : vector<16x128xf32> to vector<1x16x128xf32>
    %236 = tpu.concatenate %233, %234, %235 in 0 : vector<1x16x128xf32>, vector<1x16x128xf32>, vector<1x16x128xf32> -> vector<3x16x128xf32>
    %237 = vector.extract_strided_slice %0 {offsets = [0, 0, 0], sizes = [1, 16, 128], strides = [1, 1, 1]} : vector<3x16x128xf32> to vector<1x16x128xf32>
    %238 = vector.shape_cast %237 : vector<1x16x128xf32> to vector<16x128xf32>
    %c1_i32_73 = arith.constant 1 : i32
    %239 = tpu.dynamic_rotate %238 by %c1_i32_73 dim 1 : vector<16x128xf32>, i32 -> vector<16x128xf32>
    %240 = vector.extract_strided_slice %0 {offsets = [1, 0, 0], sizes = [1, 16, 128], strides = [1, 1, 1]} : vector<3x16x128xf32> to vector<1x16x128xf32>
    %241 = vector.shape_cast %240 : vector<1x16x128xf32> to vector<16x128xf32>
    %c1_i32_74 = arith.constant 1 : i32
    %242 = tpu.dynamic_rotate %241 by %c1_i32_74 dim 1 : vector<16x128xf32>, i32 -> vector<16x128xf32>
    %243 = vector.extract_strided_slice %0 {offsets = [2, 0, 0], sizes = [1, 16, 128], strides = [1, 1, 1]} : vector<3x16x128xf32> to vector<1x16x128xf32>
    %244 = vector.shape_cast %243 : vector<1x16x128xf32> to vector<16x128xf32>
    %c1_i32_75 = arith.constant 1 : i32
    %245 = tpu.dynamic_rotate %244 by %c1_i32_75 dim 1 : vector<16x128xf32>, i32 -> vector<16x128xf32>
    %246 = vector.shape_cast %239 : vector<16x128xf32> to vector<1x16x128xf32>
    %247 = vector.shape_cast %242 : vector<16x128xf32> to vector<1x16x128xf32>
    %248 = vector.shape_cast %245 : vector<16x128xf32> to vector<1x16x128xf32>
    %249 = tpu.concatenate %246, %247, %248 in 0 : vector<1x16x128xf32>, vector<1x16x128xf32>, vector<1x16x128xf32> -> vector<3x16x128xf32>
    %250 = vector.extract_strided_slice %0 {offsets = [0, 0, 0], sizes = [1, 16, 128], strides = [1, 1, 1]} : vector<3x16x128xf32> to vector<1x16x128xf32>
    %251 = vector.shape_cast %250 : vector<1x16x128xf32> to vector<16x128xf32>
    %c127_i32_76 = arith.constant 127 : i32
    %252 = tpu.dynamic_rotate %251 by %c127_i32_76 dim 1 : vector<16x128xf32>, i32 -> vector<16x128xf32>
    %253 = vector.extract_strided_slice %0 {offsets = [1, 0, 0], sizes = [1, 16, 128], strides = [1, 1, 1]} : vector<3x16x128xf32> to vector<1x16x128xf32>
    %254 = vector.shape_cast %253 : vector<1x16x128xf32> to vector<16x128xf32>
    %c127_i32_77 = arith.constant 127 : i32
    %255 = tpu.dynamic_rotate %254 by %c127_i32_77 dim 1 : vector<16x128xf32>, i32 -> vector<16x128xf32>
    %256 = vector.extract_strided_slice %0 {offsets = [2, 0, 0], sizes = [1, 16, 128], strides = [1, 1, 1]} : vector<3x16x128xf32> to vector<1x16x128xf32>
    %257 = vector.shape_cast %256 : vector<1x16x128xf32> to vector<16x128xf32>
    %c127_i32_78 = arith.constant 127 : i32
    %258 = tpu.dynamic_rotate %257 by %c127_i32_78 dim 1 : vector<16x128xf32>, i32 -> vector<16x128xf32>
    %259 = vector.shape_cast %252 : vector<16x128xf32> to vector<1x16x128xf32>
    %260 = vector.shape_cast %255 : vector<16x128xf32> to vector<1x16x128xf32>
    %261 = vector.shape_cast %258 : vector<16x128xf32> to vector<1x16x128xf32>
    %262 = tpu.concatenate %259, %260, %261 in 0 : vector<1x16x128xf32>, vector<1x16x128xf32>, vector<1x16x128xf32> -> vector<3x16x128xf32>
    %263 = vector.extract_strided_slice %0 {offsets = [0, 0, 0], sizes = [1, 16, 128], strides = [1, 1, 1]} : vector<3x16x128xf32> to vector<1x16x128xf32>
    %264 = vector.shape_cast %263 : vector<1x16x128xf32> to vector<16x128xf32>
    %c126_i32_79 = arith.constant 126 : i32
    %265 = tpu.dynamic_rotate %264 by %c126_i32_79 dim 1 : vector<16x128xf32>, i32 -> vector<16x128xf32>
    %266 = vector.extract_strided_slice %0 {offsets = [1, 0, 0], sizes = [1, 16, 128], strides = [1, 1, 1]} : vector<3x16x128xf32> to vector<1x16x128xf32>
    %267 = vector.shape_cast %266 : vector<1x16x128xf32> to vector<16x128xf32>
    %c126_i32_80 = arith.constant 126 : i32
    %268 = tpu.dynamic_rotate %267 by %c126_i32_80 dim 1 : vector<16x128xf32>, i32 -> vector<16x128xf32>
    %269 = vector.extract_strided_slice %0 {offsets = [2, 0, 0], sizes = [1, 16, 128], strides = [1, 1, 1]} : vector<3x16x128xf32> to vector<1x16x128xf32>
    %270 = vector.shape_cast %269 : vector<1x16x128xf32> to vector<16x128xf32>
    %c126_i32_81 = arith.constant 126 : i32
    %271 = tpu.dynamic_rotate %270 by %c126_i32_81 dim 1 : vector<16x128xf32>, i32 -> vector<16x128xf32>
    %272 = vector.shape_cast %265 : vector<16x128xf32> to vector<1x16x128xf32>
    %273 = vector.shape_cast %268 : vector<16x128xf32> to vector<1x16x128xf32>
    %274 = vector.shape_cast %271 : vector<16x128xf32> to vector<1x16x128xf32>
    %275 = tpu.concatenate %272, %273, %274 in 0 : vector<1x16x128xf32>, vector<1x16x128xf32>, vector<1x16x128xf32> -> vector<3x16x128xf32>
    %276 = vector.broadcast %19 : f32 to vector<3x16x128xf32>
    %277 = arith.mulf %276, %275 : vector<3x16x128xf32>
    %278 = vector.broadcast %20 : f32 to vector<3x16x128xf32>
    %279 = arith.mulf %278, %262 : vector<3x16x128xf32>
    %280 = arith.addf %277, %279 : vector<3x16x128xf32>
    %281 = vector.broadcast %21 : f32 to vector<3x16x128xf32>
    %282 = arith.mulf %281, %0 : vector<3x16x128xf32>
    %283 = arith.addf %280, %282 : vector<3x16x128xf32>
    %284 = vector.broadcast %22 : f32 to vector<3x16x128xf32>
    %285 = arith.mulf %284, %249 : vector<3x16x128xf32>
    %286 = arith.addf %283, %285 : vector<3x16x128xf32>
    %287 = vector.broadcast %23 : f32 to vector<3x16x128xf32>
    %288 = arith.mulf %287, %236 : vector<3x16x128xf32>
    %289 = arith.addf %286, %288 : vector<3x16x128xf32>
    %290 = vector.extract_strided_slice %289 {offsets = [0, 0, 0], sizes = [1, 16, 128], strides = [1, 1, 1]} : vector<3x16x128xf32> to vector<1x16x128xf32>
    %291 = vector.shape_cast %290 : vector<1x16x128xf32> to vector<16x128xf32>
    %c14_i32_82 = arith.constant 14 : i32
    %292 = tpu.dynamic_rotate %291 by %c14_i32_82 dim 0 : vector<16x128xf32>, i32 -> vector<16x128xf32>
    %293 = vector.extract_strided_slice %289 {offsets = [1, 0, 0], sizes = [1, 16, 128], strides = [1, 1, 1]} : vector<3x16x128xf32> to vector<1x16x128xf32>
    %294 = vector.shape_cast %293 : vector<1x16x128xf32> to vector<16x128xf32>
    %c14_i32_83 = arith.constant 14 : i32
    %295 = tpu.dynamic_rotate %294 by %c14_i32_83 dim 0 : vector<16x128xf32>, i32 -> vector<16x128xf32>
    %296 = vector.extract_strided_slice %289 {offsets = [2, 0, 0], sizes = [1, 16, 128], strides = [1, 1, 1]} : vector<3x16x128xf32> to vector<1x16x128xf32>
    %297 = vector.shape_cast %296 : vector<1x16x128xf32> to vector<16x128xf32>
    %c14_i32_84 = arith.constant 14 : i32
    %298 = tpu.dynamic_rotate %297 by %c14_i32_84 dim 0 : vector<16x128xf32>, i32 -> vector<16x128xf32>
    %299 = vector.shape_cast %292 : vector<16x128xf32> to vector<1x16x128xf32>
    %300 = vector.shape_cast %295 : vector<16x128xf32> to vector<1x16x128xf32>
    %301 = vector.shape_cast %298 : vector<16x128xf32> to vector<1x16x128xf32>
    %302 = tpu.concatenate %299, %300, %301 in 0 : vector<1x16x128xf32>, vector<1x16x128xf32>, vector<1x16x128xf32> -> vector<3x16x128xf32>
    %303 = vector.broadcast %24 : f32 to vector<3x16x128xf32>
    %304 = arith.mulf %303, %275 : vector<3x16x128xf32>
    %305 = vector.broadcast %25 : f32 to vector<3x16x128xf32>
    %306 = arith.mulf %305, %262 : vector<3x16x128xf32>
    %307 = arith.addf %304, %306 : vector<3x16x128xf32>
    %308 = vector.broadcast %26 : f32 to vector<3x16x128xf32>
    %309 = arith.mulf %308, %0 : vector<3x16x128xf32>
    %310 = arith.addf %307, %309 : vector<3x16x128xf32>
    %311 = vector.broadcast %27 : f32 to vector<3x16x128xf32>
    %312 = arith.mulf %311, %249 : vector<3x16x128xf32>
    %313 = arith.addf %310, %312 : vector<3x16x128xf32>
    %314 = vector.broadcast %28 : f32 to vector<3x16x128xf32>
    %315 = arith.mulf %314, %236 : vector<3x16x128xf32>
    %316 = arith.addf %313, %315 : vector<3x16x128xf32>
    %317 = vector.extract_strided_slice %316 {offsets = [0, 0, 0], sizes = [1, 16, 128], strides = [1, 1, 1]} : vector<3x16x128xf32> to vector<1x16x128xf32>
    %318 = vector.shape_cast %317 : vector<1x16x128xf32> to vector<16x128xf32>
    %c15_i32_85 = arith.constant 15 : i32
    %319 = tpu.dynamic_rotate %318 by %c15_i32_85 dim 0 : vector<16x128xf32>, i32 -> vector<16x128xf32>
    %320 = vector.extract_strided_slice %316 {offsets = [1, 0, 0], sizes = [1, 16, 128], strides = [1, 1, 1]} : vector<3x16x128xf32> to vector<1x16x128xf32>
    %321 = vector.shape_cast %320 : vector<1x16x128xf32> to vector<16x128xf32>
    %c15_i32_86 = arith.constant 15 : i32
    %322 = tpu.dynamic_rotate %321 by %c15_i32_86 dim 0 : vector<16x128xf32>, i32 -> vector<16x128xf32>
    %323 = vector.extract_strided_slice %316 {offsets = [2, 0, 0], sizes = [1, 16, 128], strides = [1, 1, 1]} : vector<3x16x128xf32> to vector<1x16x128xf32>
    %324 = vector.shape_cast %323 : vector<1x16x128xf32> to vector<16x128xf32>
    %c15_i32_87 = arith.constant 15 : i32
    %325 = tpu.dynamic_rotate %324 by %c15_i32_87 dim 0 : vector<16x128xf32>, i32 -> vector<16x128xf32>
    %326 = vector.shape_cast %319 : vector<16x128xf32> to vector<1x16x128xf32>
    %327 = vector.shape_cast %322 : vector<16x128xf32> to vector<1x16x128xf32>
    %328 = vector.shape_cast %325 : vector<16x128xf32> to vector<1x16x128xf32>
    %329 = tpu.concatenate %326, %327, %328 in 0 : vector<1x16x128xf32>, vector<1x16x128xf32>, vector<1x16x128xf32> -> vector<3x16x128xf32>
    %330 = arith.addf %302, %329 : vector<3x16x128xf32>
    %331 = vector.broadcast %29 : f32 to vector<3x16x128xf32>
    %332 = arith.mulf %331, %275 : vector<3x16x128xf32>
    %333 = vector.broadcast %30 : f32 to vector<3x16x128xf32>
    %334 = arith.mulf %333, %262 : vector<3x16x128xf32>
    %335 = arith.addf %332, %334 : vector<3x16x128xf32>
    %336 = vector.broadcast %31 : f32 to vector<3x16x128xf32>
    %337 = arith.mulf %336, %0 : vector<3x16x128xf32>
    %338 = arith.addf %335, %337 : vector<3x16x128xf32>
    %339 = vector.broadcast %32 : f32 to vector<3x16x128xf32>
    %340 = arith.mulf %339, %249 : vector<3x16x128xf32>
    %341 = arith.addf %338, %340 : vector<3x16x128xf32>
    %342 = vector.broadcast %33 : f32 to vector<3x16x128xf32>
    %343 = arith.mulf %342, %236 : vector<3x16x128xf32>
    %344 = arith.addf %341, %343 : vector<3x16x128xf32>
    %345 = arith.addf %330, %344 : vector<3x16x128xf32>
    %346 = vector.broadcast %34 : f32 to vector<3x16x128xf32>
    %347 = arith.mulf %346, %275 : vector<3x16x128xf32>
    %348 = vector.broadcast %35 : f32 to vector<3x16x128xf32>
    %349 = arith.mulf %348, %262 : vector<3x16x128xf32>
    %350 = arith.addf %347, %349 : vector<3x16x128xf32>
    %351 = vector.broadcast %36 : f32 to vector<3x16x128xf32>
    %352 = arith.mulf %351, %0 : vector<3x16x128xf32>
    %353 = arith.addf %350, %352 : vector<3x16x128xf32>
    %354 = vector.broadcast %37 : f32 to vector<3x16x128xf32>
    %355 = arith.mulf %354, %249 : vector<3x16x128xf32>
    %356 = arith.addf %353, %355 : vector<3x16x128xf32>
    %357 = vector.broadcast %38 : f32 to vector<3x16x128xf32>
    %358 = arith.mulf %357, %236 : vector<3x16x128xf32>
    %359 = arith.addf %356, %358 : vector<3x16x128xf32>
    %360 = vector.extract_strided_slice %359 {offsets = [0, 0, 0], sizes = [1, 16, 128], strides = [1, 1, 1]} : vector<3x16x128xf32> to vector<1x16x128xf32>
    %361 = vector.shape_cast %360 : vector<1x16x128xf32> to vector<16x128xf32>
    %c1_i32_88 = arith.constant 1 : i32
    %362 = tpu.dynamic_rotate %361 by %c1_i32_88 dim 0 : vector<16x128xf32>, i32 -> vector<16x128xf32>
    %363 = vector.extract_strided_slice %359 {offsets = [1, 0, 0], sizes = [1, 16, 128], strides = [1, 1, 1]} : vector<3x16x128xf32> to vector<1x16x128xf32>
    %364 = vector.shape_cast %363 : vector<1x16x128xf32> to vector<16x128xf32>
    %c1_i32_89 = arith.constant 1 : i32
    %365 = tpu.dynamic_rotate %364 by %c1_i32_89 dim 0 : vector<16x128xf32>, i32 -> vector<16x128xf32>
    %366 = vector.extract_strided_slice %359 {offsets = [2, 0, 0], sizes = [1, 16, 128], strides = [1, 1, 1]} : vector<3x16x128xf32> to vector<1x16x128xf32>
    %367 = vector.shape_cast %366 : vector<1x16x128xf32> to vector<16x128xf32>
    %c1_i32_90 = arith.constant 1 : i32
    %368 = tpu.dynamic_rotate %367 by %c1_i32_90 dim 0 : vector<16x128xf32>, i32 -> vector<16x128xf32>
    %369 = vector.shape_cast %362 : vector<16x128xf32> to vector<1x16x128xf32>
    %370 = vector.shape_cast %365 : vector<16x128xf32> to vector<1x16x128xf32>
    %371 = vector.shape_cast %368 : vector<16x128xf32> to vector<1x16x128xf32>
    %372 = tpu.concatenate %369, %370, %371 in 0 : vector<1x16x128xf32>, vector<1x16x128xf32>, vector<1x16x128xf32> -> vector<3x16x128xf32>
    %373 = arith.addf %345, %372 : vector<3x16x128xf32>
    %374 = vector.broadcast %39 : f32 to vector<3x16x128xf32>
    %375 = arith.mulf %374, %275 : vector<3x16x128xf32>
    %376 = vector.broadcast %40 : f32 to vector<3x16x128xf32>
    %377 = arith.mulf %376, %262 : vector<3x16x128xf32>
    %378 = arith.addf %375, %377 : vector<3x16x128xf32>
    %379 = vector.broadcast %41 : f32 to vector<3x16x128xf32>
    %380 = arith.mulf %379, %0 : vector<3x16x128xf32>
    %381 = arith.addf %378, %380 : vector<3x16x128xf32>
    %382 = vector.broadcast %42 : f32 to vector<3x16x128xf32>
    %383 = arith.mulf %382, %249 : vector<3x16x128xf32>
    %384 = arith.addf %381, %383 : vector<3x16x128xf32>
    %385 = vector.broadcast %43 : f32 to vector<3x16x128xf32>
    %386 = arith.mulf %385, %236 : vector<3x16x128xf32>
    %387 = arith.addf %384, %386 : vector<3x16x128xf32>
    %388 = vector.extract_strided_slice %387 {offsets = [0, 0, 0], sizes = [1, 16, 128], strides = [1, 1, 1]} : vector<3x16x128xf32> to vector<1x16x128xf32>
    %389 = vector.shape_cast %388 : vector<1x16x128xf32> to vector<16x128xf32>
    %c2_i32_91 = arith.constant 2 : i32
    %390 = tpu.dynamic_rotate %389 by %c2_i32_91 dim 0 : vector<16x128xf32>, i32 -> vector<16x128xf32>
    %391 = vector.extract_strided_slice %387 {offsets = [1, 0, 0], sizes = [1, 16, 128], strides = [1, 1, 1]} : vector<3x16x128xf32> to vector<1x16x128xf32>
    %392 = vector.shape_cast %391 : vector<1x16x128xf32> to vector<16x128xf32>
    %c2_i32_92 = arith.constant 2 : i32
    %393 = tpu.dynamic_rotate %392 by %c2_i32_92 dim 0 : vector<16x128xf32>, i32 -> vector<16x128xf32>
    %394 = vector.extract_strided_slice %387 {offsets = [2, 0, 0], sizes = [1, 16, 128], strides = [1, 1, 1]} : vector<3x16x128xf32> to vector<1x16x128xf32>
    %395 = vector.shape_cast %394 : vector<1x16x128xf32> to vector<16x128xf32>
    %c2_i32_93 = arith.constant 2 : i32
    %396 = tpu.dynamic_rotate %395 by %c2_i32_93 dim 0 : vector<16x128xf32>, i32 -> vector<16x128xf32>
    %397 = vector.shape_cast %390 : vector<16x128xf32> to vector<1x16x128xf32>
    %398 = vector.shape_cast %393 : vector<16x128xf32> to vector<1x16x128xf32>
    %399 = vector.shape_cast %396 : vector<16x128xf32> to vector<1x16x128xf32>
    %400 = tpu.concatenate %397, %398, %399 in 0 : vector<1x16x128xf32>, vector<1x16x128xf32>, vector<1x16x128xf32> -> vector<3x16x128xf32>
    %401 = arith.addf %373, %400 : vector<3x16x128xf32>
    %402 = vector.broadcast %2 : vector<1x16x128xf32> to vector<3x16x128xf32>
    %403 = arith.mulf %402, %401 : vector<3x16x128xf32>
    %404 = vector.extract_strided_slice %403 {offsets = [0, 0, 0], sizes = [1, 16, 128], strides = [1, 1, 1]} : vector<3x16x128xf32> to vector<1x16x128xf32>
    %405 = vector.shape_cast %404 : vector<1x16x128xf32> to vector<16x128xf32>
    %c2_i32_94 = arith.constant 2 : i32
    %406 = tpu.dynamic_rotate %405 by %c2_i32_94 dim 1 : vector<16x128xf32>, i32 -> vector<16x128xf32>
    %407 = vector.extract_strided_slice %403 {offsets = [1, 0, 0], sizes = [1, 16, 128], strides = [1, 1, 1]} : vector<3x16x128xf32> to vector<1x16x128xf32>
    %408 = vector.shape_cast %407 : vector<1x16x128xf32> to vector<16x128xf32>
    %c2_i32_95 = arith.constant 2 : i32
    %409 = tpu.dynamic_rotate %408 by %c2_i32_95 dim 1 : vector<16x128xf32>, i32 -> vector<16x128xf32>
    %410 = vector.extract_strided_slice %403 {offsets = [2, 0, 0], sizes = [1, 16, 128], strides = [1, 1, 1]} : vector<3x16x128xf32> to vector<1x16x128xf32>
    %411 = vector.shape_cast %410 : vector<1x16x128xf32> to vector<16x128xf32>
    %c2_i32_96 = arith.constant 2 : i32
    %412 = tpu.dynamic_rotate %411 by %c2_i32_96 dim 1 : vector<16x128xf32>, i32 -> vector<16x128xf32>
    %413 = vector.shape_cast %406 : vector<16x128xf32> to vector<1x16x128xf32>
    %414 = vector.shape_cast %409 : vector<16x128xf32> to vector<1x16x128xf32>
    %415 = vector.shape_cast %412 : vector<16x128xf32> to vector<1x16x128xf32>
    %416 = tpu.concatenate %413, %414, %415 in 0 : vector<1x16x128xf32>, vector<1x16x128xf32>, vector<1x16x128xf32> -> vector<3x16x128xf32>
    %417 = vector.extract_strided_slice %403 {offsets = [0, 0, 0], sizes = [1, 16, 128], strides = [1, 1, 1]} : vector<3x16x128xf32> to vector<1x16x128xf32>
    %418 = vector.shape_cast %417 : vector<1x16x128xf32> to vector<16x128xf32>
    %c1_i32_97 = arith.constant 1 : i32
    %419 = tpu.dynamic_rotate %418 by %c1_i32_97 dim 1 : vector<16x128xf32>, i32 -> vector<16x128xf32>
    %420 = vector.extract_strided_slice %403 {offsets = [1, 0, 0], sizes = [1, 16, 128], strides = [1, 1, 1]} : vector<3x16x128xf32> to vector<1x16x128xf32>
    %421 = vector.shape_cast %420 : vector<1x16x128xf32> to vector<16x128xf32>
    %c1_i32_98 = arith.constant 1 : i32
    %422 = tpu.dynamic_rotate %421 by %c1_i32_98 dim 1 : vector<16x128xf32>, i32 -> vector<16x128xf32>
    %423 = vector.extract_strided_slice %403 {offsets = [2, 0, 0], sizes = [1, 16, 128], strides = [1, 1, 1]} : vector<3x16x128xf32> to vector<1x16x128xf32>
    %424 = vector.shape_cast %423 : vector<1x16x128xf32> to vector<16x128xf32>
    %c1_i32_99 = arith.constant 1 : i32
    %425 = tpu.dynamic_rotate %424 by %c1_i32_99 dim 1 : vector<16x128xf32>, i32 -> vector<16x128xf32>
    %426 = vector.shape_cast %419 : vector<16x128xf32> to vector<1x16x128xf32>
    %427 = vector.shape_cast %422 : vector<16x128xf32> to vector<1x16x128xf32>
    %428 = vector.shape_cast %425 : vector<16x128xf32> to vector<1x16x128xf32>
    %429 = tpu.concatenate %426, %427, %428 in 0 : vector<1x16x128xf32>, vector<1x16x128xf32>, vector<1x16x128xf32> -> vector<3x16x128xf32>
    %430 = vector.extract_strided_slice %403 {offsets = [0, 0, 0], sizes = [1, 16, 128], strides = [1, 1, 1]} : vector<3x16x128xf32> to vector<1x16x128xf32>
    %431 = vector.shape_cast %430 : vector<1x16x128xf32> to vector<16x128xf32>
    %c127_i32_100 = arith.constant 127 : i32
    %432 = tpu.dynamic_rotate %431 by %c127_i32_100 dim 1 : vector<16x128xf32>, i32 -> vector<16x128xf32>
    %433 = vector.extract_strided_slice %403 {offsets = [1, 0, 0], sizes = [1, 16, 128], strides = [1, 1, 1]} : vector<3x16x128xf32> to vector<1x16x128xf32>
    %434 = vector.shape_cast %433 : vector<1x16x128xf32> to vector<16x128xf32>
    %c127_i32_101 = arith.constant 127 : i32
    %435 = tpu.dynamic_rotate %434 by %c127_i32_101 dim 1 : vector<16x128xf32>, i32 -> vector<16x128xf32>
    %436 = vector.extract_strided_slice %403 {offsets = [2, 0, 0], sizes = [1, 16, 128], strides = [1, 1, 1]} : vector<3x16x128xf32> to vector<1x16x128xf32>
    %437 = vector.shape_cast %436 : vector<1x16x128xf32> to vector<16x128xf32>
    %c127_i32_102 = arith.constant 127 : i32
    %438 = tpu.dynamic_rotate %437 by %c127_i32_102 dim 1 : vector<16x128xf32>, i32 -> vector<16x128xf32>
    %439 = vector.shape_cast %432 : vector<16x128xf32> to vector<1x16x128xf32>
    %440 = vector.shape_cast %435 : vector<16x128xf32> to vector<1x16x128xf32>
    %441 = vector.shape_cast %438 : vector<16x128xf32> to vector<1x16x128xf32>
    %442 = tpu.concatenate %439, %440, %441 in 0 : vector<1x16x128xf32>, vector<1x16x128xf32>, vector<1x16x128xf32> -> vector<3x16x128xf32>
    %443 = vector.extract_strided_slice %403 {offsets = [0, 0, 0], sizes = [1, 16, 128], strides = [1, 1, 1]} : vector<3x16x128xf32> to vector<1x16x128xf32>
    %444 = vector.shape_cast %443 : vector<1x16x128xf32> to vector<16x128xf32>
    %c126_i32_103 = arith.constant 126 : i32
    %445 = tpu.dynamic_rotate %444 by %c126_i32_103 dim 1 : vector<16x128xf32>, i32 -> vector<16x128xf32>
    %446 = vector.extract_strided_slice %403 {offsets = [1, 0, 0], sizes = [1, 16, 128], strides = [1, 1, 1]} : vector<3x16x128xf32> to vector<1x16x128xf32>
    %447 = vector.shape_cast %446 : vector<1x16x128xf32> to vector<16x128xf32>
    %c126_i32_104 = arith.constant 126 : i32
    %448 = tpu.dynamic_rotate %447 by %c126_i32_104 dim 1 : vector<16x128xf32>, i32 -> vector<16x128xf32>
    %449 = vector.extract_strided_slice %403 {offsets = [2, 0, 0], sizes = [1, 16, 128], strides = [1, 1, 1]} : vector<3x16x128xf32> to vector<1x16x128xf32>
    %450 = vector.shape_cast %449 : vector<1x16x128xf32> to vector<16x128xf32>
    %c126_i32_105 = arith.constant 126 : i32
    %451 = tpu.dynamic_rotate %450 by %c126_i32_105 dim 1 : vector<16x128xf32>, i32 -> vector<16x128xf32>
    %452 = vector.shape_cast %445 : vector<16x128xf32> to vector<1x16x128xf32>
    %453 = vector.shape_cast %448 : vector<16x128xf32> to vector<1x16x128xf32>
    %454 = vector.shape_cast %451 : vector<16x128xf32> to vector<1x16x128xf32>
    %455 = tpu.concatenate %452, %453, %454 in 0 : vector<1x16x128xf32>, vector<1x16x128xf32>, vector<1x16x128xf32> -> vector<3x16x128xf32>
    %456 = vector.broadcast %19 : f32 to vector<3x16x128xf32>
    %457 = arith.mulf %456, %416 : vector<3x16x128xf32>
    %458 = vector.broadcast %20 : f32 to vector<3x16x128xf32>
    %459 = arith.mulf %458, %429 : vector<3x16x128xf32>
    %460 = arith.addf %457, %459 : vector<3x16x128xf32>
    %461 = vector.broadcast %21 : f32 to vector<3x16x128xf32>
    %462 = arith.mulf %461, %403 : vector<3x16x128xf32>
    %463 = arith.addf %460, %462 : vector<3x16x128xf32>
    %464 = vector.broadcast %22 : f32 to vector<3x16x128xf32>
    %465 = arith.mulf %464, %442 : vector<3x16x128xf32>
    %466 = arith.addf %463, %465 : vector<3x16x128xf32>
    %467 = vector.broadcast %23 : f32 to vector<3x16x128xf32>
    %468 = arith.mulf %467, %455 : vector<3x16x128xf32>
    %469 = arith.addf %466, %468 : vector<3x16x128xf32>
    %470 = vector.extract_strided_slice %469 {offsets = [0, 0, 0], sizes = [1, 16, 128], strides = [1, 1, 1]} : vector<3x16x128xf32> to vector<1x16x128xf32>
    %471 = vector.shape_cast %470 : vector<1x16x128xf32> to vector<16x128xf32>
    %c2_i32_106 = arith.constant 2 : i32
    %472 = tpu.dynamic_rotate %471 by %c2_i32_106 dim 0 : vector<16x128xf32>, i32 -> vector<16x128xf32>
    %473 = vector.extract_strided_slice %469 {offsets = [1, 0, 0], sizes = [1, 16, 128], strides = [1, 1, 1]} : vector<3x16x128xf32> to vector<1x16x128xf32>
    %474 = vector.shape_cast %473 : vector<1x16x128xf32> to vector<16x128xf32>
    %c2_i32_107 = arith.constant 2 : i32
    %475 = tpu.dynamic_rotate %474 by %c2_i32_107 dim 0 : vector<16x128xf32>, i32 -> vector<16x128xf32>
    %476 = vector.extract_strided_slice %469 {offsets = [2, 0, 0], sizes = [1, 16, 128], strides = [1, 1, 1]} : vector<3x16x128xf32> to vector<1x16x128xf32>
    %477 = vector.shape_cast %476 : vector<1x16x128xf32> to vector<16x128xf32>
    %c2_i32_108 = arith.constant 2 : i32
    %478 = tpu.dynamic_rotate %477 by %c2_i32_108 dim 0 : vector<16x128xf32>, i32 -> vector<16x128xf32>
    %479 = vector.shape_cast %472 : vector<16x128xf32> to vector<1x16x128xf32>
    %480 = vector.shape_cast %475 : vector<16x128xf32> to vector<1x16x128xf32>
    %481 = vector.shape_cast %478 : vector<16x128xf32> to vector<1x16x128xf32>
    %482 = tpu.concatenate %479, %480, %481 in 0 : vector<1x16x128xf32>, vector<1x16x128xf32>, vector<1x16x128xf32> -> vector<3x16x128xf32>
    %483 = vector.broadcast %24 : f32 to vector<3x16x128xf32>
    %484 = arith.mulf %483, %416 : vector<3x16x128xf32>
    %485 = vector.broadcast %25 : f32 to vector<3x16x128xf32>
    %486 = arith.mulf %485, %429 : vector<3x16x128xf32>
    %487 = arith.addf %484, %486 : vector<3x16x128xf32>
    %488 = vector.broadcast %26 : f32 to vector<3x16x128xf32>
    %489 = arith.mulf %488, %403 : vector<3x16x128xf32>
    %490 = arith.addf %487, %489 : vector<3x16x128xf32>
    %491 = vector.broadcast %27 : f32 to vector<3x16x128xf32>
    %492 = arith.mulf %491, %442 : vector<3x16x128xf32>
    %493 = arith.addf %490, %492 : vector<3x16x128xf32>
    %494 = vector.broadcast %28 : f32 to vector<3x16x128xf32>
    %495 = arith.mulf %494, %455 : vector<3x16x128xf32>
    %496 = arith.addf %493, %495 : vector<3x16x128xf32>
    %497 = vector.extract_strided_slice %496 {offsets = [0, 0, 0], sizes = [1, 16, 128], strides = [1, 1, 1]} : vector<3x16x128xf32> to vector<1x16x128xf32>
    %498 = vector.shape_cast %497 : vector<1x16x128xf32> to vector<16x128xf32>
    %c1_i32_109 = arith.constant 1 : i32
    %499 = tpu.dynamic_rotate %498 by %c1_i32_109 dim 0 : vector<16x128xf32>, i32 -> vector<16x128xf32>
    %500 = vector.extract_strided_slice %496 {offsets = [1, 0, 0], sizes = [1, 16, 128], strides = [1, 1, 1]} : vector<3x16x128xf32> to vector<1x16x128xf32>
    %501 = vector.shape_cast %500 : vector<1x16x128xf32> to vector<16x128xf32>
    %c1_i32_110 = arith.constant 1 : i32
    %502 = tpu.dynamic_rotate %501 by %c1_i32_110 dim 0 : vector<16x128xf32>, i32 -> vector<16x128xf32>
    %503 = vector.extract_strided_slice %496 {offsets = [2, 0, 0], sizes = [1, 16, 128], strides = [1, 1, 1]} : vector<3x16x128xf32> to vector<1x16x128xf32>
    %504 = vector.shape_cast %503 : vector<1x16x128xf32> to vector<16x128xf32>
    %c1_i32_111 = arith.constant 1 : i32
    %505 = tpu.dynamic_rotate %504 by %c1_i32_111 dim 0 : vector<16x128xf32>, i32 -> vector<16x128xf32>
    %506 = vector.shape_cast %499 : vector<16x128xf32> to vector<1x16x128xf32>
    %507 = vector.shape_cast %502 : vector<16x128xf32> to vector<1x16x128xf32>
    %508 = vector.shape_cast %505 : vector<16x128xf32> to vector<1x16x128xf32>
    %509 = tpu.concatenate %506, %507, %508 in 0 : vector<1x16x128xf32>, vector<1x16x128xf32>, vector<1x16x128xf32> -> vector<3x16x128xf32>
    %510 = arith.addf %482, %509 : vector<3x16x128xf32>
    %511 = vector.broadcast %29 : f32 to vector<3x16x128xf32>
    %512 = arith.mulf %511, %416 : vector<3x16x128xf32>
    %513 = vector.broadcast %30 : f32 to vector<3x16x128xf32>
    %514 = arith.mulf %513, %429 : vector<3x16x128xf32>
    %515 = arith.addf %512, %514 : vector<3x16x128xf32>
    %516 = vector.broadcast %31 : f32 to vector<3x16x128xf32>
    %517 = arith.mulf %516, %403 : vector<3x16x128xf32>
    %518 = arith.addf %515, %517 : vector<3x16x128xf32>
    %519 = vector.broadcast %32 : f32 to vector<3x16x128xf32>
    %520 = arith.mulf %519, %442 : vector<3x16x128xf32>
    %521 = arith.addf %518, %520 : vector<3x16x128xf32>
    %522 = vector.broadcast %33 : f32 to vector<3x16x128xf32>
    %523 = arith.mulf %522, %455 : vector<3x16x128xf32>
    %524 = arith.addf %521, %523 : vector<3x16x128xf32>
    %525 = arith.addf %510, %524 : vector<3x16x128xf32>
    %526 = vector.broadcast %34 : f32 to vector<3x16x128xf32>
    %527 = arith.mulf %526, %416 : vector<3x16x128xf32>
    %528 = vector.broadcast %35 : f32 to vector<3x16x128xf32>
    %529 = arith.mulf %528, %429 : vector<3x16x128xf32>
    %530 = arith.addf %527, %529 : vector<3x16x128xf32>
    %531 = vector.broadcast %36 : f32 to vector<3x16x128xf32>
    %532 = arith.mulf %531, %403 : vector<3x16x128xf32>
    %533 = arith.addf %530, %532 : vector<3x16x128xf32>
    %534 = vector.broadcast %37 : f32 to vector<3x16x128xf32>
    %535 = arith.mulf %534, %442 : vector<3x16x128xf32>
    %536 = arith.addf %533, %535 : vector<3x16x128xf32>
    %537 = vector.broadcast %38 : f32 to vector<3x16x128xf32>
    %538 = arith.mulf %537, %455 : vector<3x16x128xf32>
    %539 = arith.addf %536, %538 : vector<3x16x128xf32>
    %540 = vector.extract_strided_slice %539 {offsets = [0, 0, 0], sizes = [1, 16, 128], strides = [1, 1, 1]} : vector<3x16x128xf32> to vector<1x16x128xf32>
    %541 = vector.shape_cast %540 : vector<1x16x128xf32> to vector<16x128xf32>
    %c15_i32_112 = arith.constant 15 : i32
    %542 = tpu.dynamic_rotate %541 by %c15_i32_112 dim 0 : vector<16x128xf32>, i32 -> vector<16x128xf32>
    %543 = vector.extract_strided_slice %539 {offsets = [1, 0, 0], sizes = [1, 16, 128], strides = [1, 1, 1]} : vector<3x16x128xf32> to vector<1x16x128xf32>
    %544 = vector.shape_cast %543 : vector<1x16x128xf32> to vector<16x128xf32>
    %c15_i32_113 = arith.constant 15 : i32
    %545 = tpu.dynamic_rotate %544 by %c15_i32_113 dim 0 : vector<16x128xf32>, i32 -> vector<16x128xf32>
    %546 = vector.extract_strided_slice %539 {offsets = [2, 0, 0], sizes = [1, 16, 128], strides = [1, 1, 1]} : vector<3x16x128xf32> to vector<1x16x128xf32>
    %547 = vector.shape_cast %546 : vector<1x16x128xf32> to vector<16x128xf32>
    %c15_i32_114 = arith.constant 15 : i32
    %548 = tpu.dynamic_rotate %547 by %c15_i32_114 dim 0 : vector<16x128xf32>, i32 -> vector<16x128xf32>
    %549 = vector.shape_cast %542 : vector<16x128xf32> to vector<1x16x128xf32>
    %550 = vector.shape_cast %545 : vector<16x128xf32> to vector<1x16x128xf32>
    %551 = vector.shape_cast %548 : vector<16x128xf32> to vector<1x16x128xf32>
    %552 = tpu.concatenate %549, %550, %551 in 0 : vector<1x16x128xf32>, vector<1x16x128xf32>, vector<1x16x128xf32> -> vector<3x16x128xf32>
    %553 = arith.addf %525, %552 : vector<3x16x128xf32>
    %554 = vector.broadcast %39 : f32 to vector<3x16x128xf32>
    %555 = arith.mulf %554, %416 : vector<3x16x128xf32>
    %556 = vector.broadcast %40 : f32 to vector<3x16x128xf32>
    %557 = arith.mulf %556, %429 : vector<3x16x128xf32>
    %558 = arith.addf %555, %557 : vector<3x16x128xf32>
    %559 = vector.broadcast %41 : f32 to vector<3x16x128xf32>
    %560 = arith.mulf %559, %403 : vector<3x16x128xf32>
    %561 = arith.addf %558, %560 : vector<3x16x128xf32>
    %562 = vector.broadcast %42 : f32 to vector<3x16x128xf32>
    %563 = arith.mulf %562, %442 : vector<3x16x128xf32>
    %564 = arith.addf %561, %563 : vector<3x16x128xf32>
    %565 = vector.broadcast %43 : f32 to vector<3x16x128xf32>
    %566 = arith.mulf %565, %455 : vector<3x16x128xf32>
    %567 = arith.addf %564, %566 : vector<3x16x128xf32>
    %568 = vector.extract_strided_slice %567 {offsets = [0, 0, 0], sizes = [1, 16, 128], strides = [1, 1, 1]} : vector<3x16x128xf32> to vector<1x16x128xf32>
    %569 = vector.shape_cast %568 : vector<1x16x128xf32> to vector<16x128xf32>
    %c14_i32_115 = arith.constant 14 : i32
    %570 = tpu.dynamic_rotate %569 by %c14_i32_115 dim 0 : vector<16x128xf32>, i32 -> vector<16x128xf32>
    %571 = vector.extract_strided_slice %567 {offsets = [1, 0, 0], sizes = [1, 16, 128], strides = [1, 1, 1]} : vector<3x16x128xf32> to vector<1x16x128xf32>
    %572 = vector.shape_cast %571 : vector<1x16x128xf32> to vector<16x128xf32>
    %c14_i32_116 = arith.constant 14 : i32
    %573 = tpu.dynamic_rotate %572 by %c14_i32_116 dim 0 : vector<16x128xf32>, i32 -> vector<16x128xf32>
    %574 = vector.extract_strided_slice %567 {offsets = [2, 0, 0], sizes = [1, 16, 128], strides = [1, 1, 1]} : vector<3x16x128xf32> to vector<1x16x128xf32>
    %575 = vector.shape_cast %574 : vector<1x16x128xf32> to vector<16x128xf32>
    %c14_i32_117 = arith.constant 14 : i32
    %576 = tpu.dynamic_rotate %575 by %c14_i32_117 dim 0 : vector<16x128xf32>, i32 -> vector<16x128xf32>
    %577 = vector.shape_cast %570 : vector<16x128xf32> to vector<1x16x128xf32>
    %578 = vector.shape_cast %573 : vector<16x128xf32> to vector<1x16x128xf32>
    %579 = vector.shape_cast %576 : vector<16x128xf32> to vector<1x16x128xf32>
    %580 = tpu.concatenate %577, %578, %579 in 0 : vector<1x16x128xf32>, vector<1x16x128xf32>, vector<1x16x128xf32> -> vector<3x16x128xf32>
    %581 = arith.addf %553, %580 : vector<3x16x128xf32>
    %582 = arith.addf %262, %249 : vector<3x16x128xf32>
    %583 = vector.extract_strided_slice %0 {offsets = [0, 0, 0], sizes = [1, 16, 128], strides = [1, 1, 1]} : vector<3x16x128xf32> to vector<1x16x128xf32>
    %584 = vector.shape_cast %583 : vector<1x16x128xf32> to vector<16x128xf32>
    %c15_i32_118 = arith.constant 15 : i32
    %585 = tpu.dynamic_rotate %584 by %c15_i32_118 dim 0 : vector<16x128xf32>, i32 -> vector<16x128xf32>
    %586 = vector.extract_strided_slice %0 {offsets = [1, 0, 0], sizes = [1, 16, 128], strides = [1, 1, 1]} : vector<3x16x128xf32> to vector<1x16x128xf32>
    %587 = vector.shape_cast %586 : vector<1x16x128xf32> to vector<16x128xf32>
    %c15_i32_119 = arith.constant 15 : i32
    %588 = tpu.dynamic_rotate %587 by %c15_i32_119 dim 0 : vector<16x128xf32>, i32 -> vector<16x128xf32>
    %589 = vector.extract_strided_slice %0 {offsets = [2, 0, 0], sizes = [1, 16, 128], strides = [1, 1, 1]} : vector<3x16x128xf32> to vector<1x16x128xf32>
    %590 = vector.shape_cast %589 : vector<1x16x128xf32> to vector<16x128xf32>
    %c15_i32_120 = arith.constant 15 : i32
    %591 = tpu.dynamic_rotate %590 by %c15_i32_120 dim 0 : vector<16x128xf32>, i32 -> vector<16x128xf32>
    %592 = vector.shape_cast %585 : vector<16x128xf32> to vector<1x16x128xf32>
    %593 = vector.shape_cast %588 : vector<16x128xf32> to vector<1x16x128xf32>
    %594 = vector.shape_cast %591 : vector<16x128xf32> to vector<1x16x128xf32>
    %595 = tpu.concatenate %592, %593, %594 in 0 : vector<1x16x128xf32>, vector<1x16x128xf32>, vector<1x16x128xf32> -> vector<3x16x128xf32>
    %596 = arith.addf %582, %595 : vector<3x16x128xf32>
    %597 = vector.extract_strided_slice %0 {offsets = [0, 0, 0], sizes = [1, 16, 128], strides = [1, 1, 1]} : vector<3x16x128xf32> to vector<1x16x128xf32>
    %598 = vector.shape_cast %597 : vector<1x16x128xf32> to vector<16x128xf32>
    %c1_i32_121 = arith.constant 1 : i32
    %599 = tpu.dynamic_rotate %598 by %c1_i32_121 dim 0 : vector<16x128xf32>, i32 -> vector<16x128xf32>
    %600 = vector.extract_strided_slice %0 {offsets = [1, 0, 0], sizes = [1, 16, 128], strides = [1, 1, 1]} : vector<3x16x128xf32> to vector<1x16x128xf32>
    %601 = vector.shape_cast %600 : vector<1x16x128xf32> to vector<16x128xf32>
    %c1_i32_122 = arith.constant 1 : i32
    %602 = tpu.dynamic_rotate %601 by %c1_i32_122 dim 0 : vector<16x128xf32>, i32 -> vector<16x128xf32>
    %603 = vector.extract_strided_slice %0 {offsets = [2, 0, 0], sizes = [1, 16, 128], strides = [1, 1, 1]} : vector<3x16x128xf32> to vector<1x16x128xf32>
    %604 = vector.shape_cast %603 : vector<1x16x128xf32> to vector<16x128xf32>
    %c1_i32_123 = arith.constant 1 : i32
    %605 = tpu.dynamic_rotate %604 by %c1_i32_123 dim 0 : vector<16x128xf32>, i32 -> vector<16x128xf32>
    %606 = vector.shape_cast %599 : vector<16x128xf32> to vector<1x16x128xf32>
    %607 = vector.shape_cast %602 : vector<16x128xf32> to vector<1x16x128xf32>
    %608 = vector.shape_cast %605 : vector<16x128xf32> to vector<1x16x128xf32>
    %609 = tpu.concatenate %606, %607, %608 in 0 : vector<1x16x128xf32>, vector<1x16x128xf32>, vector<1x16x128xf32> -> vector<3x16x128xf32>
    %610 = arith.addf %596, %609 : vector<3x16x128xf32>
    %611 = arith.mulf %18, %0 : vector<3x16x128xf32>
    %612 = arith.addf %581, %611 : vector<3x16x128xf32>
    %613 = arith.mulf %16, %610 : vector<3x16x128xf32>
    %614 = arith.subf %612, %613 : vector<3x16x128xf32>
    %615 = arith.subf %223, %614 : vector<3x16x128xf32>
    %616 = arith.mulf %615, %615 : vector<3x16x128xf32>
    %cst_124 = arith.constant dense<0.000000e+00> : vector<3x16xf32>
    %617 = vector.multi_reduction <add>, %616, %cst_124 [2] : vector<3x16x128xf32> to vector<3x16xf32>
    %618 = vector.shape_cast %617 : vector<3x16xf32> to vector<3x16x1xf32>
    %cst_125 = arith.constant dense<0.000000e+00> : vector<3x1xf32>
    %619 = vector.multi_reduction <add>, %618, %cst_125 [1] : vector<3x16x1xf32> to vector<3x1xf32>
    %620 = vector.shape_cast %619 : vector<3x1xf32> to vector<3x1x1xf32>
    %621 = vector.extract_strided_slice %615 {offsets = [0, 0, 0], sizes = [1, 16, 128], strides = [1, 1, 1]} : vector<3x16x128xf32> to vector<1x16x128xf32>
    %622 = vector.shape_cast %621 : vector<1x16x128xf32> to vector<16x128xf32>
    %c2_i32_126 = arith.constant 2 : i32
    %623 = tpu.dynamic_rotate %622 by %c2_i32_126 dim 1 : vector<16x128xf32>, i32 -> vector<16x128xf32>
    %624 = vector.extract_strided_slice %615 {offsets = [1, 0, 0], sizes = [1, 16, 128], strides = [1, 1, 1]} : vector<3x16x128xf32> to vector<1x16x128xf32>
    %625 = vector.shape_cast %624 : vector<1x16x128xf32> to vector<16x128xf32>
    %c2_i32_127 = arith.constant 2 : i32
    %626 = tpu.dynamic_rotate %625 by %c2_i32_127 dim 1 : vector<16x128xf32>, i32 -> vector<16x128xf32>
    %627 = vector.extract_strided_slice %615 {offsets = [2, 0, 0], sizes = [1, 16, 128], strides = [1, 1, 1]} : vector<3x16x128xf32> to vector<1x16x128xf32>
    %628 = vector.shape_cast %627 : vector<1x16x128xf32> to vector<16x128xf32>
    %c2_i32_128 = arith.constant 2 : i32
    %629 = tpu.dynamic_rotate %628 by %c2_i32_128 dim 1 : vector<16x128xf32>, i32 -> vector<16x128xf32>
    %630 = vector.shape_cast %623 : vector<16x128xf32> to vector<1x16x128xf32>
    %631 = vector.shape_cast %626 : vector<16x128xf32> to vector<1x16x128xf32>
    %632 = vector.shape_cast %629 : vector<16x128xf32> to vector<1x16x128xf32>
    %633 = tpu.concatenate %630, %631, %632 in 0 : vector<1x16x128xf32>, vector<1x16x128xf32>, vector<1x16x128xf32> -> vector<3x16x128xf32>
    %634 = vector.extract_strided_slice %615 {offsets = [0, 0, 0], sizes = [1, 16, 128], strides = [1, 1, 1]} : vector<3x16x128xf32> to vector<1x16x128xf32>
    %635 = vector.shape_cast %634 : vector<1x16x128xf32> to vector<16x128xf32>
    %c1_i32_129 = arith.constant 1 : i32
    %636 = tpu.dynamic_rotate %635 by %c1_i32_129 dim 1 : vector<16x128xf32>, i32 -> vector<16x128xf32>
    %637 = vector.extract_strided_slice %615 {offsets = [1, 0, 0], sizes = [1, 16, 128], strides = [1, 1, 1]} : vector<3x16x128xf32> to vector<1x16x128xf32>
    %638 = vector.shape_cast %637 : vector<1x16x128xf32> to vector<16x128xf32>
    %c1_i32_130 = arith.constant 1 : i32
    %639 = tpu.dynamic_rotate %638 by %c1_i32_130 dim 1 : vector<16x128xf32>, i32 -> vector<16x128xf32>
    %640 = vector.extract_strided_slice %615 {offsets = [2, 0, 0], sizes = [1, 16, 128], strides = [1, 1, 1]} : vector<3x16x128xf32> to vector<1x16x128xf32>
    %641 = vector.shape_cast %640 : vector<1x16x128xf32> to vector<16x128xf32>
    %c1_i32_131 = arith.constant 1 : i32
    %642 = tpu.dynamic_rotate %641 by %c1_i32_131 dim 1 : vector<16x128xf32>, i32 -> vector<16x128xf32>
    %643 = vector.shape_cast %636 : vector<16x128xf32> to vector<1x16x128xf32>
    %644 = vector.shape_cast %639 : vector<16x128xf32> to vector<1x16x128xf32>
    %645 = vector.shape_cast %642 : vector<16x128xf32> to vector<1x16x128xf32>
    %646 = tpu.concatenate %643, %644, %645 in 0 : vector<1x16x128xf32>, vector<1x16x128xf32>, vector<1x16x128xf32> -> vector<3x16x128xf32>
    %647 = vector.extract_strided_slice %615 {offsets = [0, 0, 0], sizes = [1, 16, 128], strides = [1, 1, 1]} : vector<3x16x128xf32> to vector<1x16x128xf32>
    %648 = vector.shape_cast %647 : vector<1x16x128xf32> to vector<16x128xf32>
    %c127_i32_132 = arith.constant 127 : i32
    %649 = tpu.dynamic_rotate %648 by %c127_i32_132 dim 1 : vector<16x128xf32>, i32 -> vector<16x128xf32>
    %650 = vector.extract_strided_slice %615 {offsets = [1, 0, 0], sizes = [1, 16, 128], strides = [1, 1, 1]} : vector<3x16x128xf32> to vector<1x16x128xf32>
    %651 = vector.shape_cast %650 : vector<1x16x128xf32> to vector<16x128xf32>
    %c127_i32_133 = arith.constant 127 : i32
    %652 = tpu.dynamic_rotate %651 by %c127_i32_133 dim 1 : vector<16x128xf32>, i32 -> vector<16x128xf32>
    %653 = vector.extract_strided_slice %615 {offsets = [2, 0, 0], sizes = [1, 16, 128], strides = [1, 1, 1]} : vector<3x16x128xf32> to vector<1x16x128xf32>
    %654 = vector.shape_cast %653 : vector<1x16x128xf32> to vector<16x128xf32>
    %c127_i32_134 = arith.constant 127 : i32
    %655 = tpu.dynamic_rotate %654 by %c127_i32_134 dim 1 : vector<16x128xf32>, i32 -> vector<16x128xf32>
    %656 = vector.shape_cast %649 : vector<16x128xf32> to vector<1x16x128xf32>
    %657 = vector.shape_cast %652 : vector<16x128xf32> to vector<1x16x128xf32>
    %658 = vector.shape_cast %655 : vector<16x128xf32> to vector<1x16x128xf32>
    %659 = tpu.concatenate %656, %657, %658 in 0 : vector<1x16x128xf32>, vector<1x16x128xf32>, vector<1x16x128xf32> -> vector<3x16x128xf32>
    %660 = vector.extract_strided_slice %615 {offsets = [0, 0, 0], sizes = [1, 16, 128], strides = [1, 1, 1]} : vector<3x16x128xf32> to vector<1x16x128xf32>
    %661 = vector.shape_cast %660 : vector<1x16x128xf32> to vector<16x128xf32>
    %c126_i32_135 = arith.constant 126 : i32
    %662 = tpu.dynamic_rotate %661 by %c126_i32_135 dim 1 : vector<16x128xf32>, i32 -> vector<16x128xf32>
    %663 = vector.extract_strided_slice %615 {offsets = [1, 0, 0], sizes = [1, 16, 128], strides = [1, 1, 1]} : vector<3x16x128xf32> to vector<1x16x128xf32>
    %664 = vector.shape_cast %663 : vector<1x16x128xf32> to vector<16x128xf32>
    %c126_i32_136 = arith.constant 126 : i32
    %665 = tpu.dynamic_rotate %664 by %c126_i32_136 dim 1 : vector<16x128xf32>, i32 -> vector<16x128xf32>
    %666 = vector.extract_strided_slice %615 {offsets = [2, 0, 0], sizes = [1, 16, 128], strides = [1, 1, 1]} : vector<3x16x128xf32> to vector<1x16x128xf32>
    %667 = vector.shape_cast %666 : vector<1x16x128xf32> to vector<16x128xf32>
    %c126_i32_137 = arith.constant 126 : i32
    %668 = tpu.dynamic_rotate %667 by %c126_i32_137 dim 1 : vector<16x128xf32>, i32 -> vector<16x128xf32>
    %669 = vector.shape_cast %662 : vector<16x128xf32> to vector<1x16x128xf32>
    %670 = vector.shape_cast %665 : vector<16x128xf32> to vector<1x16x128xf32>
    %671 = vector.shape_cast %668 : vector<16x128xf32> to vector<1x16x128xf32>
    %672 = tpu.concatenate %669, %670, %671 in 0 : vector<1x16x128xf32>, vector<1x16x128xf32>, vector<1x16x128xf32> -> vector<3x16x128xf32>
    %673 = vector.broadcast %19 : f32 to vector<3x16x128xf32>
    %674 = arith.mulf %673, %672 : vector<3x16x128xf32>
    %675 = vector.broadcast %20 : f32 to vector<3x16x128xf32>
    %676 = arith.mulf %675, %659 : vector<3x16x128xf32>
    %677 = arith.addf %674, %676 : vector<3x16x128xf32>
    %678 = vector.broadcast %21 : f32 to vector<3x16x128xf32>
    %679 = arith.mulf %678, %615 : vector<3x16x128xf32>
    %680 = arith.addf %677, %679 : vector<3x16x128xf32>
    %681 = vector.broadcast %22 : f32 to vector<3x16x128xf32>
    %682 = arith.mulf %681, %646 : vector<3x16x128xf32>
    %683 = arith.addf %680, %682 : vector<3x16x128xf32>
    %684 = vector.broadcast %23 : f32 to vector<3x16x128xf32>
    %685 = arith.mulf %684, %633 : vector<3x16x128xf32>
    %686 = arith.addf %683, %685 : vector<3x16x128xf32>
    %687 = vector.extract_strided_slice %686 {offsets = [0, 0, 0], sizes = [1, 16, 128], strides = [1, 1, 1]} : vector<3x16x128xf32> to vector<1x16x128xf32>
    %688 = vector.shape_cast %687 : vector<1x16x128xf32> to vector<16x128xf32>
    %c14_i32_138 = arith.constant 14 : i32
    %689 = tpu.dynamic_rotate %688 by %c14_i32_138 dim 0 : vector<16x128xf32>, i32 -> vector<16x128xf32>
    %690 = vector.extract_strided_slice %686 {offsets = [1, 0, 0], sizes = [1, 16, 128], strides = [1, 1, 1]} : vector<3x16x128xf32> to vector<1x16x128xf32>
    %691 = vector.shape_cast %690 : vector<1x16x128xf32> to vector<16x128xf32>
    %c14_i32_139 = arith.constant 14 : i32
    %692 = tpu.dynamic_rotate %691 by %c14_i32_139 dim 0 : vector<16x128xf32>, i32 -> vector<16x128xf32>
    %693 = vector.extract_strided_slice %686 {offsets = [2, 0, 0], sizes = [1, 16, 128], strides = [1, 1, 1]} : vector<3x16x128xf32> to vector<1x16x128xf32>
    %694 = vector.shape_cast %693 : vector<1x16x128xf32> to vector<16x128xf32>
    %c14_i32_140 = arith.constant 14 : i32
    %695 = tpu.dynamic_rotate %694 by %c14_i32_140 dim 0 : vector<16x128xf32>, i32 -> vector<16x128xf32>
    %696 = vector.shape_cast %689 : vector<16x128xf32> to vector<1x16x128xf32>
    %697 = vector.shape_cast %692 : vector<16x128xf32> to vector<1x16x128xf32>
    %698 = vector.shape_cast %695 : vector<16x128xf32> to vector<1x16x128xf32>
    %699 = tpu.concatenate %696, %697, %698 in 0 : vector<1x16x128xf32>, vector<1x16x128xf32>, vector<1x16x128xf32> -> vector<3x16x128xf32>
    %700 = vector.broadcast %24 : f32 to vector<3x16x128xf32>
    %701 = arith.mulf %700, %672 : vector<3x16x128xf32>
    %702 = vector.broadcast %25 : f32 to vector<3x16x128xf32>
    %703 = arith.mulf %702, %659 : vector<3x16x128xf32>
    %704 = arith.addf %701, %703 : vector<3x16x128xf32>
    %705 = vector.broadcast %26 : f32 to vector<3x16x128xf32>
    %706 = arith.mulf %705, %615 : vector<3x16x128xf32>
    %707 = arith.addf %704, %706 : vector<3x16x128xf32>
    %708 = vector.broadcast %27 : f32 to vector<3x16x128xf32>
    %709 = arith.mulf %708, %646 : vector<3x16x128xf32>
    %710 = arith.addf %707, %709 : vector<3x16x128xf32>
    %711 = vector.broadcast %28 : f32 to vector<3x16x128xf32>
    %712 = arith.mulf %711, %633 : vector<3x16x128xf32>
    %713 = arith.addf %710, %712 : vector<3x16x128xf32>
    %714 = vector.extract_strided_slice %713 {offsets = [0, 0, 0], sizes = [1, 16, 128], strides = [1, 1, 1]} : vector<3x16x128xf32> to vector<1x16x128xf32>
    %715 = vector.shape_cast %714 : vector<1x16x128xf32> to vector<16x128xf32>
    %c15_i32_141 = arith.constant 15 : i32
    %716 = tpu.dynamic_rotate %715 by %c15_i32_141 dim 0 : vector<16x128xf32>, i32 -> vector<16x128xf32>
    %717 = vector.extract_strided_slice %713 {offsets = [1, 0, 0], sizes = [1, 16, 128], strides = [1, 1, 1]} : vector<3x16x128xf32> to vector<1x16x128xf32>
    %718 = vector.shape_cast %717 : vector<1x16x128xf32> to vector<16x128xf32>
    %c15_i32_142 = arith.constant 15 : i32
    %719 = tpu.dynamic_rotate %718 by %c15_i32_142 dim 0 : vector<16x128xf32>, i32 -> vector<16x128xf32>
    %720 = vector.extract_strided_slice %713 {offsets = [2, 0, 0], sizes = [1, 16, 128], strides = [1, 1, 1]} : vector<3x16x128xf32> to vector<1x16x128xf32>
    %721 = vector.shape_cast %720 : vector<1x16x128xf32> to vector<16x128xf32>
    %c15_i32_143 = arith.constant 15 : i32
    %722 = tpu.dynamic_rotate %721 by %c15_i32_143 dim 0 : vector<16x128xf32>, i32 -> vector<16x128xf32>
    %723 = vector.shape_cast %716 : vector<16x128xf32> to vector<1x16x128xf32>
    %724 = vector.shape_cast %719 : vector<16x128xf32> to vector<1x16x128xf32>
    %725 = vector.shape_cast %722 : vector<16x128xf32> to vector<1x16x128xf32>
    %726 = tpu.concatenate %723, %724, %725 in 0 : vector<1x16x128xf32>, vector<1x16x128xf32>, vector<1x16x128xf32> -> vector<3x16x128xf32>
    %727 = arith.addf %699, %726 : vector<3x16x128xf32>
    %728 = vector.broadcast %29 : f32 to vector<3x16x128xf32>
    %729 = arith.mulf %728, %672 : vector<3x16x128xf32>
    %730 = vector.broadcast %30 : f32 to vector<3x16x128xf32>
    %731 = arith.mulf %730, %659 : vector<3x16x128xf32>
    %732 = arith.addf %729, %731 : vector<3x16x128xf32>
    %733 = vector.broadcast %31 : f32 to vector<3x16x128xf32>
    %734 = arith.mulf %733, %615 : vector<3x16x128xf32>
    %735 = arith.addf %732, %734 : vector<3x16x128xf32>
    %736 = vector.broadcast %32 : f32 to vector<3x16x128xf32>
    %737 = arith.mulf %736, %646 : vector<3x16x128xf32>
    %738 = arith.addf %735, %737 : vector<3x16x128xf32>
    %739 = vector.broadcast %33 : f32 to vector<3x16x128xf32>
    %740 = arith.mulf %739, %633 : vector<3x16x128xf32>
    %741 = arith.addf %738, %740 : vector<3x16x128xf32>
    %742 = arith.addf %727, %741 : vector<3x16x128xf32>
    %743 = vector.broadcast %34 : f32 to vector<3x16x128xf32>
    %744 = arith.mulf %743, %672 : vector<3x16x128xf32>
    %745 = vector.broadcast %35 : f32 to vector<3x16x128xf32>
    %746 = arith.mulf %745, %659 : vector<3x16x128xf32>
    %747 = arith.addf %744, %746 : vector<3x16x128xf32>
    %748 = vector.broadcast %36 : f32 to vector<3x16x128xf32>
    %749 = arith.mulf %748, %615 : vector<3x16x128xf32>
    %750 = arith.addf %747, %749 : vector<3x16x128xf32>
    %751 = vector.broadcast %37 : f32 to vector<3x16x128xf32>
    %752 = arith.mulf %751, %646 : vector<3x16x128xf32>
    %753 = arith.addf %750, %752 : vector<3x16x128xf32>
    %754 = vector.broadcast %38 : f32 to vector<3x16x128xf32>
    %755 = arith.mulf %754, %633 : vector<3x16x128xf32>
    %756 = arith.addf %753, %755 : vector<3x16x128xf32>
    %757 = vector.extract_strided_slice %756 {offsets = [0, 0, 0], sizes = [1, 16, 128], strides = [1, 1, 1]} : vector<3x16x128xf32> to vector<1x16x128xf32>
    %758 = vector.shape_cast %757 : vector<1x16x128xf32> to vector<16x128xf32>
    %c1_i32_144 = arith.constant 1 : i32
    %759 = tpu.dynamic_rotate %758 by %c1_i32_144 dim 0 : vector<16x128xf32>, i32 -> vector<16x128xf32>
    %760 = vector.extract_strided_slice %756 {offsets = [1, 0, 0], sizes = [1, 16, 128], strides = [1, 1, 1]} : vector<3x16x128xf32> to vector<1x16x128xf32>
    %761 = vector.shape_cast %760 : vector<1x16x128xf32> to vector<16x128xf32>
    %c1_i32_145 = arith.constant 1 : i32
    %762 = tpu.dynamic_rotate %761 by %c1_i32_145 dim 0 : vector<16x128xf32>, i32 -> vector<16x128xf32>
    %763 = vector.extract_strided_slice %756 {offsets = [2, 0, 0], sizes = [1, 16, 128], strides = [1, 1, 1]} : vector<3x16x128xf32> to vector<1x16x128xf32>
    %764 = vector.shape_cast %763 : vector<1x16x128xf32> to vector<16x128xf32>
    %c1_i32_146 = arith.constant 1 : i32
    %765 = tpu.dynamic_rotate %764 by %c1_i32_146 dim 0 : vector<16x128xf32>, i32 -> vector<16x128xf32>
    %766 = vector.shape_cast %759 : vector<16x128xf32> to vector<1x16x128xf32>
    %767 = vector.shape_cast %762 : vector<16x128xf32> to vector<1x16x128xf32>
    %768 = vector.shape_cast %765 : vector<16x128xf32> to vector<1x16x128xf32>
    %769 = tpu.concatenate %766, %767, %768 in 0 : vector<1x16x128xf32>, vector<1x16x128xf32>, vector<1x16x128xf32> -> vector<3x16x128xf32>
    %770 = arith.addf %742, %769 : vector<3x16x128xf32>
    %771 = vector.broadcast %39 : f32 to vector<3x16x128xf32>
    %772 = arith.mulf %771, %672 : vector<3x16x128xf32>
    %773 = vector.broadcast %40 : f32 to vector<3x16x128xf32>
    %774 = arith.mulf %773, %659 : vector<3x16x128xf32>
    %775 = arith.addf %772, %774 : vector<3x16x128xf32>
    %776 = vector.broadcast %41 : f32 to vector<3x16x128xf32>
    %777 = arith.mulf %776, %615 : vector<3x16x128xf32>
    %778 = arith.addf %775, %777 : vector<3x16x128xf32>
    %779 = vector.broadcast %42 : f32 to vector<3x16x128xf32>
    %780 = arith.mulf %779, %646 : vector<3x16x128xf32>
    %781 = arith.addf %778, %780 : vector<3x16x128xf32>
    %782 = vector.broadcast %43 : f32 to vector<3x16x128xf32>
    %783 = arith.mulf %782, %633 : vector<3x16x128xf32>
    %784 = arith.addf %781, %783 : vector<3x16x128xf32>
    %785 = vector.extract_strided_slice %784 {offsets = [0, 0, 0], sizes = [1, 16, 128], strides = [1, 1, 1]} : vector<3x16x128xf32> to vector<1x16x128xf32>
    %786 = vector.shape_cast %785 : vector<1x16x128xf32> to vector<16x128xf32>
    %c2_i32_147 = arith.constant 2 : i32
    %787 = tpu.dynamic_rotate %786 by %c2_i32_147 dim 0 : vector<16x128xf32>, i32 -> vector<16x128xf32>
    %788 = vector.extract_strided_slice %784 {offsets = [1, 0, 0], sizes = [1, 16, 128], strides = [1, 1, 1]} : vector<3x16x128xf32> to vector<1x16x128xf32>
    %789 = vector.shape_cast %788 : vector<1x16x128xf32> to vector<16x128xf32>
    %c2_i32_148 = arith.constant 2 : i32
    %790 = tpu.dynamic_rotate %789 by %c2_i32_148 dim 0 : vector<16x128xf32>, i32 -> vector<16x128xf32>
    %791 = vector.extract_strided_slice %784 {offsets = [2, 0, 0], sizes = [1, 16, 128], strides = [1, 1, 1]} : vector<3x16x128xf32> to vector<1x16x128xf32>
    %792 = vector.shape_cast %791 : vector<1x16x128xf32> to vector<16x128xf32>
    %c2_i32_149 = arith.constant 2 : i32
    %793 = tpu.dynamic_rotate %792 by %c2_i32_149 dim 0 : vector<16x128xf32>, i32 -> vector<16x128xf32>
    %794 = vector.shape_cast %787 : vector<16x128xf32> to vector<1x16x128xf32>
    %795 = vector.shape_cast %790 : vector<16x128xf32> to vector<1x16x128xf32>
    %796 = vector.shape_cast %793 : vector<16x128xf32> to vector<1x16x128xf32>
    %797 = tpu.concatenate %794, %795, %796 in 0 : vector<1x16x128xf32>, vector<1x16x128xf32>, vector<1x16x128xf32> -> vector<3x16x128xf32>
    %798 = arith.addf %770, %797 : vector<3x16x128xf32>
    %799 = vector.broadcast %2 : vector<1x16x128xf32> to vector<3x16x128xf32>
    %800 = arith.mulf %799, %798 : vector<3x16x128xf32>
    %801 = vector.extract_strided_slice %800 {offsets = [0, 0, 0], sizes = [1, 16, 128], strides = [1, 1, 1]} : vector<3x16x128xf32> to vector<1x16x128xf32>
    %802 = vector.shape_cast %801 : vector<1x16x128xf32> to vector<16x128xf32>
    %c2_i32_150 = arith.constant 2 : i32
    %803 = tpu.dynamic_rotate %802 by %c2_i32_150 dim 1 : vector<16x128xf32>, i32 -> vector<16x128xf32>
    %804 = vector.extract_strided_slice %800 {offsets = [1, 0, 0], sizes = [1, 16, 128], strides = [1, 1, 1]} : vector<3x16x128xf32> to vector<1x16x128xf32>
    %805 = vector.shape_cast %804 : vector<1x16x128xf32> to vector<16x128xf32>
    %c2_i32_151 = arith.constant 2 : i32
    %806 = tpu.dynamic_rotate %805 by %c2_i32_151 dim 1 : vector<16x128xf32>, i32 -> vector<16x128xf32>
    %807 = vector.extract_strided_slice %800 {offsets = [2, 0, 0], sizes = [1, 16, 128], strides = [1, 1, 1]} : vector<3x16x128xf32> to vector<1x16x128xf32>
    %808 = vector.shape_cast %807 : vector<1x16x128xf32> to vector<16x128xf32>
    %c2_i32_152 = arith.constant 2 : i32
    %809 = tpu.dynamic_rotate %808 by %c2_i32_152 dim 1 : vector<16x128xf32>, i32 -> vector<16x128xf32>
    %810 = vector.shape_cast %803 : vector<16x128xf32> to vector<1x16x128xf32>
    %811 = vector.shape_cast %806 : vector<16x128xf32> to vector<1x16x128xf32>
    %812 = vector.shape_cast %809 : vector<16x128xf32> to vector<1x16x128xf32>
    %813 = tpu.concatenate %810, %811, %812 in 0 : vector<1x16x128xf32>, vector<1x16x128xf32>, vector<1x16x128xf32> -> vector<3x16x128xf32>
    %814 = vector.extract_strided_slice %800 {offsets = [0, 0, 0], sizes = [1, 16, 128], strides = [1, 1, 1]} : vector<3x16x128xf32> to vector<1x16x128xf32>
    %815 = vector.shape_cast %814 : vector<1x16x128xf32> to vector<16x128xf32>
    %c1_i32_153 = arith.constant 1 : i32
    %816 = tpu.dynamic_rotate %815 by %c1_i32_153 dim 1 : vector<16x128xf32>, i32 -> vector<16x128xf32>
    %817 = vector.extract_strided_slice %800 {offsets = [1, 0, 0], sizes = [1, 16, 128], strides = [1, 1, 1]} : vector<3x16x128xf32> to vector<1x16x128xf32>
    %818 = vector.shape_cast %817 : vector<1x16x128xf32> to vector<16x128xf32>
    %c1_i32_154 = arith.constant 1 : i32
    %819 = tpu.dynamic_rotate %818 by %c1_i32_154 dim 1 : vector<16x128xf32>, i32 -> vector<16x128xf32>
    %820 = vector.extract_strided_slice %800 {offsets = [2, 0, 0], sizes = [1, 16, 128], strides = [1, 1, 1]} : vector<3x16x128xf32> to vector<1x16x128xf32>
    %821 = vector.shape_cast %820 : vector<1x16x128xf32> to vector<16x128xf32>
    %c1_i32_155 = arith.constant 1 : i32
    %822 = tpu.dynamic_rotate %821 by %c1_i32_155 dim 1 : vector<16x128xf32>, i32 -> vector<16x128xf32>
    %823 = vector.shape_cast %816 : vector<16x128xf32> to vector<1x16x128xf32>
    %824 = vector.shape_cast %819 : vector<16x128xf32> to vector<1x16x128xf32>
    %825 = vector.shape_cast %822 : vector<16x128xf32> to vector<1x16x128xf32>
    %826 = tpu.concatenate %823, %824, %825 in 0 : vector<1x16x128xf32>, vector<1x16x128xf32>, vector<1x16x128xf32> -> vector<3x16x128xf32>
    %827 = vector.extract_strided_slice %800 {offsets = [0, 0, 0], sizes = [1, 16, 128], strides = [1, 1, 1]} : vector<3x16x128xf32> to vector<1x16x128xf32>
    %828 = vector.shape_cast %827 : vector<1x16x128xf32> to vector<16x128xf32>
    %c127_i32_156 = arith.constant 127 : i32
    %829 = tpu.dynamic_rotate %828 by %c127_i32_156 dim 1 : vector<16x128xf32>, i32 -> vector<16x128xf32>
    %830 = vector.extract_strided_slice %800 {offsets = [1, 0, 0], sizes = [1, 16, 128], strides = [1, 1, 1]} : vector<3x16x128xf32> to vector<1x16x128xf32>
    %831 = vector.shape_cast %830 : vector<1x16x128xf32> to vector<16x128xf32>
    %c127_i32_157 = arith.constant 127 : i32
    %832 = tpu.dynamic_rotate %831 by %c127_i32_157 dim 1 : vector<16x128xf32>, i32 -> vector<16x128xf32>
    %833 = vector.extract_strided_slice %800 {offsets = [2, 0, 0], sizes = [1, 16, 128], strides = [1, 1, 1]} : vector<3x16x128xf32> to vector<1x16x128xf32>
    %834 = vector.shape_cast %833 : vector<1x16x128xf32> to vector<16x128xf32>
    %c127_i32_158 = arith.constant 127 : i32
    %835 = tpu.dynamic_rotate %834 by %c127_i32_158 dim 1 : vector<16x128xf32>, i32 -> vector<16x128xf32>
    %836 = vector.shape_cast %829 : vector<16x128xf32> to vector<1x16x128xf32>
    %837 = vector.shape_cast %832 : vector<16x128xf32> to vector<1x16x128xf32>
    %838 = vector.shape_cast %835 : vector<16x128xf32> to vector<1x16x128xf32>
    %839 = tpu.concatenate %836, %837, %838 in 0 : vector<1x16x128xf32>, vector<1x16x128xf32>, vector<1x16x128xf32> -> vector<3x16x128xf32>
    %840 = vector.extract_strided_slice %800 {offsets = [0, 0, 0], sizes = [1, 16, 128], strides = [1, 1, 1]} : vector<3x16x128xf32> to vector<1x16x128xf32>
    %841 = vector.shape_cast %840 : vector<1x16x128xf32> to vector<16x128xf32>
    %c126_i32_159 = arith.constant 126 : i32
    %842 = tpu.dynamic_rotate %841 by %c126_i32_159 dim 1 : vector<16x128xf32>, i32 -> vector<16x128xf32>
    %843 = vector.extract_strided_slice %800 {offsets = [1, 0, 0], sizes = [1, 16, 128], strides = [1, 1, 1]} : vector<3x16x128xf32> to vector<1x16x128xf32>
    %844 = vector.shape_cast %843 : vector<1x16x128xf32> to vector<16x128xf32>
    %c126_i32_160 = arith.constant 126 : i32
    %845 = tpu.dynamic_rotate %844 by %c126_i32_160 dim 1 : vector<16x128xf32>, i32 -> vector<16x128xf32>
    %846 = vector.extract_strided_slice %800 {offsets = [2, 0, 0], sizes = [1, 16, 128], strides = [1, 1, 1]} : vector<3x16x128xf32> to vector<1x16x128xf32>
    %847 = vector.shape_cast %846 : vector<1x16x128xf32> to vector<16x128xf32>
    %c126_i32_161 = arith.constant 126 : i32
    %848 = tpu.dynamic_rotate %847 by %c126_i32_161 dim 1 : vector<16x128xf32>, i32 -> vector<16x128xf32>
    %849 = vector.shape_cast %842 : vector<16x128xf32> to vector<1x16x128xf32>
    %850 = vector.shape_cast %845 : vector<16x128xf32> to vector<1x16x128xf32>
    %851 = vector.shape_cast %848 : vector<16x128xf32> to vector<1x16x128xf32>
    %852 = tpu.concatenate %849, %850, %851 in 0 : vector<1x16x128xf32>, vector<1x16x128xf32>, vector<1x16x128xf32> -> vector<3x16x128xf32>
    %853 = vector.broadcast %19 : f32 to vector<3x16x128xf32>
    %854 = arith.mulf %853, %813 : vector<3x16x128xf32>
    %855 = vector.broadcast %20 : f32 to vector<3x16x128xf32>
    %856 = arith.mulf %855, %826 : vector<3x16x128xf32>
    %857 = arith.addf %854, %856 : vector<3x16x128xf32>
    %858 = vector.broadcast %21 : f32 to vector<3x16x128xf32>
    %859 = arith.mulf %858, %800 : vector<3x16x128xf32>
    %860 = arith.addf %857, %859 : vector<3x16x128xf32>
    %861 = vector.broadcast %22 : f32 to vector<3x16x128xf32>
    %862 = arith.mulf %861, %839 : vector<3x16x128xf32>
    %863 = arith.addf %860, %862 : vector<3x16x128xf32>
    %864 = vector.broadcast %23 : f32 to vector<3x16x128xf32>
    %865 = arith.mulf %864, %852 : vector<3x16x128xf32>
    %866 = arith.addf %863, %865 : vector<3x16x128xf32>
    %867 = vector.extract_strided_slice %866 {offsets = [0, 0, 0], sizes = [1, 16, 128], strides = [1, 1, 1]} : vector<3x16x128xf32> to vector<1x16x128xf32>
    %868 = vector.shape_cast %867 : vector<1x16x128xf32> to vector<16x128xf32>
    %c2_i32_162 = arith.constant 2 : i32
    %869 = tpu.dynamic_rotate %868 by %c2_i32_162 dim 0 : vector<16x128xf32>, i32 -> vector<16x128xf32>
    %870 = vector.extract_strided_slice %866 {offsets = [1, 0, 0], sizes = [1, 16, 128], strides = [1, 1, 1]} : vector<3x16x128xf32> to vector<1x16x128xf32>
    %871 = vector.shape_cast %870 : vector<1x16x128xf32> to vector<16x128xf32>
    %c2_i32_163 = arith.constant 2 : i32
    %872 = tpu.dynamic_rotate %871 by %c2_i32_163 dim 0 : vector<16x128xf32>, i32 -> vector<16x128xf32>
    %873 = vector.extract_strided_slice %866 {offsets = [2, 0, 0], sizes = [1, 16, 128], strides = [1, 1, 1]} : vector<3x16x128xf32> to vector<1x16x128xf32>
    %874 = vector.shape_cast %873 : vector<1x16x128xf32> to vector<16x128xf32>
    %c2_i32_164 = arith.constant 2 : i32
    %875 = tpu.dynamic_rotate %874 by %c2_i32_164 dim 0 : vector<16x128xf32>, i32 -> vector<16x128xf32>
    %876 = vector.shape_cast %869 : vector<16x128xf32> to vector<1x16x128xf32>
    %877 = vector.shape_cast %872 : vector<16x128xf32> to vector<1x16x128xf32>
    %878 = vector.shape_cast %875 : vector<16x128xf32> to vector<1x16x128xf32>
    %879 = tpu.concatenate %876, %877, %878 in 0 : vector<1x16x128xf32>, vector<1x16x128xf32>, vector<1x16x128xf32> -> vector<3x16x128xf32>
    %880 = vector.broadcast %24 : f32 to vector<3x16x128xf32>
    %881 = arith.mulf %880, %813 : vector<3x16x128xf32>
    %882 = vector.broadcast %25 : f32 to vector<3x16x128xf32>
    %883 = arith.mulf %882, %826 : vector<3x16x128xf32>
    %884 = arith.addf %881, %883 : vector<3x16x128xf32>
    %885 = vector.broadcast %26 : f32 to vector<3x16x128xf32>
    %886 = arith.mulf %885, %800 : vector<3x16x128xf32>
    %887 = arith.addf %884, %886 : vector<3x16x128xf32>
    %888 = vector.broadcast %27 : f32 to vector<3x16x128xf32>
    %889 = arith.mulf %888, %839 : vector<3x16x128xf32>
    %890 = arith.addf %887, %889 : vector<3x16x128xf32>
    %891 = vector.broadcast %28 : f32 to vector<3x16x128xf32>
    %892 = arith.mulf %891, %852 : vector<3x16x128xf32>
    %893 = arith.addf %890, %892 : vector<3x16x128xf32>
    %894 = vector.extract_strided_slice %893 {offsets = [0, 0, 0], sizes = [1, 16, 128], strides = [1, 1, 1]} : vector<3x16x128xf32> to vector<1x16x128xf32>
    %895 = vector.shape_cast %894 : vector<1x16x128xf32> to vector<16x128xf32>
    %c1_i32_165 = arith.constant 1 : i32
    %896 = tpu.dynamic_rotate %895 by %c1_i32_165 dim 0 : vector<16x128xf32>, i32 -> vector<16x128xf32>
    %897 = vector.extract_strided_slice %893 {offsets = [1, 0, 0], sizes = [1, 16, 128], strides = [1, 1, 1]} : vector<3x16x128xf32> to vector<1x16x128xf32>
    %898 = vector.shape_cast %897 : vector<1x16x128xf32> to vector<16x128xf32>
    %c1_i32_166 = arith.constant 1 : i32
    %899 = tpu.dynamic_rotate %898 by %c1_i32_166 dim 0 : vector<16x128xf32>, i32 -> vector<16x128xf32>
    %900 = vector.extract_strided_slice %893 {offsets = [2, 0, 0], sizes = [1, 16, 128], strides = [1, 1, 1]} : vector<3x16x128xf32> to vector<1x16x128xf32>
    %901 = vector.shape_cast %900 : vector<1x16x128xf32> to vector<16x128xf32>
    %c1_i32_167 = arith.constant 1 : i32
    %902 = tpu.dynamic_rotate %901 by %c1_i32_167 dim 0 : vector<16x128xf32>, i32 -> vector<16x128xf32>
    %903 = vector.shape_cast %896 : vector<16x128xf32> to vector<1x16x128xf32>
    %904 = vector.shape_cast %899 : vector<16x128xf32> to vector<1x16x128xf32>
    %905 = vector.shape_cast %902 : vector<16x128xf32> to vector<1x16x128xf32>
    %906 = tpu.concatenate %903, %904, %905 in 0 : vector<1x16x128xf32>, vector<1x16x128xf32>, vector<1x16x128xf32> -> vector<3x16x128xf32>
    %907 = arith.addf %879, %906 : vector<3x16x128xf32>
    %908 = vector.broadcast %29 : f32 to vector<3x16x128xf32>
    %909 = arith.mulf %908, %813 : vector<3x16x128xf32>
    %910 = vector.broadcast %30 : f32 to vector<3x16x128xf32>
    %911 = arith.mulf %910, %826 : vector<3x16x128xf32>
    %912 = arith.addf %909, %911 : vector<3x16x128xf32>
    %913 = vector.broadcast %31 : f32 to vector<3x16x128xf32>
    %914 = arith.mulf %913, %800 : vector<3x16x128xf32>
    %915 = arith.addf %912, %914 : vector<3x16x128xf32>
    %916 = vector.broadcast %32 : f32 to vector<3x16x128xf32>
    %917 = arith.mulf %916, %839 : vector<3x16x128xf32>
    %918 = arith.addf %915, %917 : vector<3x16x128xf32>
    %919 = vector.broadcast %33 : f32 to vector<3x16x128xf32>
    %920 = arith.mulf %919, %852 : vector<3x16x128xf32>
    %921 = arith.addf %918, %920 : vector<3x16x128xf32>
    %922 = arith.addf %907, %921 : vector<3x16x128xf32>
    %923 = vector.broadcast %34 : f32 to vector<3x16x128xf32>
    %924 = arith.mulf %923, %813 : vector<3x16x128xf32>
    %925 = vector.broadcast %35 : f32 to vector<3x16x128xf32>
    %926 = arith.mulf %925, %826 : vector<3x16x128xf32>
    %927 = arith.addf %924, %926 : vector<3x16x128xf32>
    %928 = vector.broadcast %36 : f32 to vector<3x16x128xf32>
    %929 = arith.mulf %928, %800 : vector<3x16x128xf32>
    %930 = arith.addf %927, %929 : vector<3x16x128xf32>
    %931 = vector.broadcast %37 : f32 to vector<3x16x128xf32>
    %932 = arith.mulf %931, %839 : vector<3x16x128xf32>
    %933 = arith.addf %930, %932 : vector<3x16x128xf32>
    %934 = vector.broadcast %38 : f32 to vector<3x16x128xf32>
    %935 = arith.mulf %934, %852 : vector<3x16x128xf32>
    %936 = arith.addf %933, %935 : vector<3x16x128xf32>
    %937 = vector.extract_strided_slice %936 {offsets = [0, 0, 0], sizes = [1, 16, 128], strides = [1, 1, 1]} : vector<3x16x128xf32> to vector<1x16x128xf32>
    %938 = vector.shape_cast %937 : vector<1x16x128xf32> to vector<16x128xf32>
    %c15_i32_168 = arith.constant 15 : i32
    %939 = tpu.dynamic_rotate %938 by %c15_i32_168 dim 0 : vector<16x128xf32>, i32 -> vector<16x128xf32>
    %940 = vector.extract_strided_slice %936 {offsets = [1, 0, 0], sizes = [1, 16, 128], strides = [1, 1, 1]} : vector<3x16x128xf32> to vector<1x16x128xf32>
    %941 = vector.shape_cast %940 : vector<1x16x128xf32> to vector<16x128xf32>
    %c15_i32_169 = arith.constant 15 : i32
    %942 = tpu.dynamic_rotate %941 by %c15_i32_169 dim 0 : vector<16x128xf32>, i32 -> vector<16x128xf32>
    %943 = vector.extract_strided_slice %936 {offsets = [2, 0, 0], sizes = [1, 16, 128], strides = [1, 1, 1]} : vector<3x16x128xf32> to vector<1x16x128xf32>
    %944 = vector.shape_cast %943 : vector<1x16x128xf32> to vector<16x128xf32>
    %c15_i32_170 = arith.constant 15 : i32
    %945 = tpu.dynamic_rotate %944 by %c15_i32_170 dim 0 : vector<16x128xf32>, i32 -> vector<16x128xf32>
    %946 = vector.shape_cast %939 : vector<16x128xf32> to vector<1x16x128xf32>
    %947 = vector.shape_cast %942 : vector<16x128xf32> to vector<1x16x128xf32>
    %948 = vector.shape_cast %945 : vector<16x128xf32> to vector<1x16x128xf32>
    %949 = tpu.concatenate %946, %947, %948 in 0 : vector<1x16x128xf32>, vector<1x16x128xf32>, vector<1x16x128xf32> -> vector<3x16x128xf32>
    %950 = arith.addf %922, %949 : vector<3x16x128xf32>
    %951 = vector.broadcast %39 : f32 to vector<3x16x128xf32>
    %952 = arith.mulf %951, %813 : vector<3x16x128xf32>
    %953 = vector.broadcast %40 : f32 to vector<3x16x128xf32>
    %954 = arith.mulf %953, %826 : vector<3x16x128xf32>
    %955 = arith.addf %952, %954 : vector<3x16x128xf32>
    %956 = vector.broadcast %41 : f32 to vector<3x16x128xf32>
    %957 = arith.mulf %956, %800 : vector<3x16x128xf32>
    %958 = arith.addf %955, %957 : vector<3x16x128xf32>
    %959 = vector.broadcast %42 : f32 to vector<3x16x128xf32>
    %960 = arith.mulf %959, %839 : vector<3x16x128xf32>
    %961 = arith.addf %958, %960 : vector<3x16x128xf32>
    %962 = vector.broadcast %43 : f32 to vector<3x16x128xf32>
    %963 = arith.mulf %962, %852 : vector<3x16x128xf32>
    %964 = arith.addf %961, %963 : vector<3x16x128xf32>
    %965 = vector.extract_strided_slice %964 {offsets = [0, 0, 0], sizes = [1, 16, 128], strides = [1, 1, 1]} : vector<3x16x128xf32> to vector<1x16x128xf32>
    %966 = vector.shape_cast %965 : vector<1x16x128xf32> to vector<16x128xf32>
    %c14_i32_171 = arith.constant 14 : i32
    %967 = tpu.dynamic_rotate %966 by %c14_i32_171 dim 0 : vector<16x128xf32>, i32 -> vector<16x128xf32>
    %968 = vector.extract_strided_slice %964 {offsets = [1, 0, 0], sizes = [1, 16, 128], strides = [1, 1, 1]} : vector<3x16x128xf32> to vector<1x16x128xf32>
    %969 = vector.shape_cast %968 : vector<1x16x128xf32> to vector<16x128xf32>
    %c14_i32_172 = arith.constant 14 : i32
    %970 = tpu.dynamic_rotate %969 by %c14_i32_172 dim 0 : vector<16x128xf32>, i32 -> vector<16x128xf32>
    %971 = vector.extract_strided_slice %964 {offsets = [2, 0, 0], sizes = [1, 16, 128], strides = [1, 1, 1]} : vector<3x16x128xf32> to vector<1x16x128xf32>
    %972 = vector.shape_cast %971 : vector<1x16x128xf32> to vector<16x128xf32>
    %c14_i32_173 = arith.constant 14 : i32
    %973 = tpu.dynamic_rotate %972 by %c14_i32_173 dim 0 : vector<16x128xf32>, i32 -> vector<16x128xf32>
    %974 = vector.shape_cast %967 : vector<16x128xf32> to vector<1x16x128xf32>
    %975 = vector.shape_cast %970 : vector<16x128xf32> to vector<1x16x128xf32>
    %976 = vector.shape_cast %973 : vector<16x128xf32> to vector<1x16x128xf32>
    %977 = tpu.concatenate %974, %975, %976 in 0 : vector<1x16x128xf32>, vector<1x16x128xf32>, vector<1x16x128xf32> -> vector<3x16x128xf32>
    %978 = arith.addf %950, %977 : vector<3x16x128xf32>
    %979 = arith.addf %659, %646 : vector<3x16x128xf32>
    %980 = vector.extract_strided_slice %615 {offsets = [0, 0, 0], sizes = [1, 16, 128], strides = [1, 1, 1]} : vector<3x16x128xf32> to vector<1x16x128xf32>
    %981 = vector.shape_cast %980 : vector<1x16x128xf32> to vector<16x128xf32>
    %c15_i32_174 = arith.constant 15 : i32
    %982 = tpu.dynamic_rotate %981 by %c15_i32_174 dim 0 : vector<16x128xf32>, i32 -> vector<16x128xf32>
    %983 = vector.extract_strided_slice %615 {offsets = [1, 0, 0], sizes = [1, 16, 128], strides = [1, 1, 1]} : vector<3x16x128xf32> to vector<1x16x128xf32>
    %984 = vector.shape_cast %983 : vector<1x16x128xf32> to vector<16x128xf32>
    %c15_i32_175 = arith.constant 15 : i32
    %985 = tpu.dynamic_rotate %984 by %c15_i32_175 dim 0 : vector<16x128xf32>, i32 -> vector<16x128xf32>
    %986 = vector.extract_strided_slice %615 {offsets = [2, 0, 0], sizes = [1, 16, 128], strides = [1, 1, 1]} : vector<3x16x128xf32> to vector<1x16x128xf32>
    %987 = vector.shape_cast %986 : vector<1x16x128xf32> to vector<16x128xf32>
    %c15_i32_176 = arith.constant 15 : i32
    %988 = tpu.dynamic_rotate %987 by %c15_i32_176 dim 0 : vector<16x128xf32>, i32 -> vector<16x128xf32>
    %989 = vector.shape_cast %982 : vector<16x128xf32> to vector<1x16x128xf32>
    %990 = vector.shape_cast %985 : vector<16x128xf32> to vector<1x16x128xf32>
    %991 = vector.shape_cast %988 : vector<16x128xf32> to vector<1x16x128xf32>
    %992 = tpu.concatenate %989, %990, %991 in 0 : vector<1x16x128xf32>, vector<1x16x128xf32>, vector<1x16x128xf32> -> vector<3x16x128xf32>
    %993 = arith.addf %979, %992 : vector<3x16x128xf32>
    %994 = vector.extract_strided_slice %615 {offsets = [0, 0, 0], sizes = [1, 16, 128], strides = [1, 1, 1]} : vector<3x16x128xf32> to vector<1x16x128xf32>
    %995 = vector.shape_cast %994 : vector<1x16x128xf32> to vector<16x128xf32>
    %c1_i32_177 = arith.constant 1 : i32
    %996 = tpu.dynamic_rotate %995 by %c1_i32_177 dim 0 : vector<16x128xf32>, i32 -> vector<16x128xf32>
    %997 = vector.extract_strided_slice %615 {offsets = [1, 0, 0], sizes = [1, 16, 128], strides = [1, 1, 1]} : vector<3x16x128xf32> to vector<1x16x128xf32>
    %998 = vector.shape_cast %997 : vector<1x16x128xf32> to vector<16x128xf32>
    %c1_i32_178 = arith.constant 1 : i32
    %999 = tpu.dynamic_rotate %998 by %c1_i32_178 dim 0 : vector<16x128xf32>, i32 -> vector<16x128xf32>
    %1000 = vector.extract_strided_slice %615 {offsets = [2, 0, 0], sizes = [1, 16, 128], strides = [1, 1, 1]} : vector<3x16x128xf32> to vector<1x16x128xf32>
    %1001 = vector.shape_cast %1000 : vector<1x16x128xf32> to vector<16x128xf32>
    %c1_i32_179 = arith.constant 1 : i32
    %1002 = tpu.dynamic_rotate %1001 by %c1_i32_179 dim 0 : vector<16x128xf32>, i32 -> vector<16x128xf32>
    %1003 = vector.shape_cast %996 : vector<16x128xf32> to vector<1x16x128xf32>
    %1004 = vector.shape_cast %999 : vector<16x128xf32> to vector<1x16x128xf32>
    %1005 = vector.shape_cast %1002 : vector<16x128xf32> to vector<1x16x128xf32>
    %1006 = tpu.concatenate %1003, %1004, %1005 in 0 : vector<1x16x128xf32>, vector<1x16x128xf32>, vector<1x16x128xf32> -> vector<3x16x128xf32>
    %1007 = arith.addf %993, %1006 : vector<3x16x128xf32>
    %1008 = arith.mulf %18, %615 : vector<3x16x128xf32>
    %1009 = arith.addf %978, %1008 : vector<3x16x128xf32>
    %1010 = arith.mulf %16, %1007 : vector<3x16x128xf32>
    %1011 = arith.subf %1009, %1010 : vector<3x16x128xf32>
    %1012 = arith.mulf %615, %1011 : vector<3x16x128xf32>
    %cst_180 = arith.constant dense<0.000000e+00> : vector<3x16xf32>
    %1013 = vector.multi_reduction <add>, %1012, %cst_180 [2] : vector<3x16x128xf32> to vector<3x16xf32>
    %1014 = vector.shape_cast %1013 : vector<3x16xf32> to vector<3x16x1xf32>
    %cst_181 = arith.constant dense<0.000000e+00> : vector<3x1xf32>
    %1015 = vector.multi_reduction <add>, %1014, %cst_181 [1] : vector<3x16x1xf32> to vector<3x1xf32>
    %1016 = vector.shape_cast %1015 : vector<3x1xf32> to vector<3x1x1xf32>
    %1017 = arith.divf %620, %1016 : vector<3x1x1xf32>
    %1018 = vector.broadcast %1017 : vector<3x1x1xf32> to vector<3x16x128xf32>
    %1019 = arith.mulf %1018, %615 : vector<3x16x128xf32>
    %1020 = arith.addf %0, %1019 : vector<3x16x128xf32>
    %1021 = vector.broadcast %1017 : vector<3x1x1xf32> to vector<3x16x128xf32>
    %1022 = arith.mulf %1021, %1011 : vector<3x16x128xf32>
    %1023 = arith.subf %615, %1022 : vector<3x16x128xf32>
    %c0_i32_182 = arith.constant 0 : i32
    %c19_i32 = arith.constant 19 : i32
    %1024 = arith.addi %c0_i32_182, %c19_i32 : i32
    %c1_i32_183 = arith.constant 1 : i32
    %1025:4 = scf.for %arg6 = %c0_i32_182 to %1024 step %c1_i32_183 iter_args(%arg7 = %1020, %arg8 = %1023, %arg9 = %615, %arg10 = %620) -> (vector<3x16x128xf32>, vector<3x16x128xf32>, vector<3x16x128xf32>, vector<3x1x1xf32>)  : i32 {
      %1027 = arith.mulf %arg8, %arg8 : vector<3x16x128xf32>
      %cst_187 = arith.constant dense<0.000000e+00> : vector<3x16xf32>
      %1028 = vector.multi_reduction <add>, %1027, %cst_187 [2] : vector<3x16x128xf32> to vector<3x16xf32>
      %1029 = vector.shape_cast %1028 : vector<3x16xf32> to vector<3x16x1xf32>
      %cst_188 = arith.constant dense<0.000000e+00> : vector<3x1xf32>
      %1030 = vector.multi_reduction <add>, %1029, %cst_188 [1] : vector<3x16x1xf32> to vector<3x1xf32>
      %1031 = vector.shape_cast %1030 : vector<3x1xf32> to vector<3x1x1xf32>
      %1032 = arith.divf %1031, %arg10 : vector<3x1x1xf32>
      %1033 = vector.broadcast %1032 : vector<3x1x1xf32> to vector<3x16x128xf32>
      %1034 = arith.mulf %1033, %arg9 : vector<3x16x128xf32>
      %1035 = arith.addf %arg8, %1034 : vector<3x16x128xf32>
      %1036 = vector.extract_strided_slice %1035 {offsets = [0, 0, 0], sizes = [1, 16, 128], strides = [1, 1, 1]} : vector<3x16x128xf32> to vector<1x16x128xf32>
      %1037 = vector.shape_cast %1036 : vector<1x16x128xf32> to vector<16x128xf32>
      %c2_i32_189 = arith.constant 2 : i32
      %1038 = tpu.dynamic_rotate %1037 by %c2_i32_189 dim 1 : vector<16x128xf32>, i32 -> vector<16x128xf32>
      %1039 = vector.extract_strided_slice %1035 {offsets = [1, 0, 0], sizes = [1, 16, 128], strides = [1, 1, 1]} : vector<3x16x128xf32> to vector<1x16x128xf32>
      %1040 = vector.shape_cast %1039 : vector<1x16x128xf32> to vector<16x128xf32>
      %c2_i32_190 = arith.constant 2 : i32
      %1041 = tpu.dynamic_rotate %1040 by %c2_i32_190 dim 1 : vector<16x128xf32>, i32 -> vector<16x128xf32>
      %1042 = vector.extract_strided_slice %1035 {offsets = [2, 0, 0], sizes = [1, 16, 128], strides = [1, 1, 1]} : vector<3x16x128xf32> to vector<1x16x128xf32>
      %1043 = vector.shape_cast %1042 : vector<1x16x128xf32> to vector<16x128xf32>
      %c2_i32_191 = arith.constant 2 : i32
      %1044 = tpu.dynamic_rotate %1043 by %c2_i32_191 dim 1 : vector<16x128xf32>, i32 -> vector<16x128xf32>
      %1045 = vector.shape_cast %1038 : vector<16x128xf32> to vector<1x16x128xf32>
      %1046 = vector.shape_cast %1041 : vector<16x128xf32> to vector<1x16x128xf32>
      %1047 = vector.shape_cast %1044 : vector<16x128xf32> to vector<1x16x128xf32>
      %1048 = tpu.concatenate %1045, %1046, %1047 in 0 : vector<1x16x128xf32>, vector<1x16x128xf32>, vector<1x16x128xf32> -> vector<3x16x128xf32>
      %1049 = vector.extract_strided_slice %1035 {offsets = [0, 0, 0], sizes = [1, 16, 128], strides = [1, 1, 1]} : vector<3x16x128xf32> to vector<1x16x128xf32>
      %1050 = vector.shape_cast %1049 : vector<1x16x128xf32> to vector<16x128xf32>
      %c1_i32_192 = arith.constant 1 : i32
      %1051 = tpu.dynamic_rotate %1050 by %c1_i32_192 dim 1 : vector<16x128xf32>, i32 -> vector<16x128xf32>
      %1052 = vector.extract_strided_slice %1035 {offsets = [1, 0, 0], sizes = [1, 16, 128], strides = [1, 1, 1]} : vector<3x16x128xf32> to vector<1x16x128xf32>
      %1053 = vector.shape_cast %1052 : vector<1x16x128xf32> to vector<16x128xf32>
      %c1_i32_193 = arith.constant 1 : i32
      %1054 = tpu.dynamic_rotate %1053 by %c1_i32_193 dim 1 : vector<16x128xf32>, i32 -> vector<16x128xf32>
      %1055 = vector.extract_strided_slice %1035 {offsets = [2, 0, 0], sizes = [1, 16, 128], strides = [1, 1, 1]} : vector<3x16x128xf32> to vector<1x16x128xf32>
      %1056 = vector.shape_cast %1055 : vector<1x16x128xf32> to vector<16x128xf32>
      %c1_i32_194 = arith.constant 1 : i32
      %1057 = tpu.dynamic_rotate %1056 by %c1_i32_194 dim 1 : vector<16x128xf32>, i32 -> vector<16x128xf32>
      %1058 = vector.shape_cast %1051 : vector<16x128xf32> to vector<1x16x128xf32>
      %1059 = vector.shape_cast %1054 : vector<16x128xf32> to vector<1x16x128xf32>
      %1060 = vector.shape_cast %1057 : vector<16x128xf32> to vector<1x16x128xf32>
      %1061 = tpu.concatenate %1058, %1059, %1060 in 0 : vector<1x16x128xf32>, vector<1x16x128xf32>, vector<1x16x128xf32> -> vector<3x16x128xf32>
      %1062 = vector.extract_strided_slice %1035 {offsets = [0, 0, 0], sizes = [1, 16, 128], strides = [1, 1, 1]} : vector<3x16x128xf32> to vector<1x16x128xf32>
      %1063 = vector.shape_cast %1062 : vector<1x16x128xf32> to vector<16x128xf32>
      %c127_i32_195 = arith.constant 127 : i32
      %1064 = tpu.dynamic_rotate %1063 by %c127_i32_195 dim 1 : vector<16x128xf32>, i32 -> vector<16x128xf32>
      %1065 = vector.extract_strided_slice %1035 {offsets = [1, 0, 0], sizes = [1, 16, 128], strides = [1, 1, 1]} : vector<3x16x128xf32> to vector<1x16x128xf32>
      %1066 = vector.shape_cast %1065 : vector<1x16x128xf32> to vector<16x128xf32>
      %c127_i32_196 = arith.constant 127 : i32
      %1067 = tpu.dynamic_rotate %1066 by %c127_i32_196 dim 1 : vector<16x128xf32>, i32 -> vector<16x128xf32>
      %1068 = vector.extract_strided_slice %1035 {offsets = [2, 0, 0], sizes = [1, 16, 128], strides = [1, 1, 1]} : vector<3x16x128xf32> to vector<1x16x128xf32>
      %1069 = vector.shape_cast %1068 : vector<1x16x128xf32> to vector<16x128xf32>
      %c127_i32_197 = arith.constant 127 : i32
      %1070 = tpu.dynamic_rotate %1069 by %c127_i32_197 dim 1 : vector<16x128xf32>, i32 -> vector<16x128xf32>
      %1071 = vector.shape_cast %1064 : vector<16x128xf32> to vector<1x16x128xf32>
      %1072 = vector.shape_cast %1067 : vector<16x128xf32> to vector<1x16x128xf32>
      %1073 = vector.shape_cast %1070 : vector<16x128xf32> to vector<1x16x128xf32>
      %1074 = tpu.concatenate %1071, %1072, %1073 in 0 : vector<1x16x128xf32>, vector<1x16x128xf32>, vector<1x16x128xf32> -> vector<3x16x128xf32>
      %1075 = vector.extract_strided_slice %1035 {offsets = [0, 0, 0], sizes = [1, 16, 128], strides = [1, 1, 1]} : vector<3x16x128xf32> to vector<1x16x128xf32>
      %1076 = vector.shape_cast %1075 : vector<1x16x128xf32> to vector<16x128xf32>
      %c126_i32_198 = arith.constant 126 : i32
      %1077 = tpu.dynamic_rotate %1076 by %c126_i32_198 dim 1 : vector<16x128xf32>, i32 -> vector<16x128xf32>
      %1078 = vector.extract_strided_slice %1035 {offsets = [1, 0, 0], sizes = [1, 16, 128], strides = [1, 1, 1]} : vector<3x16x128xf32> to vector<1x16x128xf32>
      %1079 = vector.shape_cast %1078 : vector<1x16x128xf32> to vector<16x128xf32>
      %c126_i32_199 = arith.constant 126 : i32
      %1080 = tpu.dynamic_rotate %1079 by %c126_i32_199 dim 1 : vector<16x128xf32>, i32 -> vector<16x128xf32>
      %1081 = vector.extract_strided_slice %1035 {offsets = [2, 0, 0], sizes = [1, 16, 128], strides = [1, 1, 1]} : vector<3x16x128xf32> to vector<1x16x128xf32>
      %1082 = vector.shape_cast %1081 : vector<1x16x128xf32> to vector<16x128xf32>
      %c126_i32_200 = arith.constant 126 : i32
      %1083 = tpu.dynamic_rotate %1082 by %c126_i32_200 dim 1 : vector<16x128xf32>, i32 -> vector<16x128xf32>
      %1084 = vector.shape_cast %1077 : vector<16x128xf32> to vector<1x16x128xf32>
      %1085 = vector.shape_cast %1080 : vector<16x128xf32> to vector<1x16x128xf32>
      %1086 = vector.shape_cast %1083 : vector<16x128xf32> to vector<1x16x128xf32>
      %1087 = tpu.concatenate %1084, %1085, %1086 in 0 : vector<1x16x128xf32>, vector<1x16x128xf32>, vector<1x16x128xf32> -> vector<3x16x128xf32>
      %1088 = vector.broadcast %19 : f32 to vector<3x16x128xf32>
      %1089 = arith.mulf %1088, %1087 : vector<3x16x128xf32>
      %1090 = vector.broadcast %20 : f32 to vector<3x16x128xf32>
      %1091 = arith.mulf %1090, %1074 : vector<3x16x128xf32>
      %1092 = arith.addf %1089, %1091 : vector<3x16x128xf32>
      %1093 = vector.broadcast %21 : f32 to vector<3x16x128xf32>
      %1094 = arith.mulf %1093, %1035 : vector<3x16x128xf32>
      %1095 = arith.addf %1092, %1094 : vector<3x16x128xf32>
      %1096 = vector.broadcast %22 : f32 to vector<3x16x128xf32>
      %1097 = arith.mulf %1096, %1061 : vector<3x16x128xf32>
      %1098 = arith.addf %1095, %1097 : vector<3x16x128xf32>
      %1099 = vector.broadcast %23 : f32 to vector<3x16x128xf32>
      %1100 = arith.mulf %1099, %1048 : vector<3x16x128xf32>
      %1101 = arith.addf %1098, %1100 : vector<3x16x128xf32>
      %1102 = vector.extract_strided_slice %1101 {offsets = [0, 0, 0], sizes = [1, 16, 128], strides = [1, 1, 1]} : vector<3x16x128xf32> to vector<1x16x128xf32>
      %1103 = vector.shape_cast %1102 : vector<1x16x128xf32> to vector<16x128xf32>
      %c14_i32_201 = arith.constant 14 : i32
      %1104 = tpu.dynamic_rotate %1103 by %c14_i32_201 dim 0 : vector<16x128xf32>, i32 -> vector<16x128xf32>
      %1105 = vector.extract_strided_slice %1101 {offsets = [1, 0, 0], sizes = [1, 16, 128], strides = [1, 1, 1]} : vector<3x16x128xf32> to vector<1x16x128xf32>
      %1106 = vector.shape_cast %1105 : vector<1x16x128xf32> to vector<16x128xf32>
      %c14_i32_202 = arith.constant 14 : i32
      %1107 = tpu.dynamic_rotate %1106 by %c14_i32_202 dim 0 : vector<16x128xf32>, i32 -> vector<16x128xf32>
      %1108 = vector.extract_strided_slice %1101 {offsets = [2, 0, 0], sizes = [1, 16, 128], strides = [1, 1, 1]} : vector<3x16x128xf32> to vector<1x16x128xf32>
      %1109 = vector.shape_cast %1108 : vector<1x16x128xf32> to vector<16x128xf32>
      %c14_i32_203 = arith.constant 14 : i32
      %1110 = tpu.dynamic_rotate %1109 by %c14_i32_203 dim 0 : vector<16x128xf32>, i32 -> vector<16x128xf32>
      %1111 = vector.shape_cast %1104 : vector<16x128xf32> to vector<1x16x128xf32>
      %1112 = vector.shape_cast %1107 : vector<16x128xf32> to vector<1x16x128xf32>
      %1113 = vector.shape_cast %1110 : vector<16x128xf32> to vector<1x16x128xf32>
      %1114 = tpu.concatenate %1111, %1112, %1113 in 0 : vector<1x16x128xf32>, vector<1x16x128xf32>, vector<1x16x128xf32> -> vector<3x16x128xf32>
      %1115 = vector.broadcast %24 : f32 to vector<3x16x128xf32>
      %1116 = arith.mulf %1115, %1087 : vector<3x16x128xf32>
      %1117 = vector.broadcast %25 : f32 to vector<3x16x128xf32>
      %1118 = arith.mulf %1117, %1074 : vector<3x16x128xf32>
      %1119 = arith.addf %1116, %1118 : vector<3x16x128xf32>
      %1120 = vector.broadcast %26 : f32 to vector<3x16x128xf32>
      %1121 = arith.mulf %1120, %1035 : vector<3x16x128xf32>
      %1122 = arith.addf %1119, %1121 : vector<3x16x128xf32>
      %1123 = vector.broadcast %27 : f32 to vector<3x16x128xf32>
      %1124 = arith.mulf %1123, %1061 : vector<3x16x128xf32>
      %1125 = arith.addf %1122, %1124 : vector<3x16x128xf32>
      %1126 = vector.broadcast %28 : f32 to vector<3x16x128xf32>
      %1127 = arith.mulf %1126, %1048 : vector<3x16x128xf32>
      %1128 = arith.addf %1125, %1127 : vector<3x16x128xf32>
      %1129 = vector.extract_strided_slice %1128 {offsets = [0, 0, 0], sizes = [1, 16, 128], strides = [1, 1, 1]} : vector<3x16x128xf32> to vector<1x16x128xf32>
      %1130 = vector.shape_cast %1129 : vector<1x16x128xf32> to vector<16x128xf32>
      %c15_i32_204 = arith.constant 15 : i32
      %1131 = tpu.dynamic_rotate %1130 by %c15_i32_204 dim 0 : vector<16x128xf32>, i32 -> vector<16x128xf32>
      %1132 = vector.extract_strided_slice %1128 {offsets = [1, 0, 0], sizes = [1, 16, 128], strides = [1, 1, 1]} : vector<3x16x128xf32> to vector<1x16x128xf32>
      %1133 = vector.shape_cast %1132 : vector<1x16x128xf32> to vector<16x128xf32>
      %c15_i32_205 = arith.constant 15 : i32
      %1134 = tpu.dynamic_rotate %1133 by %c15_i32_205 dim 0 : vector<16x128xf32>, i32 -> vector<16x128xf32>
      %1135 = vector.extract_strided_slice %1128 {offsets = [2, 0, 0], sizes = [1, 16, 128], strides = [1, 1, 1]} : vector<3x16x128xf32> to vector<1x16x128xf32>
      %1136 = vector.shape_cast %1135 : vector<1x16x128xf32> to vector<16x128xf32>
      %c15_i32_206 = arith.constant 15 : i32
      %1137 = tpu.dynamic_rotate %1136 by %c15_i32_206 dim 0 : vector<16x128xf32>, i32 -> vector<16x128xf32>
      %1138 = vector.shape_cast %1131 : vector<16x128xf32> to vector<1x16x128xf32>
      %1139 = vector.shape_cast %1134 : vector<16x128xf32> to vector<1x16x128xf32>
      %1140 = vector.shape_cast %1137 : vector<16x128xf32> to vector<1x16x128xf32>
      %1141 = tpu.concatenate %1138, %1139, %1140 in 0 : vector<1x16x128xf32>, vector<1x16x128xf32>, vector<1x16x128xf32> -> vector<3x16x128xf32>
      %1142 = arith.addf %1114, %1141 : vector<3x16x128xf32>
      %1143 = vector.broadcast %29 : f32 to vector<3x16x128xf32>
      %1144 = arith.mulf %1143, %1087 : vector<3x16x128xf32>
      %1145 = vector.broadcast %30 : f32 to vector<3x16x128xf32>
      %1146 = arith.mulf %1145, %1074 : vector<3x16x128xf32>
      %1147 = arith.addf %1144, %1146 : vector<3x16x128xf32>
      %1148 = vector.broadcast %31 : f32 to vector<3x16x128xf32>
      %1149 = arith.mulf %1148, %1035 : vector<3x16x128xf32>
      %1150 = arith.addf %1147, %1149 : vector<3x16x128xf32>
      %1151 = vector.broadcast %32 : f32 to vector<3x16x128xf32>
      %1152 = arith.mulf %1151, %1061 : vector<3x16x128xf32>
      %1153 = arith.addf %1150, %1152 : vector<3x16x128xf32>
      %1154 = vector.broadcast %33 : f32 to vector<3x16x128xf32>
      %1155 = arith.mulf %1154, %1048 : vector<3x16x128xf32>
      %1156 = arith.addf %1153, %1155 : vector<3x16x128xf32>
      %1157 = arith.addf %1142, %1156 : vector<3x16x128xf32>
      %1158 = vector.broadcast %34 : f32 to vector<3x16x128xf32>
      %1159 = arith.mulf %1158, %1087 : vector<3x16x128xf32>
      %1160 = vector.broadcast %35 : f32 to vector<3x16x128xf32>
      %1161 = arith.mulf %1160, %1074 : vector<3x16x128xf32>
      %1162 = arith.addf %1159, %1161 : vector<3x16x128xf32>
      %1163 = vector.broadcast %36 : f32 to vector<3x16x128xf32>
      %1164 = arith.mulf %1163, %1035 : vector<3x16x128xf32>
      %1165 = arith.addf %1162, %1164 : vector<3x16x128xf32>
      %1166 = vector.broadcast %37 : f32 to vector<3x16x128xf32>
      %1167 = arith.mulf %1166, %1061 : vector<3x16x128xf32>
      %1168 = arith.addf %1165, %1167 : vector<3x16x128xf32>
      %1169 = vector.broadcast %38 : f32 to vector<3x16x128xf32>
      %1170 = arith.mulf %1169, %1048 : vector<3x16x128xf32>
      %1171 = arith.addf %1168, %1170 : vector<3x16x128xf32>
      %1172 = vector.extract_strided_slice %1171 {offsets = [0, 0, 0], sizes = [1, 16, 128], strides = [1, 1, 1]} : vector<3x16x128xf32> to vector<1x16x128xf32>
      %1173 = vector.shape_cast %1172 : vector<1x16x128xf32> to vector<16x128xf32>
      %c1_i32_207 = arith.constant 1 : i32
      %1174 = tpu.dynamic_rotate %1173 by %c1_i32_207 dim 0 : vector<16x128xf32>, i32 -> vector<16x128xf32>
      %1175 = vector.extract_strided_slice %1171 {offsets = [1, 0, 0], sizes = [1, 16, 128], strides = [1, 1, 1]} : vector<3x16x128xf32> to vector<1x16x128xf32>
      %1176 = vector.shape_cast %1175 : vector<1x16x128xf32> to vector<16x128xf32>
      %c1_i32_208 = arith.constant 1 : i32
      %1177 = tpu.dynamic_rotate %1176 by %c1_i32_208 dim 0 : vector<16x128xf32>, i32 -> vector<16x128xf32>
      %1178 = vector.extract_strided_slice %1171 {offsets = [2, 0, 0], sizes = [1, 16, 128], strides = [1, 1, 1]} : vector<3x16x128xf32> to vector<1x16x128xf32>
      %1179 = vector.shape_cast %1178 : vector<1x16x128xf32> to vector<16x128xf32>
      %c1_i32_209 = arith.constant 1 : i32
      %1180 = tpu.dynamic_rotate %1179 by %c1_i32_209 dim 0 : vector<16x128xf32>, i32 -> vector<16x128xf32>
      %1181 = vector.shape_cast %1174 : vector<16x128xf32> to vector<1x16x128xf32>
      %1182 = vector.shape_cast %1177 : vector<16x128xf32> to vector<1x16x128xf32>
      %1183 = vector.shape_cast %1180 : vector<16x128xf32> to vector<1x16x128xf32>
      %1184 = tpu.concatenate %1181, %1182, %1183 in 0 : vector<1x16x128xf32>, vector<1x16x128xf32>, vector<1x16x128xf32> -> vector<3x16x128xf32>
      %1185 = arith.addf %1157, %1184 : vector<3x16x128xf32>
      %1186 = vector.broadcast %39 : f32 to vector<3x16x128xf32>
      %1187 = arith.mulf %1186, %1087 : vector<3x16x128xf32>
      %1188 = vector.broadcast %40 : f32 to vector<3x16x128xf32>
      %1189 = arith.mulf %1188, %1074 : vector<3x16x128xf32>
      %1190 = arith.addf %1187, %1189 : vector<3x16x128xf32>
      %1191 = vector.broadcast %41 : f32 to vector<3x16x128xf32>
      %1192 = arith.mulf %1191, %1035 : vector<3x16x128xf32>
      %1193 = arith.addf %1190, %1192 : vector<3x16x128xf32>
      %1194 = vector.broadcast %42 : f32 to vector<3x16x128xf32>
      %1195 = arith.mulf %1194, %1061 : vector<3x16x128xf32>
      %1196 = arith.addf %1193, %1195 : vector<3x16x128xf32>
      %1197 = vector.broadcast %43 : f32 to vector<3x16x128xf32>
      %1198 = arith.mulf %1197, %1048 : vector<3x16x128xf32>
      %1199 = arith.addf %1196, %1198 : vector<3x16x128xf32>
      %1200 = vector.extract_strided_slice %1199 {offsets = [0, 0, 0], sizes = [1, 16, 128], strides = [1, 1, 1]} : vector<3x16x128xf32> to vector<1x16x128xf32>
      %1201 = vector.shape_cast %1200 : vector<1x16x128xf32> to vector<16x128xf32>
      %c2_i32_210 = arith.constant 2 : i32
      %1202 = tpu.dynamic_rotate %1201 by %c2_i32_210 dim 0 : vector<16x128xf32>, i32 -> vector<16x128xf32>
      %1203 = vector.extract_strided_slice %1199 {offsets = [1, 0, 0], sizes = [1, 16, 128], strides = [1, 1, 1]} : vector<3x16x128xf32> to vector<1x16x128xf32>
      %1204 = vector.shape_cast %1203 : vector<1x16x128xf32> to vector<16x128xf32>
      %c2_i32_211 = arith.constant 2 : i32
      %1205 = tpu.dynamic_rotate %1204 by %c2_i32_211 dim 0 : vector<16x128xf32>, i32 -> vector<16x128xf32>
      %1206 = vector.extract_strided_slice %1199 {offsets = [2, 0, 0], sizes = [1, 16, 128], strides = [1, 1, 1]} : vector<3x16x128xf32> to vector<1x16x128xf32>
      %1207 = vector.shape_cast %1206 : vector<1x16x128xf32> to vector<16x128xf32>
      %c2_i32_212 = arith.constant 2 : i32
      %1208 = tpu.dynamic_rotate %1207 by %c2_i32_212 dim 0 : vector<16x128xf32>, i32 -> vector<16x128xf32>
      %1209 = vector.shape_cast %1202 : vector<16x128xf32> to vector<1x16x128xf32>
      %1210 = vector.shape_cast %1205 : vector<16x128xf32> to vector<1x16x128xf32>
      %1211 = vector.shape_cast %1208 : vector<16x128xf32> to vector<1x16x128xf32>
      %1212 = tpu.concatenate %1209, %1210, %1211 in 0 : vector<1x16x128xf32>, vector<1x16x128xf32>, vector<1x16x128xf32> -> vector<3x16x128xf32>
      %1213 = arith.addf %1185, %1212 : vector<3x16x128xf32>
      %1214 = vector.broadcast %2 : vector<1x16x128xf32> to vector<3x16x128xf32>
      %1215 = arith.mulf %1214, %1213 : vector<3x16x128xf32>
      %1216 = vector.extract_strided_slice %1215 {offsets = [0, 0, 0], sizes = [1, 16, 128], strides = [1, 1, 1]} : vector<3x16x128xf32> to vector<1x16x128xf32>
      %1217 = vector.shape_cast %1216 : vector<1x16x128xf32> to vector<16x128xf32>
      %c2_i32_213 = arith.constant 2 : i32
      %1218 = tpu.dynamic_rotate %1217 by %c2_i32_213 dim 1 : vector<16x128xf32>, i32 -> vector<16x128xf32>
      %1219 = vector.extract_strided_slice %1215 {offsets = [1, 0, 0], sizes = [1, 16, 128], strides = [1, 1, 1]} : vector<3x16x128xf32> to vector<1x16x128xf32>
      %1220 = vector.shape_cast %1219 : vector<1x16x128xf32> to vector<16x128xf32>
      %c2_i32_214 = arith.constant 2 : i32
      %1221 = tpu.dynamic_rotate %1220 by %c2_i32_214 dim 1 : vector<16x128xf32>, i32 -> vector<16x128xf32>
      %1222 = vector.extract_strided_slice %1215 {offsets = [2, 0, 0], sizes = [1, 16, 128], strides = [1, 1, 1]} : vector<3x16x128xf32> to vector<1x16x128xf32>
      %1223 = vector.shape_cast %1222 : vector<1x16x128xf32> to vector<16x128xf32>
      %c2_i32_215 = arith.constant 2 : i32
      %1224 = tpu.dynamic_rotate %1223 by %c2_i32_215 dim 1 : vector<16x128xf32>, i32 -> vector<16x128xf32>
      %1225 = vector.shape_cast %1218 : vector<16x128xf32> to vector<1x16x128xf32>
      %1226 = vector.shape_cast %1221 : vector<16x128xf32> to vector<1x16x128xf32>
      %1227 = vector.shape_cast %1224 : vector<16x128xf32> to vector<1x16x128xf32>
      %1228 = tpu.concatenate %1225, %1226, %1227 in 0 : vector<1x16x128xf32>, vector<1x16x128xf32>, vector<1x16x128xf32> -> vector<3x16x128xf32>
      %1229 = vector.extract_strided_slice %1215 {offsets = [0, 0, 0], sizes = [1, 16, 128], strides = [1, 1, 1]} : vector<3x16x128xf32> to vector<1x16x128xf32>
      %1230 = vector.shape_cast %1229 : vector<1x16x128xf32> to vector<16x128xf32>
      %c1_i32_216 = arith.constant 1 : i32
      %1231 = tpu.dynamic_rotate %1230 by %c1_i32_216 dim 1 : vector<16x128xf32>, i32 -> vector<16x128xf32>
      %1232 = vector.extract_strided_slice %1215 {offsets = [1, 0, 0], sizes = [1, 16, 128], strides = [1, 1, 1]} : vector<3x16x128xf32> to vector<1x16x128xf32>
      %1233 = vector.shape_cast %1232 : vector<1x16x128xf32> to vector<16x128xf32>
      %c1_i32_217 = arith.constant 1 : i32
      %1234 = tpu.dynamic_rotate %1233 by %c1_i32_217 dim 1 : vector<16x128xf32>, i32 -> vector<16x128xf32>
      %1235 = vector.extract_strided_slice %1215 {offsets = [2, 0, 0], sizes = [1, 16, 128], strides = [1, 1, 1]} : vector<3x16x128xf32> to vector<1x16x128xf32>
      %1236 = vector.shape_cast %1235 : vector<1x16x128xf32> to vector<16x128xf32>
      %c1_i32_218 = arith.constant 1 : i32
      %1237 = tpu.dynamic_rotate %1236 by %c1_i32_218 dim 1 : vector<16x128xf32>, i32 -> vector<16x128xf32>
      %1238 = vector.shape_cast %1231 : vector<16x128xf32> to vector<1x16x128xf32>
      %1239 = vector.shape_cast %1234 : vector<16x128xf32> to vector<1x16x128xf32>
      %1240 = vector.shape_cast %1237 : vector<16x128xf32> to vector<1x16x128xf32>
      %1241 = tpu.concatenate %1238, %1239, %1240 in 0 : vector<1x16x128xf32>, vector<1x16x128xf32>, vector<1x16x128xf32> -> vector<3x16x128xf32>
      %1242 = vector.extract_strided_slice %1215 {offsets = [0, 0, 0], sizes = [1, 16, 128], strides = [1, 1, 1]} : vector<3x16x128xf32> to vector<1x16x128xf32>
      %1243 = vector.shape_cast %1242 : vector<1x16x128xf32> to vector<16x128xf32>
      %c127_i32_219 = arith.constant 127 : i32
      %1244 = tpu.dynamic_rotate %1243 by %c127_i32_219 dim 1 : vector<16x128xf32>, i32 -> vector<16x128xf32>
      %1245 = vector.extract_strided_slice %1215 {offsets = [1, 0, 0], sizes = [1, 16, 128], strides = [1, 1, 1]} : vector<3x16x128xf32> to vector<1x16x128xf32>
      %1246 = vector.shape_cast %1245 : vector<1x16x128xf32> to vector<16x128xf32>
      %c127_i32_220 = arith.constant 127 : i32
      %1247 = tpu.dynamic_rotate %1246 by %c127_i32_220 dim 1 : vector<16x128xf32>, i32 -> vector<16x128xf32>
      %1248 = vector.extract_strided_slice %1215 {offsets = [2, 0, 0], sizes = [1, 16, 128], strides = [1, 1, 1]} : vector<3x16x128xf32> to vector<1x16x128xf32>
      %1249 = vector.shape_cast %1248 : vector<1x16x128xf32> to vector<16x128xf32>
      %c127_i32_221 = arith.constant 127 : i32
      %1250 = tpu.dynamic_rotate %1249 by %c127_i32_221 dim 1 : vector<16x128xf32>, i32 -> vector<16x128xf32>
      %1251 = vector.shape_cast %1244 : vector<16x128xf32> to vector<1x16x128xf32>
      %1252 = vector.shape_cast %1247 : vector<16x128xf32> to vector<1x16x128xf32>
      %1253 = vector.shape_cast %1250 : vector<16x128xf32> to vector<1x16x128xf32>
      %1254 = tpu.concatenate %1251, %1252, %1253 in 0 : vector<1x16x128xf32>, vector<1x16x128xf32>, vector<1x16x128xf32> -> vector<3x16x128xf32>
      %1255 = vector.extract_strided_slice %1215 {offsets = [0, 0, 0], sizes = [1, 16, 128], strides = [1, 1, 1]} : vector<3x16x128xf32> to vector<1x16x128xf32>
      %1256 = vector.shape_cast %1255 : vector<1x16x128xf32> to vector<16x128xf32>
      %c126_i32_222 = arith.constant 126 : i32
      %1257 = tpu.dynamic_rotate %1256 by %c126_i32_222 dim 1 : vector<16x128xf32>, i32 -> vector<16x128xf32>
      %1258 = vector.extract_strided_slice %1215 {offsets = [1, 0, 0], sizes = [1, 16, 128], strides = [1, 1, 1]} : vector<3x16x128xf32> to vector<1x16x128xf32>
      %1259 = vector.shape_cast %1258 : vector<1x16x128xf32> to vector<16x128xf32>
      %c126_i32_223 = arith.constant 126 : i32
      %1260 = tpu.dynamic_rotate %1259 by %c126_i32_223 dim 1 : vector<16x128xf32>, i32 -> vector<16x128xf32>
      %1261 = vector.extract_strided_slice %1215 {offsets = [2, 0, 0], sizes = [1, 16, 128], strides = [1, 1, 1]} : vector<3x16x128xf32> to vector<1x16x128xf32>
      %1262 = vector.shape_cast %1261 : vector<1x16x128xf32> to vector<16x128xf32>
      %c126_i32_224 = arith.constant 126 : i32
      %1263 = tpu.dynamic_rotate %1262 by %c126_i32_224 dim 1 : vector<16x128xf32>, i32 -> vector<16x128xf32>
      %1264 = vector.shape_cast %1257 : vector<16x128xf32> to vector<1x16x128xf32>
      %1265 = vector.shape_cast %1260 : vector<16x128xf32> to vector<1x16x128xf32>
      %1266 = vector.shape_cast %1263 : vector<16x128xf32> to vector<1x16x128xf32>
      %1267 = tpu.concatenate %1264, %1265, %1266 in 0 : vector<1x16x128xf32>, vector<1x16x128xf32>, vector<1x16x128xf32> -> vector<3x16x128xf32>
      %1268 = vector.broadcast %19 : f32 to vector<3x16x128xf32>
      %1269 = arith.mulf %1268, %1228 : vector<3x16x128xf32>
      %1270 = vector.broadcast %20 : f32 to vector<3x16x128xf32>
      %1271 = arith.mulf %1270, %1241 : vector<3x16x128xf32>
      %1272 = arith.addf %1269, %1271 : vector<3x16x128xf32>
      %1273 = vector.broadcast %21 : f32 to vector<3x16x128xf32>
      %1274 = arith.mulf %1273, %1215 : vector<3x16x128xf32>
      %1275 = arith.addf %1272, %1274 : vector<3x16x128xf32>
      %1276 = vector.broadcast %22 : f32 to vector<3x16x128xf32>
      %1277 = arith.mulf %1276, %1254 : vector<3x16x128xf32>
      %1278 = arith.addf %1275, %1277 : vector<3x16x128xf32>
      %1279 = vector.broadcast %23 : f32 to vector<3x16x128xf32>
      %1280 = arith.mulf %1279, %1267 : vector<3x16x128xf32>
      %1281 = arith.addf %1278, %1280 : vector<3x16x128xf32>
      %1282 = vector.extract_strided_slice %1281 {offsets = [0, 0, 0], sizes = [1, 16, 128], strides = [1, 1, 1]} : vector<3x16x128xf32> to vector<1x16x128xf32>
      %1283 = vector.shape_cast %1282 : vector<1x16x128xf32> to vector<16x128xf32>
      %c2_i32_225 = arith.constant 2 : i32
      %1284 = tpu.dynamic_rotate %1283 by %c2_i32_225 dim 0 : vector<16x128xf32>, i32 -> vector<16x128xf32>
      %1285 = vector.extract_strided_slice %1281 {offsets = [1, 0, 0], sizes = [1, 16, 128], strides = [1, 1, 1]} : vector<3x16x128xf32> to vector<1x16x128xf32>
      %1286 = vector.shape_cast %1285 : vector<1x16x128xf32> to vector<16x128xf32>
      %c2_i32_226 = arith.constant 2 : i32
      %1287 = tpu.dynamic_rotate %1286 by %c2_i32_226 dim 0 : vector<16x128xf32>, i32 -> vector<16x128xf32>
      %1288 = vector.extract_strided_slice %1281 {offsets = [2, 0, 0], sizes = [1, 16, 128], strides = [1, 1, 1]} : vector<3x16x128xf32> to vector<1x16x128xf32>
      %1289 = vector.shape_cast %1288 : vector<1x16x128xf32> to vector<16x128xf32>
      %c2_i32_227 = arith.constant 2 : i32
      %1290 = tpu.dynamic_rotate %1289 by %c2_i32_227 dim 0 : vector<16x128xf32>, i32 -> vector<16x128xf32>
      %1291 = vector.shape_cast %1284 : vector<16x128xf32> to vector<1x16x128xf32>
      %1292 = vector.shape_cast %1287 : vector<16x128xf32> to vector<1x16x128xf32>
      %1293 = vector.shape_cast %1290 : vector<16x128xf32> to vector<1x16x128xf32>
      %1294 = tpu.concatenate %1291, %1292, %1293 in 0 : vector<1x16x128xf32>, vector<1x16x128xf32>, vector<1x16x128xf32> -> vector<3x16x128xf32>
      %1295 = vector.broadcast %24 : f32 to vector<3x16x128xf32>
      %1296 = arith.mulf %1295, %1228 : vector<3x16x128xf32>
      %1297 = vector.broadcast %25 : f32 to vector<3x16x128xf32>
      %1298 = arith.mulf %1297, %1241 : vector<3x16x128xf32>
      %1299 = arith.addf %1296, %1298 : vector<3x16x128xf32>
      %1300 = vector.broadcast %26 : f32 to vector<3x16x128xf32>
      %1301 = arith.mulf %1300, %1215 : vector<3x16x128xf32>
      %1302 = arith.addf %1299, %1301 : vector<3x16x128xf32>
      %1303 = vector.broadcast %27 : f32 to vector<3x16x128xf32>
      %1304 = arith.mulf %1303, %1254 : vector<3x16x128xf32>
      %1305 = arith.addf %1302, %1304 : vector<3x16x128xf32>
      %1306 = vector.broadcast %28 : f32 to vector<3x16x128xf32>
      %1307 = arith.mulf %1306, %1267 : vector<3x16x128xf32>
      %1308 = arith.addf %1305, %1307 : vector<3x16x128xf32>
      %1309 = vector.extract_strided_slice %1308 {offsets = [0, 0, 0], sizes = [1, 16, 128], strides = [1, 1, 1]} : vector<3x16x128xf32> to vector<1x16x128xf32>
      %1310 = vector.shape_cast %1309 : vector<1x16x128xf32> to vector<16x128xf32>
      %c1_i32_228 = arith.constant 1 : i32
      %1311 = tpu.dynamic_rotate %1310 by %c1_i32_228 dim 0 : vector<16x128xf32>, i32 -> vector<16x128xf32>
      %1312 = vector.extract_strided_slice %1308 {offsets = [1, 0, 0], sizes = [1, 16, 128], strides = [1, 1, 1]} : vector<3x16x128xf32> to vector<1x16x128xf32>
      %1313 = vector.shape_cast %1312 : vector<1x16x128xf32> to vector<16x128xf32>
      %c1_i32_229 = arith.constant 1 : i32
      %1314 = tpu.dynamic_rotate %1313 by %c1_i32_229 dim 0 : vector<16x128xf32>, i32 -> vector<16x128xf32>
      %1315 = vector.extract_strided_slice %1308 {offsets = [2, 0, 0], sizes = [1, 16, 128], strides = [1, 1, 1]} : vector<3x16x128xf32> to vector<1x16x128xf32>
      %1316 = vector.shape_cast %1315 : vector<1x16x128xf32> to vector<16x128xf32>
      %c1_i32_230 = arith.constant 1 : i32
      %1317 = tpu.dynamic_rotate %1316 by %c1_i32_230 dim 0 : vector<16x128xf32>, i32 -> vector<16x128xf32>
      %1318 = vector.shape_cast %1311 : vector<16x128xf32> to vector<1x16x128xf32>
      %1319 = vector.shape_cast %1314 : vector<16x128xf32> to vector<1x16x128xf32>
      %1320 = vector.shape_cast %1317 : vector<16x128xf32> to vector<1x16x128xf32>
      %1321 = tpu.concatenate %1318, %1319, %1320 in 0 : vector<1x16x128xf32>, vector<1x16x128xf32>, vector<1x16x128xf32> -> vector<3x16x128xf32>
      %1322 = arith.addf %1294, %1321 : vector<3x16x128xf32>
      %1323 = vector.broadcast %29 : f32 to vector<3x16x128xf32>
      %1324 = arith.mulf %1323, %1228 : vector<3x16x128xf32>
      %1325 = vector.broadcast %30 : f32 to vector<3x16x128xf32>
      %1326 = arith.mulf %1325, %1241 : vector<3x16x128xf32>
      %1327 = arith.addf %1324, %1326 : vector<3x16x128xf32>
      %1328 = vector.broadcast %31 : f32 to vector<3x16x128xf32>
      %1329 = arith.mulf %1328, %1215 : vector<3x16x128xf32>
      %1330 = arith.addf %1327, %1329 : vector<3x16x128xf32>
      %1331 = vector.broadcast %32 : f32 to vector<3x16x128xf32>
      %1332 = arith.mulf %1331, %1254 : vector<3x16x128xf32>
      %1333 = arith.addf %1330, %1332 : vector<3x16x128xf32>
      %1334 = vector.broadcast %33 : f32 to vector<3x16x128xf32>
      %1335 = arith.mulf %1334, %1267 : vector<3x16x128xf32>
      %1336 = arith.addf %1333, %1335 : vector<3x16x128xf32>
      %1337 = arith.addf %1322, %1336 : vector<3x16x128xf32>
      %1338 = vector.broadcast %34 : f32 to vector<3x16x128xf32>
      %1339 = arith.mulf %1338, %1228 : vector<3x16x128xf32>
      %1340 = vector.broadcast %35 : f32 to vector<3x16x128xf32>
      %1341 = arith.mulf %1340, %1241 : vector<3x16x128xf32>
      %1342 = arith.addf %1339, %1341 : vector<3x16x128xf32>
      %1343 = vector.broadcast %36 : f32 to vector<3x16x128xf32>
      %1344 = arith.mulf %1343, %1215 : vector<3x16x128xf32>
      %1345 = arith.addf %1342, %1344 : vector<3x16x128xf32>
      %1346 = vector.broadcast %37 : f32 to vector<3x16x128xf32>
      %1347 = arith.mulf %1346, %1254 : vector<3x16x128xf32>
      %1348 = arith.addf %1345, %1347 : vector<3x16x128xf32>
      %1349 = vector.broadcast %38 : f32 to vector<3x16x128xf32>
      %1350 = arith.mulf %1349, %1267 : vector<3x16x128xf32>
      %1351 = arith.addf %1348, %1350 : vector<3x16x128xf32>
      %1352 = vector.extract_strided_slice %1351 {offsets = [0, 0, 0], sizes = [1, 16, 128], strides = [1, 1, 1]} : vector<3x16x128xf32> to vector<1x16x128xf32>
      %1353 = vector.shape_cast %1352 : vector<1x16x128xf32> to vector<16x128xf32>
      %c15_i32_231 = arith.constant 15 : i32
      %1354 = tpu.dynamic_rotate %1353 by %c15_i32_231 dim 0 : vector<16x128xf32>, i32 -> vector<16x128xf32>
      %1355 = vector.extract_strided_slice %1351 {offsets = [1, 0, 0], sizes = [1, 16, 128], strides = [1, 1, 1]} : vector<3x16x128xf32> to vector<1x16x128xf32>
      %1356 = vector.shape_cast %1355 : vector<1x16x128xf32> to vector<16x128xf32>
      %c15_i32_232 = arith.constant 15 : i32
      %1357 = tpu.dynamic_rotate %1356 by %c15_i32_232 dim 0 : vector<16x128xf32>, i32 -> vector<16x128xf32>
      %1358 = vector.extract_strided_slice %1351 {offsets = [2, 0, 0], sizes = [1, 16, 128], strides = [1, 1, 1]} : vector<3x16x128xf32> to vector<1x16x128xf32>
      %1359 = vector.shape_cast %1358 : vector<1x16x128xf32> to vector<16x128xf32>
      %c15_i32_233 = arith.constant 15 : i32
      %1360 = tpu.dynamic_rotate %1359 by %c15_i32_233 dim 0 : vector<16x128xf32>, i32 -> vector<16x128xf32>
      %1361 = vector.shape_cast %1354 : vector<16x128xf32> to vector<1x16x128xf32>
      %1362 = vector.shape_cast %1357 : vector<16x128xf32> to vector<1x16x128xf32>
      %1363 = vector.shape_cast %1360 : vector<16x128xf32> to vector<1x16x128xf32>
      %1364 = tpu.concatenate %1361, %1362, %1363 in 0 : vector<1x16x128xf32>, vector<1x16x128xf32>, vector<1x16x128xf32> -> vector<3x16x128xf32>
      %1365 = arith.addf %1337, %1364 : vector<3x16x128xf32>
      %1366 = vector.broadcast %39 : f32 to vector<3x16x128xf32>
      %1367 = arith.mulf %1366, %1228 : vector<3x16x128xf32>
      %1368 = vector.broadcast %40 : f32 to vector<3x16x128xf32>
      %1369 = arith.mulf %1368, %1241 : vector<3x16x128xf32>
      %1370 = arith.addf %1367, %1369 : vector<3x16x128xf32>
      %1371 = vector.broadcast %41 : f32 to vector<3x16x128xf32>
      %1372 = arith.mulf %1371, %1215 : vector<3x16x128xf32>
      %1373 = arith.addf %1370, %1372 : vector<3x16x128xf32>
      %1374 = vector.broadcast %42 : f32 to vector<3x16x128xf32>
      %1375 = arith.mulf %1374, %1254 : vector<3x16x128xf32>
      %1376 = arith.addf %1373, %1375 : vector<3x16x128xf32>
      %1377 = vector.broadcast %43 : f32 to vector<3x16x128xf32>
      %1378 = arith.mulf %1377, %1267 : vector<3x16x128xf32>
      %1379 = arith.addf %1376, %1378 : vector<3x16x128xf32>
      %1380 = vector.extract_strided_slice %1379 {offsets = [0, 0, 0], sizes = [1, 16, 128], strides = [1, 1, 1]} : vector<3x16x128xf32> to vector<1x16x128xf32>
      %1381 = vector.shape_cast %1380 : vector<1x16x128xf32> to vector<16x128xf32>
      %c14_i32_234 = arith.constant 14 : i32
      %1382 = tpu.dynamic_rotate %1381 by %c14_i32_234 dim 0 : vector<16x128xf32>, i32 -> vector<16x128xf32>
      %1383 = vector.extract_strided_slice %1379 {offsets = [1, 0, 0], sizes = [1, 16, 128], strides = [1, 1, 1]} : vector<3x16x128xf32> to vector<1x16x128xf32>
      %1384 = vector.shape_cast %1383 : vector<1x16x128xf32> to vector<16x128xf32>
      %c14_i32_235 = arith.constant 14 : i32
      %1385 = tpu.dynamic_rotate %1384 by %c14_i32_235 dim 0 : vector<16x128xf32>, i32 -> vector<16x128xf32>
      %1386 = vector.extract_strided_slice %1379 {offsets = [2, 0, 0], sizes = [1, 16, 128], strides = [1, 1, 1]} : vector<3x16x128xf32> to vector<1x16x128xf32>
      %1387 = vector.shape_cast %1386 : vector<1x16x128xf32> to vector<16x128xf32>
      %c14_i32_236 = arith.constant 14 : i32
      %1388 = tpu.dynamic_rotate %1387 by %c14_i32_236 dim 0 : vector<16x128xf32>, i32 -> vector<16x128xf32>
      %1389 = vector.shape_cast %1382 : vector<16x128xf32> to vector<1x16x128xf32>
      %1390 = vector.shape_cast %1385 : vector<16x128xf32> to vector<1x16x128xf32>
      %1391 = vector.shape_cast %1388 : vector<16x128xf32> to vector<1x16x128xf32>
      %1392 = tpu.concatenate %1389, %1390, %1391 in 0 : vector<1x16x128xf32>, vector<1x16x128xf32>, vector<1x16x128xf32> -> vector<3x16x128xf32>
      %1393 = arith.addf %1365, %1392 : vector<3x16x128xf32>
      %1394 = arith.addf %1074, %1061 : vector<3x16x128xf32>
      %1395 = vector.extract_strided_slice %1035 {offsets = [0, 0, 0], sizes = [1, 16, 128], strides = [1, 1, 1]} : vector<3x16x128xf32> to vector<1x16x128xf32>
      %1396 = vector.shape_cast %1395 : vector<1x16x128xf32> to vector<16x128xf32>
      %c15_i32_237 = arith.constant 15 : i32
      %1397 = tpu.dynamic_rotate %1396 by %c15_i32_237 dim 0 : vector<16x128xf32>, i32 -> vector<16x128xf32>
      %1398 = vector.extract_strided_slice %1035 {offsets = [1, 0, 0], sizes = [1, 16, 128], strides = [1, 1, 1]} : vector<3x16x128xf32> to vector<1x16x128xf32>
      %1399 = vector.shape_cast %1398 : vector<1x16x128xf32> to vector<16x128xf32>
      %c15_i32_238 = arith.constant 15 : i32
      %1400 = tpu.dynamic_rotate %1399 by %c15_i32_238 dim 0 : vector<16x128xf32>, i32 -> vector<16x128xf32>
      %1401 = vector.extract_strided_slice %1035 {offsets = [2, 0, 0], sizes = [1, 16, 128], strides = [1, 1, 1]} : vector<3x16x128xf32> to vector<1x16x128xf32>
      %1402 = vector.shape_cast %1401 : vector<1x16x128xf32> to vector<16x128xf32>
      %c15_i32_239 = arith.constant 15 : i32
      %1403 = tpu.dynamic_rotate %1402 by %c15_i32_239 dim 0 : vector<16x128xf32>, i32 -> vector<16x128xf32>
      %1404 = vector.shape_cast %1397 : vector<16x128xf32> to vector<1x16x128xf32>
      %1405 = vector.shape_cast %1400 : vector<16x128xf32> to vector<1x16x128xf32>
      %1406 = vector.shape_cast %1403 : vector<16x128xf32> to vector<1x16x128xf32>
      %1407 = tpu.concatenate %1404, %1405, %1406 in 0 : vector<1x16x128xf32>, vector<1x16x128xf32>, vector<1x16x128xf32> -> vector<3x16x128xf32>
      %1408 = arith.addf %1394, %1407 : vector<3x16x128xf32>
      %1409 = vector.extract_strided_slice %1035 {offsets = [0, 0, 0], sizes = [1, 16, 128], strides = [1, 1, 1]} : vector<3x16x128xf32> to vector<1x16x128xf32>
      %1410 = vector.shape_cast %1409 : vector<1x16x128xf32> to vector<16x128xf32>
      %c1_i32_240 = arith.constant 1 : i32
      %1411 = tpu.dynamic_rotate %1410 by %c1_i32_240 dim 0 : vector<16x128xf32>, i32 -> vector<16x128xf32>
      %1412 = vector.extract_strided_slice %1035 {offsets = [1, 0, 0], sizes = [1, 16, 128], strides = [1, 1, 1]} : vector<3x16x128xf32> to vector<1x16x128xf32>
      %1413 = vector.shape_cast %1412 : vector<1x16x128xf32> to vector<16x128xf32>
      %c1_i32_241 = arith.constant 1 : i32
      %1414 = tpu.dynamic_rotate %1413 by %c1_i32_241 dim 0 : vector<16x128xf32>, i32 -> vector<16x128xf32>
      %1415 = vector.extract_strided_slice %1035 {offsets = [2, 0, 0], sizes = [1, 16, 128], strides = [1, 1, 1]} : vector<3x16x128xf32> to vector<1x16x128xf32>
      %1416 = vector.shape_cast %1415 : vector<1x16x128xf32> to vector<16x128xf32>
      %c1_i32_242 = arith.constant 1 : i32
      %1417 = tpu.dynamic_rotate %1416 by %c1_i32_242 dim 0 : vector<16x128xf32>, i32 -> vector<16x128xf32>
      %1418 = vector.shape_cast %1411 : vector<16x128xf32> to vector<1x16x128xf32>
      %1419 = vector.shape_cast %1414 : vector<16x128xf32> to vector<1x16x128xf32>
      %1420 = vector.shape_cast %1417 : vector<16x128xf32> to vector<1x16x128xf32>
      %1421 = tpu.concatenate %1418, %1419, %1420 in 0 : vector<1x16x128xf32>, vector<1x16x128xf32>, vector<1x16x128xf32> -> vector<3x16x128xf32>
      %1422 = arith.addf %1408, %1421 : vector<3x16x128xf32>
      %1423 = arith.mulf %18, %1035 : vector<3x16x128xf32>
      %1424 = arith.addf %1393, %1423 : vector<3x16x128xf32>
      %1425 = arith.mulf %16, %1422 : vector<3x16x128xf32>
      %1426 = arith.subf %1424, %1425 : vector<3x16x128xf32>
      %1427 = arith.mulf %1035, %1426 : vector<3x16x128xf32>
      %cst_243 = arith.constant dense<0.000000e+00> : vector<3x16xf32>
      %1428 = vector.multi_reduction <add>, %1427, %cst_243 [2] : vector<3x16x128xf32> to vector<3x16xf32>
      %1429 = vector.shape_cast %1428 : vector<3x16xf32> to vector<3x16x1xf32>
      %cst_244 = arith.constant dense<0.000000e+00> : vector<3x1xf32>
      %1430 = vector.multi_reduction <add>, %1429, %cst_244 [1] : vector<3x16x1xf32> to vector<3x1xf32>
      %1431 = vector.shape_cast %1430 : vector<3x1xf32> to vector<3x1x1xf32>
      %1432 = arith.divf %1031, %1431 : vector<3x1x1xf32>
      %1433 = vector.broadcast %1432 : vector<3x1x1xf32> to vector<3x16x128xf32>
      %1434 = arith.mulf %1433, %1035 : vector<3x16x128xf32>
      %1435 = arith.addf %arg7, %1434 : vector<3x16x128xf32>
      %1436 = vector.broadcast %1432 : vector<3x1x1xf32> to vector<3x16x128xf32>
      %1437 = arith.mulf %1436, %1426 : vector<3x16x128xf32>
      %1438 = arith.subf %arg8, %1437 : vector<3x16x128xf32>
      scf.yield %1435, %1438, %1035, %1031 : vector<3x16x128xf32>, vector<3x16x128xf32>, vector<3x16x128xf32>, vector<3x1x1xf32>
    }
    %c0_184 = arith.constant 0 : index
    %c0_185 = arith.constant 0 : index
    %c0_186 = arith.constant 0 : index
    %1026 = vector.load %arg5[%c0_184, %c0_185, %c0_186] : memref<3x16x128xf32, #tpu.memory_space<vmem>>, vector<3x16x128xf32>
    tpu.vector_store %arg5[%c0_184, %c0_185, %c0_186], %1025#0 {strides = array<i32>} : memref<3x16x128xf32, #tpu.memory_space<vmem>>, vector<3x16x128xf32>,
    return
  }
  func.func @transform_0(%arg0: i32) -> (i32, i32) {
    %c0_i32 = arith.constant 0 : i32
    %c0_i32_0 = arith.constant 0 : i32
    %c0_i32_1 = arith.constant 0 : i32
    return %c0_i32, %c0_i32_0 : i32, i32
  }
  func.func @transform_1(%arg0: i32) -> i32 {
    %c0_i32 = arith.constant 0 : i32
    %c0_i32_0 = arith.constant 0 : i32
    return %c0_i32 : i32
  }
  func.func @transform_2(%arg0: i32) -> (i32, i32) {
    %c0_i32 = arith.constant 0 : i32
    %c0_i32_0 = arith.constant 0 : i32
    %c0_i32_1 = arith.constant 0 : i32
    return %c0_i32, %c0_i32_0 : i32, i32
  }
  func.func @transform_3(%arg0: i32) -> (i32, i32, i32) {
    %c0_i32 = arith.constant 0 : i32
    %c0_i32_0 = arith.constant 0 : i32
    %c0_i32_1 = arith.constant 0 : i32
    return %arg0, %c0_i32, %c0_i32_0 : i32, i32, i32
  }
  func.func @transform_4(%arg0: i32) -> (i32, i32, i32) {
    %c0_i32 = arith.constant 0 : i32
    %c0_i32_0 = arith.constant 0 : i32
    %c0_i32_1 = arith.constant 0 : i32
    return %arg0, %c0_i32, %c0_i32_0 : i32, i32, i32
  }
}

</mosaic_0001>

<bundles_post_ra>
// kernel: l2_nondeblur_cg_forward.1
= control target key start
LH: loop header
LB: loop body
LE: loop exit
PB: predicated region body
PF: predicated region fallthrough
CT: control target
= control target key end

     0   :  { %9 = vsyncpa [#allocation3], 0  ;;  %s9385_s0 = inlined_call_operand.vmem [shape: f32[5,5], index: 0, kind: input, shape index: {}]   ;;  %s9386_s1 = inlined_call_operand.vmem [shape: f32[6], index: 1, kind: input, shape index: {}]   ;;  %s9387_s2 = inlined_call_operand.vmem [shape: f32[16,128], index: 2, kind: input, shape index: {}]   ;;  %s9388_s3 = inlined_call_operand.vmem [shape: f32[6,16,128], index: 3, kind: input, shape index: {}]   ;;  %s9389_s4 = inlined_call_operand.vmem [shape: f32[6,16,128], index: 4, kind: output, shape index: {}]  }
   0x1   :  { %10 = vsyncpa [#allocation5], 0  ;;  %s4225_s15 = smov 0  }
   0x2 LB: > { %s3682_s16 = sadd.s32 4294967295, %s4100_s15   ;;  %p3684_p0 = scmp.ge.s32.totalorder %s4100_s15, 1  ;;  %s4100_s15 = sphi %s4225_s15, %s16_s15  }
   0x3   : > { %p136_p1 = scmp.lt.s32.totalorder %s4100_s15, 3  ;;  %s149_s19 = sshll.u32 %s9385_s0, 4  ;;  %s150_s19 = int_to_ptr.vmem [resolvable:$true] %s149_s19 }
   0x4   : > { %p4242_p3 = scmp.eq.s32.totalorder %s3682_s16, 0  ;;  %s160_s24 = sshll.u32 %s9386_s1, 4  ;;  %s161_s24 = int_to_ptr.vmem [resolvable:$true] %s160_s24 }
   0x5   : > { %p4236_p2 = pnand %p3684_p0, %p136_p1  ;;  %s3968_s26 = scalar_lea.vmem %s150_s19, 128 }
   0x6   : > { %s9701_s21 = scalar_select %p4242_p3, 1, 0 }
   0x7   : > { %s9700_s20 = scalar_select %p4236_p2, 1, 0 }
   0x8   : > { %p3731_p4 = pneg %p4236_p2  ;;  %p3969_p6 = scmp.ne.s32.totalorder %s150_s19, %s3968_s26 }
   0x9   : > { %p3976_p10 = scmp.lt.s32.totalorder %s150_s19, %s150_s19  ;;  %p3977_p11 = scmp.lt.s32.totalorder %s3968_s26, %s3968_s26 }
   0xa   : > { %p4253_p5 = pnand %p4242_p3, %p3731_p4 }
   0xb   : > { %p3978_p12 = por %p3977_p11, %p3976_p10 }
   0xc   : > { %p3970_p7 = pneg %p4253_p5 }
   0xe   : > { %p3971_p8 = pnand %p3970_p7, %p3969_p6 }
  0x10   : > { %p3972_p9 = pneg %p3971_p8 }
  0x12   : > { %p3979_p13 = pnand %p3978_p12, %p3972_p9 }
  0x14   : > { %3982 = shalt.err (!%p3979_p13)
}
  0x15   : > { %s4190_s27 = smov [#allocation2]   ;;  %s3983_s28 = scalar_lea.vmem %s161_s24, 16 }
  0x16   : > { %3734 = dma.vmem_to_smem (!%p4253_p5), %s150_s19, 128, %s4190_s27, [#allocation3]  }
  0x17   : > { %p3984_p0 = scmp.ne.s32.totalorder %s161_s24, %s3983_s28  ;;  %p3991_p3 = scmp.lt.s32.totalorder %s161_s24, %s161_s24 }
  0x18   : > { %p3992_p2 = scmp.lt.s32.totalorder %s3983_s28, %s3983_s28 }
  0x19   : > { %p3986_p1 = pnand %p3984_p0, %p3970_p7 }
  0x1a   : > { %p3993_p6 = por %p3992_p2, %p3991_p3 }
  0x1b   : > { %p3987_p4 = pneg %p3986_p1 }
  0x1d   : > { %p3994_p8 = pnand %p3993_p6, %p3987_p4 }
  0x1f   : > { %3997 = shalt.err (!%p3994_p8)
}
  0x20   : > { %s4191_s29 = smov [#allocation4]   ;;  %p9703_p9 = scmp.ne.s32.totalorder %s9700_s20, 0 }
  0x21   : > { %3737 = dma.vmem_to_smem (!%p4253_p5), %s161_s24, 16, %s4191_s29, [#allocation5]  }
  0x22   : > { %186 = sbr.rel (%p9703_p9) target bundleno = 1795 (0x703), region = 36 }
  0x27   : > { %p9704_p10 = scmp.ne.s32.totalorder %s9701_s21, 0 }
  0x29   : > { %4091 = dma.done.wait (%p9704_p10), [#allocation3], 128  }
  0x2a   : > { %4093 = vsyncadd (%p9704_p10), [#allocation3], 4294967168 }
  0x2b   : > { %4095 = dma.done.wait (%p9704_p10), [#allocation5], 16  }
  0x2c   : > { %4097 = vsyncadd (%p9704_p10), [#allocation5], 4294967280 }
  0x2d   : > { %196 = sfence }
  0x2e   : > { %s4275_s30 = smul.u32 3, %s3682_s16  ;;  %s9395_s13 = smov 127   ;;  %v4354_v6 = vld [vmem:[%s9387_s2 + $0x8] sm:$0xff]  ;;  %v4359_v7 = vld [vmem:[%s9387_s2] sm:$0xff]  ;;  %v393_v51 = vlaneseq }
  0x2f   : > { %s9393_s14 = smov 126   ;;  %s4194_s16 = smov 1   ;;  %9705 = vst [vmem:[#allocation8_spill] sm:$0xff] %v4354_v6  ;;  %9706 = vst [vmem:[#allocation9_spill] sm:$0xff] %v4359_v7 }
  0x30   : > { %p220_p2 = scmp.lt.s32.totalorder %s4275_s30, 5  ;;  %s4195_s17 = smov 2  }
  0x31   : > { %s3695_s22 = sld [smem:[#allocation2 + $0x1]] }
  0x32   : > { %s221_s5 = scalar_select %p220_p2, %s4275_s30, 5 }
  0x33   : > { %s3700_s23 = sld [smem:[#allocation2 + $0x81]] }
  0x34   : > { %s3721_s6 = sshll.u32 %s221_s5, 4  ;;  %s3705_s24 = sld [smem:[#allocation2 + $0x101]] }
  0x35   : > { %s4282_s9 = scalar_lea.vmem %s9388_s3, %s3721_s6  ;;  %s4287_s12 = scalar_lea.vmem %s9389_s4, %s3721_s6 }
  0x36   : > { %v4290_v0 = vld [vmem:[%s4282_s9 + $0x10] sm:$0xff]  ;;  %v4293_v1 = vld [vmem:[%s4282_s9] sm:$0xff]  ;;  %v4300_v2 = vld [vmem:[%s4282_s9 + $0x18] sm:$0xff]  ;;  %s3710_s25 = sld [smem:[#allocation2 + $0x181]] }
  0x37   : > { %733 = vrot.lane.b32.xlu1 %v4290_v0, %s9395_s13  ;;  %729 = vrot.lane.b32.xlu0 %v4293_v1, %s9395_s13  ;;  %v4303_v3 = vld [vmem:[%s4282_s9 + $0x8] sm:$0xff]  ;;  %v4313_v5 = vld [vmem:[%s4282_s9 + $0x20] sm:$0xff]  ;;  %v4371_v9 = vmul.f32 %v4359_v7, %v4293_v1  ;;  %v4379_v10 = vmul.f32 %v4354_v6, %v4300_v2  ;;  %v4383_v11 = vmul.f32 %v4359_v7, %v4290_v0  ;;  %s3715_s26 = sld [smem:[#allocation2 + $0x201]] }
  0x38   : > { %v4310_v4 = vld [vmem:[%s4282_s9 + $0x28] sm:$0xff]  ;;  %v4367_v8 = vmul.f32 %v4354_v6, %v4303_v3  ;;  %v4395_v13 = vmul.f32 %v4359_v7, %v4313_v5  ;;  %s253_s27 = sld [smem:[#allocation2]]  ;;  %v4445_v14 = vstv %s3695_s22 }
  0x39   : > { %9708 = vst [vmem:[#allocation11_spill] sm:$0xff] %v4371_v9  ;;  %9709 = vst [vmem:[#allocation12_spill] sm:$0xff] %v4379_v10  ;;  %v4391_v12 = vmul.f32 %v4354_v6, %v4310_v4  ;;  %s3696_s28 = sld [smem:[#allocation2 + $0x2]]  ;;  %v4451_v16 = vstv %s3700_s23 }
  0x3a   : > { %9707 = vst [vmem:[#allocation10_spill] sm:$0xff] %v4367_v8  ;;  %9710 = vst [vmem:[#allocation13_spill] sm:$0xff] %v4383_v11  ;;  %s3699_s29 = sld [smem:[#allocation2 + $0x80]]  ;;  %v4453_v17 = vstv %s3705_s24 }
  0x3b   : > { %735 = vrot.lane.b32.xlu1 %v4300_v2, %s9395_s13  ;;  %731 = vrot.lane.b32.xlu0 %v4303_v3, %s9395_s13  ;;  %9711 = vst [vmem:[#allocation14_spill] sm:$0xff] %v4391_v12  ;;  %9712 = vst [vmem:[#allocation15_spill] sm:$0xff] %v4395_v13  ;;  %s3701_s5 = sld [smem:[#allocation2 + $0x82]] }
  0x3c   : > { %s3704_s6 = sld [smem:[#allocation2 + $0x100]]  ;;  %9713 = vst [vmem:[#allocation16_spill] sm:$0xff] %v4445_v14  ;;  %9715 = vst [vmem:[#allocation18_spill] sm:$0xff] %v4451_v16  ;;  %v4455_v18 = vstv %s3710_s25 }
  0x3d   : > { %s3706_s7 = sld [smem:[#allocation2 + $0x102]]  ;;  %9716 = vst [vmem:[#allocation19_spill] sm:$0xff] %v4453_v17  ;;  %9717 = vst [vmem:[#allocation20_spill] sm:$0xff] %v4455_v18  ;;  %v4465_v22 = vstv %s3715_s26 }
  0x3e   : > { %s4433_s8 = sld [smem:[#allocation2 + $0x180]]  ;;  %9721 = vst [vmem:[#allocation24_spill] sm:$0xff] %v4465_v22  ;;  %v4467_v23 = vstv %s253_s27 }
  0x3f   : > { %739 = vrot.lane.b32.xlu1 %v4310_v4, %s9395_s13  ;;  %737 = vrot.lane.b32.xlu0 %v4313_v5, %s9395_s13  ;;  %s3711_s10 = sld [smem:[#allocation2 + $0x182]]  ;;  %v4447_v15 = vstv %s3696_s28  ;;  %9722 = vst [vmem:[#allocation25_spill] sm:$0xff] %v4467_v23  ;;  %s244_s28 = sadd.s32 1, %s4275_s30 }
  0x40   : > { %s4435_s11 = sld [smem:[#allocation2 + $0x200]]  ;;  %9714 = vst [vmem:[#allocation17_spill] sm:$0xff] %v4447_v15  ;;  %v4469_v24 = vstv %s3699_s29  ;;  %v4477_v26 = vmul.f32 %v4447_v15, %v4303_v3  ;;  %v4481_v27 = vmul.f32 %v4447_v15, %v4293_v1  ;;  %v4485_v28 = vmul.f32 %v4447_v15, %v4300_v2 }
  0x41   : > { %s4437_s18 = sld [smem:[#allocation2 + $0x202]]  ;;  %v4461_v21 = vstv %s3701_s5  ;;  %9723 = vst [vmem:[#allocation26_spill] sm:$0xff] %v4469_v24  ;;  %v4489_v29 = vmul.f32 %v4447_v15, %v4290_v0  ;;  %v4566_v49 = vmul.f32 %v4447_v15, %v4310_v4  ;;  %v4606_v61 = vmul.f32 %v4447_v15, %v4313_v5  ;;  %s247_s5 = sadd.s32 2, %s4275_s30 }
  0x42   : > { %s4439_s19 = sld [smem:[#allocation2 + $0x3]]  ;;  %9720 = vst [vmem:[#allocation23_spill] sm:$0xff] %v4461_v21  ;;  %v4493_v30 = vstv %s3704_s6  ;;  %v4499_v32 = vmul.f32 %v4461_v21, %v4303_v3  ;;  %v4503_v33 = vmul.f32 %v4461_v21, %v4293_v1  ;;  %v4520_v38 = vmul.f32 %v4461_v21, %v4300_v2 }
  0x43   : > { %743 = vrot.lane.b32.xlu1 %v4303_v3, %s9393_s14  ;;  %741 = vrot.lane.b32.xlu0 %v4293_v1, %s9393_s14  ;;  %s4441_s20 = sld [smem:[#allocation2 + $0x83]]  ;;  %v4471_v25 = vstv %s3706_s7  ;;  %9725 = vst [vmem:[#allocation28_spill] sm:$0xff] %v4489_v29  ;;  %9726 = vst [vmem:[#allocation29_spill] sm:$0xff] %v4493_v30  ;;  %v4524_v39 = vmul.f32 %v4461_v21, %v4290_v0  ;;  %v4570_v50 = vmul.f32 %v4461_v21, %v4310_v4 }
  0x44   : > { %s4443_s21 = sld [smem:[#allocation2 + $0x103]]  ;;  %9724 = vst [vmem:[#allocation27_spill] sm:$0xff] %v4471_v25  ;;  %v4512_v36 = vstv %s4433_s8  ;;  %v4516_v37 = vmul.f32 %v4471_v25, %v4303_v3  ;;  %v4533_v41 = vmul.f32 %v4471_v25, %v4293_v1  ;;  %v4537_v42 = vmul.f32 %v4471_v25, %v4300_v2  ;;  %9736 = vst [vmem:[#allocation39_spill] sm:$0xff] %v4566_v49 }
  0x45   : > { %s4473_s22 = sld [smem:[#allocation2 + $0x4]]  ;;  %v4495_v31 = vstv %s3711_s10  ;;  %9730 = vst [vmem:[#allocation33_spill] sm:$0xff] %v4512_v36  ;;  %9731 = vst [vmem:[#allocation34_spill] sm:$0xff] %v4524_v39  ;;  %v4541_v43 = vmul.f32 %v4471_v25, %v4290_v0  ;;  %v4594_v58 = vmul.f32 %v4471_v25, %v4310_v4  ;;  %v4610_v62 = vmul.f32 %v4461_v21, %v4313_v5 }
  0x46   : > { %s4491_s23 = sld [smem:[#allocation2 + $0x84]]  ;;  %9727 = vst [vmem:[#allocation30_spill] sm:$0xff] %v4495_v31  ;;  %v4546_v44 = vstv %s4435_s11  ;;  %v4550_v45 = vmul.f32 %v4495_v31, %v4303_v3  ;;  %v4554_v46 = vmul.f32 %v4495_v31, %v4293_v1  ;;  %v4558_v47 = vmul.f32 %v4495_v31, %v4300_v2  ;;  %9737 = vst [vmem:[#allocation40_spill] sm:$0xff] %v4570_v50 }
  0x47   : > { %747 = vrot.lane.b32.xlu1 %v4300_v2, %s9393_s14  ;;  %745 = vrot.lane.b32.xlu0 %v4290_v0, %s9393_s14  ;;  %s4505_s24 = sld [smem:[#allocation2 + $0x104]]  ;;  %v4529_v40 = vstv %s4437_s18  ;;  %9733 = vst [vmem:[#allocation36_spill] sm:$0xff] %v4541_v43  ;;  %9734 = vst [vmem:[#allocation37_spill] sm:$0xff] %v4546_v44  ;;  %v4562_v48 = vmul.f32 %v4495_v31, %v4290_v0  ;;  %v4598_v59 = vmul.f32 %v4495_v31, %v4310_v4 }
  0x48   : > { %s4526_s25 = sld [smem:[#allocation2 + $0x184]]  ;;  %9732 = vst [vmem:[#allocation35_spill] sm:$0xff] %v4529_v40  ;;  %v4578_v54 = vmul.f32 %v4529_v40, %v4303_v3  ;;  %v4582_v55 = vmul.f32 %v4529_v40, %v4293_v1  ;;  %v4586_v56 = vmul.f32 %v4529_v40, %v4300_v2  ;;  %v4590_v57 = vmul.f32 %v4529_v40, %v4290_v0 }
  0x49   : > { %s4543_s26 = sld [smem:[#allocation2 + $0x204]]  ;;  %9735 = vst [vmem:[#allocation38_spill] sm:$0xff] %v4562_v48  ;;  %9742 = vst [vmem:[#allocation45_spill] sm:$0xff] %v4594_v58  ;;  %v4602_v60 = vmul.f32 %v4529_v40, %v4310_v4  ;;  %v4614_v63 = vmul.f32 %v4471_v25, %v4313_v5 }
  0x4a   : > { %9740 = vst [vmem:[#allocation43_spill] sm:$0xff] %v4586_v56  ;;  %9741 = vst [vmem:[#allocation44_spill] sm:$0xff] %v4590_v57  ;;  %s242_s27 = sld [smem:[#allocation4 + %s4275_s30]] }
  0x4b   : > { %751 = vrot.lane.b32.xlu1 %v4310_v4, %s9393_s14  ;;  %749 = vrot.lane.b32.xlu0 %v4313_v5, %s9393_s14  ;;  %9743 = vst [vmem:[#allocation46_spill] sm:$0xff] %v4598_v59  ;;  %9744 = vst [vmem:[#allocation47_spill] sm:$0xff] %v4602_v60  ;;  %s245_s29 = sld [smem:[#allocation4 + %s244_s28]] }
  0x4c   : > { %9745 = vst [vmem:[#allocation48_spill] sm:$0xff] %v4606_v61  ;;  %9746 = vst [vmem:[#allocation49_spill] sm:$0xff] %v4610_v62  ;;  %s248_s30 = sld [smem:[#allocation4 + %s247_s5]] }
  0x4d   : > { %9747 = vst [vmem:[#allocation50_spill] sm:$0xff] %v4614_v63 }
  0x4f   : > { %719 = vrot.lane.b32.xlu1 %v4303_v3, %s4194_s16  ;;  %717 = vrot.lane.b32.xlu0 %v4293_v1, %s4194_s16  ;;  %v4658_v25 = vstv %s4543_s26 }
  0x50   : > { %9760 = vst [vmem:[#allocation63_spill] sm:$0xff] %v4658_v25 }
  0x53   : > { %723 = vrot.lane.b32.xlu1 %v4300_v2, %s4194_s16  ;;  %721 = vrot.lane.b32.xlu0 %v4290_v0, %s4194_s16 }
  0x57   : > { %727 = vrot.lane.b32.xlu1 %v4310_v4, %s4194_s16  ;;  %725 = vrot.lane.b32.xlu0 %v4313_v5, %s4194_s16 }
  0x5b   : > { %707 = vrot.lane.b32.xlu1 %v4303_v3, %s4195_s17  ;;  %705 = vrot.lane.b32.xlu0 %v4293_v1, %s4195_s17  ;;  %v4622_v1 = vmul.f32 %v4529_v40, %v4313_v5  ;;  %v4627_v3 = vshrl.u32 %v393_v51, 7  ;;  %v4652_v40 = vstv %s4505_s24  ;;  %v4655_v51 = vstv %s4526_s25 }
  0x5c   : > { %9758 = vst [vmem:[#allocation61_spill] sm:$0xff] %v4652_v40  ;;  %9759 = vst [vmem:[#allocation62_spill] sm:$0xff] %v4655_v51 }
  0x5d   : > { %9749 = vst [vmem:[#allocation52_spill] sm:$0xff] %v4622_v1  ;;  %9751 = vst [vmem:[#allocation54_spill] sm:$0xff] %v4627_v3 }
  0x5f   : > { %711 = vrot.lane.b32.xlu1 %v4300_v2, %s4195_s17  ;;  %709 = vrot.lane.b32.xlu0 %v4290_v0, %s4195_s17  ;;  %v4618_v0 = vmul.f32 %v4495_v31, %v4313_v5  ;;  %v4625_v2 = vstv %s4439_s19  ;;  %v4645_v31 = vstv %s4491_s23 }
  0x60   : > { %9750 = vst [vmem:[#allocation53_spill] sm:$0xff] %v4625_v2  ;;  %9757 = vst [vmem:[#allocation60_spill] sm:$0xff] %v4645_v31 }
  0x61   : > { %9748 = vst [vmem:[#allocation51_spill] sm:$0xff] %v4618_v0 }
  0x63   : > { %715 = vrot.lane.b32.xlu1 %v4310_v4, %s4195_s17  ;;  %713 = vrot.lane.b32.xlu0 %v4313_v5, %s4195_s17  ;;  %v4630_v4 = vstv %s4441_s20 }
  0x64   : > { %9752 = vst [vmem:[#allocation55_spill] sm:$0xff] %v4630_v4 }
  0x67   : > { %286 = vrot.lane.b32.xlu1 %v4367_v8, %s4195_s17  ;;  %284 = vrot.lane.b32.xlu0 %v4371_v9, %s4195_s17 }
  0x6b   : > { %290 = vrot.lane.b32.xlu1 %v4379_v10, %s4195_s17  ;;  %288 = vrot.lane.b32.xlu0 %v4383_v11, %s4195_s17 }
  0x6f   : > { %294 = vrot.lane.b32.xlu1 %v4391_v12, %s4195_s17  ;;  %292 = vrot.lane.b32.xlu0 %v4395_v13, %s4195_s17 }
  0x73   : > { %298 = vrot.lane.b32.xlu1 %v4367_v8, %s4194_s16  ;;  %296 = vrot.lane.b32.xlu0 %v4371_v9, %s4194_s16 }
  0x77   : > { %302 = vrot.lane.b32.xlu1 %v4379_v10, %s4194_s16  ;;  %300 = vrot.lane.b32.xlu0 %v4383_v11, %s4194_s16 }
  0x7b   : > { %306 = vrot.lane.b32.xlu1 %v4391_v12, %s4194_s16  ;;  %304 = vrot.lane.b32.xlu0 %v4395_v13, %s4194_s16 }
  0x7f   : > { %310 = vrot.lane.b32.xlu1 %v4367_v8, %s9395_s13  ;;  %308 = vrot.lane.b32.xlu0 %v4371_v9, %s9395_s13 }
  0x83   : > { %314 = vrot.lane.b32.xlu1 %v4379_v10, %s9395_s13  ;;  %312 = vrot.lane.b32.xlu0 %v4383_v11, %s9395_s13 }
  0x87   : > { %318 = vrot.lane.b32.xlu1 %v4391_v12, %s9395_s13  ;;  %316 = vrot.lane.b32.xlu0 %v4395_v13, %s9395_s13  ;;  %s4463_s13 = sld [smem:[#allocation2 + $0x203]]  ;;  %v4633_v13 = vstv %s4443_s21 }
  0x88   : > { %9753 = vst [vmem:[#allocation56_spill] sm:$0xff] %v4633_v13 }
  0x8b   : > { %322 = vrot.lane.b32.xlu1 %v4367_v8, %s9393_s14  ;;  %320 = vrot.lane.b32.xlu0 %v4371_v9, %s9393_s14  ;;  %v4642_v9 = vstv %s4473_s22 }
  0x8c   : > { %9756 = vst [vmem:[#allocation59_spill] sm:$0xff] %v4642_v9 }
  0x8f   : > { %326 = vrot.lane.b32.xlu1 %v4379_v10, %s9393_s14  ;;  %324 = vrot.lane.b32.xlu0 %v4383_v11, %s9393_s14  ;;  %s4449_s14 = sld [smem:[#allocation2 + $0x183]]  ;;  %v4639_v10 = vstv %s4463_s13  ;;  %s9879_s13 = smov 127  }
  0x90   : > { %9755 = vst [vmem:[#allocation58_spill] sm:$0xff] %v4639_v10 }
  0x95   : > { %v4636_v12 = vstv %s4449_s14  ;;  %s9885_s14 = smov 126  }
  0x96   : > { %9754 = vst [vmem:[#allocation57_spill] sm:$0xff] %v4636_v12 }
  0xa9   : > { %v4457_v19 = vpop.permute.xlu1 %733  ;;  %v4459_v20 = vpop.permute.xlu0 %729 }
  0xaa   : > { %9718 = vst [vmem:[#allocation21_spill] sm:$0xff] %v4457_v19  ;;  %9719 = vst [vmem:[#allocation22_spill] sm:$0xff] %v4459_v20  ;;  %v4649_v5 = vmul.f32 %v4457_v19, %v4445_v14  ;;  %v4662_v21 = vmul.f32 %v4457_v19, %v4451_v16  ;;  %v4666_v15 = vmul.f32 %v4457_v19, %v4453_v17 }
  0xab   : > { %v4670_v8 = vmul.f32 %v4457_v19, %v4455_v18  ;;  %v4674_v6 = vmul.f32 %v4457_v19, %v4465_v22  ;;  %v759_v25 = vmul.f32 %v4459_v20, %v4445_v14  ;;  %v825_v40 = vmul.f32 %v4459_v20, %v4451_v16 }
  0xac   : > { %v897_v51 = vmul.f32 %v4459_v20, %v4453_v17  ;;  %v957_v3 = vmul.f32 %v4459_v20, %v4455_v18  ;;  %v1029_v31 = vmul.f32 %v4459_v20, %v4465_v22 }
  0xad   : > { %v4507_v34 = vpop.permute.xlu1 %735  ;;  %v4509_v35 = vpop.permute.xlu0 %731  ;;  %9761 = vst [vmem:[#allocation64_spill] sm:$0xff] %v4674_v6 }
  0xae   : > { %9728 = vst [vmem:[#allocation31_spill] sm:$0xff] %v4507_v34  ;;  %9729 = vst [vmem:[#allocation32_spill] sm:$0xff] %v4509_v35  ;;  %v762_v19 = vmul.f32 %v4507_v34, %v4445_v14  ;;  %v828_v9 = vmul.f32 %v4507_v34, %v4451_v16  ;;  %v900_v10 = vmul.f32 %v4507_v34, %v4453_v17 }
  0xaf   : > { %v960_v0 = vmul.f32 %v4507_v34, %v4455_v18  ;;  %v1032_v63 = vmul.f32 %v4507_v34, %v4465_v22  ;;  %v760_v12 = vmul.f32 %v4509_v35, %v4445_v14  ;;  %v826_v20 = vmul.f32 %v4509_v35, %v4451_v16 }
  0xb0   : > { %v898_v62 = vmul.f32 %v4509_v35, %v4453_v17  ;;  %v958_v61 = vmul.f32 %v4509_v35, %v4455_v18  ;;  %v1030_v60 = vmul.f32 %v4509_v35, %v4465_v22 }
  0xb1   : > { %v4572_v52 = vpop.permute.xlu1 %739  ;;  %v4574_v53 = vpop.permute.xlu0 %737 }
  0xb2   : > { %9738 = vst [vmem:[#allocation41_spill] sm:$0xff] %v4572_v52  ;;  %9739 = vst [vmem:[#allocation42_spill] sm:$0xff] %v4574_v53  ;;  %v4709_v34 = vmul.f32 %v4572_v52, %v4445_v14  ;;  %v4713_v4 = vmul.f32 %v4572_v52, %v4451_v16  ;;  %v4717_v2 = vmul.f32 %v4572_v52, %v4453_v17 }
  0xb3   : > { %v4722_v58 = vmul.f32 %v4572_v52, %v4455_v18  ;;  %v4726_v35 = vmul.f32 %v4572_v52, %v4465_v22  ;;  %v4730_v50 = vmul.f32 %v4574_v53, %v4445_v14  ;;  %v4739_v52 = vmul.f32 %v4574_v53, %v4451_v16 }
  0xb4   : > { %9762 = vst [vmem:[#allocation65_spill] sm:$0xff] %v4709_v34  ;;  %9763 = vst [vmem:[#allocation66_spill] sm:$0xff] %v4713_v4  ;;  %v4743_v14 = vmul.f32 %v4574_v53, %v4453_v17  ;;  %v4748_v56 = vmul.f32 %v4574_v53, %v4455_v18 }
  0xb5   : > { %v744_v11 = vpop.permute.xlu1 %743  ;;  %v742_v7 = vpop.permute.xlu0 %741  ;;  %9764 = vst [vmem:[#allocation67_spill] sm:$0xff] %v4717_v2  ;;  %9765 = vst [vmem:[#allocation68_spill] sm:$0xff] %v4722_v58 }
  0xb6   : > { %v754_v13 = vmul.f32 %v744_v11, %v4467_v23  ;;  %v820_v59 = vmul.f32 %v744_v11, %v4469_v24  ;;  %9766 = vst [vmem:[#allocation69_spill] sm:$0xff] %v4726_v35  ;;  %9767 = vst [vmem:[#allocation70_spill] sm:$0xff] %v4730_v50  ;;  %v892_v49 = vmul.f32 %v744_v11, %v4493_v30 }
  0xb7   : > { %v952_v43 = vmul.f32 %v744_v11, %v4512_v36  ;;  %v1024_v39 = vmul.f32 %v744_v11, %v4546_v44  ;;  %v753_v29 = vmul.f32 %v742_v7, %v4467_v23  ;;  %v819_v58 = vmul.f32 %v742_v7, %v4469_v24  ;;  %9768 = vst [vmem:[#allocation71_spill] sm:$0xff] %v4739_v52 }
  0xb8   : > { %9769 = vst [vmem:[#allocation72_spill] sm:$0xff] %v4743_v14  ;;  %v766_v50 = vadd.f32 %v760_v12, %v754_v13  ;;  %v891_v35 = vmul.f32 %v742_v7, %v4493_v30  ;;  %9770 = vst [vmem:[#allocation73_spill] sm:$0xff] %v4748_v56  ;;  %v4752_v11 = vmul.f32 %v4574_v53, %v4465_v22 }
  0xb9   : > { %v748_v1 = vpop.permute.xlu1 %747  ;;  %v746_v57 = vpop.permute.xlu0 %745  ;;  %v832_v2 = vadd.f32 %v826_v20, %v820_v59  ;;  %v951_v4 = vmul.f32 %v742_v7, %v4512_v36  ;;  %v904_v16 = vadd.f32 %v898_v62, %v892_v49  ;;  %v1023_v52 = vmul.f32 %v742_v7, %v4546_v44 }
  0xba   : > { %v756_v17 = vmul.f32 %v748_v1, %v4467_v23  ;;  %v822_v12 = vmul.f32 %v748_v1, %v4469_v24  ;;  %v964_v13 = vadd.f32 %v958_v61, %v952_v43  ;;  %v1036_v14 = vadd.f32 %v1030_v60, %v1024_v39 }
  0xbb   : > { %v765_v34 = vadd.f32 %v759_v25, %v753_v29  ;;  %v831_v6 = vadd.f32 %v825_v40, %v819_v58  ;;  %v4759_v18 = vadd.f32 %v4477_v26, %v766_v50  ;;  %v903_v56 = vadd.f32 %v897_v51, %v891_v35 }
  0xbc   : > { %v894_v53 = vmul.f32 %v748_v1, %v4493_v30  ;;  %v954_v20 = vmul.f32 %v748_v1, %v4512_v36  ;;  %v4766_v7 = vadd.f32 %v4499_v32, %v832_v2  ;;  %v963_v62 = vadd.f32 %v957_v3, %v951_v4  ;;  %v9774_v2 = vld [vmem:[#allocation64_spill] sm:$0xff]  ;;  %v9775_v3 = vld [vmem:[#allocation65_spill] sm:$0xff]  ;;  %v9777_v51 = vld [vmem:[#allocation67_spill] sm:$0xff] }
  0xbd   : > { %v752_v48 = vpop.permute.xlu1 %751  ;;  %v750_v59 = vpop.permute.xlu0 %749  ;;  %v1026_v43 = vmul.f32 %v748_v1, %v4546_v44  ;;  %v755_v25 = vmul.f32 %v746_v57, %v4467_v23  ;;  %v4771_v29 = vadd.f32 %v4516_v37, %v904_v16  ;;  %v1035_v26 = vadd.f32 %v1029_v31, %v1023_v52 }
  0xbe   : > { %v768_v35 = vadd.f32 %v762_v19, %v756_v17  ;;  %v834_v39 = vadd.f32 %v828_v9, %v822_v12  ;;  %v4774_v40 = vadd.f32 %v4550_v45, %v964_v13  ;;  %v4777_v50 = vadd.f32 %v4578_v54, %v1036_v14  ;;  %v9778_v12 = vld [vmem:[#allocation43_spill] sm:$0xff] }
  0xbf   : > { %v4780_v32 = vadd.f32 %v4481_v27, %v765_v34  ;;  %v4783_v58 = vadd.f32 %v4503_v33, %v831_v6  ;;  %v4786_v60 = vadd.f32 %v4533_v41, %v903_v56  ;;  %v906_v16 = vadd.f32 %v900_v10, %v894_v53 }
  0xc0   : > { %v966_v37 = vadd.f32 %v960_v0, %v954_v20  ;;  %v821_v17 = vmul.f32 %v746_v57, %v4469_v24  ;;  %v4790_v9 = vadd.f32 %v4554_v46, %v963_v62  ;;  %v1038_v19 = vadd.f32 %v1032_v63, %v1026_v43  ;;  %v9779_v20 = vld [vmem:[#allocation28_spill] sm:$0xff] }
  0xc1   : > { %v4763_v49 = vpop.permute.xlu1 %719  ;;  %v767_v14 = vadd.f32 %v4649_v5, %v755_v25  ;;  %v893_v31 = vmul.f32 %v746_v57, %v4493_v30  ;;  %v4795_v27 = vadd.f32 %v4582_v55, %v1035_v26  ;;  %v4798_v6 = vadd.f32 %v4485_v28, %v768_v35  ;;  %v4804_v34 = vpop.permute.xlu0 %717  ;;  %v9776_v5 = vld [vmem:[#allocation66_spill] sm:$0xff]  ;;  %v9781_v25 = vld [vmem:[#allocation68_spill] sm:$0xff] }
  0xc2   : > { %9771 = vst [vmem:[#allocation74_spill] sm:$0xff] %v4763_v49  ;;  %v4801_v33 = vadd.f32 %v4520_v38, %v834_v39  ;;  %v953_v10 = vmul.f32 %v746_v57, %v4512_v36  ;;  %9772 = vst [vmem:[#allocation75_spill] sm:$0xff] %v4804_v34  ;;  %v1025_v45 = vmul.f32 %v746_v57, %v4546_v44  ;;  %v9784_v39 = vld [vmem:[#allocation36_spill] sm:$0xff] }
  0xc3   : > { %v758_v46 = vmul.f32 %v752_v48, %v4467_v23  ;;  %v824_v52 = vmul.f32 %v752_v48, %v4469_v24  ;;  %v896_v53 = vmul.f32 %v752_v48, %v4493_v30  ;;  %v4813_v28 = vadd.f32 %v4537_v42, %v906_v16 }
  0xc4   : > { %v4816_v38 = vadd.f32 %v4558_v47, %v966_v37  ;;  %v833_v54 = vadd.f32 %v4662_v21, %v821_v17  ;;  %v956_v55 = vmul.f32 %v752_v48, %v4512_v36  ;;  %v905_v56 = vadd.f32 %v4666_v15, %v893_v31  ;;  %v9785_v37 = vld [vmem:[#allocation69_spill] sm:$0xff]  ;;  %v9786_v31 = vld [vmem:[#allocation70_spill] sm:$0xff] }
  0xc5   : > { %v4806_v41 = vpop.permute.xlu1 %723  ;;  %v1028_v57 = vmul.f32 %v752_v48, %v4546_v44  ;;  %v757_v61 = vmul.f32 %v750_v59, %v4467_v23  ;;  %v823_v63 = vmul.f32 %v750_v59, %v4469_v24  ;;  %v965_v0 = vadd.f32 %v4670_v8, %v953_v10  ;;  %v9780_v8 = vld [vmem:[#allocation34_spill] sm:$0xff]  ;;  %v9787_v10 = vld [vmem:[#allocation71_spill] sm:$0xff] }
  0xc6   : > { %9773 = vst [vmem:[#allocation76_spill] sm:$0xff] %v4806_v41  ;;  %v895_v42 = vmul.f32 %v750_v59, %v4493_v30  ;;  %v955_v1 = vmul.f32 %v750_v59, %v4512_v36  ;;  %v1027_v47 = vmul.f32 %v750_v59, %v4546_v44  ;;  %v1037_v21 = vadd.f32 %v9774_v2, %v1025_v45  ;;  %v4842_v59 = vpop.permute.xlu0 %721  ;;  %v9818_v30 = vld [vmem:[#allocation60_spill] sm:$0xff]  ;;  %v9819_v23 = vld [vmem:[#allocation54_spill] sm:$0xff] }
  0xc7   : > { %v770_v4 = vadd.f32 %v9775_v3, %v758_v46  ;;  %v836_v15 = vadd.f32 %v9776_v5, %v824_v52  ;;  %v908_v48 = vadd.f32 %v9777_v51, %v896_v53  ;;  %v4833_v13 = vadd.f32 %v9778_v12, %v1038_v19  ;;  %9782 = vst [vmem:[#allocation64_spill] sm:$0xff] %v4842_v59  ;;  %v9789_v52 = vld [vmem:[#allocation72_spill] sm:$0xff] }
  0xc8   : > { %v4836_v62 = vadd.f32 %v9779_v20, %v767_v14  ;;  %v4839_v43 = vadd.f32 %v9780_v8, %v833_v54  ;;  %v968_v26 = vadd.f32 %v9781_v25, %v956_v55  ;;  %v4847_v16 = vadd.f32 %v9784_v39, %v905_v56  ;;  %v9788_v14 = vld [vmem:[#allocation38_spill] sm:$0xff]  ;;  %v9790_v54 = vld [vmem:[#allocation73_spill] sm:$0xff]  ;;  %v9791_v3 = vld [vmem:[#allocation44_spill] sm:$0xff] }
  0xc9   : > { %v4844_v35 = vpop.permute.xlu1 %727  ;;  %v1040_v17 = vadd.f32 %v9785_v37, %v1028_v57  ;;  %v769_v19 = vadd.f32 %v9786_v31, %v757_v61  ;;  %v835_v45 = vadd.f32 %v9787_v10, %v823_v63  ;;  %v4853_v46 = vadd.f32 %v9788_v14, %v965_v0  ;;  %v9792_v56 = vld [vmem:[#allocation39_spill] sm:$0xff]  ;;  %v9793_v57 = vld [vmem:[#allocation40_spill] sm:$0xff]  ;;  %v9795_v61 = vld [vmem:[#allocation45_spill] sm:$0xff] }
  0xca   : > { %9783 = vst [vmem:[#allocation65_spill] sm:$0xff] %v4844_v35  ;;  %v907_v53 = vadd.f32 %v9789_v52, %v895_v42  ;;  %v967_v55 = vadd.f32 %v9790_v54, %v955_v1  ;;  %v1039_v2 = vadd.f32 %v4752_v11, %v1027_v47  ;;  %v4859_v5 = vadd.f32 %v9791_v3, %v1037_v21  ;;  %v9797_v0 = vld [vmem:[#allocation46_spill] sm:$0xff]  ;;  %v9799_v42 = vld [vmem:[#allocation53_spill] sm:$0xff]  ;;  %v9800_v8 = vld [vmem:[#allocation55_spill] sm:$0xff] }
  0xcb   : > { %v4862_v51 = vadd.f32 %v9792_v56, %v770_v4  ;;  %v4865_v12 = vadd.f32 %v9793_v57, %v836_v15  ;;  %v4868_v63 = vadd.f32 %v9795_v61, %v908_v48  ;;  %v4871_v20 = vadd.f32 %v9797_v0, %v968_v26  ;;  %v9801_v47 = vld [vmem:[#allocation56_spill] sm:$0xff]  ;;  %v9802_v4 = vld [vmem:[#allocation47_spill] sm:$0xff]  ;;  %v9806_v48 = vld [vmem:[#allocation49_spill] sm:$0xff] }
  0xcc   : > { %v784_v1 = vmul.f32 %v4763_v49, %v9799_v42  ;;  %v850_v11 = vmul.f32 %v4763_v49, %v9800_v8  ;;  %v922_v21 = vmul.f32 %v4763_v49, %v9801_v47  ;;  %v4880_v25 = vadd.f32 %v9802_v4, %v1040_v17  ;;  %v9804_v15 = vld [vmem:[#allocation48_spill] sm:$0xff]  ;;  %v9808_v26 = vld [vmem:[#allocation57_spill] sm:$0xff]  ;;  %v9809_v10 = vld [vmem:[#allocation50_spill] sm:$0xff] }
  0xcd   : > { %9794 = vst [vmem:[#allocation66_spill] sm:$0xff] %v4865_v12  ;;  %9796 = vst [vmem:[#allocation67_spill] sm:$0xff] %v4868_v63  ;;  %v4883_v39 = vadd.f32 %v9804_v15, %v769_v19  ;;  %v4886_v37 = vadd.f32 %v9806_v48, %v835_v45  ;;  %v982_v31 = vmul.f32 %v4763_v49, %v9808_v26  ;;  %v9811_v52 = vld [vmem:[#allocation51_spill] sm:$0xff]  ;;  %v9813_v3 = vld [vmem:[#allocation52_spill] sm:$0xff]  ;;  %v4901_v19 = vpop.permute.xlu0 %725  ;;  %v708_v61 = vpop.permute.xlu1 %707  ;;  %vm688_vm0 = vcmp.lt.s32.totalorder %v9819_v23, 6 }
  0xce   : > { %9798 = vst [vmem:[#allocation43_spill] sm:$0xff] %v4871_v20  ;;  %9803 = vst [vmem:[#allocation28_spill] sm:$0xff] %v4880_v25  ;;  %v4891_v14 = vadd.f32 %v9809_v10, %v907_v53  ;;  %v4894_v54 = vadd.f32 %v9811_v52, %v967_v55  ;;  %v4897_v56 = vadd.f32 %v9813_v3, %v1039_v2  ;;  %v9815_v17 = vld [vmem:[#allocation58_spill] sm:$0xff]  ;;  %vm610_vm1 = vcmp.lt.s32.totalorder %v9819_v23, 7 }
  0xcf   : > { %9805 = vst [vmem:[#allocation34_spill] sm:$0xff] %v4883_v39  ;;  %9807 = vst [vmem:[#allocation68_spill] sm:$0xff] %v4886_v37  ;;  %v1054_v57 = vmul.f32 %v4763_v49, %v9815_v17  ;;  %v783_v45 = vmul.f32 %v4804_v34, %v9799_v42  ;;  %v849_v0 = vmul.f32 %v4804_v34, %v9800_v8  ;;  %vm467_vm2 = vcmp.lt.s32.totalorder %v9819_v23, 1 }
  0xd0   : > { %9810 = vst [vmem:[#allocation36_spill] sm:$0xff] %v4891_v14  ;;  %9812 = vst [vmem:[#allocation69_spill] sm:$0xff] %v4894_v54  ;;  %v921_v53 = vmul.f32 %v4804_v34, %v9801_v47  ;;  %v981_v55 = vmul.f32 %v4804_v34, %v9808_v26  ;;  %v1053_v2 = vmul.f32 %v4804_v34, %v9815_v17  ;;  %v9817_v34 = vld [vmem:[#allocation59_spill] sm:$0xff]  ;;  %vm395_vm3 = vcmp.lt.s32.totalorder %v9819_v23, 2  ;;  %v9877_v23 = vld [vmem:[#allocation20_spill] sm:$0xff] }
  0xd1   : > { %9814 = vst [vmem:[#allocation70_spill] sm:$0xff] %v4897_v56  ;;  %9816 = vst [vmem:[#allocation71_spill] sm:$0xff] %v4901_v19  ;;  %v4915_v4 = vmul.f32 %v4806_v41, %v9799_v42  ;;  %v4919_v15 = vmul.f32 %v4806_v41, %v9800_v8  ;;  %v4923_v48 = vmul.f32 %v4806_v41, %v9801_v47  ;;  %v9821_v56 = vld [vmem:[#allocation62_spill] sm:$0xff]  ;;  %v706_v37 = vpop.permute.xlu0 %705 }
  0xd2   : > { %v4927_v10 = vmul.f32 %v4806_v41, %v9808_v26  ;;  %v4931_v52 = vmul.f32 %v4806_v41, %v9815_v17  ;;  %v4935_v3 = vmul.f32 %v4842_v59, %v9799_v42  ;;  %v796_v49 = vmul.f32 %v708_v61, %v9817_v34 }
  0xd3   : > { %v4940_v22 = vmul.f32 %v4842_v59, %v9800_v8  ;;  %v790_v44 = vadd.f32 %v784_v1, %v4759_v18  ;;  %v856_v36 = vadd.f32 %v850_v11, %v4766_v7  ;;  %v862_v24 = vmul.f32 %v708_v61, %v9818_v30 }
  0xd4   : > { %v4948_v41 = vmul.f32 %v4842_v59, %v9801_v47  ;;  %v4952_v14 = vmul.f32 %v4842_v59, %v9808_v26  ;;  %v4956_v63 = vmul.f32 %v4842_v59, %v9815_v17  ;;  %v4960_v18 = vmul.f32 %v4844_v35, %v9799_v42 }
  0xd5   : > { %v4965_v7 = vmul.f32 %v4844_v35, %v9800_v8  ;;  %v802_v1 = vadd.f32 %v796_v49, %v790_v44  ;;  %v868_v11 = vadd.f32 %v862_v24, %v856_v36  ;;  %v994_v54 = vmul.f32 %v708_v61, %v9821_v56  ;;  %v9827_v36 = vld [vmem:[#allocation61_spill] sm:$0xff] }
  0xd6   : > { %v4970_v39 = vmul.f32 %v4844_v35, %v9801_v47  ;;  %v4974_v59 = vmul.f32 %v4844_v35, %v9808_v26  ;;  %v4978_v25 = vmul.f32 %v4844_v35, %v9815_v17  ;;  %v4982_v20 = vmul.f32 %v4901_v19, %v9799_v42 }
  0xd7   : > { %9820 = vst [vmem:[#allocation38_spill] sm:$0xff] %v4965_v7  ;;  %v4986_v24 = vmul.f32 %v4901_v19, %v9800_v8  ;;  %v934_v44 = vmul.f32 %v708_v61, %v9827_v36  ;;  %v988_v49 = vadd.f32 %v982_v31, %v4774_v40  ;;  %v795_v12 = vmul.f32 %v706_v37, %v9817_v34 }
  0xd8   : > { %9822 = vst [vmem:[#allocation72_spill] sm:$0xff] %v4970_v39  ;;  %9823 = vst [vmem:[#allocation73_spill] sm:$0xff] %v4974_v59  ;;  %v9828_v39 = vld [vmem:[#allocation63_spill] sm:$0xff]  ;;  %v789_v59 = vadd.f32 %v783_v45, %v4780_v32  ;;  %v855_v35 = vadd.f32 %v849_v0, %v4783_v58  ;;  %v808_v42 = vrot.slane %v802_v1, 2  ;;  %v993_v32 = vmul.f32 %v706_v37, %v9821_v56 }
  0xd9   : > { %9824 = vst [vmem:[#allocation44_spill] sm:$0xff] %v4978_v25  ;;  %9825 = vst [vmem:[#allocation39_spill] sm:$0xff] %v4982_v20  ;;  %v1066_v7 = vmul.f32 %v708_v61, %v9828_v39  ;;  %v861_v25 = vmul.f32 %v706_v37, %v9818_v30  ;;  %v874_v20 = vrot.slane %v868_v11, 1  ;;  %v1000_v8 = vadd.f32 %v994_v54, %v988_v49 }
  0xda   : > { %9826 = vst [vmem:[#allocation40_spill] sm:$0xff] %v4986_v24  ;;  %v1060_v24 = vadd.f32 %v1054_v57, %v4777_v50  ;;  %v801_v40 = vadd.f32 %v795_v12, %v789_v59  ;;  %v987_v61 = vadd.f32 %v981_v55, %v4790_v9  ;;  %v928_v45 = vadd.f32 %v922_v21, %v4771_v29  ;;  %v712_v21 = vpop.permute.xlu1 %711 }
  0xdb   : > { %v867_v31 = vadd.f32 %v861_v25, %v855_v35  ;;  %v933_v58 = vmul.f32 %v706_v37, %v9827_v36  ;;  %v1059_v0 = vadd.f32 %v1053_v2, %v4795_v27  ;;  %v1065_v1 = vmul.f32 %v706_v37, %v9828_v39 }
  0xdc   : > { %v1072_v11 = vadd.f32 %v1066_v7, %v1060_v24  ;;  %v807_v54 = vrot.slane %v801_v40, 2  ;;  %v999_v50 = vadd.f32 %v993_v32, %v987_v61  ;;  %v940_v57 = vadd.f32 %v934_v44, %v928_v45 }
  0xdd   : > { %v873_v49 = vrot.slane %v867_v31, 1  ;;  %v1006_v17 = vrot.slane %v1000_v8, 7  ;;  %v927_v59 = vadd.f32 %v921_v53, %v4786_v60  ;;  %v1071_v35 = vadd.f32 %v1065_v1, %v1059_v0 }
  0xde   : > { %v809_v9 = vsel %vm688_vm0, %v807_v54, %v808_v42  ;;  %v810_v29 = vsel %vm688_vm0, %v808_v42, %v807_v54  ;;  %v1005_v8 = vrot.slane %v999_v50, 7  ;;  %v5015_v60 = vmul.f32 %v4901_v19, %v9801_v47 }
  0xdf   : > { %v875_v27 = vsel %vm610_vm1, %v873_v49, %v874_v20  ;;  %v876_v12 = vsel %vm610_vm1, %v874_v20, %v873_v49  ;;  %v939_v55 = vadd.f32 %v933_v58, %v927_v59  ;;  %v5019_v53 = vmul.f32 %v4901_v19, %v9808_v26 }
  0xe0   : > { %v885_v25 = vadd.f32 %v875_v27, %v809_v9  ;;  %v886_v37 = vadd.f32 %v876_v12, %v810_v29  ;;  %v1078_v42 = vrot.slane %v1072_v11, 6  ;;  %v1077_v2 = vrot.slane %v1071_v35, 6  ;;  %v9829_v35 = vld [vmem:[#allocation9_spill] sm:$0xff] }
  0xe1   : > { %v792_v20 = vadd.f32 %v4915_v4, %v4798_v6  ;;  %v798_v44 = vmul.f32 %v712_v21, %v9817_v34  ;;  %v1007_v40 = vsel %vm467_vm2, %v1005_v8, %v1006_v17  ;;  %v1008_v31 = vsel %vm467_vm2, %v1006_v17, %v1005_v8 }
  0xe2   : > { %v945_v7 = vadd.f32 %v939_v55, %v885_v25  ;;  %v946_v24 = vadd.f32 %v940_v57, %v886_v37  ;;  %v858_v61 = vadd.f32 %v4919_v15, %v4801_v33  ;;  %v864_v32 = vmul.f32 %v712_v21, %v9818_v30  ;;  %v710_v15 = vpop.permute.xlu0 %709  ;;  %v716_v55 = vpop.permute.xlu1 %715 }
  0xe3   : > { %v930_v0 = vadd.f32 %v4923_v48, %v4813_v28  ;;  %v996_v6 = vmul.f32 %v712_v21, %v9821_v56  ;;  %v1079_v4 = vsel %vm395_vm3, %v1077_v2, %v1078_v42  ;;  %v1080_v1 = vsel %vm395_vm3, %v1078_v42, %v1077_v2 }
  0xe4   : > { %v1017_v45 = vadd.f32 %v1008_v31, %v945_v7  ;;  %v1018_v58 = vadd.f32 %v1007_v40, %v946_v24  ;;  %v990_v17 = vadd.f32 %v4927_v10, %v4816_v38  ;;  %v1068_v33 = vmul.f32 %v712_v21, %v9828_v39  ;;  %v9831_v38 = vld [vmem:[#allocation8_spill] sm:$0xff]  ;;  %v9833_v40 = vld [vmem:[#allocation66_spill] sm:$0xff] }
  0xe5   : > { %v1062_v49 = vadd.f32 %v4931_v52, %v4833_v13  ;;  %v804_v28 = vadd.f32 %v798_v44, %v792_v20  ;;  %v870_v48 = vadd.f32 %v864_v32, %v858_v61  ;;  %v936_v50 = vmul.f32 %v712_v21, %v9827_v36  ;;  %v9834_v31 = vld [vmem:[#allocation38_spill] sm:$0xff] }
  0xe6   : > { %v1089_v11 = vadd.f32 %v1080_v1, %v1017_v45  ;;  %v1090_v54 = vadd.f32 %v1079_v4, %v1018_v58  ;;  %v1002_v57 = vadd.f32 %v996_v6, %v990_v17  ;;  %v791_v59 = vadd.f32 %v4935_v3, %v4836_v62 }
  0xe7   : > { %v857_v29 = vadd.f32 %v4940_v22, %v4839_v43  ;;  %v797_v27 = vmul.f32 %v710_v15, %v9817_v34  ;;  %v1074_v13 = vadd.f32 %v1068_v33, %v1062_v49  ;;  %v989_v52 = vadd.f32 %v4952_v14, %v4853_v46 }
  0xe8   : > { %v5047_v9 = vmul.f32 %v1089_v11, %v9829_v35  ;;  %v5050_v10 = vmul.f32 %v1090_v54, %v9831_v38  ;;  %v863_v12 = vmul.f32 %v710_v15, %v9818_v30  ;;  %v995_v21 = vmul.f32 %v710_v15, %v9821_v56 }
  0xe9   : > { %v812_v62 = vrot.slane %v804_v28, 2  ;;  %v1061_v3 = vadd.f32 %v4956_v63, %v4859_v5  ;;  %v803_v25 = vadd.f32 %v797_v27, %v791_v59  ;;  %v1067_v37 = vmul.f32 %v710_v15, %v9828_v39  ;;  %v9839_v27 = vld [vmem:[#allocation44_spill] sm:$0xff] }
  0xea   : > { %9830 = vst [vmem:[#allocation45_spill] sm:$0xff] %v5047_v9  ;;  %9832 = vst [vmem:[#allocation46_spill] sm:$0xff] %v5050_v10  ;;  %1103 = vrot.lane.b32.xlu1 %v5050_v10, %s4195_s17  ;;  %v878_v22 = vrot.slane %v870_v48, 1  ;;  %v929_v43 = vadd.f32 %v4948_v41, %v4847_v16  ;;  %v869_v46 = vadd.f32 %v863_v12, %v857_v29  ;;  %1101 = vrot.lane.b32.xlu0 %v5047_v9, %s4195_s17  ;;  %v9836_v48 = vld [vmem:[#allocation43_spill] sm:$0xff]  ;;  %v9838_v29 = vld [vmem:[#allocation28_spill] sm:$0xff] }
  0xeb   : > { %v1001_v14 = vadd.f32 %v995_v21, %v989_v52  ;;  %v1010_v8 = vrot.slane %v1002_v57, 7  ;;  %v811_v42 = vrot.slane %v803_v25, 2  ;;  %v935_v5 = vmul.f32 %v710_v15, %v9827_v36  ;;  %v9835_v15 = vld [vmem:[#allocation58_spill] sm:$0xff]  ;;  %v9837_v57 = vld [vmem:[#allocation73_spill] sm:$0xff]  ;;  %v714_v52 = vpop.permute.xlu0 %713 }
  0xec   : > { %v1073_v63 = vadd.f32 %v1067_v37, %v1061_v3  ;;  %v1082_v2 = vrot.slane %v1074_v13, 6  ;;  %v877_v7 = vrot.slane %v869_v46, 1  ;;  %v800_v24 = vmul.f32 %v716_v55, %v9817_v34  ;;  %v9840_v37 = vld [vmem:[#allocation34_spill] sm:$0xff] }
  0xed   : > { %v866_v20 = vmul.f32 %v716_v55, %v9818_v30  ;;  %v813_v44 = vsel %vm688_vm0, %v811_v42, %v812_v62  ;;  %v814_v41 = vsel %vm688_vm0, %v812_v62, %v811_v42  ;;  %v794_v16 = vadd.f32 %v4960_v18, %v4862_v51 }
  0xee   : > { %v860_v61 = vadd.f32 %v9834_v31, %v9833_v40  ;;  %v879_v32 = vsel %vm610_vm1, %v877_v7, %v878_v22  ;;  %v880_v45 = vsel %vm610_vm1, %v878_v22, %v877_v7  ;;  %v1009_v58 = vrot.slane %v1001_v14, 7  ;;  %v9841_v22 = vld [vmem:[#allocation39_spill] sm:$0xff]  ;;  %v9842_v7 = vld [vmem:[#allocation68_spill] sm:$0xff] }
  0xef   : > { %v1081_v6 = vrot.slane %v1073_v63, 6  ;;  %v942_v4 = vadd.f32 %v936_v50, %v930_v0  ;;  %v887_v1 = vadd.f32 %v879_v32, %v813_v44  ;;  %v888_v17 = vadd.f32 %v880_v45, %v814_v41  ;;  %v9844_v41 = vld [vmem:[#allocation69_spill] sm:$0xff] }
  0xf0   : > { %v941_v33 = vadd.f32 %v935_v5, %v929_v43  ;;  %v1057_v11 = vmul.f32 %v4901_v19, %v9835_v15  ;;  %v806_v54 = vadd.f32 %v800_v24, %v794_v16  ;;  %v872_v51 = vadd.f32 %v866_v20, %v860_v61  ;;  %v9843_v24 = vld [vmem:[#allocation40_spill] sm:$0xff] }
  0xf1   : > { %v998_v18 = vmul.f32 %v716_v55, %v9821_v56  ;;  %v948_v28 = vadd.f32 %v942_v4, %v888_v17  ;;  %v992_v59 = vadd.f32 %v9837_v57, %v9836_v48  ;;  %v1064_v13 = vadd.f32 %v9839_v27, %v9838_v29 }
  0xf2   : > { %v947_v49 = vadd.f32 %v941_v33, %v887_v1  ;;  %v1011_v0 = vsel %vm467_vm2, %v1009_v58, %v1010_v8  ;;  %v1012_v50 = vsel %vm467_vm2, %v1010_v8, %v1009_v58  ;;  %v1083_v12 = vsel %vm395_vm3, %v1081_v6, %v1082_v2  ;;  %v9847_v58 = vld [vmem:[#allocation70_spill] sm:$0xff] }
  0xf3   : > { %v1084_v21 = vsel %vm395_vm3, %v1082_v2, %v1081_v6  ;;  %v1020_v3 = vadd.f32 %v1011_v0, %v948_v28  ;;  %v1070_v25 = vmul.f32 %v716_v55, %v9828_v39  ;;  %v793_v43 = vadd.f32 %v9841_v22, %v9840_v37  ;;  %v5105_v2 = vpop.permute.xlu1 %286  ;;  %v9849_v28 = vld [vmem:[#allocation72_spill] sm:$0xff] }
  0xf4   : > { %v1019_v62 = vadd.f32 %v1012_v50, %v947_v49  ;;  %v816_v46 = vrot.slane %v806_v54, 2  ;;  %v882_v14 = vrot.slane %v872_v51, 1  ;;  %v1004_v42 = vadd.f32 %v998_v18, %v992_v59  ;;  %v9848_v49 = vld [vmem:[#allocation67_spill] sm:$0xff] }
  0xf5   : > { %v799_v5 = vmul.f32 %v714_v52, %v9817_v34  ;;  %v1092_v8 = vadd.f32 %v1083_v12, %v1020_v3  ;;  %v859_v20 = vadd.f32 %v9843_v24, %v9842_v7  ;;  %v865_v44 = vmul.f32 %v714_v52, %v9818_v30 }
  0xf6   : > { %v1091_v63 = vadd.f32 %v1084_v21, %v1019_v62  ;;  %v991_v16 = vadd.f32 %v5019_v53, %v9844_v41  ;;  %v997_v31 = vmul.f32 %v714_v52, %v9821_v56  ;;  %v1069_v61 = vmul.f32 %v714_v52, %v9828_v39 }
  0xf7   : > { %v805_v40 = vadd.f32 %v799_v5, %v793_v43  ;;  %v5115_v45 = vmul.f32 %v1092_v8, %v9831_v38  ;;  %v1063_v6 = vadd.f32 %v1057_v11, %v9847_v58  ;;  %v871_v4 = vadd.f32 %v865_v44, %v859_v20  ;;  %v9850_v11 = vld [vmem:[#allocation36_spill] sm:$0xff]  ;;  %v291_v0 = vpop.permute.xlu1 %290 }
  0xf8   : > { %v5112_v32 = vmul.f32 %v1091_v63, %v9829_v35  ;;  %v938_v1 = vmul.f32 %v716_v55, %v9827_v36  ;;  %v937_v33 = vmul.f32 %v714_v52, %v9827_v36  ;;  %v1003_v53 = vadd.f32 %v997_v31, %v991_v16  ;;  %v9855_v31 = vld [vmem:[#allocation10_spill] sm:$0xff]  ;;  %v9878_v36 = vld [vmem:[#allocation24_spill] sm:$0xff] }
  0xf9   : > { %9846 = vst [vmem:[#allocation48_spill] sm:$0xff] %v5115_v45  ;;  %v815_v17 = vrot.slane %v805_v40, 2  ;;  %v1076_v54 = vadd.f32 %v1070_v25, %v1064_v13  ;;  %v881_v51 = vrot.slane %v871_v4, 1  ;;  %v1075_v18 = vadd.f32 %v1069_v61, %v1063_v6  ;;  %1107 = vrot.lane.b32.xlu1 %v5115_v45, %s4195_s17  ;;  %v9856_v61 = vld [vmem:[#allocation17_spill] sm:$0xff]  ;;  %v9860_v6 = vld [vmem:[#allocation27_spill] sm:$0xff] }
  0xfa   : > { %9845 = vst [vmem:[#allocation47_spill] sm:$0xff] %v5112_v32  ;;  %1105 = vrot.lane.b32.xlu0 %v5112_v32, %s4195_s17  ;;  %v932_v48 = vadd.f32 %v9849_v28, %v9848_v49  ;;  %v931_v57 = vadd.f32 %v5015_v60, %v9850_v11  ;;  %v1014_v29 = vrot.slane %v1004_v42, 7  ;;  %v1013_v52 = vrot.slane %v1003_v53, 7  ;;  %v5136_v60 = vpop.permute.xlu0 %284  ;;  %v9868_v28 = vld [vmem:[#allocation11_spill] sm:$0xff]  ;;  %v9870_v11 = vld [vmem:[#allocation29_spill] sm:$0xff] }
  0xfb   : > { %v817_v55 = vsel %vm688_vm0, %v815_v17, %v816_v46  ;;  %v818_v59 = vsel %vm688_vm0, %v816_v46, %v815_v17  ;;  %v883_v27 = vsel %vm610_vm1, %v881_v51, %v882_v14  ;;  %v884_v13 = vsel %vm610_vm1, %v882_v14, %v881_v51  ;;  %9851 = vst [vmem:[#allocation49_spill] sm:$0xff] %v5136_v60  ;;  %v295_v8 = vpop.permute.xlu1 %294 }
  0xfc   : > { %v944_v50 = vadd.f32 %v938_v1, %v932_v48  ;;  %v889_v12 = vadd.f32 %v883_v27, %v817_v55  ;;  %v890_v21 = vadd.f32 %v884_v13, %v818_v59  ;;  %v943_v62 = vadd.f32 %v937_v33, %v931_v57  ;;  %v9862_v1 = vld [vmem:[#allocation30_spill] sm:$0xff]  ;;  %v9864_v33 = vld [vmem:[#allocation25_spill] sm:$0xff] }
  0xfd   : > { %v1086_v3 = vrot.slane %v1076_v54, 6  ;;  %v1085_v25 = vrot.slane %v1075_v18, 6  ;;  %v1015_v43 = vsel %vm467_vm2, %v1013_v52, %v1014_v29  ;;  %v1016_v46 = vsel %vm467_vm2, %v1014_v29, %v1013_v52  ;;  %v9865_v54 = vld [vmem:[#allocation26_spill] sm:$0xff]  ;;  %v9866_v18 = vld [vmem:[#allocation35_spill] sm:$0xff]  ;;  %v9871_v55 = vld [vmem:[#allocation33_spill] sm:$0xff] }
  0xfe   : > { %v949_v37 = vadd.f32 %v943_v62, %v889_v12  ;;  %v950_v22 = vadd.f32 %v944_v50, %v890_v21  ;;  %v289_v20 = vpop.permute.xlu0 %288  ;;  %v5160_v58 = vmul.f32 %v9856_v61, %v9855_v31  ;;  %v5172_v4 = vmul.f32 %v9860_v6, %v9855_v31  ;;  %v9872_v29 = vld [vmem:[#allocation37_spill] sm:$0xff] }
  0xff   : > { %v1087_v5 = vsel %vm395_vm3, %v1085_v25, %v1086_v3  ;;  %v1088_v63 = vsel %vm395_vm3, %v1086_v3, %v1085_v25  ;;  %v299_v16 = vpop.permute.xlu1 %298  ;;  %v5176_v17 = vmul.f32 %v9862_v1, %v9855_v31  ;;  %v334_v53 = vmul.f32 %v9864_v33, %v5105_v2 }
 0x100   : > { %v1021_v42 = vadd.f32 %v1016_v46, %v949_v37  ;;  %v1022_v14 = vadd.f32 %v1015_v43, %v950_v22  ;;  %9857 = vst [vmem:[#allocation66_spill] sm:$0xff] %v5160_v58  ;;  %9861 = vst [vmem:[#allocation43_spill] sm:$0xff] %v5172_v4  ;;  %v408_v51 = vmul.f32 %v9865_v54, %v5105_v2 }
 0x101   : > { %9863 = vst [vmem:[#allocation73_spill] sm:$0xff] %v5176_v17  ;;  %v5184_v49 = vmul.f32 %v9866_v18, %v9855_v31  ;;  %v5188_v48 = vmul.f32 %v9856_v61, %v9868_v28  ;;  %v486_v57 = vmul.f32 %v9870_v11, %v5105_v2  ;;  %v551_v59 = vmul.f32 %v9871_v55, %v5105_v2 }
 0x102   : > { %v1093_v7 = vadd.f32 %v1088_v63, %v1021_v42  ;;  %v1094_v24 = vadd.f32 %v1087_v5, %v1022_v14  ;;  %v5156_v40 = vpop.permute.xlu0 %292  ;;  %v629_v27 = vmul.f32 %v9872_v29, %v5105_v2  ;;  %v333_v13 = vmul.f32 %v9864_v33, %v5136_v60  ;;  %v9874_v5 = vld [vmem:[#allocation16_spill] sm:$0xff] }
 0x103   : > { %9854 = vst [vmem:[#allocation52_spill] sm:$0xff] %v5156_v40  ;;  %9867 = vst [vmem:[#allocation28_spill] sm:$0xff] %v5184_v49  ;;  %v407_v52 = vmul.f32 %v9865_v54, %v5136_v60  ;;  %v550_v50 = vmul.f32 %v9871_v55, %v5136_v60  ;;  %v628_v12 = vmul.f32 %v9872_v29, %v5136_v60  ;;  %v303_v62 = vpop.permute.xlu1 %302 }
 0x104   : > { %v5147_v44 = vmul.f32 %v1093_v7, %v9829_v35  ;;  %v5150_v41 = vmul.f32 %v1094_v24, %v9831_v38  ;;  %v9858_v35 = vld [vmem:[#allocation23_spill] sm:$0xff]  ;;  %9869 = vst [vmem:[#allocation44_spill] sm:$0xff] %v5188_v48  ;;  %v336_v21 = vmul.f32 %v9864_v33, %v291_v0  ;;  %v410_v2 = vmul.f32 %v9865_v54, %v291_v0  ;;  %v9875_v7 = vld [vmem:[#allocation18_spill] sm:$0xff] }
 0x105   : > { %v5168_v38 = vmul.f32 %v9858_v35, %v9855_v31  ;;  %v488_v3 = vmul.f32 %v9870_v11, %v291_v0  ;;  %v553_v25 = vmul.f32 %v9871_v55, %v291_v0  ;;  %v631_v22 = vmul.f32 %v9872_v29, %v291_v0  ;;  %v9876_v31 = vld [vmem:[#allocation19_spill] sm:$0xff] }
 0x106   : > { %9852 = vst [vmem:[#allocation50_spill] sm:$0xff] %v5147_v44  ;;  %9853 = vst [vmem:[#allocation51_spill] sm:$0xff] %v5150_v41  ;;  %1111 = vrot.lane.b32.xlu1 %v5150_v41, %s4195_s17  ;;  %1109 = vrot.lane.b32.xlu0 %v5147_v44, %s4195_s17  ;;  %v5212_v37 = vpop.permute.xlu0 %296  ;;  %v335_v43 = vmul.f32 %v9864_v33, %v289_v20  ;;  %v409_v46 = vmul.f32 %v9865_v54, %v289_v20 }
 0x107   : > { %9859 = vst [vmem:[#allocation38_spill] sm:$0xff] %v5168_v38  ;;  %9873 = vst [vmem:[#allocation34_spill] sm:$0xff] %v5212_v37  ;;  %v487_v42 = vmul.f32 %v9870_v11, %v289_v20  ;;  %v552_v14 = vmul.f32 %v9871_v55, %v289_v20  ;;  %v341_v63 = vmul.f32 %v9874_v5, %v299_v16  ;;  %v307_v49 = vpop.permute.xlu1 %306 }
 0x108   : > { %v415_v24 = vmul.f32 %v9875_v7, %v299_v16  ;;  %v493_v19 = vmul.f32 %v9876_v31, %v299_v16  ;;  %v630_v40 = vmul.f32 %v9872_v29, %v289_v20  ;;  %v338_v60 = vmul.f32 %v9864_v33, %v295_v8 }
 0x109   : > { %v558_v0 = vmul.f32 %v9877_v23, %v299_v16  ;;  %v636_v39 = vmul.f32 %v9878_v36, %v299_v16  ;;  %v412_v56 = vmul.f32 %v9865_v54, %v295_v8  ;;  %v340_v30 = vmul.f32 %v9874_v5, %v5212_v37 }
 0x10a   : > { %1115 = vrot.lane.b32.xlu1 %v5050_v10, %s4194_s16  ;;  %1113 = vrot.lane.b32.xlu0 %v5047_v9, %s4194_s16  ;;  %v414_v20 = vmul.f32 %v9875_v7, %v5212_v37  ;;  %v490_v33 = vmul.f32 %v9870_v11, %v295_v8  ;;  %v555_v34 = vmul.f32 %v9871_v55, %v295_v8  ;;  %v301_v38 = vpop.permute.xlu0 %300 }
 0x10b   : > { %v633_v16 = vmul.f32 %v9872_v29, %v295_v8  ;;  %v557_v48 = vmul.f32 %v9877_v23, %v5212_v37  ;;  %v5240_v17 = vadd.f32 %v341_v63, %v334_v53  ;;  %v5242_v4 = vadd.f32 %v415_v24, %v408_v51 }
 0x10c   : > { %v5244_v54 = vadd.f32 %v493_v19, %v486_v57  ;;  %v635_v28 = vmul.f32 %v9878_v36, %v5212_v37  ;;  %v5248_v58 = vadd.f32 %v558_v0, %v551_v59  ;;  %v5250_v11 = vadd.f32 %v636_v39, %v629_v27 }
 0x10d   : > { %v343_v8 = vmul.f32 %v9874_v5, %v303_v62  ;;  %v417_v29 = vmul.f32 %v9875_v7, %v303_v62  ;;  %v5258_v19 = vadd.f32 %v340_v30, %v333_v13  ;;  %v5260_v53 = vadd.f32 %v414_v20, %v407_v52 }
 0x10e   : > { %1119 = vrot.lane.b32.xlu1 %v5115_v45, %s4194_s16  ;;  %1117 = vrot.lane.b32.xlu0 %v5112_v32, %s4194_s16  ;;  %v495_v51 = vmul.f32 %v9876_v31, %v303_v62  ;;  %v5263_v57 = vadd.f32 %v557_v48, %v550_v50  ;;  %v560_v39 = vmul.f32 %v9877_v23, %v303_v62  ;;  %v311_v50 = vpop.permute.xlu1 %310  ;;  %v5281_v55 = vpop.permute.xlu0 %304 }
 0x10f   : > { %v638_v59 = vmul.f32 %v9878_v36, %v303_v62  ;;  %v342_v27 = vmul.f32 %v9874_v5, %v301_v38  ;;  %v5268_v63 = vadd.f32 %v635_v28, %v628_v12  ;;  %v416_v24 = vmul.f32 %v9875_v7, %v301_v38  ;;  %9880 = vst [vmem:[#allocation39_spill] sm:$0xff] %v5281_v55 }
 0x110   : > { %v494_v0 = vmul.f32 %v9876_v31, %v301_v38  ;;  %v559_v30 = vmul.f32 %v9877_v23, %v301_v38  ;;  %v349_v13 = vadd.f32 %v343_v8, %v336_v21  ;;  %v423_v52 = vadd.f32 %v417_v29, %v410_v2 }
 0x111   : > { %v637_v20 = vmul.f32 %v9878_v36, %v301_v38  ;;  %v345_v48 = vmul.f32 %v9874_v5, %v307_v49  ;;  %v501_v28 = vadd.f32 %v495_v51, %v488_v3  ;;  %v419_v12 = vmul.f32 %v9875_v7, %v307_v49 }
 0x112   : > { %1123 = vrot.lane.b32.xlu1 %v5150_v41, %s4194_s16  ;;  %1121 = vrot.lane.b32.xlu0 %v5147_v44, %s4194_s16  ;;  %v497_v62 = vmul.f32 %v9876_v31, %v307_v49  ;;  %v566_v21 = vadd.f32 %v560_v39, %v553_v25  ;;  %v644_v29 = vadd.f32 %v638_v59, %v631_v22  ;;  %v9881_v31 = vld [vmem:[#allocation12_spill] sm:$0xff]  ;;  %v5307_v59 = vpop.permute.xlu0 %308 }
 0x113   : > { %v5283_v2 = vadd.f32 %v342_v27, %v335_v43  ;;  %v562_v38 = vmul.f32 %v9877_v23, %v307_v49  ;;  %v5286_v8 = vadd.f32 %v416_v24, %v409_v46  ;;  %v5288_v5 = vadd.f32 %v494_v0, %v487_v42  ;;  %9882 = vst [vmem:[#allocation68_spill] sm:$0xff] %v5307_v59  ;;  %v9883_v0 = vld [vmem:[#allocation53_spill] sm:$0xff] }
 0x114   : > { %v5290_v37 = vadd.f32 %v559_v30, %v552_v14  ;;  %v640_v3 = vmul.f32 %v9878_v36, %v307_v49  ;;  %v5293_v51 = vadd.f32 %v637_v20, %v630_v40  ;;  %v351_v7 = vadd.f32 %v345_v48, %v338_v60  ;;  %v315_v14 = vpop.permute.xlu1 %314  ;;  %v9884_v30 = vld [vmem:[#allocation55_spill] sm:$0xff] }
 0x115   : > { %v356_v55 = vmul.f32 %v9856_v61, %v9881_v31  ;;  %v430_v25 = vmul.f32 %v9858_v35, %v9881_v31  ;;  %v425_v22 = vadd.f32 %v419_v12, %v412_v56  ;;  %v503_v43 = vadd.f32 %v497_v62, %v490_v33 }
 0x116   : > { %1127 = vrot.lane.b32.xlu1 %v5050_v10, %s9879_s13  ;;  %1125 = vrot.lane.b32.xlu0 %v5047_v9, %s9879_s13  ;;  %v508_v49 = vmul.f32 %v9860_v6, %v9881_v31  ;;  %v568_v40 = vadd.f32 %v562_v38, %v555_v34  ;;  %v573_v42 = vmul.f32 %v9862_v1, %v9881_v31  ;;  %v9887_v38 = vld [vmem:[#allocation38_spill] sm:$0xff] }
 0x117   : > { %v362_v46 = vadd.f32 %v356_v55, %v349_v13  ;;  %v436_v60 = vadd.f32 %v430_v25, %v423_v52  ;;  %v646_v39 = vadd.f32 %v640_v3, %v633_v16  ;;  %v651_v24 = vmul.f32 %v9866_v18, %v9881_v31  ;;  %v9886_v52 = vld [vmem:[#allocation66_spill] sm:$0xff]  ;;  %v9888_v25 = vld [vmem:[#allocation11_spill] sm:$0xff] }
 0x118   : > { %v514_v27 = vadd.f32 %v508_v49, %v501_v28  ;;  %v369_v56 = vmul.f32 %v9883_v0, %v315_v14  ;;  %v579_v33 = vadd.f32 %v573_v42, %v566_v21  ;;  %v443_v20 = vmul.f32 %v9884_v30, %v315_v14 }
 0x119   : > { %v521_v34 = vmul.f32 %v9801_v47, %v315_v14  ;;  %v586_v55 = vmul.f32 %v9808_v26, %v315_v14  ;;  %v657_v16 = vadd.f32 %v651_v24, %v644_v29  ;;  %v664_v31 = vmul.f32 %v9835_v15, %v315_v14  ;;  %v9890_v14 = vld [vmem:[#allocation73_spill] sm:$0xff]  ;;  %v9891_v24 = vld [vmem:[#allocation28_spill] sm:$0xff] }
 0x11a   : > { %1131 = vrot.lane.b32.xlu1 %v5115_v45, %s9879_s13  ;;  %1129 = vrot.lane.b32.xlu0 %v5112_v32, %s9879_s13  ;;  %v5319_v13 = vadd.f32 %v369_v56, %v362_v46  ;;  %v360_v48 = vadd.f32 %v9886_v52, %v5240_v17  ;;  %v5324_v28 = vadd.f32 %v443_v20, %v436_v60  ;;  %v9889_v17 = vld [vmem:[#allocation43_spill] sm:$0xff]  ;;  %v9893_v52 = vld [vmem:[#allocation14_spill] sm:$0xff] }
 0x11b   : > { %v5326_v12 = vadd.f32 %v521_v34, %v514_v27  ;;  %v5328_v62 = vadd.f32 %v586_v55, %v579_v33  ;;  %v367_v21 = vmul.f32 %v9883_v0, %v311_v50  ;;  %v434_v3 = vadd.f32 %v9887_v38, %v5242_v4 }
 0x11c   : > { %v427_v29 = vmul.f32 %v9858_v35, %v9888_v25  ;;  %v5335_v49 = vadd.f32 %v664_v31, %v657_v16  ;;  %v441_v46 = vmul.f32 %v9884_v30, %v311_v50  ;;  %v512_v60 = vadd.f32 %v9889_v17, %v5244_v54  ;;  %v5352_v54 = vpop.permute.xlu0 %312 }
 0x11d   : > { %v519_v42 = vmul.f32 %v9801_v47, %v311_v50  ;;  %v577_v27 = vadd.f32 %v9890_v14, %v5248_v58  ;;  %v584_v4 = vmul.f32 %v9808_v26, %v311_v50  ;;  %v655_v56 = vadd.f32 %v9891_v24, %v5250_v11  ;;  %v9892_v58 = vld [vmem:[#allocation44_spill] sm:$0xff] }
 0x11e   : > { %1135 = vrot.lane.b32.xlu1 %v5150_v41, %s9879_s13  ;;  %1133 = vrot.lane.b32.xlu0 %v5147_v44, %s9879_s13  ;;  %v570_v33 = vmul.f32 %v9862_v1, %v9888_v25  ;;  %v662_v20 = vmul.f32 %v9835_v15, %v311_v50  ;;  %v359_v34 = vadd.f32 %v9892_v58, %v5258_v19 }
 0x11f   : > { %v366_v55 = vmul.f32 %v9883_v0, %v5307_v59  ;;  %v440_v16 = vmul.f32 %v9884_v30, %v5307_v59  ;;  %v433_v31 = vadd.f32 %v427_v29, %v5260_v53  ;;  %v583_v11 = vmul.f32 %v9808_v26, %v5307_v59 }
 0x120   : > { %v358_v38 = vmul.f32 %v9856_v61, %v9893_v52  ;;  %v432_v50 = vmul.f32 %v9858_v35, %v9893_v52  ;;  %v648_v19 = vmul.f32 %v9866_v18, %v9888_v25  ;;  %v661_v17 = vmul.f32 %v9835_v15, %v5307_v59  ;;  %v5388_v25 = vpop.permute.xlu0 %316 }
 0x121   : > { %v510_v14 = vmul.f32 %v9860_v6, %v9893_v52  ;;  %v575_v53 = vmul.f32 %v9862_v1, %v9893_v52  ;;  %v576_v29 = vadd.f32 %v570_v33, %v5263_v57  ;;  %v9894_v57 = vld [vmem:[#allocation13_spill] sm:$0xff]  ;;  %v9896_v33 = vld [vmem:[#allocation15_spill] sm:$0xff] }
 0x122   : > { %1139 = vrot.lane.b32.xlu1 %v5050_v10, %s9885_s14  ;;  %1137 = vrot.lane.b32.xlu0 %v5047_v9, %s9885_s14  ;;  %v364_v24 = vadd.f32 %v358_v38, %v351_v7  ;;  %v438_v58 = vadd.f32 %v432_v50, %v425_v22  ;;  %v653_v10 = vmul.f32 %v9866_v18, %v9893_v52 }
 0x123   : > { %v581_v9 = vadd.f32 %v575_v53, %v568_v40  ;;  %v654_v7 = vadd.f32 %v648_v19, %v5268_v63  ;;  %v355_v22 = vmul.f32 %v9856_v61, %v9894_v57  ;;  %v447_v63 = vadd.f32 %v441_v46, %v434_v3 }
 0x124   : > { %v429_v19 = vmul.f32 %v9858_v35, %v9894_v57  ;;  %v368_v3 = vmul.f32 %v9883_v0, %v5352_v54  ;;  %v5418_v46 = vpop.permute.xlu0 %320 }
 0x126   : > { %1143 = vrot.lane.b32.xlu1 %v5115_v45, %s9885_s14  ;;  %1141 = vrot.lane.b32.xlu0 %v5112_v32, %s9885_s14  ;;  %v319_v32 = vpop.permute.xlu1 %318  ;;  %v516_v45 = vadd.f32 %v510_v14, %v503_v43  ;;  %v659_v43 = vadd.f32 %v653_v10, %v646_v39  ;;  %v373_v14 = vadd.f32 %v367_v21, %v360_v48 }
 0x127   : > { %v371_v36 = vmul.f32 %v9883_v0, %v319_v32  ;;  %v445_v23 = vmul.f32 %v9884_v30, %v319_v32  ;;  %v523_v59 = vmul.f32 %v9801_v47, %v319_v32  ;;  %v590_v39 = vadd.f32 %v584_v4, %v577_v27  ;;  %v9901_v27 = vld [vmem:[#allocation59_spill] sm:$0xff] }
 0x128   : > { %v589_v48 = vadd.f32 %v583_v11, %v576_v29  ;;  %v667_v21 = vadd.f32 %v661_v17, %v654_v7  ;;  %v520_v7 = vmul.f32 %v9801_v47, %v5352_v54 }
 0x129   : > { %v5393_v40 = vadd.f32 %v371_v36, %v364_v24  ;;  %v5399_v38 = vadd.f32 %v445_v23, %v438_v58  ;;  %v5401_v50 = vadd.f32 %v523_v59, %v516_v45  ;;  %v525_v36 = vadd.f32 %v519_v42, %v512_v60 }
 0x12a   : > { %1147 = vrot.lane.b32.xlu1 %v5150_v41, %s9885_s14  ;;  %1145 = vrot.lane.b32.xlu0 %v5147_v44, %s9885_s14  ;;  %v588_v41 = vmul.f32 %v9808_v26, %v319_v32  ;;  %v666_v44 = vmul.f32 %v9835_v15, %v319_v32  ;;  %v572_v23 = vmul.f32 %v9862_v1, %v9894_v57  ;;  %v323_v53 = vpop.permute.xlu1 %322 }
 0x12b   : > { %9895 = vst [vmem:[#allocation40_spill] sm:$0xff] %v5393_v40  ;;  %9897 = vst [vmem:[#allocation69_spill] sm:$0xff] %v5399_v38  ;;  %v668_v45 = vadd.f32 %v662_v20, %v655_v56  ;;  %v372_v59 = vadd.f32 %v366_v55, %v359_v34  ;;  %v435_v60 = vadd.f32 %v429_v19, %v5286_v8  ;;  %v9902_v56 = vld [vmem:[#allocation60_spill] sm:$0xff]  ;;  %v9924_v38 = vld [vmem:[#allocation22_spill] sm:$0xff] }
 0x12c   : > { %9898 = vst [vmem:[#allocation70_spill] sm:$0xff] %v5401_v50  ;;  %v5403_v32 = vadd.f32 %v588_v41, %v581_v9  ;;  %v5407_v10 = vadd.f32 %v666_v44, %v659_v43  ;;  %v446_v9 = vadd.f32 %v440_v16, %v433_v31  ;;  %v650_v41 = vmul.f32 %v9866_v18, %v9894_v57  ;;  %v9903_v16 = vld [vmem:[#allocation62_spill] sm:$0xff]  ;;  %v9904_v31 = vld [vmem:[#allocation63_spill] sm:$0xff] }
 0x12d   : > { %v361_v44 = vadd.f32 %v355_v22, %v5283_v2  ;;  %v442_v42 = vmul.f32 %v9884_v30, %v5352_v54  ;;  %v380_v4 = vmul.f32 %v9901_v27, %v323_v53  ;;  %v454_v20 = vmul.f32 %v9902_v56, %v323_v53 }
 0x12e   : > { %330 = vrot.lane.b32.xlu1 %v9893_v52, %s9885_s14  ;;  %328 = vrot.lane.b32.xlu0 %v9896_v33, %s9885_s14  ;;  %9899 = vst [vmem:[#allocation67_spill] sm:$0xff] %v5403_v32  ;;  %9900 = vst [vmem:[#allocation72_spill] sm:$0xff] %v5407_v10  ;;  %v507_v52 = vmul.f32 %v9860_v6, %v9894_v57  ;;  %v578_v55 = vadd.f32 %v572_v23, %v5290_v37  ;;  %v327_v57 = vpop.permute.xlu1 %326  ;;  %v9923_v32 = vld [vmem:[#allocation75_spill] sm:$0xff] }
 0x12f   : > { %v597_v2 = vmul.f32 %v9903_v16, %v323_v53  ;;  %v675_v11 = vmul.f32 %v9904_v31, %v323_v53  ;;  %v656_v17 = vadd.f32 %v650_v41, %v5293_v51  ;;  %v5430_v29 = vadd.f32 %v380_v4, %v373_v14  ;;  %v9905_v51 = vld [vmem:[#allocation61_spill] sm:$0xff] }
 0x130   : > { %v513_v34 = vadd.f32 %v507_v52, %v5288_v5  ;;  %v5432_v8 = vadd.f32 %v454_v20, %v447_v63  ;;  %v379_v24 = vmul.f32 %v9901_v27, %v5418_v46  ;;  %v374_v58 = vadd.f32 %v368_v3, %v361_v44 }
 0x131   : > { %v5438_v5 = vadd.f32 %v597_v2, %v590_v39  ;;  %v453_v37 = vmul.f32 %v9902_v56, %v5418_v46  ;;  %v9531_v22 = vrot.slane %v5430_v29, 6  ;;  %v532_v43 = vmul.f32 %v9905_v51, %v323_v53 }
 0x132   : > { %v5444_v14 = vadd.f32 %v379_v24, %v372_v59  ;;  %v596_v63 = vmul.f32 %v9903_v16, %v5418_v46  ;;  %v585_v19 = vmul.f32 %v9808_v26, %v5352_v54  ;;  %v9533_v52 = vrot.slane %v5432_v8, 7 }
 0x133   : > { %v681_v39 = vadd.f32 %v675_v11, %v668_v45  ;;  %v5451_v23 = vadd.f32 %v453_v37, %v446_v9  ;;  %v674_v53 = vmul.f32 %v9904_v31, %v5418_v46  ;;  %v382_v59 = vmul.f32 %v9901_v27, %v327_v57 }
 0x134   : > { %v9532_v41 = vrot.slane %v5444_v14, 6  ;;  %v5454_v44 = vadd.f32 %v596_v63, %v589_v48  ;;  %v663_v3 = vmul.f32 %v9835_v15, %v5352_v54  ;;  %v456_v45 = vmul.f32 %v9902_v56, %v327_v57 }
 0x135   : > { %v9534_v20 = vrot.slane %v5451_v23, 7  ;;  %v538_v9 = vadd.f32 %v532_v43, %v525_v36  ;;  %v680_v24 = vadd.f32 %v674_v53, %v667_v21  ;;  %v448_v37 = vadd.f32 %v442_v42, %v435_v60 }
 0x136   : > { %v396_v2 = vsel %vm395_vm3, %v9532_v41, %v9531_v22  ;;  %v687_v63 = vrot.slane %v681_v39, 2  ;;  %v388_v36 = vadd.f32 %v382_v59, %v5319_v13  ;;  %v526_v43 = vadd.f32 %v520_v7, %v513_v34  ;;  %v325_v41 = vpop.permute.xlu0 %324 }
 0x137   : > { %v468_v54 = vsel %vm467_vm2, %v9534_v20, %v9533_v52  ;;  %v462_v50 = vadd.f32 %v456_v45, %v5324_v28  ;;  %v599_v22 = vmul.f32 %v9903_v16, %v327_v57  ;;  %v591_v11 = vadd.f32 %v585_v19, %v578_v55 }
 0x138   : > { %v479_v4 = vadd.f32 %v468_v54, %v396_v2  ;;  %v669_v21 = vadd.f32 %v663_v3, %v656_v17  ;;  %v9907_v60 = vrot.slane %v5454_v44, 1  ;;  %v9908_v42 = vrot.slane %v5438_v5, 1 }
 0x139   : > { %v686_v53 = vrot.slane %v680_v24, 2  ;;  %v399_v20 = vrot.slane %v388_v36, 6  ;;  %v534_v13 = vmul.f32 %v9905_v51, %v327_v57  ;;  %v677_v34 = vmul.f32 %v9904_v31, %v327_v57 }
 0x13a   : > { %v612_v39 = vsel %vm610_vm1, %v9908_v42, %v9907_v60  ;;  %v544_v52 = vadd.f32 %v538_v9, %v479_v4  ;;  %v381_v17 = vmul.f32 %v9901_v27, %v325_v41  ;;  %v455_v7 = vmul.f32 %v9902_v56, %v325_v41  ;;  %v9945_v56 = vld [vmem:[#allocation37_spill] sm:$0xff] }
 0x13b   : > { %v5490_v28 = vsel %vm688_vm0, %v686_v53, %v687_v63  ;;  %v690_v55 = vsel %vm688_vm0, %v687_v63, %v686_v53  ;;  %v471_v59 = vrot.slane %v462_v50, 7  ;;  %v605_v3 = vadd.f32 %v599_v22, %v5328_v62 }
 0x13c   : > { %v622_v19 = vadd.f32 %v612_v39, %v544_v52  ;;  %v683_v4 = vadd.f32 %v677_v34, %v5335_v49  ;;  %v387_v45 = vadd.f32 %v381_v17, %v374_v58  ;;  %v461_v9 = vadd.f32 %v455_v7, %v448_v37 }
 0x13d   : > { %v533_v57 = vmul.f32 %v9905_v51, %v325_v41  ;;  %v598_v2 = vmul.f32 %v9903_v16, %v325_v41  ;;  %v676_v63 = vmul.f32 %v9904_v31, %v325_v41  ;;  %v540_v54 = vadd.f32 %v534_v13, %v5326_v12  ;;  %v9938_v16 = vld [vmem:[#allocation26_spill] sm:$0xff] }
 0x13e   : > { %v5500_v24 = vadd.f32 %v690_v55, %v622_v19  ;;  %v398_v36 = vrot.slane %v387_v45, 6  ;;  %v470_v60 = vrot.slane %v461_v9, 7  ;;  %v614_v50 = vrot.slane %v605_v3, 1  ;;  %v9912_v3 = vld [vmem:[#allocation49_spill] sm:$0xff]  ;;  %v9914_v9 = vld [vmem:[#allocation34_spill] sm:$0xff] }
 0x13f   : > { %v604_v52 = vadd.f32 %v598_v2, %v591_v11  ;;  %v692_v42 = vrot.slane %v683_v4, 2  ;;  %v539_v62 = vadd.f32 %v533_v57, %v526_v43  ;;  %v682_v22 = vadd.f32 %v676_v63, %v669_v21  ;;  %v9913_v4 = vld [vmem:[#allocation29_spill] sm:$0xff]  ;;  %v9915_v57 = vld [vmem:[#allocation19_spill] sm:$0xff]  ;;  %v5531_v63 = vld [vmem:[%s4282_s9] sm:$0xff] }
 0x140   : > { %9909 = vst [vmem:[#allocation36_spill] sm:$0xff] %v5500_v24  ;;  %v400_v49 = vsel %vm395_vm3, %v398_v36, %v399_v20  ;;  %v401_v58 = vsel %vm395_vm3, %v399_v20, %v398_v36  ;;  %v472_v37 = vsel %vm467_vm2, %v470_v60, %v471_v59  ;;  %v473_v12 = vsel %vm467_vm2, %v471_v59, %v470_v60  ;;  %v5535_v36 = vld [vmem:[%s4282_s9 + $0x8] sm:$0xff] }
 0x141   : > { %v480_v41 = vadd.f32 %v473_v12, %v401_v58  ;;  %v481_v11 = vadd.f32 %v472_v37, %v400_v49  ;;  %v613_v39 = vrot.slane %v604_v52, 1  ;;  %v691_v43 = vrot.slane %v682_v22, 2  ;;  %v5543_v49 = vld [vmem:[%s4282_s9 + $0x10] sm:$0xff]  ;;  %v5547_v37 = vld [vmem:[%s4282_s9 + $0x18] sm:$0xff] }
 0x142   : > { %v485_v45 = vmul.f32 %v9913_v4, %v9912_v3  ;;  %v492_v2 = vmul.f32 %v9915_v57, %v9914_v9  ;;  %v1498_v60 = vrot.slane %v5535_v36, 1  ;;  %v1515_v52 = vrot.slane %v5531_v63, 7 }
 0x143   : > { %v545_v21 = vadd.f32 %v539_v62, %v480_v41  ;;  %v546_v53 = vadd.f32 %v540_v54, %v481_v11  ;;  %v615_v13 = vsel %vm610_vm1, %v613_v39, %v614_v50  ;;  %v616_v20 = vsel %vm610_vm1, %v614_v50, %v613_v39  ;;  %v9916_v62 = vld [vmem:[#allocation11_spill] sm:$0xff] }
 0x144   : > { %v693_v34 = vsel %vm688_vm0, %v691_v43, %v692_v42  ;;  %v694_v55 = vsel %vm688_vm0, %v692_v42, %v691_v43  ;;  %v1497_v54 = vrot.slane %v5531_v63, 1  ;;  %v1516_v50 = vrot.slane %v5535_v36, 7 }
 0x145   : > { %v623_v17 = vadd.f32 %v615_v13, %v545_v21  ;;  %v624_v7 = vadd.f32 %v616_v20, %v546_v53  ;;  %v498_v42 = vadd.f32 %v492_v2, %v485_v45  ;;  %v505_v22 = vmul.f32 %v9860_v6, %v9916_v62  ;;  %v5562_v13 = vld [vmem:[%s4282_s9 + $0x20] sm:$0xff] }
 0x146   : > { %v1501_v58 = vrot.slane %v5543_v49, 1  ;;  %v1502_v12 = vrot.slane %v5547_v37, 1  ;;  %v1519_v41 = vrot.slane %v5543_v49, 7  ;;  %v1520_v11 = vrot.slane %v5547_v37, 7  ;;  %9918 = vst [vmem:[#allocation38_spill] sm:$0xff] %v5562_v13  ;;  %v9922_v62 = vld [vmem:[#allocation32_spill] sm:$0xff] }
 0x147   : > { %v5520_v19 = vadd.f32 %v693_v34, %v623_v17  ;;  %v5522_v59 = vadd.f32 %v694_v55, %v624_v7  ;;  %v5552_v39 = vstv %s242_s27  ;;  %v1500_v43 = vsel %vm610_vm1, %v1498_v60, %v1497_v54  ;;  %v5566_v34 = vld [vmem:[%s4282_s9 + $0x28] sm:$0xff]  ;;  %v9920_v7 = vld [vmem:[#allocation68_spill] sm:$0xff] }
 0x148   : > { %9917 = vst [vmem:[#allocation66_spill] sm:$0xff] %v5552_v39  ;;  %v1517_v21 = vsel %vm467_vm2, %v1515_v52, %v1516_v50  ;;  %v1499_v53 = vsel %vm610_vm1, %v1497_v54, %v1498_v60  ;;  %v1505_v20 = vrot.slane %v5562_v13, 1  ;;  %9919 = vst [vmem:[#allocation43_spill] sm:$0xff] %v5566_v34  ;;  %v1506_v55 = vrot.slane %v5566_v34, 1  ;;  %v9921_v60 = vld [vmem:[#allocation74_spill] sm:$0xff] }
 0x149   : > { %9910 = vst [vmem:[#allocation10_spill] sm:$0xff] %v5520_v19  ;;  %9911 = vst [vmem:[#allocation12_spill] sm:$0xff] %v5522_v59  ;;  %v511_v17 = vadd.f32 %v505_v22, %v498_v42  ;;  %v518_v3 = vmul.f32 %v9801_v47, %v9920_v7  ;;  %v1518_v45 = vsel %vm467_vm2, %v1516_v50, %v1515_v52  ;;  %v1523_v2 = vrot.slane %v5562_v13, 7  ;;  %v9926_v50 = vld [vmem:[#allocation76_spill] sm:$0xff]  ;;  %v9927_v7 = vld [vmem:[#allocation31_spill] sm:$0xff] }
 0x14a   : > { %v1504_v9 = vsel %vm610_vm1, %v1502_v12, %v1501_v58  ;;  %v1524_v54 = vrot.slane %v5566_v34, 7  ;;  %v1492_v10 = vadd.f32 %v9922_v62, %v9921_v60  ;;  %v1491_v40 = vadd.f32 %v9924_v38, %v9923_v32  ;;  %v9928_v13 = vld [vmem:[#allocation64_spill] sm:$0xff]  ;;  %v9929_v19 = vld [vmem:[#allocation21_spill] sm:$0xff] }
 0x14b   : > { %v1521_v42 = vsel %vm467_vm2, %v1519_v41, %v1520_v11  ;;  %v1503_v22 = vsel %vm610_vm1, %v1501_v58, %v1502_v12  ;;  %v5585_v52 = vstv %s245_s29  ;;  %v1494_v59 = vadd.f32 %v9927_v7, %v9926_v50  ;;  %v9935_v7 = vld [vmem:[#allocation25_spill] sm:$0xff] }
 0x14c   : > { %9925 = vst [vmem:[#allocation73_spill] sm:$0xff] %v5585_v52  ;;  %v1522_v34 = vsel %vm467_vm2, %v1520_v11, %v1519_v41  ;;  %v1493_v60 = vadd.f32 %v9929_v19, %v9928_v13  ;;  %v1508_v38 = vsel %vm610_vm1, %v1506_v55, %v1505_v20  ;;  %v1507_v32 = vsel %vm610_vm1, %v1505_v20, %v1506_v55 }
 0x14d   : > { %v524_v62 = vadd.f32 %v518_v3, %v511_v17  ;;  %v531_v58 = vmul.f32 %v9905_v51, %v5418_v46  ;;  %v1525_v12 = vsel %vm467_vm2, %v1523_v2, %v1524_v54  ;;  %v1526_v41 = vsel %vm467_vm2, %v1524_v54, %v1523_v2  ;;  %v9934_v3 = vld [vmem:[#allocation52_spill] sm:$0xff]  ;;  %v9936_v2 = vld [vmem:[#allocation39_spill] sm:$0xff] }
 0x14e   : > { %v9930_v11 = vrot.slane %v5444_v14, 6  ;;  %v9931_v19 = vrot.slane %v5430_v29, 6  ;;  %v9932_v50 = vrot.slane %v5451_v23, 7  ;;  %v9933_v20 = vrot.slane %v5432_v8, 7  ;;  %v9937_v54 = vld [vmem:[#allocation16_spill] sm:$0xff]  ;;  %v9939_v23 = vld [vmem:[#allocation18_spill] sm:$0xff] }
 0x14f   : > { %v1510_v55 = vadd.f32 %v1500_v43, %v1492_v10  ;;  %v1509_v17 = vadd.f32 %v1499_v53, %v1491_v40  ;;  %v337_v24 = vmul.f32 %v9935_v7, %v9934_v3  ;;  %v344_v14 = vmul.f32 %v9937_v54, %v9936_v2  ;;  %v9940_v53 = vld [vmem:[#allocation65_spill] sm:$0xff]  ;;  %v9942_v51 = vld [vmem:[#allocation71_spill] sm:$0xff]  ;;  %v9946_v54 = vld [vmem:[#allocation20_spill] sm:$0xff] }
 0x150   : > { %v397_v13 = vsel %vm395_vm3, %v9931_v19, %v9930_v11  ;;  %v469_v46 = vsel %vm467_vm2, %v9933_v20, %v9932_v50  ;;  %v1512_v31 = vadd.f32 %v1504_v9, %v1494_v59  ;;  %v1511_v29 = vadd.f32 %v1503_v22, %v1493_v60  ;;  %v9941_v50 = vld [vmem:[#allocation41_spill] sm:$0xff]  ;;  %v9943_v59 = vld [vmem:[#allocation42_spill] sm:$0xff] }
 0x151   : > { %v411_v11 = vmul.f32 %v9938_v16, %v9934_v3  ;;  %v418_v19 = vmul.f32 %v9939_v23, %v9936_v2  ;;  %v489_v8 = vmul.f32 %v9913_v4, %v9934_v3  ;;  %v496_v40 = vmul.f32 %v9915_v57, %v9936_v2  ;;  %v9944_v22 = vld [vmem:[#allocation33_spill] sm:$0xff]  ;;  %v9947_v57 = vld [vmem:[#allocation24_spill] sm:$0xff] }
 0x152   : > { %v478_v10 = vadd.f32 %v469_v46, %v397_v13  ;;  %v537_v43 = vadd.f32 %v531_v58, %v524_v62  ;;  %v1496_v20 = vadd.f32 %v9941_v50, %v9940_v53  ;;  %v1495_v9 = vadd.f32 %v9943_v59, %v9942_v51 }
 0x153   : > { %v554_v60 = vmul.f32 %v9944_v22, %v9934_v3  ;;  %v632_v27 = vmul.f32 %v9945_v56, %v9934_v3  ;;  %v350_v23 = vadd.f32 %v344_v14, %v337_v24  ;;  %v561_v4 = vmul.f32 %v9946_v54, %v9936_v2 }
 0x154   : > { %v639_v13 = vmul.f32 %v9947_v57, %v9936_v2  ;;  %v357_v62 = vmul.f32 %v9856_v61, %v9896_v33  ;;  %v1528_v58 = vadd.f32 %v1517_v21, %v1510_v55  ;;  %v5641_v46 = vstv %s248_s30 }
 0x155   : > { %9948 = vst [vmem:[#allocation28_spill] sm:$0xff] %v5641_v46  ;;  %v424_v51 = vadd.f32 %v418_v19, %v411_v11  ;;  %v431_v53 = vmul.f32 %v9858_v35, %v9896_v33  ;;  %v1527_v50 = vadd.f32 %v1518_v45, %v1509_v17  ;;  %v502_v59 = vadd.f32 %v496_v40, %v489_v8 }
 0x156   : > { %v509_v24 = vmul.f32 %v9860_v6, %v9896_v33  ;;  %v543_v3 = vadd.f32 %v537_v43, %v478_v10  ;;  %v1530_v14 = vadd.f32 %v1521_v42, %v1512_v31  ;;  %v1529_v54 = vadd.f32 %v1522_v34, %v1511_v29 }
 0x157   : > { %v1514_v56 = vadd.f32 %v1508_v38, %v1496_v20  ;;  %v9949_v2 = vrot.slane %v5438_v5, 1  ;;  %v9950_v57 = vrot.slane %v5454_v44, 1  ;;  %v1513_v55 = vadd.f32 %v1507_v32, %v1495_v9 }
 0x158   : > { %v567_v11 = vadd.f32 %v561_v4, %v554_v60  ;;  %v645_v19 = vadd.f32 %v639_v13, %v632_v27  ;;  %v363_v22 = vadd.f32 %v357_v62, %v350_v23  ;;  %v437_v45 = vadd.f32 %v431_v53, %v424_v51  ;;  %v9966_v60 = vld [vmem:[#allocation46_spill] sm:$0xff] }
 0x159   : > { %v611_v21 = vsel %vm610_vm1, %v9950_v57, %v9949_v2  ;;  %v574_v17 = vmul.f32 %v9862_v1, %v9896_v33  ;;  %v652_v31 = vmul.f32 %v9866_v18, %v9896_v33  ;;  %v370_v34 = vmul.f32 %v9883_v0, %v5388_v25 }
 0x15a   : > { %v515_v5 = vadd.f32 %v509_v24, %v502_v59  ;;  %v444_v44 = vmul.f32 %v9884_v30, %v5388_v25  ;;  %v522_v57 = vmul.f32 %v9801_v47, %v5388_v25  ;;  %v621_v4 = vadd.f32 %v611_v21, %v543_v3  ;;  %v9974_v3 = vld [vmem:[#allocation48_spill] sm:$0xff] }
 0x15b   : > { %v5664_v27 = vmul.f32 %v1528_v58, %v5552_v39  ;;  %v5667_v42 = vmul.f32 %v1527_v50, %v5552_v39  ;;  %v5670_v38 = vmul.f32 %v1530_v14, %v5585_v52  ;;  %v5673_v33 = vmul.f32 %v1529_v54, %v5585_v52  ;;  %v9968_v58 = vld [vmem:[#allocation45_spill] sm:$0xff] }
 0x15c   : > { %v5675_v32 = vadd.f32 %v1525_v12, %v1514_v56  ;;  %v5677_v29 = vadd.f32 %v1526_v41, %v1513_v55  ;;  %v5681_v23 = vmul.f32 %v9808_v26, %v5388_v25  ;;  %v5684_v8 = vmul.f32 4.0, %v5552_v39  ;;  %v1104_v20 = vpop.permute.xlu1 %1103  ;;  %v1102_v9 = vpop.permute.xlu0 %1101 }
 0x15d   : > { %9951 = vst [vmem:[#allocation44_spill] sm:$0xff] %v5664_v27  ;;  %9952 = vst [vmem:[#allocation14_spill] sm:$0xff] %v5667_v42  ;;  %v5686_v40 = vadd.f32 %v574_v17, %v567_v11  ;;  %v5688_v10 = vadd.f32 %v652_v31, %v645_v19  ;;  %v5690_v43 = vadd.f32 %v370_v34, %v363_v22  ;;  %v9980_v19 = vld [vmem:[#allocation47_spill] sm:$0xff] }
 0x15e   : > { %9953 = vst [vmem:[#allocation13_spill] sm:$0xff] %v5670_v38  ;;  %9954 = vst [vmem:[#allocation15_spill] sm:$0xff] %v5673_v33  ;;  %v5694_v54 = vmul.f32 %v9835_v15, %v5388_v25  ;;  %v5696_v56 = vadd.f32 %v444_v44, %v437_v45  ;;  %v5698_v12 = vadd.f32 %v522_v57, %v515_v5  ;;  %v5784_v44 = vmul.f32 4.0, %v5585_v52 }
 0x15f   : > { %9955 = vst [vmem:[#allocation49_spill] sm:$0xff] %v5675_v32  ;;  %9956 = vst [vmem:[#allocation34_spill] sm:$0xff] %v5677_v29  ;;  %v5701_v41 = vadd.f32 %v5490_v28, %v621_v4  ;;  %v5705_v13 = vmul.f32 %v9966_v60, %v9856_v61  ;;  %v5709_v22 = vmul.f32 %v9966_v60, %v9858_v35  ;;  %v9993_v29 = vld [vmem:[#allocation50_spill] sm:$0xff] }
 0x160   : > { %9957 = vst [vmem:[#allocation11_spill] sm:$0xff] %v5681_v23  ;;  %9958 = vst [vmem:[#allocation68_spill] sm:$0xff] %v5684_v8  ;;  %v5713_v25 = vmul.f32 %v9966_v60, %v9860_v6  ;;  %v5717_v62 = vmul.f32 %v9966_v60, %v9862_v1  ;;  %v5721_v28 = vmul.f32 %v9966_v60, %v9866_v18  ;;  %v9987_v60 = vld [vmem:[#allocation51_spill] sm:$0xff]  ;;  %v10005_v23 = vld [vmem:[#allocation33_spill] sm:$0xff] }
 0x161   : > { %9959 = vst [vmem:[#allocation74_spill] sm:$0xff] %v5686_v40  ;;  %9960 = vst [vmem:[#allocation32_spill] sm:$0xff] %v5688_v10  ;;  %v5725_v51 = vmul.f32 %v9968_v58, %v9856_v61  ;;  %v5729_v53 = vmul.f32 %v9968_v58, %v9858_v35  ;;  %v5733_v50 = vmul.f32 %v9968_v58, %v9860_v6 }
 0x162   : > { %9961 = vst [vmem:[#allocation75_spill] sm:$0xff] %v5690_v43  ;;  %9962 = vst [vmem:[#allocation22_spill] sm:$0xff] %v5694_v54  ;;  %v5737_v59 = vmul.f32 %v9968_v58, %v9862_v1  ;;  %v5741_v24 = vmul.f32 %v9968_v58, %v9866_v18  ;;  %v5745_v14 = vmul.f32 %v9974_v3, %v9856_v61 }
 0x163   : > { %9963 = vst [vmem:[#allocation76_spill] sm:$0xff] %v5696_v56  ;;  %9964 = vst [vmem:[#allocation31_spill] sm:$0xff] %v5698_v12  ;;  %v5749_v2 = vmul.f32 %v9974_v3, %v9858_v35  ;;  %v5753_v21 = vmul.f32 %v9974_v3, %v9860_v6  ;;  %v5757_v55 = vmul.f32 %v9974_v3, %v9862_v1 }
 0x164   : > { %9965 = vst [vmem:[#allocation64_spill] sm:$0xff] %v5701_v41  ;;  %9967 = vst [vmem:[#allocation21_spill] sm:$0xff] %v5721_v28  ;;  %v5761_v11 = vmul.f32 %v9974_v3, %v9866_v18  ;;  %v5765_v45 = vmul.f32 %v9980_v19, %v9856_v61  ;;  %v5769_v17 = vmul.f32 %v9980_v19, %v9858_v35 }
 0x165   : > { %9969 = vst [vmem:[#allocation52_spill] sm:$0xff] %v5725_v51  ;;  %9970 = vst [vmem:[#allocation39_spill] sm:$0xff] %v5729_v53  ;;  %v5773_v31 = vmul.f32 %v9980_v19, %v9860_v6  ;;  %v5777_v34 = vmul.f32 %v9980_v19, %v9862_v1  ;;  %v5781_v5 = vmul.f32 %v9980_v19, %v9866_v18 }
 0x166   : > { %9971 = vst [vmem:[#allocation65_spill] sm:$0xff] %v5733_v50  ;;  %9972 = vst [vmem:[#allocation41_spill] sm:$0xff] %v5737_v59  ;;  %v5788_v58 = vmul.f32 %v9987_v60, %v9856_v61  ;;  %v5792_v3 = vmul.f32 %v9987_v60, %v9858_v35  ;;  %v5796_v39 = vmul.f32 %v9987_v60, %v9860_v6 }
 0x167   : > { %9973 = vst [vmem:[#allocation71_spill] sm:$0xff] %v5741_v24  ;;  %9975 = vst [vmem:[#allocation42_spill] sm:$0xff] %v5745_v14  ;;  %v5800_v19 = vmul.f32 %v9987_v60, %v9862_v1  ;;  %v5804_v52 = vmul.f32 %v9987_v60, %v9866_v18  ;;  %v5808_v32 = vmul.f32 %v9993_v29, %v9856_v61 }
 0x168   : > { %9976 = vst [vmem:[#allocation46_spill] sm:$0xff] %v5749_v2  ;;  %9977 = vst [vmem:[#allocation45_spill] sm:$0xff] %v5753_v21  ;;  %v5812_v12 = vmul.f32 %v9993_v29, %v9858_v35  ;;  %v5816_v56 = vmul.f32 %v9993_v29, %v9860_v6  ;;  %v5820_v43 = vmul.f32 %v9993_v29, %v9862_v1 }
 0x169   : > { %9978 = vst [vmem:[#allocation48_spill] sm:$0xff] %v5757_v55  ;;  %9979 = vst [vmem:[#allocation77_spill] sm:$0xff] %v5761_v11  ;;  %v5824_v60 = vmul.f32 %v9993_v29, %v9866_v18  ;;  %v5828_v61 = vmul.f32 %v5531_v63, %v5684_v8  ;;  %v5832_v35 = vmul.f32 %v5535_v36, %v5684_v8  ;;  %v5844_v29 = vmul.f32 4.0, %v5641_v46  ;;  %v10004_v18 = vld [vmem:[#allocation29_spill] sm:$0xff] }
 0x16a   : > { %9981 = vst [vmem:[#allocation47_spill] sm:$0xff] %v5765_v45  ;;  %9982 = vst [vmem:[#allocation78_spill] sm:$0xff] %v5769_v17  ;;  %v1150_v54 = vmul.f32 %v1104_v20, %v9935_v7  ;;  %v5837_v6 = vmul.f32 %v5543_v49, %v5784_v44  ;;  %v5841_v1 = vmul.f32 %v5547_v37, %v5784_v44  ;;  %v10006_v8 = vld [vmem:[#allocation37_spill] sm:$0xff]  ;;  %v10010_v45 = vld [vmem:[#allocation20_spill] sm:$0xff] }
 0x16b   : > { %9983 = vst [vmem:[#allocation79_spill] sm:$0xff] %v5773_v31  ;;  %9984 = vst [vmem:[#allocation80_spill] sm:$0xff] %v5777_v34  ;;  %v1108_v57 = vpop.permute.xlu1 %1107  ;;  %v1216_v63 = vmul.f32 %v1104_v20, %v9938_v16  ;;  %v1288_v10 = vmul.f32 %v1104_v20, %v10004_v18  ;;  %v1348_v36 = vmul.f32 %v1104_v20, %v10005_v23  ;;  %v10008_v34 = vld [vmem:[#allocation18_spill] sm:$0xff] }
 0x16c   : > { %9985 = vst [vmem:[#allocation81_spill] sm:$0xff] %v5781_v5  ;;  %9986 = vst [vmem:[#allocation82_spill] sm:$0xff] %v5784_v44  ;;  %v1106_v4 = vpop.permute.xlu0 %1105  ;;  %v1420_v40 = vmul.f32 %v1104_v20, %v10006_v8  ;;  %v1149_v38 = vmul.f32 %v1102_v9, %v9935_v7  ;;  %v1215_v49 = vmul.f32 %v1102_v9, %v9938_v16 }
 0x16d   : > { %9988 = vst [vmem:[#allocation51_spill] sm:$0xff] %v5788_v58  ;;  %9989 = vst [vmem:[#allocation83_spill] sm:$0xff] %v5792_v3  ;;  %v1287_v33 = vmul.f32 %v1102_v9, %v10004_v18  ;;  %v1347_v37 = vmul.f32 %v1102_v9, %v10005_v23  ;;  %v1419_v44 = vmul.f32 %v1102_v9, %v10006_v8  ;;  %v10007_v58 = vld [vmem:[#allocation16_spill] sm:$0xff] }
 0x16e   : > { %9990 = vst [vmem:[#allocation84_spill] sm:$0xff] %v5796_v39  ;;  %9991 = vst [vmem:[#allocation85_spill] sm:$0xff] %v5800_v19  ;;  %v1152_v46 = vmul.f32 %v1108_v57, %v9935_v7  ;;  %v1350_v20 = vmul.f32 %v1108_v57, %v10005_v23  ;;  %v1422_v27 = vmul.f32 %v1108_v57, %v10006_v8 }
 0x16f   : > { %9992 = vst [vmem:[#allocation86_spill] sm:$0xff] %v5804_v52  ;;  %9994 = vst [vmem:[#allocation50_spill] sm:$0xff] %v5808_v32  ;;  %v1151_v42 = vmul.f32 %v1106_v4, %v9935_v7  ;;  %v1349_v9 = vmul.f32 %v1106_v4, %v10005_v23  ;;  %v1421_v48 = vmul.f32 %v1106_v4, %v10006_v8 }
 0x170   : > { %9995 = vst [vmem:[#allocation87_spill] sm:$0xff] %v5812_v12  ;;  %9996 = vst [vmem:[#allocation88_spill] sm:$0xff] %v5816_v56 }
 0x171   : > { %9997 = vst [vmem:[#allocation89_spill] sm:$0xff] %v5820_v43  ;;  %9998 = vst [vmem:[#allocation90_spill] sm:$0xff] %v5824_v60 }
 0x172   : > { %9999 = vst [vmem:[#allocation91_spill] sm:$0xff] %v5828_v61  ;;  %10000 = vst [vmem:[#allocation92_spill] sm:$0xff] %v5832_v35  ;;  %v1217_v35 = vmul.f32 %v1106_v4, %v9938_v16  ;;  %v1289_v61 = vmul.f32 %v1106_v4, %v10004_v18 }
 0x173   : > { %10001 = vst [vmem:[#allocation93_spill] sm:$0xff] %v5837_v6  ;;  %10002 = vst [vmem:[#allocation94_spill] sm:$0xff] %v5841_v1  ;;  %v1290_v1 = vmul.f32 %v1108_v57, %v10004_v18 }
 0x174   : > { %10003 = vst [vmem:[#allocation95_spill] sm:$0xff] %v5844_v29  ;;  %v1218_v29 = vmul.f32 %v1108_v57, %v9938_v16 }
 0x178   : > { %v1112_v6 = vpop.permute.xlu1 %1111  ;;  %v1110_v41 = vpop.permute.xlu0 %1109 }
 0x179   : > { %v1154_v60 = vmul.f32 %v1112_v6, %v9935_v7  ;;  %v1220_v43 = vmul.f32 %v1112_v6, %v9938_v16  ;;  %v1292_v56 = vmul.f32 %v1112_v6, %v10004_v18  ;;  %v5869_v12 = vmul.f32 %v1112_v6, %v10005_v23 }
 0x17a   : > { %v5872_v57 = vmul.f32 %v1112_v6, %v10006_v8  ;;  %v5875_v32 = vmul.f32 %v1110_v41, %v9935_v7  ;;  %v5878_v52 = vmul.f32 %v1110_v41, %v9938_v16  ;;  %v5881_v4 = vmul.f32 %v1110_v41, %v10004_v18  ;;  %v10009_v6 = vld [vmem:[#allocation19_spill] sm:$0xff]  ;;  %v10011_v16 = vld [vmem:[#allocation24_spill] sm:$0xff] }
 0x17b   : > { %v5884_v19 = vmul.f32 %v1110_v41, %v10005_v23  ;;  %v5891_v11 = vmul.f32 %v1110_v41, %v10006_v8 }
 0x17c   : > { %v1116_v39 = vpop.permute.xlu1 %1115  ;;  %v1114_v3 = vpop.permute.xlu0 %1113 }
 0x17d   : > { %v1156_v5 = vmul.f32 %v1116_v39, %v10007_v58  ;;  %v1222_v31 = vmul.f32 %v1116_v39, %v10008_v34  ;;  %v1294_v17 = vmul.f32 %v1116_v39, %v10009_v6  ;;  %v1354_v7 = vmul.f32 %v1116_v39, %v10010_v45 }
 0x17e   : > { %v1426_v55 = vmul.f32 %v1116_v39, %v10011_v16  ;;  %v1155_v18 = vmul.f32 %v1114_v3, %v10007_v58  ;;  %v1221_v23 = vmul.f32 %v1114_v3, %v10008_v34  ;;  %v1293_v24 = vmul.f32 %v1114_v3, %v10009_v6 }
 0x17f   : > { %v1162_v21 = vadd.f32 %v1156_v5, %v1150_v54  ;;  %v1228_v2 = vadd.f32 %v1222_v31, %v1216_v63  ;;  %v1300_v14 = vadd.f32 %v1294_v17, %v1288_v10  ;;  %v1360_v59 = vadd.f32 %v1354_v7, %v1348_v36 }
 0x180   : > { %v1432_v50 = vadd.f32 %v1426_v55, %v1420_v40  ;;  %v5897_v53 = vadd.f32 %v1155_v18, %v1149_v38  ;;  %v5899_v51 = vadd.f32 %v1221_v23, %v1215_v49  ;;  %v1120_v15 = vpop.permute.xlu1 %1119  ;;  %v1118_v41 = vpop.permute.xlu0 %1117  ;;  %v1353_v8 = vmul.f32 %v1114_v3, %v10010_v45 }
 0x181   : > { %v1425_v39 = vmul.f32 %v1114_v3, %v10011_v16  ;;  %v1158_v28 = vmul.f32 %v1120_v15, %v10007_v58  ;;  %v1224_v54 = vmul.f32 %v1120_v15, %v10008_v34  ;;  %v1296_v10 = vmul.f32 %v1120_v15, %v10009_v6 }
 0x182   : > { %v1356_v17 = vmul.f32 %v1120_v15, %v10010_v45  ;;  %v1428_v7 = vmul.f32 %v1120_v15, %v10011_v16  ;;  %v1157_v18 = vmul.f32 %v1118_v41, %v10007_v58  ;;  %v1299_v38 = vadd.f32 %v1293_v24, %v1287_v33 }
 0x183   : > { %v1359_v23 = vadd.f32 %v1353_v8, %v1347_v37  ;;  %v5909_v40 = vadd.f32 %v1425_v39, %v1419_v44  ;;  %v5911_v55 = vadd.f32 %v1158_v28, %v1152_v46  ;;  %v5913_v31 = vadd.f32 %v1224_v54, %v1218_v29 }
 0x184   : > { %v5915_v5 = vadd.f32 %v1296_v10, %v1290_v1  ;;  %v5917_v3 = vadd.f32 %v1356_v17, %v1350_v20  ;;  %v5919_v63 = vadd.f32 %v1428_v7, %v1422_v27  ;;  %v1124_v36 = vpop.permute.xlu1 %1123  ;;  %v1223_v49 = vmul.f32 %v1118_v41, %v10008_v34  ;;  %v1122_v44 = vpop.permute.xlu0 %1121 }
 0x185   : > { %v1295_v15 = vmul.f32 %v1118_v41, %v10009_v6  ;;  %v1355_v33 = vmul.f32 %v1118_v41, %v10010_v45  ;;  %v1427_v8 = vmul.f32 %v1118_v41, %v10011_v16  ;;  %v5925_v24 = vadd.f32 %v1157_v18, %v1151_v42 }
 0x186   : > { %v1160_v46 = vmul.f32 %v1124_v36, %v10007_v58  ;;  %v1226_v1 = vmul.f32 %v1124_v36, %v10008_v34  ;;  %v1298_v28 = vmul.f32 %v1124_v36, %v10009_v6  ;;  %v5930_v27 = vadd.f32 %v1223_v49, %v1217_v35 }
 0x187   : > { %v5932_v29 = vadd.f32 %v1295_v15, %v1289_v61  ;;  %v5934_v37 = vadd.f32 %v1355_v33, %v1349_v9  ;;  %v1358_v20 = vmul.f32 %v1124_v36, %v10010_v45  ;;  %v5937_v39 = vadd.f32 %v1427_v8, %v1421_v48 }
 0x188   : > { %v5939_v41 = vadd.f32 %v1160_v46, %v1154_v60  ;;  %v5941_v42 = vadd.f32 %v1226_v1, %v1220_v43  ;;  %v5943_v54 = vadd.f32 %v1298_v28, %v1292_v56  ;;  %v1128_v10 = vpop.permute.xlu1 %1127  ;;  %v1430_v17 = vmul.f32 %v1124_v36, %v10011_v16  ;;  %v10012_v46 = vld [vmem:[#allocation21_spill] sm:$0xff]  ;;  %v10013_v1 = vld [vmem:[#allocation58_spill] sm:$0xff] }
 0x189   : > { %v1159_v35 = vmul.f32 %v1122_v44, %v10007_v58  ;;  %v1225_v61 = vmul.f32 %v1122_v44, %v10008_v34  ;;  %v1297_v9 = vmul.f32 %v1122_v44, %v10009_v6  ;;  %v1357_v7 = vmul.f32 %v1122_v44, %v10010_v45 }
 0x18a   : > { %v1429_v48 = vmul.f32 %v1122_v44, %v10011_v16  ;;  %v1174_v60 = vadd.f32 %v5705_v13, %v1162_v21  ;;  %v1180_v43 = vmul.f32 %v1128_v10, %v9883_v0  ;;  %v5954_v56 = vadd.f32 %v1358_v20, %v5869_v12 }
 0x18b   : > { %v5957_v18 = vadd.f32 %v1430_v17, %v5872_v57  ;;  %v5960_v36 = vadd.f32 %v1159_v35, %v5875_v32  ;;  %v5963_v49 = vadd.f32 %v1225_v61, %v5878_v52  ;;  %v5966_v15 = vadd.f32 %v1297_v9, %v5881_v4 }
 0x18c   : > { %v5969_v33 = vadd.f32 %v1357_v7, %v5884_v19  ;;  %v5972_v13 = vadd.f32 %v1429_v48, %v5891_v11  ;;  %v5974_v12 = vadd.f32 %v1180_v43, %v1174_v60  ;;  %v1240_v21 = vadd.f32 %v5709_v22, %v1228_v2  ;;  %v1126_v11 = vpop.permute.xlu0 %1125  ;;  %v10014_v22 = vld [vmem:[#allocation52_spill] sm:$0xff]  ;;  %v10018_v60 = vld [vmem:[#allocation71_spill] sm:$0xff] }
 0x18d   : > { %v1246_v57 = vmul.f32 %v1128_v10, %v9884_v30  ;;  %v1312_v32 = vadd.f32 %v5713_v25, %v1300_v14  ;;  %v1318_v52 = vmul.f32 %v1128_v10, %v9801_v47  ;;  %v1372_v8 = vadd.f32 %v5717_v62, %v1360_v59  ;;  %v10015_v25 = vld [vmem:[#allocation39_spill] sm:$0xff]  ;;  %v10016_v59 = vld [vmem:[#allocation65_spill] sm:$0xff] }
 0x18e   : > { %v1378_v4 = vmul.f32 %v1128_v10, %v9808_v26  ;;  %v1444_v19 = vadd.f32 %v10012_v46, %v1432_v50  ;;  %v1450_v28 = vmul.f32 %v1128_v10, %v10013_v1  ;;  %v1173_v2 = vadd.f32 %v10014_v22, %v5897_v53  ;;  %v10017_v50 = vld [vmem:[#allocation41_spill] sm:$0xff]  ;;  %v1132_v53 = vpop.permute.xlu1 %1131 }
 0x18f   : > { %v5984_v44 = vadd.f32 %v1246_v57, %v1240_v21  ;;  %v5986_v20 = vadd.f32 %v1318_v52, %v1312_v32  ;;  %v1239_v14 = vadd.f32 %v10015_v25, %v5899_v51  ;;  %v1311_v35 = vadd.f32 %v10016_v59, %v1299_v38  ;;  %v10019_v21 = vld [vmem:[#allocation42_spill] sm:$0xff] }
 0x190   : > { %v5992_v17 = vadd.f32 %v1378_v4, %v1372_v8  ;;  %v5994_v62 = vadd.f32 %v1450_v28, %v1444_v19  ;;  %v1371_v61 = vadd.f32 %v10017_v50, %v1359_v23  ;;  %v1179_v10 = vmul.f32 %v1126_v11, %v9883_v0  ;;  %v10020_v38 = vld [vmem:[#allocation46_spill] sm:$0xff]  ;;  %v10021_v4 = vld [vmem:[#allocation45_spill] sm:$0xff]  ;;  %v10022_v28 = vld [vmem:[#allocation48_spill] sm:$0xff] }
 0x191   : > { %v1245_v9 = vmul.f32 %v1126_v11, %v9884_v30  ;;  %v1317_v7 = vmul.f32 %v1126_v11, %v9801_v47  ;;  %v1377_v48 = vmul.f32 %v1126_v11, %v9808_v26  ;;  %v1443_v51 = vadd.f32 %v10018_v60, %v5909_v40  ;;  %v10024_v50 = vld [vmem:[#allocation47_spill] sm:$0xff] }
 0x192   : > { %v1449_v43 = vmul.f32 %v1126_v11, %v10013_v1  ;;  %v1176_v57 = vadd.f32 %v10019_v21, %v5911_v55  ;;  %v1242_v23 = vadd.f32 %v10020_v38, %v5913_v31  ;;  %v6009_v32 = vadd.f32 %v1179_v10, %v1173_v2 }
 0x193   : > { %v6011_v52 = vadd.f32 %v1245_v9, %v1239_v14  ;;  %v6013_v8 = vadd.f32 %v1317_v7, %v1311_v35  ;;  %v1314_v46 = vadd.f32 %v10021_v4, %v5915_v5  ;;  %v6017_v19 = vadd.f32 %v1377_v48, %v1371_v61  ;;  %v1130_v14 = vpop.permute.xlu0 %1129  ;;  %v10023_v5 = vld [vmem:[#allocation77_spill] sm:$0xff] }
 0x194   : > { %v6019_v40 = vadd.f32 %v1449_v43, %v1443_v51  ;;  %v1374_v11 = vadd.f32 %v10022_v28, %v5917_v3  ;;  %v1182_v55 = vmul.f32 %v1132_v53, %v9883_v0  ;;  %v1248_v31 = vmul.f32 %v1132_v53, %v9884_v30  ;;  %v10025_v3 = vld [vmem:[#allocation78_spill] sm:$0xff] }
 0x195   : > { %v1320_v22 = vmul.f32 %v1132_v53, %v9801_v47  ;;  %v1380_v2 = vmul.f32 %v1132_v53, %v9808_v26  ;;  %v1452_v25 = vmul.f32 %v1132_v53, %v10013_v1  ;;  %v1446_v59 = vadd.f32 %v10023_v5, %v5919_v63  ;;  %v10026_v53 = vld [vmem:[#allocation79_spill] sm:$0xff]  ;;  %v10027_v63 = vld [vmem:[#allocation80_spill] sm:$0xff] }
 0x196   : > { %v6030_v35 = vadd.f32 %v1182_v55, %v1176_v57  ;;  %v1175_v61 = vadd.f32 %v10024_v50, %v5925_v24  ;;  %v1241_v10 = vadd.f32 %v10025_v3, %v5930_v27  ;;  %v6036_v9 = vadd.f32 %v1248_v31, %v1242_v23  ;;  %v1136_v57 = vpop.permute.xlu1 %1135  ;;  %v10028_v27 = vld [vmem:[#allocation81_spill] sm:$0xff]  ;;  %v10030_v55 = vld [vmem:[#allocation83_spill] sm:$0xff] }
 0x197   : > { %v6038_v7 = vadd.f32 %v1320_v22, %v1314_v46  ;;  %v6040_v48 = vadd.f32 %v1380_v2, %v1374_v11  ;;  %v1313_v60 = vadd.f32 %v10026_v53, %v5932_v29  ;;  %v6044_v51 = vadd.f32 %v1452_v25, %v1446_v59  ;;  %v10031_v25 = vld [vmem:[#allocation84_spill] sm:$0xff]  ;;  %v10032_v59 = vld [vmem:[#allocation85_spill] sm:$0xff] }
 0x198   : > { %v1373_v43 = vadd.f32 %v10027_v63, %v5934_v37  ;;  %v1181_v21 = vmul.f32 %v1130_v14, %v9883_v0  ;;  %v1247_v24 = vmul.f32 %v1130_v14, %v9884_v30  ;;  %v1445_v38 = vadd.f32 %v10028_v27, %v5937_v39  ;;  %v10029_v37 = vld [vmem:[#allocation51_spill] sm:$0xff]  ;;  %v10034_v63 = vld [vmem:[#allocation50_spill] sm:$0xff] }
 0x199   : > { %v1319_v23 = vmul.f32 %v1130_v14, %v9801_v47  ;;  %v1379_v4 = vmul.f32 %v1130_v14, %v9808_v26  ;;  %v1451_v46 = vmul.f32 %v1130_v14, %v10013_v1  ;;  %v1178_v11 = vadd.f32 %v10029_v37, %v5939_v41  ;;  %v1134_v14 = vpop.permute.xlu0 %1133 }
 0x19a   : > { %v6055_v29 = vadd.f32 %v1181_v21, %v1175_v61  ;;  %v6057_v28 = vadd.f32 %v1247_v24, %v1241_v10  ;;  %v1244_v31 = vadd.f32 %v10030_v55, %v5941_v42  ;;  %v1316_v5 = vadd.f32 %v10031_v25, %v5943_v54  ;;  %v10033_v42 = vld [vmem:[#allocation86_spill] sm:$0xff]  ;;  %v10035_v24 = vld [vmem:[#allocation87_spill] sm:$0xff] }
 0x19b   : > { %v6063_v22 = vadd.f32 %v1319_v23, %v1313_v60  ;;  %v6065_v2 = vadd.f32 %v1379_v4, %v1373_v43  ;;  %v6067_v39 = vadd.f32 %v1451_v46, %v1445_v38  ;;  %v1376_v50 = vadd.f32 %v10032_v59, %v5954_v56  ;;  %v1140_v38 = vpop.permute.xlu1 %1139  ;;  %v10036_v4 = vld [vmem:[#allocation88_spill] sm:$0xff]  ;;  %v10037_v46 = vld [vmem:[#allocation89_spill] sm:$0xff] }
 0x19c   : > { %v1184_v61 = vmul.f32 %v1136_v57, %v9883_v0  ;;  %v1250_v41 = vmul.f32 %v1136_v57, %v9884_v30  ;;  %v1322_v3 = vmul.f32 %v1136_v57, %v9801_v47  ;;  %v1448_v10 = vadd.f32 %v10033_v42, %v5957_v18 }
 0x19d   : > { %v1382_v53 = vmul.f32 %v1136_v57, %v9808_v26  ;;  %v1454_v60 = vmul.f32 %v1136_v57, %v10013_v1  ;;  %v1177_v54 = vadd.f32 %v10034_v63, %v5960_v36  ;;  %v1243_v27 = vadd.f32 %v10035_v24, %v5963_v49  ;;  %v10038_v49 = vld [vmem:[#allocation90_spill] sm:$0xff] }
 0x19e   : > { %v6082_v43 = vadd.f32 %v1184_v61, %v1178_v11  ;;  %v6084_v21 = vadd.f32 %v1250_v41, %v1244_v31  ;;  %v6086_v56 = vadd.f32 %v1322_v3, %v1316_v5  ;;  %v1315_v57 = vadd.f32 %v10036_v4, %v5966_v15  ;;  %v10039_v5 = vld [vmem:[#allocation59_spill] sm:$0xff]  ;;  %v10041_v15 = vld [vmem:[#allocation61_spill] sm:$0xff]  ;;  %v1138_v3 = vpop.permute.xlu0 %1137  ;;  %v10042_v4 = vld [vmem:[#allocation62_spill] sm:$0xff] }
 0x19f   : > { %v6090_v23 = vadd.f32 %v1382_v53, %v1376_v50  ;;  %v6092_v18 = vadd.f32 %v1454_v60, %v1448_v10  ;;  %v1375_v36 = vadd.f32 %v10037_v46, %v5969_v33  ;;  %v1183_v37 = vmul.f32 %v1134_v14, %v9883_v0  ;;  %v10040_v50 = vld [vmem:[#allocation60_spill] sm:$0xff] }
 0x1a0   : > { %v1249_v11 = vmul.f32 %v1134_v14, %v9884_v30  ;;  %v1321_v55 = vmul.f32 %v1134_v14, %v9801_v47  ;;  %v1381_v31 = vmul.f32 %v1134_v14, %v9808_v26  ;;  %v6104_v25 = vadd.f32 %v10038_v49, %v5972_v13  ;;  %v10043_v49 = vld [vmem:[#allocation63_spill] sm:$0xff] }
 0x1a1   : > { %v1192_v59 = vmul.f32 %v1140_v38, %v10039_v5  ;;  %v1258_v61 = vmul.f32 %v1140_v38, %v10040_v50  ;;  %v1330_v41 = vmul.f32 %v1140_v38, %v10041_v15  ;;  %v6109_v33 = vadd.f32 %v1183_v37, %v1177_v54  ;;  %v1144_v37 = vpop.permute.xlu1 %1143 }
 0x1a2   : > { %v6111_v42 = vadd.f32 %v1249_v11, %v1243_v27  ;;  %v6113_v10 = vadd.f32 %v1321_v55, %v1315_v57  ;;  %v6116_v53 = vmul.f32 %v1134_v14, %v10013_v1  ;;  %v6118_v60 = vadd.f32 %v1381_v31, %v1375_v36 }
 0x1a3   : > { %v1198_v13 = vadd.f32 %v1192_v59, %v5974_v12  ;;  %v1264_v63 = vadd.f32 %v1258_v61, %v5984_v44  ;;  %v1336_v24 = vadd.f32 %v1330_v41, %v5986_v20  ;;  %v1390_v46 = vmul.f32 %v1140_v38, %v10042_v4 }
 0x1a4   : > { %v1462_v54 = vmul.f32 %v1140_v38, %v10043_v49  ;;  %v1191_v27 = vmul.f32 %v1138_v3, %v10039_v5  ;;  %v1257_v57 = vmul.f32 %v1138_v3, %v10040_v50  ;;  %v1329_v36 = vmul.f32 %v1138_v3, %v10041_v15 }
 0x1a5   : > { %v1204_v11 = vrot.slane %v1198_v13, 6  ;;  %v1270_v14 = vrot.slane %v1264_v63, 7  ;;  %v1389_v55 = vmul.f32 %v1138_v3, %v10042_v4  ;;  %v1396_v12 = vadd.f32 %v1390_v46, %v5992_v17 }
 0x1a6   : > { %v1468_v44 = vadd.f32 %v1462_v54, %v5994_v62  ;;  %v1197_v20 = vadd.f32 %v1191_v27, %v6009_v32  ;;  %v1263_v31 = vadd.f32 %v1257_v57, %v6011_v52  ;;  %v1335_v38 = vadd.f32 %v1329_v36, %v6013_v8 }
 0x1a7   : > { %v1395_v59 = vadd.f32 %v1389_v55, %v6017_v19  ;;  %v1461_v61 = vmul.f32 %v1138_v3, %v10043_v49  ;;  %v1194_v41 = vmul.f32 %v1144_v37, %v10039_v5  ;;  %v1402_v13 = vrot.slane %v1396_v12, 1 }
 0x1a8   : > { %v1474_v63 = vrot.slane %v1468_v44, 2  ;;  %v1203_v1 = vrot.slane %v1197_v20, 6  ;;  %v1269_v26 = vrot.slane %v1263_v31, 7  ;;  %v1260_v32 = vmul.f32 %v1144_v37, %v10040_v50 }
 0x1a9   : > { %v1401_v47 = vrot.slane %v1395_v59, 1  ;;  %v1467_v17 = vadd.f32 %v1461_v61, %v6019_v40  ;;  %v1200_v62 = vadd.f32 %v1194_v41, %v6030_v35  ;;  %v1392_v44 = vmul.f32 %v1144_v37, %v10042_v4 }
 0x1aa   : > { %v1205_v8 = vsel %vm395_vm3, %v1203_v1, %v1204_v11  ;;  %v1206_v19 = vsel %vm395_vm3, %v1204_v11, %v1203_v1  ;;  %v1271_v3 = vsel %vm467_vm2, %v1269_v26, %v1270_v14  ;;  %v1272_v46 = vsel %vm467_vm2, %v1270_v14, %v1269_v26  ;;  %v1142_v14 = vpop.permute.xlu0 %1141 }
 0x1ab   : > { %v1281_v54 = vadd.f32 %v1272_v46, %v1206_v19  ;;  %v1282_v27 = vadd.f32 %v1271_v3, %v1205_v8  ;;  %v1403_v40 = vsel %vm610_vm1, %v1401_v47, %v1402_v13  ;;  %v1404_v35 = vsel %vm610_vm1, %v1402_v13, %v1401_v47  ;;  %v10045_v46 = vld [vmem:[#allocation91_spill] sm:$0xff] }
 0x1ac   : > { %v1473_v57 = vrot.slane %v1467_v17, 2  ;;  %v1208_v36 = vrot.slane %v1200_v62, 6  ;;  %v1266_v55 = vadd.f32 %v1260_v32, %v6036_v9  ;;  %v1332_v1 = vmul.f32 %v1144_v37, %v10041_v15  ;;  %v1148_v62 = vpop.permute.xlu1 %1147 }
 0x1ad   : > { %v1341_v11 = vadd.f32 %v1335_v38, %v1281_v54  ;;  %v1342_v12 = vadd.f32 %v1336_v24, %v1282_v27  ;;  %v1464_v26 = vmul.f32 %v1144_v37, %v10043_v49  ;;  %v1398_v41 = vadd.f32 %v1392_v44, %v6040_v48  ;;  %v10046_v27 = vld [vmem:[#allocation92_spill] sm:$0xff] }
 0x1ae   : > { %v1475_v20 = vsel %vm688_vm0, %v1473_v57, %v1474_v63  ;;  %v1476_v31 = vsel %vm688_vm0, %v1474_v63, %v1473_v57  ;;  %v1274_v47 = vrot.slane %v1266_v55, 7  ;;  %v1338_v59 = vadd.f32 %v1332_v1, %v6038_v7 }
 0x1af   : > { %v1413_v61 = vadd.f32 %v1403_v40, %v1341_v11  ;;  %v1414_v9 = vadd.f32 %v1404_v35, %v1342_v12  ;;  %v1470_v24 = vadd.f32 %v1464_v26, %v6044_v51  ;;  %v1193_v38 = vmul.f32 %v1142_v14, %v10039_v5 }
 0x1b0   : > { %v1259_v37 = vmul.f32 %v1142_v14, %v10040_v50  ;;  %v1331_v13 = vmul.f32 %v1142_v14, %v10041_v15  ;;  %v1391_v17 = vmul.f32 %v1142_v14, %v10042_v4  ;;  %v1406_v8 = vrot.slane %v1398_v41, 1 }
 0x1b1   : > { %v1485_v32 = vadd.f32 %v1475_v20, %v1413_v61  ;;  %v1486_v63 = vadd.f32 %v1476_v31, %v1414_v9  ;;  %v1478_v19 = vrot.slane %v1470_v24, 2  ;;  %v1199_v7 = vadd.f32 %v1193_v38, %v6055_v29  ;;  %v10047_v29 = vld [vmem:[#allocation14_spill] sm:$0xff]  ;;  %v10049_v9 = vld [vmem:[#allocation64_spill] sm:$0xff] }
 0x1b2   : > { %v1265_v3 = vadd.f32 %v1259_v37, %v6057_v28  ;;  %v1337_v48 = vadd.f32 %v1331_v13, %v6063_v22  ;;  %v1397_v51 = vadd.f32 %v1391_v17, %v6065_v2  ;;  %v1463_v35 = vmul.f32 %v1142_v14, %v10043_v49  ;;  %v10048_v28 = vld [vmem:[#allocation44_spill] sm:$0xff] }
 0x1b3   : > { %v1539_v54 = vadd.f32 %v10045_v46, %v1485_v32  ;;  %v1540_v40 = vadd.f32 %v10046_v27, %v1486_v63  ;;  %v1196_v57 = vmul.f32 %v1148_v62, %v10039_v5  ;;  %v1207_v55 = vrot.slane %v1199_v7, 6  ;;  %v10051_v24 = vld [vmem:[#allocation36_spill] sm:$0xff] }
 0x1b4   : > { %v1273_v1 = vrot.slane %v1265_v3, 7  ;;  %v1405_v11 = vrot.slane %v1397_v51, 1  ;;  %v1262_v12 = vmul.f32 %v1148_v62, %v10040_v50  ;;  %v1469_v22 = vadd.f32 %v1463_v35, %v6067_v39  ;;  %v1146_v3 = vpop.permute.xlu0 %1145 }
 0x1b5   : > { %v1551_v44 = vsub.f32 %v1539_v54, %v10047_v29  ;;  %v1552_v26 = vsub.f32 %v1540_v40, %v10048_v28  ;;  %v1202_v2 = vadd.f32 %v1196_v57, %v6082_v43  ;;  %v1209_v20 = vsel %vm395_vm3, %v1207_v55, %v1208_v36  ;;  %v10054_v28 = vld [vmem:[#allocation94_spill] sm:$0xff] }
 0x1b6   : > { %v1210_v14 = vsel %vm395_vm3, %v1208_v36, %v1207_v55  ;;  %v1275_v31 = vsel %vm467_vm2, %v1273_v1, %v1274_v47  ;;  %v1276_v61 = vsel %vm467_vm2, %v1274_v47, %v1273_v1  ;;  %v1459_v37 = vadd.f32 %v6116_v53, %v6104_v25 }
 0x1b7   : > { %v6189_v41 = vsub.f32 %v10049_v9, %v1551_v44   ;;  %v6192_v38 = vsub.f32 %v10051_v24, %v1552_v26   ;;  %v1283_v39 = vadd.f32 %v1276_v61, %v1210_v14  ;;  %v1284_v43 = vadd.f32 %v1275_v31, %v1209_v20  ;;  %v10053_v44 = vld [vmem:[#allocation93_spill] sm:$0xff]  ;;  %v10055_v9 = vld [vmem:[#allocation15_spill] sm:$0xff] }
 0x1b8   : > { %v1407_v36 = vsel %vm610_vm1, %v1405_v11, %v1406_v8  ;;  %v1408_v13 = vsel %vm610_vm1, %v1406_v8, %v1405_v11  ;;  %v1477_v17 = vrot.slane %v1469_v22, 2  ;;  %v1268_v63 = vadd.f32 %v1262_v12, %v6084_v21  ;;  %v331_v11 = vpop.permute.xlu1 %330  ;;  %v10056_v24 = vld [vmem:[#allocation13_spill] sm:$0xff] }
 0x1b9   : > { %10050 = vst [vmem:[#allocation21_spill] sm:$0xff] %v6189_v41  ;;  %10052 = vst [vmem:[#allocation52_spill] sm:$0xff] %v6192_v38  ;;  %v1343_v32 = vadd.f32 %v1337_v48, %v1283_v39  ;;  %v1344_v47 = vadd.f32 %v1338_v59, %v1284_v43  ;;  %v1334_v7 = vmul.f32 %v1148_v62, %v10041_v15  ;;  %1626 = vrot.lane.b32.xlu0 %v6189_v41, %s9879_s13 }
 0x1ba   : > { %v1479_v25 = vsel %vm688_vm0, %v1477_v17, %v1478_v19  ;;  %v1212_v53 = vrot.slane %v1202_v2, 6  ;;  %v1394_v51 = vmul.f32 %v1148_v62, %v10042_v4  ;;  %v1466_v46 = vmul.f32 %v1148_v62, %v10043_v49  ;;  %1628 = vrot.lane.b32.xlu1 %v6192_v38, %s9879_s13 }
 0x1bb   : > { %v1415_v59 = vadd.f32 %v1407_v36, %v1343_v32  ;;  %v1416_v8 = vadd.f32 %v1408_v13, %v1344_v47  ;;  %v1480_v21 = vsel %vm688_vm0, %v1478_v19, %v1477_v17  ;;  %v1278_v48 = vrot.slane %v1268_v63, 7  ;;  %v10057_v13 = vld [vmem:[#allocation10_spill] sm:$0xff]  ;;  %v10059_v32 = vld [vmem:[#allocation12_spill] sm:$0xff] }
 0x1bc   : > { %v1340_v54 = vadd.f32 %v1334_v7, %v6086_v56  ;;  %v1400_v27 = vadd.f32 %v1394_v51, %v6090_v23  ;;  %v1195_v40 = vmul.f32 %v1146_v3, %v10039_v5  ;;  %v1261_v35 = vmul.f32 %v1146_v3, %v10040_v50 }
 0x1bd   : > { %v1487_v57 = vadd.f32 %v1479_v25, %v1415_v59  ;;  %v1488_v55 = vadd.f32 %v1480_v21, %v1416_v8  ;;  %v1333_v62 = vmul.f32 %v1146_v3, %v10041_v15  ;;  %v1393_v1 = vmul.f32 %v1146_v3, %v10042_v4  ;;  %v10062_v25 = vld [vmem:[#allocation11_spill] sm:$0xff]  ;;  %v10064_v59 = vld [vmem:[#allocation22_spill] sm:$0xff] }
 0x1be   : > { %v1410_v12 = vrot.slane %v1400_v27, 1  ;;  %v1472_v29 = vadd.f32 %v1466_v46, %v6092_v18  ;;  %v1201_v19 = vadd.f32 %v1195_v40, %v6109_v33  ;;  %v1267_v56 = vadd.f32 %v1261_v35, %v6111_v42  ;;  %v10063_v46 = vld [vmem:[#allocation32_spill] sm:$0xff]  ;;  %v10065_v27 = vld [vmem:[#allocation95_spill] sm:$0xff]  ;;  %v10066_v40 = vld [vmem:[#allocation38_spill] sm:$0xff] }
 0x1bf   : > { %v1541_v23 = vadd.f32 %v10053_v44, %v1487_v57  ;;  %v1542_v26 = vadd.f32 %v10054_v28, %v1488_v55  ;;  %v1339_v22 = vadd.f32 %v1333_v62, %v6113_v10  ;;  %v1399_v2 = vadd.f32 %v1393_v1, %v6118_v60  ;;  %v10067_v44 = vld [vmem:[#allocation40_spill] sm:$0xff]  ;;  %v10068_v28 = vld [vmem:[#allocation69_spill] sm:$0xff] }
 0x1c0   : > { %v1211_v20 = vrot.slane %v1201_v19, 6  ;;  %v1277_v14 = vrot.slane %v1267_v56, 7  ;;  %v1465_v31 = vmul.f32 %v1146_v3, %v10043_v49  ;;  %v384_v61 = vmul.f32 %v10039_v5, %v331_v11  ;;  %v10061_v3 = vld [vmem:[#allocation74_spill] sm:$0xff] }
 0x1c1   : > { %v1553_v18 = vsub.f32 %v1541_v23, %v10055_v9  ;;  %v1554_v33 = vsub.f32 %v1542_v26, %v10056_v24  ;;  %v1409_v39 = vrot.slane %v1399_v2, 1  ;;  %v458_v42 = vmul.f32 %v10040_v50, %v331_v11  ;;  %v10070_v9 = vld [vmem:[#allocation72_spill] sm:$0xff] }
 0x1c2   : > { %v1213_v43 = vsel %vm395_vm3, %v1211_v20, %v1212_v53  ;;  %v1214_v10 = vsel %vm395_vm3, %v1212_v53, %v1211_v20  ;;  %v1279_v60 = vsel %vm467_vm2, %v1277_v14, %v1278_v48  ;;  %v1280_v36 = vsel %vm467_vm2, %v1278_v48, %v1277_v14  ;;  %v10069_v20 = vld [vmem:[#allocation67_spill] sm:$0xff] }
 0x1c3   : > { %v6239_v17 = vsub.f32 %v10057_v13, %v1553_v18   ;;  %v6242_v47 = vsub.f32 %v10059_v32, %v1554_v33   ;;  %v1285_v63 = vadd.f32 %v1280_v36, %v1214_v10  ;;  %v1286_v7 = vadd.f32 %v1279_v60, %v1213_v43  ;;  %v10073_v32 = vld [vmem:[#allocation76_spill] sm:$0xff] }
 0x1c4   : > { %v593_v51 = vadd.f32 %v10062_v25, %v10061_v3  ;;  %v671_v53 = vadd.f32 %v10064_v59, %v10063_v46  ;;  %v1482_v8 = vrot.slane %v1472_v29, 2  ;;  %v1471_v21 = vadd.f32 %v1465_v31, %v1459_v37  ;;  %v329_v37 = vpop.permute.xlu0 %328 }
 0x1c5   : > { %10058 = vst [vmem:[#allocation39_spill] sm:$0xff] %v6239_v17  ;;  %10060 = vst [vmem:[#allocation65_spill] sm:$0xff] %v6242_v47  ;;  %v1537_v35 = vmul.f32 %v10066_v40, %v10065_v27  ;;  %v1345_v48 = vadd.f32 %v1339_v22, %v1285_v63  ;;  %v1346_v57 = vadd.f32 %v1340_v54, %v1286_v7  ;;  %1630 = vrot.lane.b32.xlu0 %v6239_v17, %s9879_s13  ;;  %v10074_v7 = vld [vmem:[#allocation70_spill] sm:$0xff] }
 0x1c6   : > { %v1411_v55 = vsel %vm610_vm1, %v1409_v39, %v1410_v12  ;;  %v1412_v62 = vsel %vm610_vm1, %v1410_v12, %v1409_v39  ;;  %v1481_v1 = vrot.slane %v1471_v21, 2  ;;  %v601_v19 = vmul.f32 %v10042_v4, %v331_v11  ;;  %1632 = vrot.lane.b32.xlu1 %v6242_v47, %s9879_s13 }
 0x1c7   : > { %v679_v29 = vmul.f32 %v10043_v49, %v331_v11  ;;  %v1417_v56 = vadd.f32 %v1411_v55, %v1345_v48  ;;  %v1418_v54 = vadd.f32 %v1412_v62, %v1346_v57  ;;  %v390_v23 = vadd.f32 %v384_v61, %v10067_v44  ;;  %v10071_v61 = vld [vmem:[#allocation43_spill] sm:$0xff] }
 0x1c8   : > { %v464_v26 = vadd.f32 %v458_v42, %v10068_v28  ;;  %v1483_v22 = vsel %vm688_vm0, %v1481_v1, %v1482_v8  ;;  %v1484_v12 = vsel %vm688_vm0, %v1482_v8, %v1481_v1  ;;  %v536_v2 = vmul.f32 %v10041_v15, %v331_v11  ;;  %v10072_v11 = vld [vmem:[#allocation75_spill] sm:$0xff]  ;;  %v10076_v28 = vld [vmem:[#allocation28_spill] sm:$0xff] }
 0x1c9   : > { %v607_v14 = vadd.f32 %v601_v19, %v10069_v20  ;;  %v1489_v31 = vadd.f32 %v1483_v22, %v1417_v56  ;;  %v685_v18 = vadd.f32 %v679_v29, %v10070_v9  ;;  %v383_v24 = vmul.f32 %v10039_v5, %v329_v37  ;;  %v10075_v55 = vld [vmem:[#allocation31_spill] sm:$0xff] }
 0x1ca   : > { %v457_v33 = vmul.f32 %v10040_v50, %v329_v37  ;;  %v1538_v39 = vmul.f32 %v10071_v61, %v10065_v27  ;;  %v1490_v42 = vadd.f32 %v1484_v12, %v1418_v54  ;;  %v535_v43 = vmul.f32 %v10041_v15, %v329_v37  ;;  %v10078_v12 = vld [vmem:[#allocation34_spill] sm:$0xff] }
 0x1cb   : > { %v600_v10 = vmul.f32 %v10042_v4, %v329_v37  ;;  %v403_v60 = vrot.slane %v390_v23, 6  ;;  %v475_v36 = vrot.slane %v464_v26, 7  ;;  %v389_v13 = vadd.f32 %v383_v24, %v10072_v11  ;;  %v10077_v26 = vld [vmem:[#allocation49_spill] sm:$0xff] }
 0x1cc   : > { %v463_v63 = vadd.f32 %v457_v33, %v10073_v32  ;;  %v542_v3 = vadd.f32 %v536_v2, %v10074_v7  ;;  %v618_v25 = vrot.slane %v607_v14, 1  ;;  %v678_v59 = vmul.f32 %v10043_v49, %v329_v37  ;;  %v10083_v11 = vld [vmem:[#allocation17_spill] sm:$0xff]  ;;  %v10084_v32 = vld [vmem:[#allocation23_spill] sm:$0xff] }
 0x1cd   : > { %v606_v46 = vadd.f32 %v600_v10, %v593_v51  ;;  %v1543_v8 = vadd.f32 %v1537_v35, %v1489_v31  ;;  %v696_v21 = vrot.slane %v685_v18, 2  ;;  %v402_v40 = vrot.slane %v389_v13, 6  ;;  %v10085_v7 = vld [vmem:[#allocation27_spill] sm:$0xff] }
 0x1ce   : > { %v474_v48 = vrot.slane %v463_v63, 7  ;;  %v1544_v57 = vadd.f32 %v1538_v39, %v1490_v42  ;;  %v541_v62 = vadd.f32 %v535_v43, %v10075_v55  ;;  %v684_v19 = vadd.f32 %v678_v59, %v671_v53  ;;  %v10087_v59 = vld [vmem:[#allocation35_spill] sm:$0xff] }
 0x1cf   : > { %v617_v1 = vrot.slane %v606_v46, 1  ;;  %v404_v29 = vsel %vm395_vm3, %v402_v40, %v403_v60  ;;  %v405_v56 = vsel %vm395_vm3, %v403_v60, %v402_v40  ;;  %v1550_v22 = vmul.f32 %v10077_v26, %v10076_v28 }
 0x1d0   : > { %v476_v51 = vsel %vm467_vm2, %v474_v48, %v475_v36  ;;  %v477_v35 = vsel %vm467_vm2, %v475_v36, %v474_v48  ;;  %v695_v23 = vrot.slane %v684_v19, 2  ;;  %v1549_v2 = vmul.f32 %v10078_v12, %v10076_v28 }
 0x1d1   : > { %v482_v37 = vadd.f32 %v477_v35, %v405_v56  ;;  %v483_v54 = vadd.f32 %v476_v51, %v404_v29  ;;  %v619_v44 = vsel %vm610_vm1, %v617_v1, %v618_v25  ;;  %v620_v53 = vsel %vm610_vm1, %v618_v25, %v617_v1  ;;  %v10086_v25 = vld [vmem:[#allocation30_spill] sm:$0xff] }
 0x1d2   : > { %v697_v31 = vsel %vm688_vm0, %v695_v23, %v696_v21  ;;  %v698_v9 = vsel %vm688_vm0, %v696_v21, %v695_v23  ;;  %v1555_v18 = vsub.f32 %v1543_v8, %v1549_v2  ;;  %v1556_v24 = vsub.f32 %v1544_v57, %v1550_v22 }
 0x1d3   : > { %v547_v20 = vadd.f32 %v541_v62, %v482_v37  ;;  %v548_v14 = vadd.f32 %v542_v3, %v483_v54  ;;  %v6350_v13 = vmul.f32 %v6189_v41, %v10083_v11  ;;  %v6354_v63 = vmul.f32 %v6189_v41, %v10084_v32 }
 0x1d4   : > { %v6358_v3 = vmul.f32 %v6189_v41, %v10085_v7  ;;  %v6362_v46 = vmul.f32 %v6189_v41, %v10086_v25  ;;  %v6366_v8 = vmul.f32 %v6189_v41, %v10087_v59  ;;  %v6374_v48 = vmul.f32 %v6192_v38, %v10083_v11 }
 0x1d5   : > { %v625_v33 = vadd.f32 %v619_v44, %v547_v20  ;;  %v626_v61 = vadd.f32 %v620_v53, %v548_v14  ;;  %v6378_v57 = vmul.f32 %v6192_v38, %v10084_v32  ;;  %v6382_v55 = vmul.f32 %v6192_v38, %v10085_v7 }
 0x1d6   : > { %v6386_v62 = vmul.f32 %v6192_v38, %v10086_v25  ;;  %v6390_v1 = vmul.f32 %v6192_v38, %v10087_v59  ;;  %v6394_v19 = vmul.f32 %v6239_v17, %v10083_v11  ;;  %v6398_v29 = vmul.f32 %v6239_v17, %v10084_v32 }
 0x1d7   : > { %v703_v39 = vadd.f32 %v697_v31, %v625_v33  ;;  %v704_v42 = vadd.f32 %v698_v9, %v626_v61  ;;  %v6402_v56 = vmul.f32 %v6239_v17, %v10085_v7  ;;  %v6406_v51 = vmul.f32 %v6239_v17, %v10086_v25 }
 0x1d8   : > { %v6410_v35 = vmul.f32 %v6239_v17, %v10087_v59  ;;  %v6414_v37 = vmul.f32 %v6242_v47, %v10083_v11  ;;  %v6418_v54 = vmul.f32 %v6242_v47, %v10084_v32  ;;  %v6422_v44 = vmul.f32 %v6242_v47, %v10085_v7 }
 0x1d9   : > { %v6300_v43 = vsub.f32 %v703_v39, %v1555_v18   ;;  %v6302_v10 = vsub.f32 %v704_v42, %v1556_v24   ;;  %v6426_v53 = vmul.f32 %v6242_v47, %v10086_v25  ;;  %v6430_v23 = vmul.f32 %v6242_v47, %v10087_v59 }
 0x1da   : > { %10090 = vst [vmem:[#allocation77_spill] sm:$0xff] %v6410_v35  ;;  %10091 = vst [vmem:[#allocation47_spill] sm:$0xff] %v6414_v37 }
 0x1db   : > { %10079 = vst [vmem:[#allocation41_spill] sm:$0xff] %v6300_v43  ;;  %10080 = vst [vmem:[#allocation71_spill] sm:$0xff] %v6302_v10  ;;  %1634 = vrot.lane.b32.xlu0 %v6300_v43, %s9879_s13  ;;  %1636 = vrot.lane.b32.xlu1 %v6302_v10, %s9879_s13  ;;  %v6434_v26 = vmul.f32 %v6300_v43, %v10083_v11  ;;  %v6438_v22 = vmul.f32 %v6300_v43, %v10084_v32 }
 0x1dc   : > { %10092 = vst [vmem:[#allocation78_spill] sm:$0xff] %v6418_v54  ;;  %10093 = vst [vmem:[#allocation79_spill] sm:$0xff] %v6422_v44  ;;  %v6442_v12 = vmul.f32 %v6300_v43, %v10085_v7  ;;  %v6446_v2 = vmul.f32 %v6300_v43, %v10086_v25  ;;  %v6450_v20 = vmul.f32 %v6300_v43, %v10087_v59 }
 0x1dd   : > { %10094 = vst [vmem:[#allocation80_spill] sm:$0xff] %v6426_v53  ;;  %10095 = vst [vmem:[#allocation81_spill] sm:$0xff] %v6430_v23  ;;  %v6454_v14 = vmul.f32 %v6302_v10, %v10083_v11  ;;  %v6458_v31 = vmul.f32 %v6302_v10, %v10084_v32  ;;  %v6462_v9 = vmul.f32 %v6302_v10, %v10085_v7 }
 0x1de   : > { %10096 = vst [vmem:[#allocation51_spill] sm:$0xff] %v6434_v26  ;;  %10097 = vst [vmem:[#allocation83_spill] sm:$0xff] %v6438_v22  ;;  %v6466_v18 = vmul.f32 %v6302_v10, %v10086_v25  ;;  %v6480_v28 = vmul.f32 %v6302_v10, %v10087_v59 }
 0x1df   : > { %1638 = vrot.lane.b32.xlu0 %v6189_v41, %s9885_s14  ;;  %1640 = vrot.lane.b32.xlu1 %v6192_v38, %s9885_s14  ;;  %10098 = vst [vmem:[#allocation84_spill] sm:$0xff] %v6442_v12  ;;  %10099 = vst [vmem:[#allocation85_spill] sm:$0xff] %v6446_v2  ;;  %v10114_v2 = vld [vmem:[#allocation37_spill] sm:$0xff] }
 0x1e0   : > { %10100 = vst [vmem:[#allocation86_spill] sm:$0xff] %v6450_v20  ;;  %10101 = vst [vmem:[#allocation50_spill] sm:$0xff] %v6454_v14 }
 0x1e1   : > { %10102 = vst [vmem:[#allocation87_spill] sm:$0xff] %v6458_v31  ;;  %10103 = vst [vmem:[#allocation88_spill] sm:$0xff] %v6462_v9  ;;  %v10110_v31 = vld [vmem:[#allocation29_spill] sm:$0xff] }
 0x1e2   : > { %10104 = vst [vmem:[#allocation89_spill] sm:$0xff] %v6466_v18  ;;  %10106 = vst [vmem:[#allocation91_spill] sm:$0xff] %v6480_v28  ;;  %v10109_v18 = vld [vmem:[#allocation26_spill] sm:$0xff] }
 0x1e3   : > { %1642 = vrot.lane.b32.xlu0 %v6239_v17, %s9885_s14  ;;  %1644 = vrot.lane.b32.xlu1 %v6242_v47, %s9885_s14 }
 0x1e7   : > { %1646 = vrot.lane.b32.xlu0 %v6300_v43, %s9885_s14  ;;  %1648 = vrot.lane.b32.xlu1 %v6302_v10, %s9885_s14 }
 0x1eb   : > { %1614 = vrot.lane.b32.xlu0 %v6189_v41, %s4194_s16  ;;  %1616 = vrot.lane.b32.xlu1 %v6192_v38, %s4194_s16 }
 0x1ef   : > { %1618 = vrot.lane.b32.xlu0 %v6239_v17, %s4194_s16  ;;  %1620 = vrot.lane.b32.xlu1 %v6242_v47, %s4194_s16 }
 0x1f3   : > { %1622 = vrot.lane.b32.xlu0 %v6300_v43, %s4194_s16  ;;  %1624 = vrot.lane.b32.xlu1 %v6302_v10, %s4194_s16 }
 0x1f7   : > { %1602 = vrot.lane.b32.xlu0 %v6189_v41, %s4195_s17  ;;  %1604 = vrot.lane.b32.xlu1 %v6192_v38, %s4195_s17 }
 0x1fb   : > { %1606 = vrot.lane.b32.xlu0 %v6239_v17, %s4195_s17  ;;  %1608 = vrot.lane.b32.xlu1 %v6242_v47, %s4195_s17 }
 0x1ff   : > { %1610 = vrot.lane.b32.xlu0 %v6300_v43, %s4195_s17  ;;  %1612 = vrot.lane.b32.xlu1 %v6302_v10, %s4195_s17 }
 0x22b   : > { %v6344_v60 = vpop.permute.xlu0 %1626 }
 0x22c   : > { %10081 = vst [vmem:[#allocation42_spill] sm:$0xff] %v6344_v60  ;;  %v6346_v36 = vpop.permute.xlu1 %1628  ;;  %v1656_v24 = vmul.f32 %v6344_v60, %v10007_v58  ;;  %v1722_v33 = vmul.f32 %v6344_v60, %v10008_v34  ;;  %v1794_v61 = vmul.f32 %v6344_v60, %v10009_v6  ;;  %v1854_v25 = vmul.f32 %v6344_v60, %v10010_v45 }
 0x22d   : > { %10082 = vst [vmem:[#allocation46_spill] sm:$0xff] %v6346_v36  ;;  %v1926_v7 = vmul.f32 %v6344_v60, %v10011_v16  ;;  %v1657_v32 = vmul.f32 %v6346_v36, %v10007_v58  ;;  %v1723_v11 = vmul.f32 %v6346_v36, %v10008_v34  ;;  %v1795_v27 = vmul.f32 %v6346_v36, %v10009_v6  ;;  %v10113_v60 = vld [vmem:[#allocation33_spill] sm:$0xff] }
 0x22e   : > { %v1855_v43 = vmul.f32 %v6346_v36, %v10010_v45  ;;  %v1927_v59 = vmul.f32 %v6346_v36, %v10011_v16 }
 0x237   : > { %v6368_v21 = vpop.permute.xlu0 %1630 }
 0x238   : > { %10088 = vst [vmem:[#allocation45_spill] sm:$0xff] %v6368_v21  ;;  %v6370_v40 = vpop.permute.xlu1 %1632  ;;  %v1658_v10 = vmul.f32 %v6368_v21, %v10007_v58  ;;  %v1724_v47 = vmul.f32 %v6368_v21, %v10008_v34  ;;  %v1796_v17 = vmul.f32 %v6368_v21, %v10009_v6  ;;  %v1856_v38 = vmul.f32 %v6368_v21, %v10010_v45 }
 0x239   : > { %10089 = vst [vmem:[#allocation48_spill] sm:$0xff] %v6370_v40  ;;  %v6506_v41 = vmul.f32 %v6368_v21, %v10011_v16  ;;  %v6510_v9 = vmul.f32 %v6370_v40, %v10007_v58  ;;  %v6514_v52 = vmul.f32 %v6370_v40, %v10008_v34  ;;  %v6518_v15 = vmul.f32 %v6370_v40, %v10009_v6  ;;  %v10108_v21 = vld [vmem:[#allocation25_spill] sm:$0xff] }
 0x23a   : > { %v6522_v49 = vmul.f32 %v6370_v40, %v10010_v45  ;;  %v6526_v5 = vmul.f32 %v6370_v40, %v10011_v16 }
 0x23c   : > { %10107 = vst [vmem:[#allocation92_spill] sm:$0xff] %v6526_v5 }
 0x24d   : > { %v6474_v39 = vpop.permute.xlu0 %1634  ;;  %v6476_v42 = vpop.permute.xlu1 %1636 }
 0x24e   : > { %10105 = vst [vmem:[#allocation90_spill] sm:$0xff] %v6474_v39  ;;  %v6533_v20 = vmul.f32 %v6474_v39, %v10007_v58  ;;  %v6537_v30 = vmul.f32 %v6474_v39, %v10008_v34  ;;  %v6543_v40 = vmul.f32 %v6474_v39, %v10009_v6  ;;  %v6547_v22 = vmul.f32 %v6474_v39, %v10010_v45 }
 0x24f   : > { %v6551_v26 = vmul.f32 %v6474_v39, %v10011_v16  ;;  %v6556_v53 = vmul.f32 %v6476_v42, %v10007_v58  ;;  %v6566_v39 = vmul.f32 %v6476_v42, %v10009_v6  ;;  %v6570_v58 = vmul.f32 %v6476_v42, %v10010_v45 }
 0x250   : > { %10111 = vst [vmem:[#allocation14_spill] sm:$0xff] %v6533_v20  ;;  %10112 = vst [vmem:[#allocation44_spill] sm:$0xff] %v6537_v30 }
 0x251   : > { %v1639_v4 = vpop.permute.xlu0 %1638  ;;  %v1641_v50 = vpop.permute.xlu1 %1640  ;;  %10115 = vst [vmem:[#allocation64_spill] sm:$0xff] %v6543_v40  ;;  %10116 = vst [vmem:[#allocation36_spill] sm:$0xff] %v6547_v22 }
 0x252   : > { %v1650_v28 = vmul.f32 %v1639_v4, %v10108_v21  ;;  %v1716_v36 = vmul.f32 %v1639_v4, %v10109_v18  ;;  %v1788_v14 = vmul.f32 %v1639_v4, %v10110_v31  ;;  %v1848_v0 = vmul.f32 %v1639_v4, %v10113_v60  ;;  %10117 = vst [vmem:[#allocation93_spill] sm:$0xff] %v6551_v26 }
 0x253   : > { %v1920_v12 = vmul.f32 %v1639_v4, %v10114_v2  ;;  %v1651_v23 = vmul.f32 %v1641_v50, %v10108_v21  ;;  %10118 = vst [vmem:[#allocation94_spill] sm:$0xff] %v6556_v53  ;;  %v6560_v4 = vmul.f32 %v6476_v42, %v10008_v34  ;;  %v1717_v44 = vmul.f32 %v1641_v50, %v10109_v18 }
 0x254   : > { %v1789_v54 = vmul.f32 %v1641_v50, %v10110_v31  ;;  %v1662_v26 = vadd.f32 %v1656_v24, %v1650_v28  ;;  %v1728_v30 = vadd.f32 %v1722_v33, %v1716_v36  ;;  %v1800_v20 = vadd.f32 %v1794_v61, %v1788_v14 }
 0x255   : > { %10119 = vst [vmem:[#allocation15_spill] sm:$0xff] %v6560_v4  ;;  %v1643_v40 = vpop.permute.xlu0 %1642  ;;  %v1645_v22 = vpop.permute.xlu1 %1644  ;;  %v6574_v34 = vmul.f32 %v6476_v42, %v10011_v16  ;;  %v1860_v4 = vadd.f32 %v1854_v25, %v1848_v0  ;;  %v1932_v53 = vadd.f32 %v1926_v7, %v1920_v12  ;;  %v1663_v5 = vadd.f32 %v1657_v32, %v1651_v23  ;;  %v10159_v16 = vld [vmem:[#allocation58_spill] sm:$0xff] }
 0x256   : > { %v1849_v37 = vmul.f32 %v1641_v50, %v10113_v60  ;;  %v1921_v35 = vmul.f32 %v1641_v50, %v10114_v2  ;;  %v1652_v6 = vmul.f32 %v1643_v40, %v10108_v21  ;;  %v1729_v28 = vadd.f32 %v1723_v11, %v1717_v44 }
 0x257   : > { %v1801_v36 = vadd.f32 %v1795_v27, %v1789_v54  ;;  %v1718_v14 = vmul.f32 %v1643_v40, %v10109_v18  ;;  %v1790_v24 = vmul.f32 %v1643_v40, %v10110_v31  ;;  %v6582_v61 = vadd.f32 %v6350_v13, %v1662_v26 }
 0x258   : > { %v6585_v0 = vadd.f32 %v6354_v63, %v1728_v30  ;;  %v6588_v32 = vadd.f32 %v6358_v3, %v1800_v20  ;;  %v1850_v50 = vmul.f32 %v1643_v40, %v10113_v60  ;;  %v6592_v11 = vadd.f32 %v6362_v46, %v1860_v4  ;;  %v10121_v4 = vld [vmem:[#allocation47_spill] sm:$0xff] }
 0x259   : > { %v1647_v33 = vpop.permute.xlu0 %1646  ;;  %v1649_v7 = vpop.permute.xlu1 %1648  ;;  %v6595_v27 = vadd.f32 %v6366_v8, %v1932_v53  ;;  %v1922_v25 = vmul.f32 %v1643_v40, %v10114_v2  ;;  %v1653_v13 = vmul.f32 %v1645_v22, %v10108_v21  ;;  %v6600_v54 = vadd.f32 %v6374_v48, %v1663_v5 }
 0x25a   : > { %v1861_v30 = vadd.f32 %v1855_v43, %v1849_v37  ;;  %v1933_v63 = vadd.f32 %v1927_v59, %v1921_v35  ;;  %v1664_v3 = vadd.f32 %v1658_v10, %v1652_v6  ;;  %v6603_v44 = vadd.f32 %v6378_v57, %v1729_v28  ;;  %v10122_v28 = vld [vmem:[#allocation92_spill] sm:$0xff] }
 0x25b   : > { %v6606_v23 = vadd.f32 %v6382_v55, %v1801_v36  ;;  %v1730_v46 = vadd.f32 %v1724_v47, %v1718_v14  ;;  %v1802_v26 = vadd.f32 %v1796_v17, %v1790_v24  ;;  %v1862_v53 = vadd.f32 %v1856_v38, %v1850_v50  ;;  %v10123_v14 = vld [vmem:[#allocation14_spill] sm:$0xff]  ;;  %v10124_v50 = vld [vmem:[#allocation44_spill] sm:$0xff] }
 0x25c   : > { %v1719_v40 = vmul.f32 %v1645_v22, %v10109_v18  ;;  %v1791_v12 = vmul.f32 %v1645_v22, %v10110_v31  ;;  %v1851_v5 = vmul.f32 %v1645_v22, %v10113_v60  ;;  %v1934_v43 = vadd.f32 %v6506_v41, %v1922_v25 }
 0x25d   : > { %v6608_v8 = vpop.permute.xlu0 %1614  ;;  %v1665_v6 = vadd.f32 %v6510_v9, %v1653_v13  ;;  %v1923_v10 = vmul.f32 %v1645_v22, %v10114_v2  ;;  %v1654_v59 = vmul.f32 %v1647_v33, %v10108_v21  ;;  %v6618_v47 = vadd.f32 %v6386_v62, %v1861_v30  ;;  %v1617_v57 = vpop.permute.xlu1 %1616  ;;  %v10120_v9 = vld [vmem:[#allocation77_spill] sm:$0xff]  ;;  %v10126_v30 = vld [vmem:[#allocation36_spill] sm:$0xff] }
 0x25e   : > { %v6621_v17 = vadd.f32 %v6390_v1, %v1933_v63  ;;  %v6624_v38 = vadd.f32 %v6394_v19, %v1664_v3  ;;  %v1720_v48 = vmul.f32 %v1647_v33, %v10109_v18  ;;  %v6628_v41 = vadd.f32 %v6398_v29, %v1730_v46 }
 0x25f   : > { %v6631_v55 = vadd.f32 %v6402_v56, %v1802_v26  ;;  %v1792_v35 = vmul.f32 %v1647_v33, %v10110_v31  ;;  %v1852_v62 = vmul.f32 %v1647_v33, %v10113_v60  ;;  %v6636_v37 = vadd.f32 %v6406_v51, %v1862_v53  ;;  %v10127_v26 = vld [vmem:[#allocation78_spill] sm:$0xff] }
 0x260   : > { %v1731_v1 = vadd.f32 %v6514_v52, %v1719_v40  ;;  %v1803_v19 = vadd.f32 %v6518_v15, %v1791_v12  ;;  %v1863_v22 = vadd.f32 %v6522_v49, %v1851_v5  ;;  %v6642_v29 = vadd.f32 %v10120_v9, %v1934_v43  ;;  %v10125_v49 = vld [vmem:[#allocation64_spill] sm:$0xff]  ;;  %v10128_v40 = vld [vmem:[#allocation79_spill] sm:$0xff] }
 0x261   : > { %v1619_v20 = vpop.permute.xlu0 %1618  ;;  %v6645_v56 = vadd.f32 %v10121_v4, %v1665_v6  ;;  %v1935_v36 = vadd.f32 %v10122_v28, %v1923_v10  ;;  %v1666_v24 = vadd.f32 %v10123_v14, %v1654_v59  ;;  %v1732_v51 = vadd.f32 %v10124_v50, %v1720_v48  ;;  %v10129_v5 = vld [vmem:[#allocation80_spill] sm:$0xff]  ;;  %v1621_v6 = vpop.permute.xlu1 %1620  ;;  %v10130_v10 = vld [vmem:[#allocation81_spill] sm:$0xff]  ;;  %v10133_v4 = vld [vmem:[#allocation15_spill] sm:$0xff] }
 0x262   : > { %v1924_v25 = vmul.f32 %v1647_v33, %v10114_v2  ;;  %v1655_v52 = vmul.f32 %v1649_v7, %v10108_v21  ;;  %v1721_v15 = vmul.f32 %v1649_v7, %v10109_v18  ;;  %v1804_v13 = vadd.f32 %v10125_v49, %v1792_v35  ;;  %v10131_v48 = vld [vmem:[#allocation93_spill] sm:$0xff] }
 0x263   : > { %v1864_v63 = vadd.f32 %v10126_v30, %v1852_v62  ;;  %v1853_v3 = vmul.f32 %v1649_v7, %v10113_v60  ;;  %v1925_v46 = vmul.f32 %v1649_v7, %v10114_v2  ;;  %v6658_v53 = vadd.f32 %v10127_v26, %v1731_v1  ;;  %v10132_v62 = vld [vmem:[#allocation94_spill] sm:$0xff]  ;;  %v10134_v1 = vld [vmem:[#allocation51_spill] sm:$0xff]  ;;  %v10136_v30 = vld [vmem:[#allocation84_spill] sm:$0xff] }
 0x264   : > { %v6661_v12 = vadd.f32 %v10128_v40, %v1803_v19  ;;  %v6664_v33 = vadd.f32 %v10129_v5, %v1863_v22  ;;  %v1793_v43 = vmul.f32 %v1649_v7, %v10110_v31  ;;  %v6668_v59 = vadd.f32 %v10130_v10, %v1935_v36  ;;  %v10135_v19 = vld [vmem:[#allocation83_spill] sm:$0xff]  ;;  %v10138_v26 = vld [vmem:[#allocation85_spill] sm:$0xff]  ;;  %v10147_v5 = vld [vmem:[#allocation86_spill] sm:$0xff] }
 0x265   : > { %v1936_v35 = vadd.f32 %v10131_v48, %v1924_v25  ;;  %v1667_v9 = vadd.f32 %v10132_v62, %v1655_v52  ;;  %v1733_v28 = vadd.f32 %v10133_v4, %v1721_v15  ;;  %v6674_v14 = vadd.f32 %v10134_v1, %v1666_v24  ;;  %v1623_v49 = vpop.permute.xlu0 %1622  ;;  %v10140_v52 = vld [vmem:[#allocation53_spill] sm:$0xff]  ;;  %v10141_v24 = vld [vmem:[#allocation42_spill] sm:$0xff]  ;;  %v10151_v4 = vld [vmem:[#allocation87_spill] sm:$0xff] }
 0x266   : > { %v6677_v50 = vadd.f32 %v10135_v19, %v1732_v51  ;;  %v1865_v22 = vadd.f32 %v6570_v58, %v1853_v3  ;;  %v1937_v7 = vadd.f32 %v6574_v34, %v1925_v46  ;;  %v6682_v36 = vadd.f32 %v10136_v30, %v1804_v13  ;;  %v10144_v58 = vld [vmem:[#allocation55_spill] sm:$0xff]  ;;  %v10145_v3 = vld [vmem:[#allocation56_spill] sm:$0xff]  ;;  %v10146_v46 = vld [vmem:[#allocation57_spill] sm:$0xff] }
 0x267   : > { %v6685_v25 = vadd.f32 %v10138_v26, %v1864_v63  ;;  %v1680_v15 = vmul.f32 %v6608_v8, %v10140_v52  ;;  %v6691_v40 = vadd.f32 %v10141_v24, %v6608_v8  ;;  %v6694_v51 = vadd.f32 %v6566_v39, %v1793_v43  ;;  %v10149_v48 = vld [vmem:[#allocation50_spill] sm:$0xff]  ;;  %v10155_v19 = vld [vmem:[#allocation89_spill] sm:$0xff]  ;;  %v10157_v26 = vld [vmem:[#allocation91_spill] sm:$0xff] }
 0x268   : > { %10137 = vst [vmem:[#allocation13_spill] sm:$0xff] %v6682_v36  ;;  %v1746_v34 = vmul.f32 %v6608_v8, %v10144_v58  ;;  %v1818_v13 = vmul.f32 %v6608_v8, %v10145_v3  ;;  %v1878_v63 = vmul.f32 %v6608_v8, %v10146_v46  ;;  %v6703_v10 = vadd.f32 %v10147_v5, %v1936_v35  ;;  %v10153_v39 = vld [vmem:[#allocation46_spill] sm:$0xff]  ;;  %v10160_v35 = vld [vmem:[#allocation45_spill] sm:$0xff] }
 0x269   : > { %10139 = vst [vmem:[#allocation10_spill] sm:$0xff] %v6685_v25  ;;  %10142 = vst [vmem:[#allocation12_spill] sm:$0xff] %v6691_v40  ;;  %v6706_v62 = vadd.f32 %v10149_v48, %v1667_v9  ;;  %v6709_v1 = vadd.f32 %v10151_v4, %v1733_v28  ;;  %v6712_v43 = vadd.f32 %v10153_v39, %v1617_v57  ;;  %v6725_v9 = vpop.permute.xlu1 %1624 }
 0x26a   : > { %10143 = vst [vmem:[#allocation74_spill] sm:$0xff] %v6694_v51  ;;  %10148 = vst [vmem:[#allocation11_spill] sm:$0xff] %v6703_v10  ;;  %v6715_v30 = vadd.f32 %v10155_v19, %v1865_v22  ;;  %v6718_v24 = vadd.f32 %v10157_v26, %v1937_v7  ;;  %v1950_v45 = vmul.f32 %v6608_v8, %v10159_v16  ;;  %v10162_v19 = vld [vmem:[#allocation48_spill] sm:$0xff] }
 0x26b   : > { %10150 = vst [vmem:[#allocation32_spill] sm:$0xff] %v6706_v62  ;;  %10152 = vst [vmem:[#allocation22_spill] sm:$0xff] %v6709_v1  ;;  %v6723_v5 = vadd.f32 %v10160_v35, %v1619_v20  ;;  %v1681_v28 = vmul.f32 %v1617_v57, %v10140_v52  ;;  %v1747_v48 = vmul.f32 %v1617_v57, %v10144_v58  ;;  %v1603_v35 = vpop.permute.xlu0 %1602 }
 0x26c   : > { %10154 = vst [vmem:[#allocation38_spill] sm:$0xff] %v6712_v43  ;;  %10156 = vst [vmem:[#allocation40_spill] sm:$0xff] %v6715_v30  ;;  %v1819_v4 = vmul.f32 %v1617_v57, %v10145_v3  ;;  %v1879_v22 = vmul.f32 %v1617_v57, %v10146_v46  ;;  %v1951_v39 = vmul.f32 %v1617_v57, %v10159_v16  ;;  %v10164_v57 = vld [vmem:[#allocation90_spill] sm:$0xff]  ;;  %v10169_v30 = vld [vmem:[#allocation60_spill] sm:$0xff] }
 0x26d   : > { %10158 = vst [vmem:[#allocation69_spill] sm:$0xff] %v6718_v24  ;;  %10161 = vst [vmem:[#allocation67_spill] sm:$0xff] %v6723_v5  ;;  %v6733_v7 = vmul.f32 %v1619_v20, %v10140_v52  ;;  %v6736_v8 = vmul.f32 %v1619_v20, %v10144_v58  ;;  %v6739_v26 = vadd.f32 %v10162_v19, %v1621_v6 }
 0x26e   : > { %v6742_v2 = vmul.f32 %v1619_v20, %v10145_v3  ;;  %v6745_v60 = vmul.f32 %v1619_v20, %v10146_v46  ;;  %v6748_v31 = vmul.f32 %v1619_v20, %v10159_v16  ;;  %v6751_v18 = vadd.f32 %v10164_v57, %v1623_v49 }
 0x26f   : > { %10163 = vst [vmem:[#allocation72_spill] sm:$0xff] %v6739_v26  ;;  %v6754_v21 = vmul.f32 %v1621_v6, %v10140_v52  ;;  %v6757_v5 = vmul.f32 %v1621_v6, %v10144_v58  ;;  %v6760_v19 = vmul.f32 %v1621_v6, %v10145_v3  ;;  %v6763_v26 = vmul.f32 %v1621_v6, %v10146_v46 }
 0x270   : > { %10165 = vst [vmem:[#allocation43_spill] sm:$0xff] %v6751_v18  ;;  %v6766_v43 = vmul.f32 %v1621_v6, %v10159_v16  ;;  %v6770_v20 = vadd.f32 %v6476_v42, %v6725_v9  ;;  %v1686_v57 = vadd.f32 %v1680_v15, %v6582_v61  ;;  %v10167_v18 = vld [vmem:[#allocation59_spill] sm:$0xff]  ;;  %v6775_v36 = vmul.f32 %v1623_v49, %v10140_v52  ;;  %v1605_v6 = vpop.permute.xlu1 %1604  ;;  %v10172_v15 = vld [vmem:[#allocation62_spill] sm:$0xff] }
 0x271   : > { %v1692_v40 = vmul.f32 %v1603_v35, %v10167_v18  ;;  %v6778_v51 = vmul.f32 %v1623_v49, %v10144_v58  ;;  %v1752_v24 = vadd.f32 %v1746_v34, %v6585_v0  ;;  %v1758_v1 = vmul.f32 %v1603_v35, %v10169_v30  ;;  %v10175_v34 = vld [vmem:[#allocation63_spill] sm:$0xff] }
 0x272   : > { %10166 = vst [vmem:[#allocation75_spill] sm:$0xff] %v6770_v20  ;;  %v6783_v62 = vmul.f32 %v1623_v49, %v10145_v3  ;;  %v6786_v42 = vmul.f32 %v1623_v49, %v10146_v46  ;;  %v1890_v20 = vmul.f32 %v1603_v35, %v10172_v15  ;;  %v6790_v10 = vmul.f32 %v1623_v49, %v10159_v16 }
 0x273   : > { %10168 = vst [vmem:[#allocation76_spill] sm:$0xff] %v6778_v51  ;;  %v1698_v61 = vadd.f32 %v1692_v40, %v1686_v57  ;;  %v6794_v25 = vmul.f32 %v6725_v9, %v10140_v52  ;;  %v1764_v0 = vadd.f32 %v1758_v1, %v1752_v24  ;;  %v1962_v58 = vmul.f32 %v1603_v35, %v10175_v34  ;;  %v10176_v57 = vld [vmem:[#allocation61_spill] sm:$0xff] }
 0x274   : > { %10170 = vst [vmem:[#allocation70_spill] sm:$0xff] %v6783_v62  ;;  %10171 = vst [vmem:[#allocation31_spill] sm:$0xff] %v6786_v42  ;;  %v1824_v51 = vadd.f32 %v1818_v13, %v6588_v32  ;;  %v1884_v62 = vadd.f32 %v1878_v63, %v6592_v11  ;;  %v1687_v46 = vadd.f32 %v1681_v28, %v6600_v54 }
 0x275   : > { %10173 = vst [vmem:[#allocation49_spill] sm:$0xff] %v6790_v10  ;;  %10174 = vst [vmem:[#allocation34_spill] sm:$0xff] %v6794_v25  ;;  %v1693_v40 = vmul.f32 %v1605_v6, %v10167_v18  ;;  %v1830_v42 = vmul.f32 %v1603_v35, %v10176_v57  ;;  %v1956_v49 = vadd.f32 %v1950_v45, %v6595_v27  ;;  %v1704_v25 = vrot.slane %v1698_v61, 2 }
 0x276   : > { %v1753_v10 = vadd.f32 %v1747_v48, %v6603_v44  ;;  %v1759_v52 = vmul.f32 %v1605_v6, %v10169_v30  ;;  %v1770_v1 = vrot.slane %v1764_v0, 1  ;;  %v1896_v24 = vadd.f32 %v1890_v20, %v1884_v62  ;;  %v1607_v62 = vpop.permute.xlu0 %1606 }
 0x277   : > { %v1699_v16 = vadd.f32 %v1693_v40, %v1687_v46  ;;  %v1968_v3 = vadd.f32 %v1962_v58, %v1956_v49  ;;  %v1885_v11 = vadd.f32 %v1879_v22, %v6618_v47  ;;  %v1891_v54 = vmul.f32 %v1605_v6, %v10172_v15 }
 0x278   : > { %v1765_v32 = vadd.f32 %v1759_v52, %v1753_v10  ;;  %v1831_v63 = vmul.f32 %v1605_v6, %v10176_v57  ;;  %v1957_v28 = vadd.f32 %v1951_v39, %v6621_v17  ;;  %v1963_v45 = vmul.f32 %v1605_v6, %v10175_v34 }
 0x279   : > { %v1705_v13 = vrot.slane %v1699_v16, 2  ;;  %v1836_v27 = vadd.f32 %v1830_v42, %v1824_v51  ;;  %v1825_v48 = vadd.f32 %v1819_v4, %v6606_v23  ;;  %v1897_v35 = vadd.f32 %v1891_v54, %v1885_v11 }
 0x27a   : > { %v1771_v44 = vrot.slane %v1765_v32, 1  ;;  %v1902_v46 = vrot.slane %v1896_v24, 7  ;;  %v1969_v16 = vadd.f32 %v1963_v45, %v1957_v28  ;;  %v1974_v10 = vrot.slane %v1968_v3, 6 }
 0x27b   : > { %v1706_v52 = vsel %vm688_vm0, %v1704_v25, %v1705_v13  ;;  %v1707_v47 = vsel %vm688_vm0, %v1705_v13, %v1704_v25  ;;  %v1903_v22 = vrot.slane %v1897_v35, 7  ;;  %v1837_v4 = vadd.f32 %v1831_v63, %v1825_v48  ;;  %v6850_v48 = vld [vmem:[%s9387_s2] sm:$0xff] }
 0x27c   : > { %v1772_v17 = vsel %vm610_vm1, %v1770_v1, %v1771_v44  ;;  %v1773_v51 = vsel %vm610_vm1, %v1771_v44, %v1770_v1  ;;  %v1694_v20 = vmul.f32 %v1607_v62, %v10167_v18  ;;  %v1975_v6 = vrot.slane %v1969_v16, 6  ;;  %v6870_v16 = vpop.permute.xlu0 %1610 }
 0x27d   : > { %v1782_v39 = vadd.f32 %v1772_v17, %v1706_v52  ;;  %v1783_v23 = vadd.f32 %v1773_v51, %v1707_v47  ;;  %v1688_v42 = vadd.f32 %v6733_v7, %v6624_v38  ;;  %v1754_v25 = vadd.f32 %v6736_v8, %v6628_v41 }
 0x27e   : > { %v1760_v3 = vmul.f32 %v1607_v62, %v10169_v30  ;;  %v1826_v40 = vadd.f32 %v6742_v2, %v6631_v55  ;;  %v1886_v49 = vadd.f32 %v6745_v60, %v6636_v37  ;;  %v1904_v1 = vsel %vm467_vm2, %v1902_v46, %v1903_v22  ;;  %v1609_v2 = vpop.permute.xlu1 %1608 }
 0x27f   : > { %v1842_v61 = vadd.f32 %v1836_v27, %v1782_v39  ;;  %v1843_v0 = vadd.f32 %v1837_v4, %v1783_v23  ;;  %v1905_v24 = vsel %vm467_vm2, %v1903_v22, %v1902_v46  ;;  %v1700_v38 = vadd.f32 %v1694_v20, %v1688_v42  ;;  %v10178_v42 = vld [vmem:[#allocation76_spill] sm:$0xff] }
 0x280   : > { %v1892_v7 = vmul.f32 %v1607_v62, %v10172_v15  ;;  %v1958_v32 = vadd.f32 %v6748_v31, %v6642_v29  ;;  %v1964_v11 = vmul.f32 %v1607_v62, %v10175_v34  ;;  %v1976_v60 = vsel %vm395_vm3, %v1974_v10, %v1975_v6 }
 0x281   : > { %v1914_v41 = vadd.f32 %v1905_v24, %v1842_v61  ;;  %v1915_v8 = vadd.f32 %v1904_v1, %v1843_v0  ;;  %v1977_v55 = vsel %vm395_vm3, %v1975_v6, %v1974_v10  ;;  %v1766_v37 = vadd.f32 %v1760_v3, %v1754_v25 }
 0x282   : > { %v1832_v54 = vmul.f32 %v1607_v62, %v10176_v57  ;;  %v1708_v28 = vrot.slane %v1700_v38, 2  ;;  %v1689_v45 = vadd.f32 %v6754_v21, %v6645_v56  ;;  %v1898_v27 = vadd.f32 %v1892_v7, %v1886_v49  ;;  %v6858_v62 = vld [vmem:[%s9387_s2 + $0x8] sm:$0xff]  ;;  %v10179_v7 = vld [vmem:[#allocation55_spill] sm:$0xff] }
 0x283   : > { %v1986_v13 = vadd.f32 %v1977_v55, %v1914_v41  ;;  %v1987_v63 = vadd.f32 %v1976_v60, %v1915_v8  ;;  %v1970_v31 = vadd.f32 %v1964_v11, %v1958_v32  ;;  %v1755_v29 = vadd.f32 %v6757_v5, %v6658_v53  ;;  %v10181_v32 = vld [vmem:[#allocation57_spill] sm:$0xff] }
 0x284   : > { %v1695_v44 = vmul.f32 %v1609_v2, %v10167_v18  ;;  %v1887_v56 = vadd.f32 %v6763_v26, %v6664_v33  ;;  %v1761_v53 = vmul.f32 %v1609_v2, %v10169_v30  ;;  %v1959_v5 = vadd.f32 %v6766_v43, %v6668_v59 }
 0x285   : > { %v6853_v35 = vmul.f32 %v6850_v48, %v1986_v13  ;;  %v6861_v21 = vmul.f32 %v6858_v62, %v1987_v63  ;;  %v1893_v52 = vmul.f32 %v1609_v2, %v10172_v15  ;;  %v1965_v47 = vmul.f32 %v1609_v2, %v10175_v34  ;;  %v10183_v63 = vld [vmem:[#allocation10_spill] sm:$0xff] }
 0x286   : > { %v1701_v46 = vadd.f32 %v1695_v44, %v1689_v45  ;;  %v1774_v10 = vrot.slane %v1766_v37, 1  ;;  %v1838_v17 = vadd.f32 %v1832_v54, %v1826_v40  ;;  %v1827_v51 = vadd.f32 %v6760_v19, %v6661_v12  ;;  %v1613_v44 = vpop.permute.xlu1 %1612 }
 0x287   : > { %v1767_v22 = vadd.f32 %v1761_v53, %v1755_v29  ;;  %2000 = vrot.lane.b32.xlu1 %v6861_v21, %s4195_s17  ;;  %v1833_v26 = vmul.f32 %v1609_v2, %v10176_v57  ;;  %v1899_v59 = vadd.f32 %v1893_v52, %v1887_v56  ;;  %v1971_v43 = vadd.f32 %v1965_v47, %v1959_v5  ;;  %v10182_v2 = vld [vmem:[#allocation58_spill] sm:$0xff] }
 0x288   : > { %v1709_v33 = vrot.slane %v1701_v46, 2  ;;  %1998 = vrot.lane.b32.xlu0 %v6853_v35, %s4195_s17  ;;  %v1906_v39 = vrot.slane %v1898_v27, 7  ;;  %v1978_v23 = vrot.slane %v1970_v31, 6  ;;  %v1696_v20 = vmul.f32 %v6870_v16, %v10167_v18  ;;  %v10185_v27 = vld [vmem:[#allocation11_spill] sm:$0xff]  ;;  %v10186_v31 = vld [vmem:[#allocation49_spill] sm:$0xff] }
 0x289   : > { %v1775_v4 = vrot.slane %v1767_v22, 1  ;;  %v1690_v6 = vadd.f32 %v6775_v36, %v6674_v14  ;;  %v1756_v25 = vadd.f32 %v10178_v42, %v6677_v50  ;;  %v1907_v0 = vrot.slane %v1899_v59, 7  ;;  %v10180_v36 = vld [vmem:[#allocation56_spill] sm:$0xff] }
 0x28a   : > { %v1710_v12 = vsel %vm688_vm0, %v1708_v28, %v1709_v33  ;;  %v1711_v19 = vsel %vm688_vm0, %v1709_v33, %v1708_v28  ;;  %v1762_v40 = vmul.f32 %v6870_v16, %v10169_v30  ;;  %v1839_v24 = vadd.f32 %v1833_v26, %v1827_v51  ;;  %v10184_v28 = vld [vmem:[#allocation31_spill] sm:$0xff]  ;;  %v10187_v22 = vld [vmem:[#allocation32_spill] sm:$0xff]  ;;  %v10188_v33 = vld [vmem:[#allocation34_spill] sm:$0xff] }
 0x28b   : > { %v1776_v3 = vsel %vm610_vm1, %v1774_v10, %v1775_v4  ;;  %v1777_v61 = vsel %vm610_vm1, %v1775_v4, %v1774_v10  ;;  %v1979_v38 = vrot.slane %v1971_v43, 6  ;;  %v1751_v14 = vmul.f32 %v6725_v9, %v10179_v7  ;;  %v10189_v43 = vld [vmem:[#allocation22_spill] sm:$0xff]  ;;  %v10190_v4 = vld [vmem:[#allocation40_spill] sm:$0xff] }
 0x28c   : > { %v1784_v49 = vadd.f32 %v1776_v3, %v1710_v12  ;;  %v1785_v1 = vadd.f32 %v1777_v61, %v1711_v19  ;;  %v1823_v50 = vmul.f32 %v6725_v9, %v10180_v36  ;;  %v1702_v41 = vadd.f32 %v1696_v20, %v1690_v6  ;;  %v10191_v61 = vld [vmem:[#allocation69_spill] sm:$0xff] }
 0x28d   : > { %v1768_v8 = vadd.f32 %v1762_v40, %v1756_v25  ;;  %v1883_v11 = vmul.f32 %v6725_v9, %v10181_v32  ;;  %v1955_v60 = vmul.f32 %v6725_v9, %v10182_v2  ;;  %v1908_v54 = vsel %vm467_vm2, %v1906_v39, %v1907_v0 }
 0x28e   : > { %v1844_v55 = vadd.f32 %v1838_v17, %v1784_v49  ;;  %v1845_v37 = vadd.f32 %v1839_v24, %v1785_v1  ;;  %v1909_v13 = vsel %vm467_vm2, %v1907_v0, %v1906_v39  ;;  %v1888_v45 = vadd.f32 %v10184_v28, %v10183_v63  ;;  %v10192_v1 = vld [vmem:[#allocation74_spill] sm:$0xff]  ;;  %v10193_v24 = vld [vmem:[#allocation88_spill] sm:$0xff] }
 0x28f   : > { %v1960_v29 = vadd.f32 %v10186_v31, %v10185_v27  ;;  %v1980_v9 = vsel %vm395_vm3, %v1978_v23, %v1979_v38  ;;  %v1981_v5 = vsel %vm395_vm3, %v1979_v38, %v1978_v23  ;;  %v1712_v46 = vrot.slane %v1702_v41, 2 }
 0x290   : > { %v1916_v56 = vadd.f32 %v1909_v13, %v1844_v55  ;;  %v1917_v53 = vadd.f32 %v1908_v54, %v1845_v37  ;;  %v1778_v52 = vrot.slane %v1768_v8, 1  ;;  %v1894_v47 = vmul.f32 %v6870_v16, %v10172_v15  ;;  %v10194_v37 = vld [vmem:[#allocation13_spill] sm:$0xff]  ;;  %v10195_v54 = vld [vmem:[#allocation70_spill] sm:$0xff] }
 0x291   : > { %v1966_v10 = vmul.f32 %v6870_v16, %v10175_v34  ;;  %v1691_v26 = vadd.f32 %v10188_v33, %v10187_v22  ;;  %v1697_v59 = vmul.f32 %v1613_v44, %v10167_v18  ;;  %v1757_v39 = vadd.f32 %v1751_v14, %v10189_v43 }
 0x292   : > { %v1988_v17 = vadd.f32 %v1981_v5, %v1916_v56  ;;  %v1989_v51 = vadd.f32 %v1980_v9, %v1917_v53  ;;  %v1889_v20 = vadd.f32 %v1883_v11, %v10190_v4  ;;  %v1763_v23 = vmul.f32 %v1613_v44, %v10169_v30  ;;  %v10197_v4 = vld [vmem:[#allocation52_spill] sm:$0xff] }
 0x293   : > { %v1895_v12 = vmul.f32 %v1613_v44, %v10172_v15  ;;  %v1703_v42 = vadd.f32 %v1697_v59, %v1691_v26  ;;  %v1967_v25 = vmul.f32 %v1613_v44, %v10175_v34  ;;  %v1900_v3 = vadd.f32 %v1894_v47, %v1888_v45 }
 0x294   : > { %v6927_v19 = vmul.f32 %v6850_v48, %v1988_v17  ;;  %v6930_v6 = vmul.f32 %v6858_v62, %v1989_v51  ;;  %v1961_v0 = vadd.f32 %v1955_v60, %v10191_v61  ;;  %v1769_v40 = vadd.f32 %v1763_v23, %v1757_v39 }
 0x295   : > { %v1901_v49 = vadd.f32 %v1895_v12, %v1889_v20  ;;  %v1817_v38 = vadd.f32 %v10193_v24, %v10192_v1  ;;  %v1834_v14 = vmul.f32 %v6870_v16, %v10176_v57  ;;  %v1713_v41 = vrot.slane %v1703_v42, 2  ;;  %v10198_v42 = vld [vmem:[#allocation39_spill] sm:$0xff] }
 0x296   : > { %v1835_v8 = vmul.f32 %v1613_v44, %v10176_v57  ;;  %2004 = vrot.lane.b32.xlu1 %v6930_v6, %s4195_s17  ;;  %2002 = vrot.lane.b32.xlu0 %v6927_v19, %s4195_s17  ;;  %v1972_v11 = vadd.f32 %v1966_v10, %v1960_v29  ;;  %v1779_v55 = vrot.slane %v1769_v40, 1  ;;  %v1973_v60 = vadd.f32 %v1967_v25, %v1961_v0  ;;  %v10201_v24 = vld [vmem:[#allocation71_spill] sm:$0xff] }
 0x297   : > { %v1828_v13 = vadd.f32 %v10195_v54, %v10194_v37  ;;  %v1829_v63 = vadd.f32 %v1823_v50, %v1817_v38  ;;  %v1714_v28 = vsel %vm688_vm0, %v1712_v46, %v1713_v41  ;;  %v1715_v16 = vsel %vm688_vm0, %v1713_v41, %v1712_v46 }
 0x298   : > { %v1910_v45 = vrot.slane %v1900_v3, 7  ;;  %v1780_v27 = vsel %vm610_vm1, %v1778_v52, %v1779_v55  ;;  %v1781_v31 = vsel %vm610_vm1, %v1779_v55, %v1778_v52  ;;  %v1911_v29 = vrot.slane %v1901_v49, 7  ;;  %v10199_v3 = vld [vmem:[#allocation65_spill] sm:$0xff]  ;;  %v10202_v55 = vld [vmem:[#allocation68_spill] sm:$0xff] }
 0x299   : > { %v1840_v44 = vadd.f32 %v1834_v14, %v1828_v13  ;;  %v1786_v56 = vadd.f32 %v1780_v27, %v1714_v28  ;;  %v1787_v53 = vadd.f32 %v1781_v31, %v1715_v16  ;;  %v1841_v9 = vadd.f32 %v1835_v8, %v1829_v63  ;;  %v10200_v49 = vld [vmem:[#allocation41_spill] sm:$0xff]  ;;  %v10205_v16 = vld [vmem:[#allocation82_spill] sm:$0xff] }
 0x29a   : > { %v1982_v5 = vrot.slane %v1972_v11, 6  ;;  %v1983_v50 = vrot.slane %v1973_v60, 6  ;;  %v1912_v17 = vsel %vm467_vm2, %v1910_v45, %v1911_v29  ;;  %v1913_v46 = vsel %vm467_vm2, %v1911_v29, %v1910_v45 }
 0x29b   : > { %v1846_v47 = vadd.f32 %v1840_v44, %v1786_v56  ;;  %v1847_v10 = vadd.f32 %v1841_v9, %v1787_v53  ;;  %v2395_v20 = vrot.slane %v10197_v4, 1  ;;  %v2413_v12 = vrot.slane %v10197_v4, 7  ;;  %v10207_v44 = vld [vmem:[#allocation95_spill] sm:$0xff]  ;;  %v10209_v53 = vld [vmem:[#allocation12_spill] sm:$0xff] }
 0x29c   : > { %v1984_v52 = vsel %vm395_vm3, %v1982_v5, %v1983_v50  ;;  %v1985_v33 = vsel %vm395_vm3, %v1983_v50, %v1982_v5  ;;  %v2398_v25 = vrot.slane %v10198_v42, 1  ;;  %v2399_v61 = vrot.slane %v10199_v3, 1 }
 0x29d   : > { %v1918_v51 = vadd.f32 %v1913_v46, %v1846_v47  ;;  %v1919_v22 = vadd.f32 %v1912_v17, %v1847_v10  ;;  %v2416_v0 = vrot.slane %v10198_v42, 7  ;;  %v2417_v40 = vrot.slane %v10199_v3, 7  ;;  %v10211_v10 = vld [vmem:[#allocation17_spill] sm:$0xff]  ;;  %v10212_v46 = vld [vmem:[#allocation23_spill] sm:$0xff]  ;;  %v10240_v3 = vld [vmem:[#allocation66_spill] sm:$0xff] }
 0x29e   : > { %v2402_v1 = vrot.slane %v10200_v49, 1  ;;  %v2403_v38 = vrot.slane %v10201_v24, 1  ;;  %v2420_v41 = vrot.slane %v10200_v49, 7  ;;  %v2421_v8 = vrot.slane %v10201_v24, 7 }
 0x29f   : > { %v1990_v26 = vadd.f32 %v1985_v33, %v1918_v51  ;;  %v1991_v59 = vadd.f32 %v1984_v52, %v1919_v22  ;;  %v7031_v54 = vmul.f32 %v10197_v4, %v10202_v55  ;;  %v2400_v63 = vsel %vm610_vm1, %v2398_v25, %v2399_v61  ;;  %v10213_v22 = vld [vmem:[#allocation27_spill] sm:$0xff]  ;;  %v10214_v33 = vld [vmem:[#allocation30_spill] sm:$0xff] }
 0x2a0   : > { %v2419_v28 = vsel %vm467_vm2, %v2417_v40, %v2416_v0  ;;  %v7041_v45 = vmul.f32 %v10198_v42, %v10205_v16  ;;  %v2401_v27 = vsel %vm610_vm1, %v2399_v61, %v2398_v25  ;;  %v2418_v31 = vsel %vm467_vm2, %v2416_v0, %v2417_v40  ;;  %v10222_v40 = vld [vmem:[#allocation38_spill] sm:$0xff] }
 0x2a1   : > { %v6962_v43 = vmul.f32 %v6850_v48, %v1990_v26  ;;  %v6965_v39 = vmul.f32 %v6858_v62, %v1991_v59  ;;  %v10196_v48 = vld [vmem:[#allocation21_spill] sm:$0xff]  ;;  %10204 = vst [vmem:[#allocation47_spill] sm:$0xff] %v7031_v54  ;;  %v2404_v29 = vsel %vm610_vm1, %v2402_v1, %v2403_v38  ;;  %v7051_v56 = vmul.f32 %v10200_v49, %v10207_v44  ;;  %v10226_v49 = vld [vmem:[#allocation43_spill] sm:$0xff] }
 0x2a2   : > { %v2394_v62 = vrot.slane %v10196_v48, 1  ;;  %v2412_v23 = vrot.slane %v10196_v48, 7  ;;  %v7025_v60 = vmul.f32 %v10196_v48, %v10202_v55  ;;  %10206 = vst [vmem:[#allocation92_spill] sm:$0xff] %v7041_v45  ;;  %v2423_v5 = vsel %vm467_vm2, %v2421_v8, %v2420_v41  ;;  %v10225_v55 = vld [vmem:[#allocation72_spill] sm:$0xff] }
 0x2a3   : > { %2008 = vrot.lane.b32.xlu1 %v6965_v39, %s4195_s17  ;;  %2006 = vrot.lane.b32.xlu0 %v6962_v43, %s4195_s17  ;;  %10208 = vst [vmem:[#allocation14_spill] sm:$0xff] %v7051_v56  ;;  %v2405_v50 = vsel %vm610_vm1, %v2403_v38, %v2402_v1  ;;  %v7060_v47 = vsel %vm467_vm2, %v2420_v41, %v2421_v8  ;;  %v10223_v38 = vld [vmem:[#allocation67_spill] sm:$0xff] }
 0x2a4   : > { %v2396_v14 = vsel %vm610_vm1, %v2394_v62, %v2395_v20  ;;  %v2415_v11 = vsel %vm467_vm2, %v2413_v12, %v2412_v23  ;;  %10203 = vst [vmem:[#allocation77_spill] sm:$0xff] %v7025_v60  ;;  %v2397_v37 = vsel %vm610_vm1, %v2395_v20, %v2394_v62  ;;  %v2414_v13 = vsel %vm467_vm2, %v2412_v23, %v2413_v12  ;;  %v10215_v20 = vld [vmem:[#allocation35_spill] sm:$0xff] }
 0x2a5   : > { %v2406_v9 = vadd.f32 %v2396_v14, %v10209_v53  ;;  %10210 = vst [vmem:[#allocation44_spill] sm:$0xff] %v7060_v47  ;;  %v7064_v17 = vmul.f32 %v6861_v21, %v10211_v10  ;;  %v7068_v51 = vmul.f32 %v6861_v21, %v10212_v46  ;;  %v7072_v52 = vmul.f32 %v6861_v21, %v10213_v22 }
 0x2a6   : > { %v7076_v26 = vmul.f32 %v6861_v21, %v10214_v33  ;;  %v7080_v23 = vmul.f32 %v6861_v21, %v10215_v20  ;;  %v7084_v12 = vmul.f32 %v6853_v35, %v10211_v10  ;;  %v7088_v25 = vmul.f32 %v6853_v35, %v10212_v46 }
 0x2a7   : > { %2012 = vrot.lane.b32.xlu1 %v6861_v21, %s4194_s16  ;;  %2010 = vrot.lane.b32.xlu0 %v6853_v35, %s4194_s16  ;;  %v7092_v61 = vmul.f32 %v6853_v35, %v10213_v22  ;;  %v7096_v0 = vmul.f32 %v6853_v35, %v10214_v33  ;;  %v2407_v1 = vadd.f32 %v2397_v37, %v10222_v40 }
 0x2a8   : > { %10216 = vst [vmem:[#allocation64_spill] sm:$0xff] %v7080_v23  ;;  %10217 = vst [vmem:[#allocation36_spill] sm:$0xff] %v7084_v12  ;;  %v2408_v14 = vadd.f32 %v2400_v63, %v10223_v38  ;;  %v7106_v41 = vmul.f32 %v6930_v6, %v10211_v10  ;;  %v2424_v8 = vadd.f32 %v2415_v11, %v2406_v9  ;;  %v10237_v38 = vld [vmem:[#allocation75_spill] sm:$0xff] }
 0x2a9   : > { %10218 = vst [vmem:[#allocation78_spill] sm:$0xff] %v7088_v25  ;;  %10219 = vst [vmem:[#allocation79_spill] sm:$0xff] %v7092_v61  ;;  %v2409_v53 = vadd.f32 %v2401_v27, %v10225_v55  ;;  %v2410_v4 = vadd.f32 %v2404_v29, %v10226_v49  ;;  %v7112_v24 = vmul.f32 %v6930_v6, %v10212_v46 }
 0x2aa   : > { %10220 = vst [vmem:[#allocation80_spill] sm:$0xff] %v7096_v0  ;;  %10224 = vst [vmem:[#allocation93_spill] sm:$0xff] %v7106_v41  ;;  %v7120_v37 = vmul.f32 %v6930_v6, %v10214_v33  ;;  %v7124_v63 = vmul.f32 %v6930_v6, %v10215_v20  ;;  %v7128_v11 = vmul.f32 %v6927_v19, %v10211_v10 }
 0x2ab   : > { %2016 = vrot.lane.b32.xlu1 %v6930_v6, %s4194_s16  ;;  %2014 = vrot.lane.b32.xlu0 %v6927_v19, %s4194_s16  ;;  %10227 = vst [vmem:[#allocation94_spill] sm:$0xff] %v7112_v24  ;;  %v7132_v49 = vmul.f32 %v6927_v19, %v10212_v46  ;;  %v7136_v27 = vmul.f32 %v6927_v19, %v10213_v22 }
 0x2ac   : > { %10229 = vst [vmem:[#allocation51_spill] sm:$0xff] %v7120_v37  ;;  %10230 = vst [vmem:[#allocation83_spill] sm:$0xff] %v7124_v63  ;;  %v7140_v29 = vmul.f32 %v6927_v19, %v10214_v33  ;;  %v7146_v9 = vadd.f32 %v2414_v13, %v2407_v1  ;;  %v2426_v40 = vadd.f32 %v2419_v28, %v2408_v14  ;;  %v10252_v14 = vld [vmem:[#allocation25_spill] sm:$0xff] }
 0x2ad   : > { %10231 = vst [vmem:[#allocation84_spill] sm:$0xff] %v7128_v11  ;;  %10232 = vst [vmem:[#allocation85_spill] sm:$0xff] %v7132_v49  ;;  %v7149_v55 = vadd.f32 %v2405_v50, %v10237_v38  ;;  %v7153_v47 = vmul.f32 %v6965_v39, %v10211_v10  ;;  %v7156_v16 = vmul.f32 %v2424_v8, %v10240_v3  ;;  %v10255_v38 = vld [vmem:[#allocation73_spill] sm:$0xff]  ;;  %v10263_v49 = vld [vmem:[#allocation20_spill] sm:$0xff] }
 0x2ae   : > { %10233 = vst [vmem:[#allocation42_spill] sm:$0xff] %v7136_v27  ;;  %10234 = vst [vmem:[#allocation86_spill] sm:$0xff] %v7140_v29  ;;  %v7158_v56 = vadd.f32 %v2418_v31, %v2409_v53  ;;  %v7160_v54 = vadd.f32 %v2423_v5, %v2410_v4  ;;  %v7168_v13 = vmul.f32 %v6965_v39, %v10213_v22  ;;  %v10264_v11 = vld [vmem:[#allocation24_spill] sm:$0xff] }
 0x2af   : > { %2020 = vrot.lane.b32.xlu1 %v6965_v39, %s4194_s16  ;;  %2018 = vrot.lane.b32.xlu0 %v6962_v43, %s4194_s16  ;;  %10236 = vst [vmem:[#allocation87_spill] sm:$0xff] %v7146_v9  ;;  %10238 = vst [vmem:[#allocation46_spill] sm:$0xff] %v7149_v55  ;;  %v7172_v28 = vmul.f32 %v6965_v39, %v10214_v33  ;;  %v7176_v50 = vmul.f32 %v6965_v39, %v10215_v20  ;;  %v10259_v9 = vld [vmem:[#allocation37_spill] sm:$0xff] }
 0x2b0   : > { %10239 = vst [vmem:[#allocation89_spill] sm:$0xff] %v7153_v47  ;;  %10241 = vst [vmem:[#allocation91_spill] sm:$0xff] %v7156_v16  ;;  %v7180_v4 = vmul.f32 %v6962_v43, %v10211_v10  ;;  %v7184_v31 = vmul.f32 %v6962_v43, %v10212_v46  ;;  %v7188_v5 = vmul.f32 %v6962_v43, %v10213_v22  ;;  %v10260_v47 = vld [vmem:[#allocation16_spill] sm:$0xff] }
 0x2b1   : > { %10242 = vst [vmem:[#allocation45_spill] sm:$0xff] %v7158_v56  ;;  %10243 = vst [vmem:[#allocation48_spill] sm:$0xff] %v7160_v54  ;;  %v7192_v1 = vmul.f32 %v6962_v43, %v10214_v33  ;;  %v7198_v10 = vmul.f32 %v6962_v43, %v10215_v20  ;;  %v7201_v56 = vmul.f32 %v2426_v40, %v10255_v38  ;;  %v10258_v54 = vld [vmem:[#allocation33_spill] sm:$0xff] }
 0x2b2   : > { %10245 = vst [vmem:[#allocation76_spill] sm:$0xff] %v7168_v13  ;;  %10246 = vst [vmem:[#allocation10_spill] sm:$0xff] %v7172_v28 }
 0x2b3   : > { %2024 = vrot.lane.b32.xlu1 %v6861_v21, %s9879_s13  ;;  %2022 = vrot.lane.b32.xlu0 %v6853_v35, %s9879_s13  ;;  %10247 = vst [vmem:[#allocation31_spill] sm:$0xff] %v7176_v50  ;;  %10248 = vst [vmem:[#allocation11_spill] sm:$0xff] %v7180_v4 }
 0x2b4   : > { %10249 = vst [vmem:[#allocation49_spill] sm:$0xff] %v7184_v31  ;;  %10250 = vst [vmem:[#allocation32_spill] sm:$0xff] %v7188_v5 }
 0x2b5   : > { %10251 = vst [vmem:[#allocation34_spill] sm:$0xff] %v7192_v1  ;;  %10254 = vst [vmem:[#allocation22_spill] sm:$0xff] %v7198_v10 }
 0x2b6   : > { %10256 = vst [vmem:[#allocation40_spill] sm:$0xff] %v7201_v56 }
 0x2b7   : > { %2028 = vrot.lane.b32.xlu1 %v6930_v6, %s9879_s13  ;;  %2026 = vrot.lane.b32.xlu0 %v6927_v19, %s9879_s13 }
 0x2bb   : > { %2032 = vrot.lane.b32.xlu1 %v6965_v39, %s9879_s13  ;;  %2030 = vrot.lane.b32.xlu0 %v6962_v43, %s9879_s13 }
 0x2bf   : > { %2036 = vrot.lane.b32.xlu1 %v6861_v21, %s9885_s14  ;;  %2034 = vrot.lane.b32.xlu0 %v6853_v35, %s9885_s14  ;;  %v7100_v21 = vmul.f32 %v6853_v35, %v10215_v20  ;;  %v7116_v35 = vmul.f32 %v6930_v6, %v10213_v22 }
 0x2c1   : > { %10221 = vst [vmem:[#allocation81_spill] sm:$0xff] %v7100_v21  ;;  %10228 = vst [vmem:[#allocation15_spill] sm:$0xff] %v7116_v35 }
 0x2c3   : > { %2040 = vrot.lane.b32.xlu1 %v6930_v6, %s9885_s14  ;;  %2038 = vrot.lane.b32.xlu0 %v6927_v19, %s9885_s14  ;;  %v7144_v6 = vmul.f32 %v6927_v19, %v10215_v20  ;;  %v7164_v19 = vmul.f32 %v6965_v39, %v10212_v46  ;;  %v10257_v46 = vld [vmem:[#allocation29_spill] sm:$0xff] }
 0x2c5   : > { %10235 = vst [vmem:[#allocation50_spill] sm:$0xff] %v7144_v6  ;;  %10244 = vst [vmem:[#allocation90_spill] sm:$0xff] %v7164_v19  ;;  %v10261_v6 = vld [vmem:[#allocation18_spill] sm:$0xff] }
 0x2c7   : > { %2044 = vrot.lane.b32.xlu1 %v6965_v39, %s9885_s14  ;;  %2042 = vrot.lane.b32.xlu0 %v6962_v43, %s9885_s14  ;;  %v10253_v39 = vld [vmem:[#allocation26_spill] sm:$0xff] }
 0x2f9   : > { %v2001_v59 = vpop.permute.xlu1 %2000 }
 0x2fa   : > { %v1999_v62 = vpop.permute.xlu0 %1998  ;;  %v2047_v8 = vmul.f32 %v2001_v59, %v10252_v14  ;;  %v2113_v53 = vmul.f32 %v2001_v59, %v10253_v39  ;;  %v2185_v55 = vmul.f32 %v2001_v59, %v10257_v46  ;;  %v2245_v22 = vmul.f32 %v2001_v59, %v10258_v54 }
 0x2fb   : > { %v2317_v3 = vmul.f32 %v2001_v59, %v10259_v9  ;;  %v2046_v33 = vmul.f32 %v1999_v62, %v10252_v14  ;;  %v2112_v45 = vmul.f32 %v1999_v62, %v10253_v39  ;;  %v2184_v48 = vmul.f32 %v1999_v62, %v10257_v46 }
 0x2fc   : > { %v2244_v16 = vmul.f32 %v1999_v62, %v10258_v54  ;;  %v2316_v43 = vmul.f32 %v1999_v62, %v10259_v9 }
 0x308   : > { %v2005_v44 = vpop.permute.xlu1 %2004  ;;  %v2003_v42 = vpop.permute.xlu0 %2002 }
 0x309   : > { %v2049_v20 = vmul.f32 %v2005_v44, %v10252_v14  ;;  %v2115_v40 = vmul.f32 %v2005_v44, %v10253_v39  ;;  %v2187_v38 = vmul.f32 %v2005_v44, %v10257_v46  ;;  %v2247_v56 = vmul.f32 %v2005_v44, %v10258_v54 }
 0x30a   : > { %v2319_v58 = vmul.f32 %v2005_v44, %v10259_v9  ;;  %v2048_v34 = vmul.f32 %v2003_v42, %v10252_v14  ;;  %v2114_v15 = vmul.f32 %v2003_v42, %v10253_v39  ;;  %v2186_v57 = vmul.f32 %v2003_v42, %v10257_v46 }
 0x30b   : > { %v2246_v62 = vmul.f32 %v2003_v42, %v10258_v54  ;;  %v2318_v30 = vmul.f32 %v2003_v42, %v10259_v9 }
 0x315   : > { %v2009_v60 = vpop.permute.xlu1 %2008  ;;  %v2007_v59 = vpop.permute.xlu0 %2006 }
 0x316   : > { %v2051_v18 = vmul.f32 %v2009_v60, %v10252_v14  ;;  %v2117_v10 = vmul.f32 %v2009_v60, %v10253_v39  ;;  %v2189_v1 = vmul.f32 %v2009_v60, %v10257_v46  ;;  %v2249_v5 = vmul.f32 %v2009_v60, %v10258_v54 }
 0x317   : > { %v7226_v44 = vmul.f32 %v2009_v60, %v10259_v9  ;;  %v7229_v31 = vmul.f32 %v2007_v59, %v10252_v14  ;;  %v7232_v4 = vmul.f32 %v2007_v59, %v10253_v39  ;;  %v7235_v50 = vmul.f32 %v2007_v59, %v10257_v46  ;;  %v10262_v14 = vld [vmem:[#allocation19_spill] sm:$0xff] }
 0x318   : > { %v7238_v42 = vmul.f32 %v2007_v59, %v10258_v54  ;;  %v7241_v28 = vmul.f32 %v2007_v59, %v10259_v9 }
 0x319   : > { %v2013_v13 = vpop.permute.xlu1 %2012  ;;  %v2011_v19 = vpop.permute.xlu0 %2010 }
 0x31a   : > { %v2053_v60 = vmul.f32 %v2013_v13, %v10260_v47  ;;  %v2119_v29 = vmul.f32 %v2013_v13, %v10261_v6  ;;  %v2191_v27 = vmul.f32 %v2013_v13, %v10262_v14  ;;  %v2251_v39 = vmul.f32 %v2013_v13, %v10263_v49 }
 0x31b   : > { %v2323_v63 = vmul.f32 %v2013_v13, %v10264_v11  ;;  %v2052_v46 = vmul.f32 %v2011_v19, %v10260_v47  ;;  %v2118_v54 = vmul.f32 %v2011_v19, %v10261_v6  ;;  %v2190_v37 = vmul.f32 %v2011_v19, %v10262_v14 }
 0x31c   : > { %v2059_v9 = vadd.f32 %v2053_v60, %v2047_v8  ;;  %v2125_v59 = vadd.f32 %v2119_v29, %v2113_v53  ;;  %v2197_v35 = vadd.f32 %v2191_v27, %v2185_v55  ;;  %v2257_v24 = vadd.f32 %v2251_v39, %v2245_v22 }
 0x31d   : > { %v7251_v41 = vadd.f32 %v2323_v63, %v2317_v3  ;;  %v7253_v21 = vadd.f32 %v2052_v46, %v2046_v33  ;;  %v7255_v0 = vadd.f32 %v2118_v54, %v2112_v45  ;;  %v7257_v61 = vadd.f32 %v2190_v37, %v2184_v48  ;;  %v2017_v25 = vpop.permute.xlu1 %2016  ;;  %v2015_v13 = vpop.permute.xlu0 %2014 }
 0x31e   : > { %v2250_v12 = vmul.f32 %v2011_v19, %v10263_v49  ;;  %v2322_v2 = vmul.f32 %v2011_v19, %v10264_v11  ;;  %v2055_v23 = vmul.f32 %v2017_v25, %v10260_v47  ;;  %v2121_v29 = vmul.f32 %v2017_v25, %v10261_v6 }
 0x31f   : > { %v2193_v27 = vmul.f32 %v2017_v25, %v10262_v14  ;;  %v2253_v3 = vmul.f32 %v2017_v25, %v10263_v49  ;;  %v2325_v63 = vmul.f32 %v2017_v25, %v10264_v11  ;;  %v2054_v45 = vmul.f32 %v2015_v13, %v10260_v47 }
 0x320   : > { %v2256_v48 = vadd.f32 %v2250_v12, %v2244_v16  ;;  %v7267_v37 = vadd.f32 %v2322_v2, %v2316_v43  ;;  %v7269_v55 = vadd.f32 %v2055_v23, %v2049_v20  ;;  %v7271_v8 = vadd.f32 %v2121_v29, %v2115_v40 }
 0x321   : > { %v7273_v19 = vadd.f32 %v2193_v27, %v2187_v38  ;;  %v7275_v53 = vadd.f32 %v2253_v3, %v2247_v56  ;;  %v7277_v22 = vadd.f32 %v2325_v63, %v2319_v58  ;;  %v7279_v33 = vadd.f32 %v2054_v45, %v2048_v34  ;;  %v2021_v60 = vpop.permute.xlu1 %2020  ;;  %v2019_v38 = vpop.permute.xlu0 %2018  ;;  %v10265_v63 = vld [vmem:[#allocation53_spill] sm:$0xff] }
 0x322   : > { %v2120_v25 = vmul.f32 %v2015_v13, %v10261_v6  ;;  %v2192_v39 = vmul.f32 %v2015_v13, %v10262_v14  ;;  %v2252_v2 = vmul.f32 %v2015_v13, %v10263_v49  ;;  %v2324_v16 = vmul.f32 %v2015_v13, %v10264_v11 }
 0x323   : > { %v2057_v23 = vmul.f32 %v2021_v60, %v10260_v47  ;;  %v2123_v12 = vmul.f32 %v2021_v60, %v10261_v6  ;;  %v2195_v56 = vmul.f32 %v2021_v60, %v10262_v14  ;;  %v2255_v58 = vmul.f32 %v2021_v60, %v10263_v49 }
 0x324   : > { %v7289_v34 = vadd.f32 %v2120_v25, %v2114_v15  ;;  %v7291_v43 = vadd.f32 %v2192_v39, %v2186_v57  ;;  %v7293_v20 = vadd.f32 %v2252_v2, %v2246_v62  ;;  %v7295_v40 = vadd.f32 %v2324_v16, %v2318_v30  ;;  %v10268_v2 = vld [vmem:[#allocation36_spill] sm:$0xff] }
 0x325   : > { %v7297_v46 = vadd.f32 %v2057_v23, %v2051_v18  ;;  %v7299_v54 = vadd.f32 %v2123_v12, %v2117_v10  ;;  %v7301_v13 = vadd.f32 %v2195_v56, %v2189_v1  ;;  %v7303_v29 = vadd.f32 %v2255_v58, %v2249_v5  ;;  %v2025_v27 = vpop.permute.xlu1 %2024  ;;  %v10270_v12 = vld [vmem:[#allocation79_spill] sm:$0xff] }
 0x326   : > { %v2327_v3 = vmul.f32 %v2021_v60, %v10264_v11  ;;  %v2056_v15 = vmul.f32 %v2019_v38, %v10260_v47  ;;  %v2122_v57 = vmul.f32 %v2019_v38, %v10261_v6  ;;  %v2194_v62 = vmul.f32 %v2019_v38, %v10262_v14  ;;  %v2023_v14 = vpop.permute.xlu0 %2022 }
 0x327   : > { %v2254_v30 = vmul.f32 %v2019_v38, %v10263_v49  ;;  %v2326_v18 = vmul.f32 %v2019_v38, %v10264_v11  ;;  %v2071_v10 = vadd.f32 %v7064_v17, %v2059_v9  ;;  %v2077_v1 = vmul.f32 %v2025_v27, %v10265_v63  ;;  %v10271_v38 = vld [vmem:[#allocation80_spill] sm:$0xff] }
 0x328   : > { %v7314_v5 = vadd.f32 %v2327_v3, %v7226_v44  ;;  %v7317_v45 = vadd.f32 %v2056_v15, %v7229_v31  ;;  %v7320_v47 = vadd.f32 %v2122_v57, %v7232_v4  ;;  %v7323_v6 = vadd.f32 %v2194_v62, %v7235_v50 }
 0x329   : > { %v7326_v49 = vadd.f32 %v2254_v30, %v7238_v42  ;;  %v7329_v11 = vadd.f32 %v2326_v18, %v7241_v28  ;;  %v7331_v17 = vadd.f32 %v2077_v1, %v2071_v10  ;;  %v2137_v44 = vadd.f32 %v7068_v51, %v2125_v59  ;;  %v10266_v42 = vld [vmem:[#allocation64_spill] sm:$0xff]  ;;  %v10267_v28 = vld [vmem:[#allocation58_spill] sm:$0xff]  ;;  %v2029_v15 = vpop.permute.xlu1 %2028  ;;  %v10273_v18 = vld [vmem:[#allocation93_spill] sm:$0xff] }
 0x32a   : > { %v2143_v31 = vmul.f32 %v2025_v27, %v10179_v7  ;;  %v2209_v9 = vadd.f32 %v7072_v52, %v2197_v35  ;;  %v2215_v4 = vmul.f32 %v2025_v27, %v10180_v36  ;;  %v2269_v50 = vadd.f32 %v7076_v26, %v2257_v24  ;;  %v10269_v35 = vld [vmem:[#allocation78_spill] sm:$0xff] }
 0x32b   : > { %v2275_v60 = vmul.f32 %v2025_v27, %v10181_v32  ;;  %v2341_v25 = vadd.f32 %v10266_v42, %v7251_v41  ;;  %v2347_v39 = vmul.f32 %v2025_v27, %v10267_v28  ;;  %v2070_v16 = vadd.f32 %v10268_v2, %v7253_v21  ;;  %v2027_v2 = vpop.permute.xlu0 %2026 }
 0x32c   : > { %v7344_v51 = vadd.f32 %v2143_v31, %v2137_v44  ;;  %v7346_v59 = vadd.f32 %v2215_v4, %v2209_v9  ;;  %v2076_v52 = vmul.f32 %v2023_v14, %v10265_v63  ;;  %v2136_v23 = vadd.f32 %v10269_v35, %v7255_v0  ;;  %v10272_v0 = vld [vmem:[#allocation81_spill] sm:$0xff]  ;;  %v10274_v44 = vld [vmem:[#allocation94_spill] sm:$0xff]  ;;  %v10275_v31 = vld [vmem:[#allocation15_spill] sm:$0xff] }
 0x32d   : > { %v7351_v24 = vadd.f32 %v2275_v60, %v2269_v50  ;;  %v7353_v26 = vadd.f32 %v2347_v39, %v2341_v25  ;;  %v2142_v41 = vmul.f32 %v2023_v14, %v10179_v7  ;;  %v2208_v56 = vadd.f32 %v10270_v12, %v7257_v61  ;;  %v10276_v50 = vld [vmem:[#allocation51_spill] sm:$0xff] }
 0x32e   : > { %v7358_v58 = vadd.f32 %v2076_v52, %v2070_v16  ;;  %v2214_v21 = vmul.f32 %v2023_v14, %v10180_v36  ;;  %v2268_v27 = vadd.f32 %v10271_v38, %v2256_v48  ;;  %v2274_v3 = vmul.f32 %v2023_v14, %v10181_v32  ;;  %v10278_v16 = vld [vmem:[#allocation84_spill] sm:$0xff]  ;;  %v10281_v38 = vld [vmem:[#allocation86_spill] sm:$0xff] }
 0x32f   : > { %v7363_v57 = vadd.f32 %v2142_v41, %v2136_v23  ;;  %v2340_v62 = vadd.f32 %v10272_v0, %v7267_v37  ;;  %v2346_v30 = vmul.f32 %v2023_v14, %v10267_v28  ;;  %v2073_v10 = vadd.f32 %v10273_v18, %v7269_v55  ;;  %v10277_v14 = vld [vmem:[#allocation83_spill] sm:$0xff]  ;;  %v2033_v0 = vpop.permute.xlu1 %2032  ;;  %v10283_v18 = vld [vmem:[#allocation89_spill] sm:$0xff] }
 0x330   : > { %v7370_v61 = vadd.f32 %v2214_v21, %v2208_v56  ;;  %v7372_v1 = vadd.f32 %v2274_v3, %v2268_v27  ;;  %v2139_v48 = vadd.f32 %v10274_v44, %v7271_v8  ;;  %v2211_v9 = vadd.f32 %v10275_v31, %v7273_v19  ;;  %v10282_v3 = vld [vmem:[#allocation50_spill] sm:$0xff]  ;;  %v10285_v31 = vld [vmem:[#allocation76_spill] sm:$0xff] }
 0x331   : > { %v7378_v4 = vadd.f32 %v2346_v30, %v2340_v62  ;;  %v2271_v37 = vadd.f32 %v10276_v50, %v7275_v53  ;;  %v2343_v60 = vadd.f32 %v10277_v14, %v7277_v22  ;;  %v2079_v55 = vmul.f32 %v2029_v15, %v10265_v63  ;;  %v10279_v53 = vld [vmem:[#allocation85_spill] sm:$0xff]  ;;  %v10280_v22 = vld [vmem:[#allocation42_spill] sm:$0xff] }
 0x332   : > { %v2145_v42 = vmul.f32 %v2029_v15, %v10179_v7  ;;  %v2217_v25 = vmul.f32 %v2029_v15, %v10180_v36  ;;  %v2277_v39 = vmul.f32 %v2029_v15, %v10181_v32  ;;  %v2349_v8 = vmul.f32 %v2029_v15, %v10267_v28 }
 0x333   : > { %v7389_v19 = vadd.f32 %v2079_v55, %v2073_v10  ;;  %v2072_v52 = vadd.f32 %v10278_v16, %v7279_v33  ;;  %v2138_v35 = vadd.f32 %v10279_v53, %v7289_v34  ;;  %v2210_v23 = vadd.f32 %v10280_v22, %v7291_v43  ;;  %v10288_v16 = vld [vmem:[#allocation11_spill] sm:$0xff]  ;;  %v10289_v53 = vld [vmem:[#allocation49_spill] sm:$0xff] }
 0x334   : > { %v7397_v41 = vadd.f32 %v2145_v42, %v2139_v48  ;;  %v7399_v12 = vadd.f32 %v2217_v25, %v2211_v9  ;;  %v7401_v56 = vadd.f32 %v2277_v39, %v2271_v37  ;;  %v7403_v21 = vadd.f32 %v2349_v8, %v2343_v60  ;;  %v10286_v60 = vld [vmem:[#allocation10_spill] sm:$0xff]  ;;  %v10287_v42 = vld [vmem:[#allocation31_spill] sm:$0xff] }
 0x335   : > { %v2270_v27 = vadd.f32 %v10281_v38, %v7293_v20  ;;  %v2342_v33 = vadd.f32 %v10282_v3, %v7295_v40  ;;  %v2078_v15 = vmul.f32 %v2027_v2, %v10265_v63  ;;  %v2144_v34 = vmul.f32 %v2027_v2, %v10179_v7  ;;  %v10284_v40 = vld [vmem:[#allocation90_spill] sm:$0xff] }
 0x336   : > { %v2216_v43 = vmul.f32 %v2027_v2, %v10180_v36  ;;  %v2276_v62 = vmul.f32 %v2027_v2, %v10181_v32  ;;  %v2348_v30 = vmul.f32 %v2027_v2, %v10267_v28  ;;  %v2075_v10 = vadd.f32 %v10283_v18, %v7297_v46  ;;  %v2031_v46 = vpop.permute.xlu0 %2030  ;;  %v10293_v18 = vld [vmem:[#allocation59_spill] sm:$0xff] }
 0x337   : > { %v7416_v44 = vadd.f32 %v2078_v15, %v2072_v52  ;;  %v7418_v20 = vadd.f32 %v2144_v34, %v2138_v35  ;;  %v2141_v48 = vadd.f32 %v10284_v40, %v7299_v54  ;;  %v2213_v9 = vadd.f32 %v10285_v31, %v7301_v13  ;;  %v10291_v15 = vld [vmem:[#allocation34_spill] sm:$0xff]  ;;  %v10294_v40 = vld [vmem:[#allocation60_spill] sm:$0xff]  ;;  %v10295_v31 = vld [vmem:[#allocation61_spill] sm:$0xff] }
 0x338   : > { %v7424_v50 = vadd.f32 %v2216_v43, %v2210_v23  ;;  %v7426_v37 = vadd.f32 %v2276_v62, %v2270_v27  ;;  %v7428_v14 = vadd.f32 %v2348_v30, %v2342_v33  ;;  %v2273_v55 = vadd.f32 %v10286_v60, %v7303_v29  ;;  %v10290_v23 = vld [vmem:[#allocation32_spill] sm:$0xff]  ;;  %v2037_v27 = vpop.permute.xlu1 %2036  ;;  %v10292_v34 = vld [vmem:[#allocation22_spill] sm:$0xff] }
 0x339   : > { %v2345_v25 = vadd.f32 %v10287_v42, %v7314_v5  ;;  %v2081_v39 = vmul.f32 %v2033_v0, %v10265_v63  ;;  %v2147_v54 = vmul.f32 %v2033_v0, %v10179_v7  ;;  %v2219_v8 = vmul.f32 %v2033_v0, %v10180_v36 }
 0x33a   : > { %v2279_v13 = vmul.f32 %v2033_v0, %v10181_v32  ;;  %v2351_v2 = vmul.f32 %v2033_v0, %v10267_v28  ;;  %v2074_v52 = vadd.f32 %v10288_v16, %v7317_v45  ;;  %v2140_v29 = vadd.f32 %v10289_v53, %v7320_v47 }
 0x33b   : > { %v7443_v35 = vadd.f32 %v2081_v39, %v2075_v10  ;;  %v7445_v22 = vadd.f32 %v2147_v54, %v2141_v48  ;;  %v7447_v5 = vadd.f32 %v2219_v8, %v2213_v9  ;;  %v2212_v38 = vadd.f32 %v10290_v23, %v7323_v6 }
 0x33c   : > { %v7451_v3 = vadd.f32 %v2279_v13, %v2273_v55  ;;  %v7453_v33 = vadd.f32 %v2351_v2, %v2345_v25  ;;  %v2272_v45 = vadd.f32 %v10291_v15, %v7326_v49  ;;  %v2344_v47 = vadd.f32 %v10292_v34, %v7329_v11  ;;  %v2035_v49 = vpop.permute.xlu0 %2034  ;;  %v10297_v25 = vld [vmem:[#allocation63_spill] sm:$0xff]  ;;  %v2041_v13 = vpop.permute.xlu1 %2040 }
 0x33d   : > { %v2080_v0 = vmul.f32 %v2031_v46, %v10265_v63  ;;  %v2146_v43 = vmul.f32 %v2031_v46, %v10179_v7  ;;  %v2218_v62 = vmul.f32 %v2031_v46, %v10180_v36  ;;  %v2278_v30 = vmul.f32 %v2031_v46, %v10181_v32 }
 0x33e   : > { %v2350_v6 = vmul.f32 %v2031_v46, %v10267_v28  ;;  %v2089_v10 = vmul.f32 %v2037_v27, %v10293_v18  ;;  %v2155_v48 = vmul.f32 %v2037_v27, %v10294_v40  ;;  %v2227_v9 = vmul.f32 %v2037_v27, %v10295_v31  ;;  %v10296_v46 = vld [vmem:[#allocation62_spill] sm:$0xff] }
 0x33f   : > { %v7467_v60 = vadd.f32 %v2080_v0, %v2074_v52  ;;  %v7469_v11 = vadd.f32 %v2146_v43, %v2140_v29  ;;  %v7471_v63 = vadd.f32 %v2218_v62, %v2212_v38  ;;  %v7473_v7 = vadd.f32 %v2278_v30, %v2272_v45 }
 0x340   : > { %v7475_v36 = vadd.f32 %v2350_v6, %v2344_v47  ;;  %v2095_v32 = vadd.f32 %v2089_v10, %v7331_v17  ;;  %v2161_v28 = vadd.f32 %v2155_v48, %v7344_v51  ;;  %v7480_v55 = vadd.f32 %v2227_v9, %v7346_v59 }
 0x341   : > { %v2287_v42 = vmul.f32 %v2037_v27, %v10296_v46  ;;  %v2359_v39 = vmul.f32 %v2037_v27, %v10297_v25  ;;  %v2088_v54 = vmul.f32 %v2035_v49, %v10293_v18  ;;  %v2154_v8 = vmul.f32 %v2035_v49, %v10294_v40 }
 0x342   : > { %v2101_v2 = vrot.slane %v2095_v32, 6  ;;  %v2167_v16 = vrot.slane %v2161_v28, 7  ;;  %v2226_v52 = vmul.f32 %v2035_v49, %v10295_v31  ;;  %v2286_v17 = vmul.f32 %v2035_v49, %v10296_v46 }
 0x343   : > { %v7489_v51 = vadd.f32 %v2287_v42, %v7351_v24  ;;  %v7492_v59 = vadd.f32 %v2359_v39, %v7353_v26  ;;  %v2094_v53 = vadd.f32 %v2088_v54, %v7358_v58  ;;  %v2160_v29 = vadd.f32 %v2154_v8, %v7363_v57 }
 0x344   : > { %v2232_v23 = vadd.f32 %v2226_v52, %v7370_v61  ;;  %v7498_v38 = vadd.f32 %v2286_v17, %v7372_v1  ;;  %v2358_v27 = vmul.f32 %v2035_v49, %v10297_v25  ;;  %v2091_v15 = vmul.f32 %v2041_v13, %v10293_v18  ;;  %v2039_v1 = vpop.permute.xlu0 %2038 }
 0x345   : > { %v2299_v45 = vrot.slane %v7489_v51, 1  ;;  %v2371_v24 = vrot.slane %v7492_v59, 2  ;;  %v2100_v34 = vrot.slane %v2094_v53, 6  ;;  %v2166_v26 = vrot.slane %v2160_v29, 7 }
 0x346   : > { %v2298_v47 = vrot.slane %v7498_v38, 1  ;;  %v7506_v58 = vadd.f32 %v2358_v27, %v7378_v4  ;;  %v2097_v57 = vadd.f32 %v2091_v15, %v7389_v19  ;;  %v2157_v61 = vmul.f32 %v2041_v13, %v10294_v40 }
 0x347   : > { %v7512_v43 = vsel %vm395_vm3, %v2100_v34, %v2101_v2  ;;  %v2103_v62 = vsel %vm395_vm3, %v2101_v2, %v2100_v34  ;;  %v7518_v30 = vsel %vm467_vm2, %v2166_v26, %v2167_v16  ;;  %v2169_v4 = vsel %vm467_vm2, %v2167_v16, %v2166_v26  ;;  %v2045_v2 = vpop.permute.xlu1 %2044 }
 0x348   : > { %v2178_v6 = vadd.f32 %v2169_v4, %v2103_v62  ;;  %v2370_v19 = vrot.slane %v7506_v58, 2  ;;  %v2105_v10 = vrot.slane %v2097_v57, 6  ;;  %v2163_v48 = vadd.f32 %v2157_v61, %v7397_v41 }
 0x349   : > { %v2229_v9 = vmul.f32 %v2041_v13, %v10295_v31  ;;  %v2289_v49 = vmul.f32 %v2041_v13, %v10296_v46  ;;  %v2361_v32 = vmul.f32 %v2041_v13, %v10297_v25  ;;  %v2090_v28 = vmul.f32 %v2039_v1, %v10293_v18 }
 0x34a   : > { %v2238_v42 = vadd.f32 %v2232_v23, %v2178_v6  ;;  %v2171_v39 = vrot.slane %v2163_v48, 7  ;;  %v2156_v54 = vmul.f32 %v2039_v1, %v10294_v40  ;;  %v2228_v8 = vmul.f32 %v2039_v1, %v10295_v31 }
 0x34b   : > { %v7531_v16 = vadd.f32 %v2229_v9, %v7399_v12  ;;  %v7534_v41 = vadd.f32 %v2289_v49, %v7401_v56  ;;  %v7537_v52 = vadd.f32 %v2361_v32, %v7403_v21  ;;  %v2096_v13 = vadd.f32 %v2090_v28, %v7416_v44 }
 0x34c   : > { %v2162_v17 = vadd.f32 %v2156_v54, %v7418_v20  ;;  %v2234_v53 = vadd.f32 %v2228_v8, %v7424_v50  ;;  %v2288_v29 = vmul.f32 %v2039_v1, %v10296_v46  ;;  %v2360_v23 = vmul.f32 %v2039_v1, %v10297_v25  ;;  %v2043_v1 = vpop.permute.xlu0 %2042 }
 0x34d   : > { %v2303_v27 = vrot.slane %v7534_v41, 1  ;;  %v2375_v12 = vrot.slane %v7537_v52, 2  ;;  %v2104_v15 = vrot.slane %v2096_v13, 6  ;;  %v2093_v56 = vmul.f32 %v2045_v2, %v10293_v18 }
 0x34e   : > { %v2170_v34 = vrot.slane %v2162_v17, 7  ;;  %v2294_v21 = vadd.f32 %v2288_v29, %v7426_v37  ;;  %v2366_v44 = vadd.f32 %v2360_v23, %v7428_v14  ;;  %v2159_v20 = vmul.f32 %v2045_v2, %v10294_v40 }
 0x34f   : > { %v2106_v50 = vsel %vm395_vm3, %v2104_v15, %v2105_v10  ;;  %v2107_v26 = vsel %vm395_vm3, %v2105_v10, %v2104_v15  ;;  %v2099_v57 = vadd.f32 %v2093_v56, %v7443_v35  ;;  %v2231_v61 = vmul.f32 %v2045_v2, %v10295_v31 }
 0x350   : > { %v2172_v62 = vsel %vm467_vm2, %v2170_v34, %v2171_v39  ;;  %v2173_v37 = vsel %vm467_vm2, %v2171_v39, %v2170_v34  ;;  %v2302_v14 = vrot.slane %v2294_v21, 1  ;;  %v2374_v4 = vrot.slane %v2366_v44, 2 }
 0x351   : > { %v2180_v6 = vadd.f32 %v2173_v37, %v2107_v26  ;;  %v2109_v48 = vrot.slane %v2099_v57, 6  ;;  %v2165_v9 = vadd.f32 %v2159_v20, %v7445_v22  ;;  %v2237_v49 = vadd.f32 %v2231_v61, %v7447_v5  ;;  %v10300_v57 = vld [vmem:[#allocation91_spill] sm:$0xff] }
 0x352   : > { %v2291_v10 = vmul.f32 %v2045_v2, %v10296_v46  ;;  %v2363_v35 = vmul.f32 %v2045_v2, %v10297_v25  ;;  %v2092_v32 = vmul.f32 %v2043_v1, %v10293_v18  ;;  %v2158_v28 = vmul.f32 %v2043_v1, %v10294_v40 }
 0x353   : > { %v2240_v54 = vadd.f32 %v2234_v53, %v2180_v6  ;;  %v2175_v8 = vrot.slane %v2165_v9, 7  ;;  %v2230_v39 = vmul.f32 %v2043_v1, %v10295_v31  ;;  %v2290_v13 = vmul.f32 %v2043_v1, %v10296_v46  ;;  %v10303_v9 = vld [vmem:[#allocation66_spill] sm:$0xff] }
 0x354   : > { %v2297_v17 = vadd.f32 %v2291_v10, %v7451_v3  ;;  %v2369_v22 = vadd.f32 %v2363_v35, %v7453_v33  ;;  %v2098_v5 = vadd.f32 %v2092_v32, %v7467_v60  ;;  %v2164_v29 = vadd.f32 %v2158_v28, %v7469_v11  ;;  %v10304_v10 = vld [vmem:[#allocation87_spill] sm:$0xff] }
 0x355   : > { %v2236_v2 = vadd.f32 %v2230_v39, %v7471_v63  ;;  %v2296_v18 = vadd.f32 %v2290_v13, %v7473_v7  ;;  %v2362_v40 = vmul.f32 %v2043_v1, %v10297_v25  ;;  %v2300_v31 = vsel %vm610_vm1, %v2298_v47, %v2299_v45  ;;  %v10306_v39 = vld [vmem:[#allocation40_spill] sm:$0xff] }
 0x356   : > { %v2307_v3 = vrot.slane %v2297_v17, 1  ;;  %v2379_v46 = vrot.slane %v2369_v22, 2  ;;  %v2108_v33 = vrot.slane %v2098_v5, 6  ;;  %v2174_v53 = vrot.slane %v2164_v29, 7  ;;  %v10307_v17 = vld [vmem:[#allocation14_spill] sm:$0xff]  ;;  %v10308_v5 = vld [vmem:[#allocation28_spill] sm:$0xff] }
 0x357   : > { %v2306_v60 = vrot.slane %v2296_v18, 1  ;;  %v2368_v11 = vadd.f32 %v2362_v40, %v7475_v36  ;;  %v2310_v23 = vadd.f32 %v2300_v31, %v2238_v42  ;;  %v2372_v63 = vsel %vm688_vm0, %v2370_v19, %v2371_v24  ;;  %v10309_v29 = vld [vmem:[#allocation48_spill] sm:$0xff]  ;;  %v10310_v40 = vld [vmem:[#allocation82_spill] sm:$0xff]  ;;  %v10311_v31 = vld [vmem:[#allocation65_spill] sm:$0xff] }
 0x358   : > { %v2110_v7 = vsel %vm395_vm3, %v2108_v33, %v2109_v48  ;;  %v2111_v25 = vsel %vm395_vm3, %v2109_v48, %v2108_v33  ;;  %v2176_v15 = vsel %vm467_vm2, %v2174_v53, %v2175_v8  ;;  %v2177_v36 = vsel %vm467_vm2, %v2175_v8, %v2174_v53  ;;  %v10313_v53 = vld [vmem:[#allocation44_spill] sm:$0xff] }
 0x359   : > { %v2182_v42 = vadd.f32 %v2177_v36, %v2111_v25  ;;  %v2378_v56 = vrot.slane %v2368_v11, 2  ;;  %v2382_v34 = vadd.f32 %v2372_v63, %v2310_v23  ;;  %v2179_v21 = vadd.f32 %v7518_v30, %v7512_v43  ;;  %v10299_v43 = vld [vmem:[#allocation77_spill] sm:$0xff] }
 0x35a   : > { %v2301_v44 = vsel %vm610_vm1, %v2299_v45, %v2298_v47  ;;  %v2373_v20 = vsel %vm688_vm0, %v2371_v24, %v2370_v19  ;;  %v2304_v26 = vsel %vm610_vm1, %v2302_v14, %v2303_v27  ;;  %v2376_v51 = vsel %vm688_vm0, %v2374_v4, %v2375_v12  ;;  %v10316_v25 = vld [vmem:[#allocation45_spill] sm:$0xff] }
 0x35b   : > { %v2242_v38 = vadd.f32 %v2236_v2, %v2182_v42  ;;  %v2436_v45 = vadd.f32 %v10299_v43, %v2382_v34  ;;  %v2239_v47 = vadd.f32 %v7480_v55, %v2179_v21  ;;  %v2312_v58 = vadd.f32 %v2304_v26, %v2240_v54  ;;  %v10305_v54 = vld [vmem:[#allocation47_spill] sm:$0xff]  ;;  %v10319_v21 = vld [vmem:[#allocation52_spill] sm:$0xff] }
 0x35c   : > { %v2181_v59 = vadd.f32 %v2172_v62, %v2106_v50  ;;  %v2305_v24 = vsel %vm610_vm1, %v2303_v27, %v2302_v14  ;;  %v2377_v30 = vsel %vm688_vm0, %v2375_v12, %v2374_v4  ;;  %v2308_v19 = vsel %vm610_vm1, %v2306_v60, %v2307_v3  ;;  %v10301_v62 = vld [vmem:[#allocation21_spill] sm:$0xff]  ;;  %v10302_v4 = vld [vmem:[#allocation92_spill] sm:$0xff]  ;;  %v10317_v42 = vld [vmem:[#allocation95_spill] sm:$0xff] }
 0x35d   : > { %v7631_v61 = vsub.f32 %v2436_v45, %v10300_v57  ;;  %v2311_v1 = vadd.f32 %v2301_v44, %v2239_v47  ;;  %v2384_v55 = vadd.f32 %v2376_v51, %v2312_v58  ;;  %v2314_v37 = vadd.f32 %v2308_v19, %v2242_v38  ;;  %v10320_v38 = vld [vmem:[#allocation41_spill] sm:$0xff] }
 0x35e   : > { %v2241_v50 = vadd.f32 %v7531_v16, %v2181_v59  ;;  %v2380_v41 = vsel %vm688_vm0, %v2378_v56, %v2379_v46  ;;  %v2183_v27 = vadd.f32 %v2176_v15, %v2110_v7  ;;  %v2309_v52 = vsel %vm610_vm1, %v2307_v3, %v2306_v60  ;;  %v10314_v60 = vld [vmem:[#allocation39_spill] sm:$0xff]  ;;  %v10315_v7 = vld [vmem:[#allocation73_spill] sm:$0xff] }
 0x35f   : > { %v2454_v12 = vmul.f32 %v7631_v61, %v10301_v62  ;;  %v2383_v14 = vadd.f32 %v2373_v20, %v2311_v1  ;;  %v2438_v6 = vadd.f32 %v10302_v4, %v2384_v55  ;;  %v2386_v48 = vadd.f32 %v2380_v41, %v2314_v37 }
 0x360   : > { %v2443_v35 = vmul.f32 %v10304_v10, %v10303_v9  ;;  %v2313_v32 = vadd.f32 %v2305_v24, %v2241_v50  ;;  %v2243_v28 = vadd.f32 %v2237_v49, %v2183_v27  ;;  %v2381_v16 = vsel %vm688_vm0, %v2379_v46, %v2378_v56  ;;  %v10312_v49 = vld [vmem:[#allocation46_spill] sm:$0xff]  ;;  %v10318_v56 = vld [vmem:[#allocation71_spill] sm:$0xff] }
 0x361   : > { %2460 = vadd.xlane.f32.xlu0 %v2454_v12  ;;  %v2437_v8 = vadd.f32 %v10305_v54, %v2383_v14  ;;  %v7647_v13 = vsub.f32 %v2438_v6, %v10306_v39  ;;  %v2440_v22 = vadd.f32 %v10307_v17, %v2386_v48  ;;  %v2446_v2 = vmul.f32 %v10309_v29, %v10308_v5 }
 0x362   : > { %v2385_v18 = vadd.f32 %v2377_v30, %v2313_v32  ;;  %v2433_v3 = vmul.f32 %v10311_v31, %v10310_v40  ;;  %v2315_v33 = vadd.f32 %v2309_v52, %v2243_v28  ;;  %v2429_v0 = vadd.f32 %v10313_v53, %v10312_v49 }
 0x363   : > { %v7656_v46 = vsub.f32 %v2437_v8, %v2443_v35  ;;  %v2456_v11 = vmul.f32 %v7647_v13, %v10314_v60  ;;  %v7660_v23 = vsub.f32 %v2440_v22, %v2446_v2  ;;  %v2445_v15 = vmul.f32 %v10316_v25, %v10315_v7 }
 0x364   : > { %v2439_v63 = vadd.f32 %v2433_v3, %v2385_v18  ;;  %v2387_v36 = vadd.f32 %v2381_v16, %v2315_v33  ;;  %v2435_v34 = vmul.f32 %v10318_v56, %v10317_v42  ;;  %v2447_v51 = vmul.f32 %v2429_v0, %v10308_v5 }
 0x365   : > { %v2455_v44 = vmul.f32 %v7656_v46, %v10319_v21  ;;  %2464 = vadd.xlane.f32.xlu0 %v2456_v11  ;;  %v2458_v43 = vmul.f32 %v7660_v23, %v10320_v38  ;;  %v1563_v59 = vmul.f32 %v10301_v62, %v10301_v62  ;;  %v1564_v24 = vmul.f32 %v10319_v21, %v10319_v21 }
 0x366   : > { %v7668_v20 = vsub.f32 %v2439_v63, %v2445_v15  ;;  %v2441_v26 = vadd.f32 %v2435_v34, %v2387_v36  ;;  %v1565_v30 = vmul.f32 %v10314_v60, %v10314_v60  ;;  %v1566_v19 = vmul.f32 %v10311_v31, %v10311_v31 }
 0x367   : > { %2462 = vadd.xlane.f32.xlu1 %v2455_v44  ;;  %v1567_v57 = vmul.f32 %v10320_v38, %v10320_v38  ;;  %v1568_v1 = vmul.f32 %v10318_v56, %v10318_v56 }
 0x368   : > { %v2457_v45 = vmul.f32 %v7668_v20, %v10311_v31  ;;  %v7675_v47 = vsub.f32 %v2441_v26, %v2447_v51 }
 0x36a   : > { %2466 = vadd.xlane.f32.xlu0 %v2457_v45  ;;  %v2459_v58 = vmul.f32 %v7675_v47, %v10318_v56 }
 0x36b   : > { %2468 = vadd.xlane.f32.xlu1 %v2458_v43 }
 0x36e   : > { %2470 = vadd.xlane.f32.xlu0 %v2459_v58 }
 0x36f   : > { %1569 = vadd.xlane.f32.xlu1 %v1563_v59 }
 0x372   : > { %1571 = vadd.xlane.f32.xlu0 %v1564_v24 }
 0x373   : > { %1573 = vadd.xlane.f32.xlu1 %v1565_v30 }
 0x376   : > { %1575 = vadd.xlane.f32.xlu0 %v1566_v19 }
 0x377   : > { %1577 = vadd.xlane.f32.xlu1 %v1567_v57 }
 0x37a   : > { %1579 = vadd.xlane.f32.xlu0 %v1568_v1 }
 0x3ea   : > { %v2461_v55 = vpop.xlane.xlu0 %2460 }
 0x3ee   : > { %v2465_v37 = vpop.xlane.xlu0 %2464 }
 0x3f0   : > { %v2463_v50 = vpop.xlane.xlu1 %2462 }
 0x3f1   : > { %v2472_v41 = vadd.f32 %v2463_v50, %v2461_v55 }
 0x3f3   : > { %v2473_v27 = vrot.slane %v2472_v41, 4  ;;  %v2467_v52 = vpop.xlane.xlu0 %2466 }
 0x3f4   : > { %v2479_v12 = vadd.f32 %v2467_v52, %v2465_v37  ;;  %v2469_v14 = vpop.xlane.xlu1 %2468 }
 0x3f5   : > { %v2474_v4 = vadd.f32 %v2473_v27, %v2472_v41 }
 0x3f6   : > { %v2480_v6 = vrot.slane %v2479_v12, 4 }
 0x3f7   : > { %v2475_v48 = vrot.slane %v2474_v4, 2  ;;  %v2471_v9 = vpop.xlane.xlu0 %2470 }
 0x3f8   : > { %v2481_v10 = vadd.f32 %v2480_v6, %v2479_v12  ;;  %v2486_v35 = vadd.f32 %v2471_v9, %v2469_v14  ;;  %v1570_v32 = vpop.xlane.xlu1 %1569  ;;  %v3950_v6 = vld [vmem:[%s4282_s9] sm:$0xff]  ;;  %v3951_v9 = vld [vmem:[%s4282_s9 + $0x8] sm:$0xff] }
 0x3f9   : > { %v2476_v28 = vadd.f32 %v2475_v48, %v2474_v4 }
 0x3fa   : > { %v2482_v16 = vrot.slane %v2481_v10, 2  ;;  %v2487_v54 = vrot.slane %v2486_v35, 4 }
 0x3fb   : > { %v2477_v8 = vrot.slane %v2476_v28, 1  ;;  %v1572_v39 = vpop.xlane.xlu0 %1571 }
 0x3fc   : > { %v2483_v17 = vadd.f32 %v2482_v16, %v2481_v10  ;;  %v2488_v22 = vadd.f32 %v2487_v54, %v2486_v35  ;;  %v1581_v5 = vadd.f32 %v1572_v39, %v1570_v32  ;;  %v1574_v2 = vpop.xlane.xlu1 %1573  ;;  %v3952_v39 = vld [vmem:[%s4282_s9 + $0x10] sm:$0xff] }
 0x3fd   : > { %v2478_v29 = vadd.f32 %v2477_v8, %v2476_v28 }
 0x3fe   : > { %v2484_v18 = vrot.slane %v2483_v17, 1  ;;  %v2489_v40 = vrot.slane %v2488_v22, 2  ;;  %v1582_v3 = vrot.slane %v1581_v5, 4 }
 0x3ff   : > { %3936 = vrcp.f32 %v2478_v29  ;;  %v1576_v33 = vpop.xlane.xlu0 %1575 }
 0x400   : > { %v2485_v49 = vadd.f32 %v2484_v18, %v2483_v17  ;;  %v2490_v53 = vadd.f32 %v2489_v40, %v2488_v22  ;;  %v1583_v0 = vadd.f32 %v1582_v3, %v1581_v5  ;;  %v1588_v11 = vadd.f32 %v1576_v33, %v1574_v2  ;;  %v1578_v15 = vpop.xlane.xlu1 %1577  ;;  %v3953_v22 = vld [vmem:[%s4282_s9 + $0x18] sm:$0xff]  ;;  %v3954_v33 = vld [vmem:[%s4282_s9 + $0x20] sm:$0xff] }
 0x402   : > { %3938 = vrcp.f32 %v2485_v49  ;;  %v2491_v63 = vrot.slane %v2490_v53, 1  ;;  %v1584_v7 = vrot.slane %v1583_v0, 2  ;;  %v1589_v25 = vrot.slane %v1588_v11, 4 }
 0x403   : > { %v1580_v36 = vpop.xlane.xlu0 %1579 }
 0x404   : > { %v2492_v42 = vadd.f32 %v2491_v63, %v2490_v53  ;;  %v1585_v34 = vadd.f32 %v1584_v7, %v1583_v0  ;;  %v1590_v44 = vadd.f32 %v1589_v25, %v1588_v11  ;;  %v1595_v26 = vadd.f32 %v1580_v36, %v1578_v15  ;;  %v3955_v53 = vld [vmem:[%s4282_s9 + $0x28] sm:$0xff]  ;;  %s7763_s9 = smov 0  }
 0x406   : > { %3940 = vrcp.f32 %v2492_v42  ;;  %v1586_v51 = vrot.slane %v1585_v34, 1  ;;  %v1591_v43 = vrot.slane %v1590_v44, 2  ;;  %v1596_v45 = vrot.slane %v1595_v26, 4 }
 0x408   : > { %v1592_v58 = vadd.f32 %v1591_v43, %v1590_v44  ;;  %v1597_v59 = vadd.f32 %v1596_v45, %v1595_v26  ;;  %v1587_v24 = vadd.f32 %v1586_v51, %v1585_v34  }
 0x40a   : > { %v1593_v30 = vrot.slane %v1592_v58, 1  ;;  %v1598_v19 = vrot.slane %v1597_v59, 2 }
 0x40c   : > { %v3937_v57 = vpop.eup %3936  ;;  %v1599_v1 = vadd.f32 %v1598_v19, %v1597_v59  ;;  %v1594_v37 = vadd.f32 %v1593_v30, %v1592_v58  }
 0x40d   : > { %v2494_v55 = vmul.f32 %v3937_v57, %v1587_v24 }
 0x40e   : > { %v1600_v50 = vrot.slane %v1599_v1, 1 }
 0x40f   : > { %v3939_v41 = vpop.eup %3938  ;;  %v2499_v27 = vmul.f32 %v2494_v55, %v10301_v62  ;;  %v2500_v52 = vmul.f32 %v2494_v55, %v10319_v21  ;;  %v2511_v12 = vmul.f32 %v2494_v55, %v7631_v61  ;;  %v2512_v14 = vmul.f32 %v2494_v55, %v7656_v46 }
 0x410   : > { %v2496_v4 = vmul.f32 %v3939_v41, %v1594_v37  ;;  %v1601_v8 = vadd.f32 %v1600_v50, %v1599_v1  }
 0x411   : > { %v2505_v48 = vadd.f32 %v3950_v6, %v2499_v27   ;;  %v2506_v10 = vadd.f32 %v3951_v9, %v2500_v52   ;;  %v2517_v35 = vsub.f32 %v10301_v62, %v2511_v12   ;;  %v2518_v32 = vsub.f32 %v10319_v21, %v2512_v14  }
 0x412   : > { %v2501_v28 = vmul.f32 %v2496_v4, %v10314_v60  ;;  %v2502_v16 = vmul.f32 %v2496_v4, %v10311_v31  ;;  %v2513_v54 = vmul.f32 %v2496_v4, %v7647_v13  ;;  %v2514_v61 = vmul.f32 %v2496_v4, %v7668_v20 }
 0x413   : > { %v3941_v46 = vpop.eup %3940 }
 0x414   : > { %v2507_v17 = vadd.f32 %v3952_v39, %v2501_v28   ;;  %v2508_v5 = vadd.f32 %v3953_v22, %v2502_v16   ;;  %v2519_v29 = vsub.f32 %v10314_v60, %v2513_v54   ;;  %v2520_v2 = vsub.f32 %v10311_v31, %v2514_v61  }
 0x415   : > { %v2498_v18 = vmul.f32 %v3941_v46, %v1601_v8 }
 0x417   : > { %v2503_v40 = vmul.f32 %v2498_v18, %v10320_v38  ;;  %v2504_v3 = vmul.f32 %v2498_v18, %v10318_v56  ;;  %v2515_v13 = vmul.f32 %v2498_v18, %v7660_v23  ;;  %v2516_v20 = vmul.f32 %v2498_v18, %v7675_v47 }
 0x419   : > { %v2509_v49 = vadd.f32 %v3954_v33, %v2503_v40   ;;  %v2510_v0 = vadd.f32 %v3955_v53, %v2504_v3   ;;  %v2521_v11 = vsub.f32 %v10320_v38, %v2515_v13   ;;  %v2522_v63 = vsub.f32 %v10318_v56, %v2516_v20  }
 0x41a LB: >> { %10321 = vst [vmem:[#allocation96_spill] sm:$0xff] %v4140_v63  ;;  %10322 = vst [vmem:[#allocation97_spill] sm:$0xff] %v4144_v11  ;;  %v2550_v23 = vmul.f32 %v4160_v35, %v4160_v35  ;;  %v2552_v47 = vmul.f32 %v4152_v29, %v4152_v29  ;;  %v2551_v7 = vmul.f32 %v4156_v32, %v4156_v32  ;;  %3956 = vrcp.f32 %v4112_v24  ;;  %s4196_s16 = smov 127   ;;  %s4197_s17 = smov 126   ;;  %v10342_v33 = vld [vmem:[#allocation17_spill] sm:$0xff]  ;;  %s4188_s9 = sphi %s7763_s9, %s2528_s9   ;;  %v4184_v48 = vphi %v2505_v48, %v10596_v48   ;;  %v4180_v10 = vphi %v2506_v10, %v10595_v10   ;;  %v4176_v17 = vphi %v2507_v17, %v10594_v17   ;;  %v4172_v5 = vphi %v2508_v5, %v10593_v5   ;;  %v4168_v49 = vphi %v2509_v49, %v10592_v49   ;;  %v4164_v0 = vphi %v2510_v0, %v10591_v0   ;;  %v4160_v35 = vphi %v2517_v35, %v3522_v35   ;;  %v4156_v32 = vphi %v2518_v32, %v3523_v32   ;;  %v4152_v29 = vphi %v2519_v29, %v3524_v29   ;;  %v4148_v2 = vphi %v2520_v2, %v3525_v2   ;;  %v4144_v11 = vphi %v2521_v11, %v3526_v11   ;;  %v4140_v63 = vphi %v2522_v63, %v3527_v63   ;;  %v4136_v62 = vphi %v10301_v62, %v10558_v62   ;;  %v4132_v21 = vphi %v10319_v21, %v10563_v21   ;;  %v4128_v60 = vphi %v10314_v60, %v10567_v60   ;;  %v4124_v31 = vphi %v10311_v31, %v10574_v31   ;;  %v4120_v38 = vphi %v10320_v38, %v10572_v38   ;;  %v4116_v56 = vphi %v10318_v56, %v10573_v56   ;;  %v4112_v24 = vphi %v1587_v24, %v10575_v24   ;;  %v4108_v37 = vphi %v1594_v37, %v10580_v37   ;;  %v4104_v8 = vphi %v1601_v8, %v10585_v8  }
 0x41b   : >> { %10323 = vst [vmem:[#allocation98_spill] sm:$0xff] %v4148_v2  ;;  %10324 = vst [vmem:[#allocation99_spill] sm:$0xff] %v4152_v29  ;;  %v2553_v25 = vmul.f32 %v4148_v2, %v4148_v2  ;;  %v2554_v15 = vmul.f32 %v4144_v11, %v4144_v11  ;;  %v2555_v36 = vmul.f32 %v4140_v63, %v4140_v63  ;;  %3958 = vrcp.f32 %v4108_v37  ;;  %s4198_s11 = smov 1   ;;  %s4199_s18 = smov 2  }
 0x41c   : >> { %10325 = vst [vmem:[#allocation100_spill] sm:$0xff] %v4156_v32  ;;  %10326 = vst [vmem:[#allocation101_spill] sm:$0xff] %v4160_v35  ;;  %2556 = vadd.xlane.f32.xlu0 %v2550_v23  ;;  %2560 = vadd.xlane.f32.xlu1 %v2552_v47  ;;  %3960 = vrcp.f32 %v4104_v8  ;;  %v10343_v23 = vld [vmem:[#allocation23_spill] sm:$0xff]  ;;  %s2528_s9 = sadd.s32 1, %s4188_s9  }
 0x41d   : >> { %10327 = vst [vmem:[#allocation102_spill] sm:$0xff] %v4164_v0  ;;  %10328 = vst [vmem:[#allocation103_spill] sm:$0xff] %v4168_v49  ;;  %v10365_v0 = vld [vmem:[#allocation20_spill] sm:$0xff]  ;;  %p9317_p3 = scmp.ge.s32.totalorder %s2528_s9, 19  }
 0x41e   : >> { %10329 = vst [vmem:[#allocation104_spill] sm:$0xff] %v4172_v5  ;;  %10330 = vst [vmem:[#allocation105_spill] sm:$0xff] %v4176_v17 }
 0x41f   : >> { %10331 = vst [vmem:[#allocation106_spill] sm:$0xff] %v4180_v10  ;;  %10332 = vst [vmem:[#allocation107_spill] sm:$0xff] %v4184_v48 }
 0x420   : >> { %2558 = vadd.xlane.f32.xlu0 %v2551_v7  ;;  %2562 = vadd.xlane.f32.xlu1 %v2553_v25  ;;  %v10344_v7 = vld [vmem:[#allocation27_spill] sm:$0xff] }
 0x424   : >> { %2564 = vadd.xlane.f32.xlu0 %v2554_v15  ;;  %2566 = vadd.xlane.f32.xlu1 %v2555_v36  ;;  %v10345_v15 = vld [vmem:[#allocation30_spill] sm:$0xff] }
 0x427   : >> { %v3957_v24 = vpop.eup %3956 }
 0x428   : >> { %v3959_v6 = vpop.eup %3958 }
 0x429   : >> { %v3961_v46 = vpop.eup %3960 }
 0x4a5   : >> { %v2557_v42 = vpop.xlane.xlu0 %2556  ;;  %v2561_v34 = vpop.xlane.xlu1 %2560 }
 0x4a9   : >> { %v2559_v44 = vpop.xlane.xlu0 %2558  ;;  %v2563_v26 = vpop.xlane.xlu1 %2562 }
 0x4aa   : >> { %v2568_v51 = vadd.f32 %v2559_v44, %v2557_v42  ;;  %v2575_v43 = vadd.f32 %v2563_v26, %v2561_v34  ;;  %v10346_v42 = vld [vmem:[#allocation35_spill] sm:$0xff] }
 0x4ac   : >> { %v2569_v45 = vrot.slane %v2568_v51, 4  ;;  %v2576_v58 = vrot.slane %v2575_v43, 4 }
 0x4ad   : >> { %v2565_v59 = vpop.xlane.xlu0 %2564  ;;  %v2567_v30 = vpop.xlane.xlu1 %2566 }
 0x4ae   : >> { %v2570_v19 = vadd.f32 %v2569_v45, %v2568_v51  ;;  %v2577_v57 = vadd.f32 %v2576_v58, %v2575_v43  ;;  %v2582_v1 = vadd.f32 %v2567_v30, %v2565_v59 }
 0x4b0   : >> { %v2571_v55 = vrot.slane %v2570_v19, 2  ;;  %v2578_v50 = vrot.slane %v2577_v57, 2  ;;  %v2583_v41 = vrot.slane %v2582_v1, 4 }
 0x4b2   : >> { %v2572_v27 = vadd.f32 %v2571_v55, %v2570_v19  ;;  %v2579_v52 = vadd.f32 %v2578_v50, %v2577_v57  ;;  %v2584_v12 = vadd.f32 %v2583_v41, %v2582_v1 }
 0x4b4   : >> { %v2573_v37 = vrot.slane %v2572_v27, 1  ;;  %v2580_v14 = vrot.slane %v2579_v52, 1  ;;  %v2585_v4 = vrot.slane %v2584_v12, 2 }
 0x4b6   : >> { %v7833_v9 = vadd.f32 %v2573_v37, %v2572_v27   ;;  %v7835_v37 = vadd.f32 %v2580_v14, %v2579_v52   ;;  %v2586_v28 = vadd.f32 %v2585_v4, %v2584_v12 }
 0x4b8   : >> { %10333 = vst [vmem:[#allocation108_spill] sm:$0xff] %v7833_v9  ;;  %10334 = vst [vmem:[#allocation109_spill] sm:$0xff] %v7835_v37  ;;  %v2590_v16 = vmul.f32 %v3957_v24, %v7833_v9  ;;  %v2592_v54 = vmul.f32 %v3959_v6, %v7835_v37  ;;  %v2587_v61 = vrot.slane %v2586_v28, 1 }
 0x4ba   : >> { %v2595_v8 = vmul.f32 %v4136_v62, %v2590_v16  ;;  %v2596_v39 = vmul.f32 %v4132_v21, %v2590_v16  ;;  %v7839_v22 = vadd.f32 %v2587_v61, %v2586_v28   ;;  %v2597_v18 = vmul.f32 %v4128_v60, %v2592_v54 }
 0x4bb   : >> { %v2598_v13 = vmul.f32 %v4124_v31, %v2592_v54 }
 0x4bc   : >> { %10335 = vst [vmem:[#allocation110_spill] sm:$0xff] %v7839_v22  ;;  %v7842_v62 = vadd.f32 %v4160_v35, %v2595_v8   ;;  %v7845_v21 = vadd.f32 %v4156_v32, %v2596_v39   ;;  %v2594_v40 = vmul.f32 %v3961_v46, %v7839_v22  ;;  %v7856_v60 = vadd.f32 %v4152_v29, %v2597_v18   ;;  %v10358_v46 = vld [vmem:[#allocation16_spill] sm:$0xff] }
 0x4bd   : >> { %v7866_v31 = vadd.f32 %v4148_v2, %v2598_v13   ;;  %v10363_v13 = vld [vmem:[#allocation18_spill] sm:$0xff]  ;;  %v10366_v22 = vld [vmem:[#allocation24_spill] sm:$0xff] }
 0x4be   : >> { %10336 = vst [vmem:[#allocation111_spill] sm:$0xff] %v7842_v62  ;;  %10337 = vst [vmem:[#allocation112_spill] sm:$0xff] %v7845_v21  ;;  %2633 = vrot.lane.b32.xlu1 %v7845_v21, %s4196_s16  ;;  %2631 = vrot.lane.b32.xlu0 %v7842_v62, %s4196_s16  ;;  %v2599_v3 = vmul.f32 %v4120_v38, %v2594_v40  ;;  %v2600_v20 = vmul.f32 %v4116_v56, %v2594_v40 }
 0x4bf   : >> { %10338 = vst [vmem:[#allocation113_spill] sm:$0xff] %v7856_v60  ;;  %10340 = vst [vmem:[#allocation115_spill] sm:$0xff] %v7866_v31  ;;  %v7914_v53 = vmul.f32 %v7842_v62, %v10342_v33  ;;  %v7918_v47 = vmul.f32 %v7842_v62, %v10343_v23  ;;  %v7922_v25 = vmul.f32 %v7842_v62, %v10344_v7 }
 0x4c0   : >> { %v7859_v38 = vadd.f32 %v4144_v11, %v2599_v3   ;;  %v7874_v56 = vadd.f32 %v4140_v63, %v2600_v20   ;;  %v7926_v36 = vmul.f32 %v7842_v62, %v10345_v15  ;;  %v7930_v34 = vmul.f32 %v7842_v62, %v10346_v42  ;;  %v10364_v63 = vld [vmem:[#allocation19_spill] sm:$0xff] }
 0x4c1   : >> { %v7934_v44 = vmul.f32 %v7856_v60, %v10342_v33  ;;  %v7938_v26 = vmul.f32 %v7856_v60, %v10343_v23  ;;  %v7946_v45 = vmul.f32 %v7856_v60, %v10344_v7  ;;  %v7950_v58 = vmul.f32 %v7856_v60, %v10345_v15 }
 0x4c2   : >> { %10339 = vst [vmem:[#allocation114_spill] sm:$0xff] %v7859_v38  ;;  %2635 = vrot.lane.b32.xlu1 %v7856_v60, %s4196_s16  ;;  %2639 = vrot.lane.b32.xlu0 %v7859_v38, %s4196_s16  ;;  %10341 = vst [vmem:[#allocation116_spill] sm:$0xff] %v7874_v56  ;;  %v7954_v59 = vmul.f32 %v7856_v60, %v10346_v42  ;;  %v7958_v30 = vmul.f32 %v7845_v21, %v10342_v33 }
 0x4c3   : >> { %v7962_v19 = vmul.f32 %v7845_v21, %v10343_v23  ;;  %v7966_v57 = vmul.f32 %v7845_v21, %v10344_v7  ;;  %v7970_v1 = vmul.f32 %v7845_v21, %v10345_v15  ;;  %v7974_v55 = vmul.f32 %v7845_v21, %v10346_v42 }
 0x4c4   : >> { %v7978_v50 = vmul.f32 %v7859_v38, %v10342_v33  ;;  %v7982_v41 = vmul.f32 %v7859_v38, %v10343_v23  ;;  %v7986_v27 = vmul.f32 %v7859_v38, %v10344_v7  ;;  %v7990_v52 = vmul.f32 %v7859_v38, %v10345_v15 }
 0x4c5   : >> { %v7994_v12 = vmul.f32 %v7859_v38, %v10346_v42  ;;  %v7998_v24 = vmul.f32 %v7866_v31, %v10342_v33  ;;  %v8002_v14 = vmul.f32 %v7866_v31, %v10343_v23  ;;  %v8006_v4 = vmul.f32 %v7866_v31, %v10344_v7 }
 0x4c6   : >> { %2637 = vrot.lane.b32.xlu1 %v7866_v31, %s4196_s16  ;;  %2643 = vrot.lane.b32.xlu0 %v7842_v62, %s4197_s17  ;;  %v8012_v28 = vmul.f32 %v7866_v31, %v10345_v15  ;;  %v8016_v16 = vmul.f32 %v7866_v31, %v10346_v42  ;;  %v8020_v54 = vmul.f32 %v7874_v56, %v10342_v33 }
 0x4c7   : >> { %10349 = vst [vmem:[#allocation119_spill] sm:$0xff] %v7994_v12  ;;  %10350 = vst [vmem:[#allocation120_spill] sm:$0xff] %v7998_v24  ;;  %v8024_v61 = vmul.f32 %v7874_v56, %v10343_v23  ;;  %v8034_v18 = vmul.f32 %v7874_v56, %v10344_v7  ;;  %v8038_v40 = vmul.f32 %v7874_v56, %v10345_v15 }
 0x4c8   : >> { %10351 = vst [vmem:[#allocation121_spill] sm:$0xff] %v8002_v14  ;;  %10352 = vst [vmem:[#allocation122_spill] sm:$0xff] %v8006_v4  ;;  %v8042_v3 = vmul.f32 %v7874_v56, %v10346_v42 }
 0x4c9   : >> { %10354 = vst [vmem:[#allocation124_spill] sm:$0xff] %v8012_v28  ;;  %10355 = vst [vmem:[#allocation125_spill] sm:$0xff] %v8016_v16 }
 0x4ca   : >> { %2641 = vrot.lane.b32.xlu1 %v7874_v56, %s4196_s16  ;;  %2647 = vrot.lane.b32.xlu0 %v7856_v60, %s4197_s17  ;;  %10356 = vst [vmem:[#allocation126_spill] sm:$0xff] %v8020_v54  ;;  %10357 = vst [vmem:[#allocation127_spill] sm:$0xff] %v8024_v61 }
 0x4cb   : >> { %10360 = vst [vmem:[#allocation129_spill] sm:$0xff] %v8034_v18  ;;  %10361 = vst [vmem:[#allocation130_spill] sm:$0xff] %v8038_v40  ;;  %v10372_v18 = vld [vmem:[#allocation37_spill] sm:$0xff] }
 0x4cc   : >> { %10362 = vst [vmem:[#allocation131_spill] sm:$0xff] %v8042_v3  ;;  %v10371_v3 = vld [vmem:[#allocation33_spill] sm:$0xff] }
 0x4ce   : >> { %2645 = vrot.lane.b32.xlu1 %v7845_v21, %s4197_s17  ;;  %2651 = vrot.lane.b32.xlu0 %v7859_v38, %s4197_s17 }
 0x4d2   : >> { %2649 = vrot.lane.b32.xlu1 %v7866_v31, %s4197_s17  ;;  %2619 = vrot.lane.b32.xlu0 %v7842_v62, %s4198_s11 }
 0x4d6   : >> { %2653 = vrot.lane.b32.xlu1 %v7874_v56, %s4197_s17  ;;  %2623 = vrot.lane.b32.xlu0 %v7856_v60, %s4198_s11 }
 0x4da   : >> { %2621 = vrot.lane.b32.xlu1 %v7845_v21, %s4198_s11  ;;  %2627 = vrot.lane.b32.xlu0 %v7859_v38, %s4198_s11 }
 0x4de   : >> { %2625 = vrot.lane.b32.xlu1 %v7866_v31, %s4198_s11  ;;  %2607 = vrot.lane.b32.xlu0 %v7842_v62, %s4199_s18 }
 0x4e2   : >> { %2629 = vrot.lane.b32.xlu1 %v7874_v56, %s4198_s11  ;;  %2611 = vrot.lane.b32.xlu0 %v7856_v60, %s4199_s18  ;;  %v10370_v60 = vld [vmem:[#allocation29_spill] sm:$0xff] }
 0x4e6   : >> { %2609 = vrot.lane.b32.xlu1 %v7845_v21, %s4199_s18  ;;  %2615 = vrot.lane.b32.xlu0 %v7859_v38, %s4199_s18  ;;  %v10369_v38 = vld [vmem:[#allocation26_spill] sm:$0xff] }
 0x4ea   : >> { %2613 = vrot.lane.b32.xlu1 %v7866_v31, %s4199_s18 }
 0x4ee   : >> { %2617 = vrot.lane.b32.xlu1 %v7874_v56, %s4199_s18 }
 0x530   : >> { %v7940_v51 = vpop.permute.xlu1 %2633  ;;  %v7942_v43 = vpop.permute.xlu0 %2631 }
 0x531   : >> { %10347 = vst [vmem:[#allocation117_spill] sm:$0xff] %v7940_v51  ;;  %10348 = vst [vmem:[#allocation118_spill] sm:$0xff] %v7942_v43  ;;  %v8028_v8 = vmul.f32 %v7940_v51, %v10358_v46  ;;  %v8046_v20 = vmul.f32 %v7940_v51, %v10363_v13  ;;  %v8050_v11 = vmul.f32 %v7940_v51, %v10364_v63 }
 0x532   : >> { %v8054_v49 = vmul.f32 %v7940_v51, %v10365_v0  ;;  %v8058_v2 = vmul.f32 %v7940_v51, %v10366_v22  ;;  %v2661_v29 = vmul.f32 %v7942_v43, %v10358_v46  ;;  %v2727_v5 = vmul.f32 %v7942_v43, %v10363_v13 }
 0x533   : >> { %v2799_v17 = vmul.f32 %v7942_v43, %v10364_v63  ;;  %v2859_v37 = vmul.f32 %v7942_v43, %v10365_v0  ;;  %v2931_v32 = vmul.f32 %v7942_v43, %v10366_v22  ;;  %v10368_v43 = vld [vmem:[#allocation25_spill] sm:$0xff] }
 0x534   : >> { %v8008_v6 = vpop.permute.xlu1 %2635  ;;  %v8030_v39 = vpop.permute.xlu0 %2639 }
 0x535   : >> { %10353 = vst [vmem:[#allocation123_spill] sm:$0xff] %v8008_v6  ;;  %10359 = vst [vmem:[#allocation128_spill] sm:$0xff] %v8030_v39  ;;  %v2663_v35 = vmul.f32 %v8008_v6, %v10358_v46  ;;  %v2729_v10 = vmul.f32 %v8008_v6, %v10363_v13  ;;  %v2801_v48 = vmul.f32 %v8008_v6, %v10364_v63 }
 0x536   : >> { %v2861_v42 = vmul.f32 %v8008_v6, %v10365_v0  ;;  %v2933_v15 = vmul.f32 %v8008_v6, %v10366_v22  ;;  %v8084_v7 = vmul.f32 %v8030_v39, %v10358_v46  ;;  %v8088_v23 = vmul.f32 %v8030_v39, %v10363_v13 }
 0x537   : >> { %v8092_v51 = vmul.f32 %v8030_v39, %v10364_v63  ;;  %v8099_v6 = vmul.f32 %v8030_v39, %v10365_v0  ;;  %v8103_v62 = vmul.f32 %v8030_v39, %v10366_v22 }
 0x538   : >> { %v8076_v9 = vpop.permute.xlu1 %2637  ;;  %v2644_v33 = vpop.permute.xlu0 %2643 }
 0x539   : >> { %10367 = vst [vmem:[#allocation132_spill] sm:$0xff] %v8076_v9  ;;  %v2655_v56 = vmul.f32 %v2644_v33, %v10368_v43  ;;  %v2721_v31 = vmul.f32 %v2644_v33, %v10369_v38  ;;  %v2793_v21 = vmul.f32 %v2644_v33, %v10370_v60  ;;  %v2853_v40 = vmul.f32 %v2644_v33, %v10371_v3 }
 0x53a   : >> { %v2925_v61 = vmul.f32 %v2644_v33, %v10372_v18  ;;  %v2664_v54 = vmul.f32 %v8076_v9, %v10358_v46  ;;  %v8113_v24 = vmul.f32 %v8076_v9, %v10363_v13  ;;  %v8117_v39 = vmul.f32 %v8076_v9, %v10364_v63 }
 0x53b   : >> { %v2667_v16 = vadd.f32 %v2661_v29, %v2655_v56  ;;  %v2733_v28 = vadd.f32 %v2727_v5, %v2721_v31  ;;  %v2805_v4 = vadd.f32 %v2799_v17, %v2793_v21  ;;  %v8121_v12 = vmul.f32 %v8076_v9, %v10365_v0 }
 0x53c   : >> { %v8109_v14 = vpop.permute.xlu1 %2641  ;;  %v8125_v33 = vmul.f32 %v8076_v9, %v10366_v22  ;;  %v2648_v31 = vpop.permute.xlu0 %2647  ;;  %v2865_v56 = vadd.f32 %v2859_v37, %v2853_v40  ;;  %v2937_v21 = vadd.f32 %v2931_v32, %v2925_v61 }
 0x53d   : >> { %10373 = vst [vmem:[#allocation133_spill] sm:$0xff] %v8109_v14  ;;  %10374 = vst [vmem:[#allocation134_spill] sm:$0xff] %v8121_v12  ;;  %v8129_v17 = vmul.f32 %v8109_v14, %v10358_v46  ;;  %v8133_v5 = vmul.f32 %v8109_v14, %v10363_v13  ;;  %v8136_v29 = vadd.f32 %v7914_v53, %v2667_v16 }
 0x53e   : >> { %v8139_v12 = vadd.f32 %v7918_v47, %v2733_v28  ;;  %v8142_v9 = vadd.f32 %v7922_v25, %v2805_v4  ;;  %v8146_v32 = vmul.f32 %v8109_v14, %v10364_v63  ;;  %v2657_v37 = vmul.f32 %v2648_v31, %v10368_v43 }
 0x53f   : >> { %10375 = vst [vmem:[#allocation135_spill] sm:$0xff] %v8129_v17  ;;  %10376 = vst [vmem:[#allocation136_spill] sm:$0xff] %v8133_v5  ;;  %v2723_v61 = vmul.f32 %v2648_v31, %v10369_v38  ;;  %v2795_v40 = vmul.f32 %v2648_v31, %v10370_v60  ;;  %v2855_v13 = vmul.f32 %v2648_v31, %v10371_v3 }
 0x540   : >> { %10377 = vst [vmem:[#allocation137_spill] sm:$0xff] %v8136_v29  ;;  %10378 = vst [vmem:[#allocation138_spill] sm:$0xff] %v8139_v12  ;;  %v2646_v53 = vpop.permute.xlu1 %2645  ;;  %v2927_v16 = vmul.f32 %v2648_v31, %v10372_v18  ;;  %v2652_v28 = vpop.permute.xlu0 %2651  ;;  %v2669_v63 = vadd.f32 %v2663_v35, %v2657_v37  ;;  %v8157_v29 = vadd.f32 %v7926_v36, %v2865_v56 }
 0x541   : >> { %10379 = vst [vmem:[#allocation139_spill] sm:$0xff] %v8142_v9  ;;  %10380 = vst [vmem:[#allocation140_spill] sm:$0xff] %v8146_v32  ;;  %v2656_v47 = vmul.f32 %v2646_v53, %v10368_v43  ;;  %v2722_v25 = vmul.f32 %v2646_v53, %v10369_v38  ;;  %v2794_v4 = vmul.f32 %v2646_v53, %v10370_v60 }
 0x542   : >> { %v2735_v46 = vadd.f32 %v2729_v10, %v2723_v61  ;;  %v2807_v9 = vadd.f32 %v2801_v48, %v2795_v40  ;;  %v2867_v12 = vadd.f32 %v2861_v42, %v2855_v13  ;;  %v8160_v32 = vadd.f32 %v7930_v34, %v2937_v21 }
 0x543   : >> { %v8164_v31 = vmul.f32 %v8109_v14, %v10365_v0  ;;  %v8168_v5 = vmul.f32 %v8109_v14, %v10366_v22  ;;  %v2939_v17 = vadd.f32 %v2933_v15, %v2927_v16  ;;  %v2668_v35 = vadd.f32 %v8028_v8, %v2656_v47 }
 0x544   : >> { %v2734_v48 = vadd.f32 %v8046_v20, %v2722_v25  ;;  %v2806_v10 = vadd.f32 %v8050_v11, %v2794_v4  ;;  %v2650_v36 = vpop.permute.xlu1 %2649  ;;  %v8174_v42 = vadd.f32 %v7934_v44, %v2669_v63  ;;  %v8177_v34 = vadd.f32 %v7938_v26, %v2735_v46  ;;  %v8185_v15 = vpop.permute.xlu0 %2619 }
 0x545   : >> { %v8180_v13 = vadd.f32 %v7946_v45, %v2807_v9  ;;  %v8183_v56 = vadd.f32 %v7950_v58, %v2867_v12  ;;  %10381 = vst [vmem:[#allocation141_spill] sm:$0xff] %v8185_v15  ;;  %v2854_v8 = vmul.f32 %v2646_v53, %v10371_v3  ;;  %v2926_v20 = vmul.f32 %v2646_v53, %v10372_v18 }
 0x546   : >> { %v2659_v11 = vmul.f32 %v2652_v28, %v10368_v43  ;;  %v2725_v63 = vmul.f32 %v2652_v28, %v10369_v38  ;;  %v2797_v44 = vmul.f32 %v2652_v28, %v10370_v60  ;;  %v2857_v26 = vmul.f32 %v2652_v28, %v10371_v3 }
 0x547   : >> { %v2929_v9 = vmul.f32 %v2652_v28, %v10372_v18  ;;  %v2658_v45 = vmul.f32 %v2650_v36, %v10368_v43  ;;  %v2866_v58 = vadd.f32 %v8054_v49, %v2854_v8  ;;  %v2938_v12 = vadd.f32 %v8058_v2, %v2926_v20 }
 0x548   : >> { %v2671_v46 = vadd.f32 %v8084_v7, %v2659_v11  ;;  %v2737_v21 = vadd.f32 %v8088_v23, %v2725_v63  ;;  %v2654_v37 = vpop.permute.xlu1 %2653  ;;  %v2809_v61 = vadd.f32 %v8092_v51, %v2797_v44  ;;  %v2869_v40 = vadd.f32 %v8099_v6, %v2857_v26  ;;  %v10389_v63 = vld [vmem:[#allocation55_spill] sm:$0xff]  ;;  %v10390_v44 = vld [vmem:[#allocation56_spill] sm:$0xff]  ;;  %v10391_v26 = vld [vmem:[#allocation57_spill] sm:$0xff] }
 0x549   : >> { %v2941_v53 = vadd.f32 %v8103_v62, %v2929_v9  ;;  %v2670_v16 = vadd.f32 %v2664_v54, %v2658_v45  ;;  %v8203_v47 = vadd.f32 %v7954_v59, %v2939_v17  ;;  %v8206_v25 = vadd.f32 %v7958_v30, %v2668_v35  ;;  %v8226_v59 = vpop.permute.xlu0 %2623  ;;  %v10386_v35 = vld [vmem:[#allocation134_spill] sm:$0xff] }
 0x54a   : >> { %v8209_v2 = vadd.f32 %v7962_v19, %v2734_v48  ;;  %v8212_v49 = vadd.f32 %v7966_v57, %v2806_v10  ;;  %v8215_v23 = vadd.f32 %v7970_v1, %v2866_v58  ;;  %v8218_v7 = vadd.f32 %v7974_v55, %v2938_v12  ;;  %10382 = vst [vmem:[#allocation142_spill] sm:$0xff] %v8226_v59  ;;  %v10387_v10 = vld [vmem:[#allocation53_spill] sm:$0xff]  ;;  %v10392_v45 = vld [vmem:[#allocation58_spill] sm:$0xff]  ;;  %v10393_v12 = vld [vmem:[#allocation135_spill] sm:$0xff] }
 0x54b   : >> { %v8221_v62 = vadd.f32 %v7978_v50, %v2671_v46  ;;  %v8224_v51 = vadd.f32 %v7982_v41, %v2737_v21  ;;  %v2724_v30 = vmul.f32 %v2650_v36, %v10369_v38  ;;  %v2796_v19 = vmul.f32 %v2650_v36, %v10370_v60  ;;  %v10383_v50 = vld [vmem:[#allocation119_spill] sm:$0xff]  ;;  %v10384_v41 = vld [vmem:[#allocation120_spill] sm:$0xff] }
 0x54c   : >> { %v2856_v57 = vmul.f32 %v2650_v36, %v10371_v3  ;;  %v2928_v1 = vmul.f32 %v2650_v36, %v10372_v18  ;;  %v8233_v6 = vadd.f32 %v7986_v27, %v2809_v61  ;;  %v8236_v55 = vadd.f32 %v7990_v52, %v2869_v40  ;;  %v8249_v27 = vpop.permute.xlu1 %2621  ;;  %v10394_v46 = vld [vmem:[#allocation136_spill] sm:$0xff] }
 0x54d   : >> { %v8239_v54 = vadd.f32 %v10383_v50, %v2941_v53  ;;  %v8242_v17 = vadd.f32 %v10384_v41, %v2670_v16  ;;  %v2736_v4 = vadd.f32 %v8113_v24, %v2724_v30  ;;  %v2808_v28 = vadd.f32 %v8117_v39, %v2796_v19  ;;  %10388 = vst [vmem:[#allocation120_spill] sm:$0xff] %v8249_v27  ;;  %v10395_v61 = vld [vmem:[#allocation140_spill] sm:$0xff]  ;;  %v8267_v16 = vpop.permute.xlu0 %2627  ;;  %v10397_v30 = vld [vmem:[#allocation121_spill] sm:$0xff] }
 0x54e   : >> { %v2868_v48 = vadd.f32 %v10386_v35, %v2856_v57  ;;  %v2685_v36 = vmul.f32 %v8185_v15, %v10387_v10  ;;  %v2940_v52 = vadd.f32 %v8125_v33, %v2928_v1  ;;  %v2660_v8 = vmul.f32 %v2654_v37, %v10368_v43  ;;  %10396 = vst [vmem:[#allocation134_spill] sm:$0xff] %v8267_v16  ;;  %v10399_v57 = vld [vmem:[#allocation122_spill] sm:$0xff]  ;;  %v10401_v50 = vld [vmem:[#allocation124_spill] sm:$0xff]  ;;  %v10419_v43 = vld [vmem:[#allocation137_spill] sm:$0xff] }
 0x54f   : >> { %10385 = vst [vmem:[#allocation119_spill] sm:$0xff] %v8242_v17  ;;  %v2726_v20 = vmul.f32 %v2654_v37, %v10369_v38  ;;  %v2798_v11 = vmul.f32 %v2654_v37, %v10370_v60  ;;  %v2751_v24 = vmul.f32 %v8185_v15, %v10389_v63  ;;  %v2823_v39 = vmul.f32 %v8185_v15, %v10390_v44 }
 0x550   : >> { %v2883_v9 = vmul.f32 %v8185_v15, %v10391_v26  ;;  %v2955_v58 = vmul.f32 %v8185_v15, %v10392_v45  ;;  %v2672_v33 = vadd.f32 %v10393_v12, %v2660_v8  ;;  %v2858_v53 = vmul.f32 %v2654_v37, %v10371_v3  ;;  %v10403_v8 = vld [vmem:[#allocation125_spill] sm:$0xff] }
 0x551   : >> { %v2738_v21 = vadd.f32 %v10394_v46, %v2726_v20  ;;  %v2810_v40 = vadd.f32 %v10395_v61, %v2798_v11  ;;  %v8270_v19 = vadd.f32 %v10397_v30, %v2736_v4  ;;  %v8273_v1 = vadd.f32 %v10399_v57, %v2808_v28  ;;  %v10405_v46 = vld [vmem:[#allocation126_spill] sm:$0xff]  ;;  %v10407_v28 = vld [vmem:[#allocation127_spill] sm:$0xff]  ;;  %v2608_v22 = vpop.permute.xlu0 %2607 }
 0x552   : >> { %v8276_v41 = vadd.f32 %v10401_v50, %v2868_v48  ;;  %v2930_v35 = vmul.f32 %v2654_v37, %v10372_v18  ;;  %v8280_v12 = vadd.f32 %v10403_v8, %v2940_v52  ;;  %v2870_v20 = vadd.f32 %v8164_v31, %v2858_v53  ;;  %v8296_v52 = vpop.permute.xlu1 %2625  ;;  %v10409_v31 = vld [vmem:[#allocation129_spill] sm:$0xff]  ;;  %v10411_v50 = vld [vmem:[#allocation130_spill] sm:$0xff] }
 0x553   : >> { %10398 = vst [vmem:[#allocation135_spill] sm:$0xff] %v8270_v19  ;;  %10400 = vst [vmem:[#allocation136_spill] sm:$0xff] %v8273_v1  ;;  %v2687_v11 = vmul.f32 %v8226_v59, %v10387_v10  ;;  %v2753_v4 = vmul.f32 %v8226_v59, %v10389_v63  ;;  %v8288_v61 = vadd.f32 %v10405_v46, %v2672_v33  ;;  %v10413_v46 = vld [vmem:[#allocation131_spill] sm:$0xff] }
 0x554   : >> { %10402 = vst [vmem:[#allocation140_spill] sm:$0xff] %v8276_v41  ;;  %10404 = vst [vmem:[#allocation121_spill] sm:$0xff] %v8280_v12  ;;  %v8291_v30 = vadd.f32 %v10407_v28, %v2738_v21  ;;  %v2942_v48 = vadd.f32 %v8168_v5, %v2930_v35  ;;  %v2825_v37 = vmul.f32 %v8226_v59, %v10390_v44 }
 0x555   : >> { %10406 = vst [vmem:[#allocation122_spill] sm:$0xff] %v8288_v61  ;;  %v8299_v53 = vadd.f32 %v10409_v31, %v2810_v40  ;;  %v2885_v57 = vmul.f32 %v8226_v59, %v10391_v26  ;;  %v2957_v33 = vmul.f32 %v8226_v59, %v10392_v45  ;;  %v2686_v21 = vmul.f32 %v8249_v27, %v10387_v10 }
 0x556   : >> { %10408 = vst [vmem:[#allocation124_spill] sm:$0xff] %v8291_v30  ;;  %v8308_v8 = vadd.f32 %v10411_v50, %v2870_v20  ;;  %v2752_v5 = vmul.f32 %v8249_v27, %v10389_v63  ;;  %v2824_v35 = vmul.f32 %v8249_v27, %v10390_v44  ;;  %v8316_v40 = vmul.f32 %v8249_v27, %v10391_v26  ;;  %v8364_v61 = vpop.permute.xlu1 %2629 }
 0x557   : >> { %10410 = vst [vmem:[#allocation125_spill] sm:$0xff] %v8299_v53  ;;  %v8319_v28 = vadd.f32 %v10413_v46, %v2942_v48  ;;  %v2956_v31 = vmul.f32 %v8249_v27, %v10392_v45  ;;  %v8325_v20 = vmul.f32 %v8267_v16, %v10387_v10  ;;  %v8329_v50 = vmul.f32 %v8267_v16, %v10389_v63  ;;  %v10421_v27 = vld [vmem:[#allocation59_spill] sm:$0xff]  ;;  %v10423_v53 = vld [vmem:[#allocation61_spill] sm:$0xff] }
 0x558   : >> { %10412 = vst [vmem:[#allocation126_spill] sm:$0xff] %v8308_v8  ;;  %v8333_v0 = vmul.f32 %v8267_v16, %v10390_v44  ;;  %v8337_v48 = vmul.f32 %v8267_v16, %v10391_v26  ;;  %v8341_v46 = vmul.f32 %v8267_v16, %v10392_v45  ;;  %v8345_v18 = vmul.f32 %v8296_v52, %v10387_v10  ;;  %v10420_v16 = vld [vmem:[#allocation138_spill] sm:$0xff] }
 0x559   : >> { %10414 = vst [vmem:[#allocation127_spill] sm:$0xff] %v8319_v28  ;;  %v8349_v3 = vmul.f32 %v8296_v52, %v10389_v63  ;;  %v8353_v60 = vmul.f32 %v8296_v52, %v10390_v44  ;;  %v8357_v38 = vmul.f32 %v8296_v52, %v10391_v26  ;;  %v2691_v14 = vadd.f32 %v2685_v36, %v10419_v43  ;;  %v10422_v28 = vld [vmem:[#allocation60_spill] sm:$0xff]  ;;  %v10426_v36 = vld [vmem:[#allocation139_spill] sm:$0xff] }
 0x55a   : >> { %10415 = vst [vmem:[#allocation129_spill] sm:$0xff] %v8345_v18  ;;  %v2757_v59 = vadd.f32 %v2751_v24, %v10420_v16  ;;  %v2697_v15 = vmul.f32 %v2608_v22, %v10421_v27  ;;  %v2763_v8 = vmul.f32 %v2608_v22, %v10422_v28  ;;  %v2835_v30 = vmul.f32 %v2608_v22, %v10423_v53 }
 0x55b   : >> { %10416 = vst [vmem:[#allocation130_spill] sm:$0xff] %v8349_v3  ;;  %10417 = vst [vmem:[#allocation131_spill] sm:$0xff] %v8353_v60  ;;  %v2889_v12 = vadd.f32 %v2883_v9, %v8157_v29  ;;  %v2961_v41 = vadd.f32 %v2955_v58, %v8160_v32  ;;  %v10424_v60 = vld [vmem:[#allocation62_spill] sm:$0xff]  ;;  %v10425_v3 = vld [vmem:[#allocation63_spill] sm:$0xff]  ;;  %v8372_v43 = vmul.f32 %v8296_v52, %v10392_v45 }
 0x55c   : >> { %10418 = vst [vmem:[#allocation143_spill] sm:$0xff] %v8357_v38  ;;  %v2895_v1 = vmul.f32 %v2608_v22, %v10424_v60  ;;  %v2967_v38 = vmul.f32 %v2608_v22, %v10425_v3  ;;  %v2829_v24 = vadd.f32 %v2823_v39, %v10426_v36  ;;  %v2703_v16 = vadd.f32 %v2697_v15, %v2691_v14  ;;  %v2612_v22 = vpop.permute.xlu0 %2611 }
 0x55d   : >> { %v2769_v19 = vadd.f32 %v2763_v8, %v2757_v59  ;;  %v8381_v29 = vmul.f32 %v8364_v61, %v10387_v10  ;;  %v8385_v32 = vmul.f32 %v8364_v61, %v10389_v63  ;;  %v8391_v39 = vmul.f32 %v8364_v61, %v10390_v44 }
 0x55e   : >> { %v8375_v18 = vadd.f32 %v2895_v1, %v2889_v12  ;;  %v8377_v17 = vadd.f32 %v2967_v38, %v2961_v41  ;;  %v8387_v9 = vadd.f32 %v2835_v30, %v2829_v24  ;;  %v8395_v14 = vmul.f32 %v8364_v61, %v10391_v26 }
 0x55f   : >> { %v8399_v38 = vmul.f32 %v8364_v61, %v10392_v45  ;;  %v2709_v15 = vrot.slane %v2703_v16, 2  ;;  %v2775_v59 = vrot.slane %v2769_v19, 1  ;;  %v2693_v58 = vadd.f32 %v2687_v11, %v8174_v42  ;;  %v2610_v16 = vpop.permute.xlu1 %2609 }
 0x560   : >> { %v2759_v1 = vadd.f32 %v2753_v4, %v8177_v34  ;;  %v2907_v41 = vrot.slane %v8375_v18, 7  ;;  %v2699_v12 = vmul.f32 %v2612_v22, %v10421_v27  ;;  %v2765_v30 = vmul.f32 %v2612_v22, %v10422_v28 }
 0x561   : >> { %v2837_v8 = vmul.f32 %v2612_v22, %v10423_v53  ;;  %v2831_v24 = vadd.f32 %v2825_v37, %v8180_v13  ;;  %v2897_v45 = vmul.f32 %v2612_v22, %v10424_v60  ;;  %v2969_v19 = vmul.f32 %v2612_v22, %v10425_v3 }
 0x562   : >> { %v2891_v42 = vadd.f32 %v2885_v57, %v8183_v56  ;;  %v2963_v34 = vadd.f32 %v2957_v33, %v8203_v47  ;;  %v8413_v18 = vadd.f32 %v2699_v12, %v2693_v58  ;;  %v8415_v11 = vadd.f32 %v2765_v30, %v2759_v1  ;;  %v2616_v57 = vpop.permute.xlu0 %2615 }
 0x563   : >> { %v8417_v4 = vadd.f32 %v2837_v8, %v2831_v24  ;;  %v2692_v26 = vadd.f32 %v2686_v21, %v8206_v25  ;;  %v2758_v36 = vadd.f32 %v2752_v5, %v8209_v2  ;;  %v2830_v13 = vadd.f32 %v2824_v35, %v8212_v49 }
 0x564   : >> { %v8422_v37 = vadd.f32 %v2897_v45, %v2891_v42  ;;  %v8424_v22 = vadd.f32 %v2969_v19, %v2963_v34  ;;  %v2698_v56 = vmul.f32 %v2610_v16, %v10421_v27  ;;  %v2764_v47 = vmul.f32 %v2610_v16, %v10422_v28 }
 0x565   : >> { %v2713_v33 = vrot.slane %v8413_v18, 2  ;;  %v2890_v58 = vadd.f32 %v8316_v40, %v8215_v23  ;;  %v2962_v25 = vadd.f32 %v2956_v31, %v8218_v7  ;;  %v2896_v2 = vmul.f32 %v2610_v16, %v10424_v60 }
 0x566   : >> { %v2779_v49 = vrot.slane %v8415_v11, 1  ;;  %v2704_v45 = vadd.f32 %v2698_v56, %v2692_v26  ;;  %v2770_v21 = vadd.f32 %v2764_v47, %v2758_v36  ;;  %v2968_v5 = vmul.f32 %v2610_v16, %v10425_v3 }
 0x567   : >> { %v2836_v35 = vmul.f32 %v2610_v16, %v10423_v53  ;;  %v2902_v1 = vadd.f32 %v2896_v2, %v2890_v58  ;;  %v2695_v12 = vadd.f32 %v8325_v20, %v8221_v62  ;;  %v2701_v30 = vmul.f32 %v2616_v57, %v10421_v27 }
 0x568   : >> { %v2710_v8 = vrot.slane %v2704_v45, 2  ;;  %v2776_v23 = vrot.slane %v2770_v21, 1  ;;  %v2974_v40 = vadd.f32 %v2968_v5, %v2962_v25  ;;  %v2767_v7 = vmul.f32 %v2616_v57, %v10422_v28 }
 0x569   : >> { %v2908_v31 = vrot.slane %v2902_v1, 7  ;;  %v8440_v24 = vadd.f32 %v2701_v30, %v2695_v12  ;;  %v2761_v26 = vadd.f32 %v8329_v50, %v8224_v51  ;;  %v2839_v36 = vmul.f32 %v2616_v57, %v10423_v53 }
 0x56a   : >> { %v2711_v16 = vsel %vm688_vm0, %v2709_v15, %v2710_v8  ;;  %v2712_v62 = vsel %vm688_vm0, %v2710_v8, %v2709_v15  ;;  %v2777_v20 = vsel %vm610_vm1, %v2775_v59, %v2776_v23  ;;  %v2778_v42 = vsel %vm610_vm1, %v2776_v23, %v2775_v59  ;;  %v2614_v15 = vpop.permute.xlu1 %2613 }
 0x56b   : >> { %v2911_v34 = vrot.slane %v8422_v37, 7  ;;  %v2787_v56 = vadd.f32 %v2777_v20, %v2711_v16  ;;  %v2788_v47 = vadd.f32 %v2778_v42, %v2712_v62  ;;  %v2842_v58 = vadd.f32 %v2836_v35, %v2830_v13  ;;  %v10432_v16 = vld [vmem:[#allocation135_spill] sm:$0xff]  ;;  %v10433_v62 = vld [vmem:[#allocation130_spill] sm:$0xff]  ;;  %v10434_v20 = vld [vmem:[#allocation136_spill] sm:$0xff] }
 0x56c   : >> { %v2983_v51 = vrot.slane %v8424_v22, 6  ;;  %v2980_v50 = vrot.slane %v2974_v40, 6  ;;  %v8455_v25 = vadd.f32 %v2767_v7, %v2761_v26  ;;  %v2833_v2 = vadd.f32 %v8333_v0, %v8233_v6  ;;  %v10431_v26 = vld [vmem:[#allocation129_spill] sm:$0xff] }
 0x56d   : >> { %v2847_v45 = vadd.f32 %v8387_v9, %v2787_v56  ;;  %v2848_v21 = vadd.f32 %v2842_v58, %v2788_v47  ;;  %v2909_v59 = vsel %vm467_vm2, %v2907_v41, %v2908_v31  ;;  %v2899_v5 = vmul.f32 %v2616_v57, %v10424_v60  ;;  %v10436_v56 = vld [vmem:[#allocation140_spill] sm:$0xff]  ;;  %v10437_v47 = vld [vmem:[#allocation143_spill] sm:$0xff] }
 0x56e   : >> { %v2910_v13 = vsel %vm467_vm2, %v2908_v31, %v2907_v41  ;;  %v2717_v35 = vrot.slane %v8440_v24, 2  ;;  %v8466_v1 = vadd.f32 %v2839_v36, %v2833_v2  ;;  %v2893_v12 = vadd.f32 %v8337_v48, %v8236_v55  ;;  %v10430_v24 = vld [vmem:[#allocation119_spill] sm:$0xff] }
 0x56f   : >> { %v2919_v0 = vadd.f32 %v2910_v13, %v2847_v45  ;;  %v2920_v6 = vadd.f32 %v2909_v59, %v2848_v21  ;;  %v10428_v9 = vrot.slane %v8377_v17, 6  ;;  %v2971_v8 = vmul.f32 %v2616_v57, %v10425_v3  ;;  %v10435_v17 = vld [vmem:[#allocation131_spill] sm:$0xff]  ;;  %v2618_v45 = vpop.permute.xlu1 %2617  ;;  %v10439_v21 = vld [vmem:[#allocation8_spill] sm:$0xff] }
 0x570   : >> { %v2783_v40 = vrot.slane %v8455_v25, 1  ;;  %v8480_v7 = vadd.f32 %v2899_v5, %v2893_v12  ;;  %v2965_v55 = vadd.f32 %v8341_v46, %v8239_v54  ;;  %v2694_v36 = vadd.f32 %v10431_v26, %v10430_v24  ;;  %v10438_v54 = vld [vmem:[#allocation9_spill] sm:$0xff]  ;;  %v10441_v24 = vld [vmem:[#allocation122_spill] sm:$0xff] }
 0x571   : >> { %v2981_v30 = vsel %vm395_vm3, %v10428_v9, %v2980_v50  ;;  %v10429_v23 = vmov %v10428_v9  ;;  %v2760_v57 = vadd.f32 %v10433_v62, %v10432_v16  ;;  %v2832_v42 = vadd.f32 %v10435_v17, %v10434_v20  ;;  %v10440_v12 = vld [vmem:[#allocation121_spill] sm:$0xff] }
 0x572   : >> { %v2982_v41 = vsel %vm395_vm3, %v2980_v50, %v10429_v23  ;;  %v2992_v31 = vadd.f32 %v2981_v30, %v2920_v6  ;;  %v2892_v58 = vadd.f32 %v10437_v47, %v10436_v56  ;;  %v2700_v50 = vmul.f32 %v2614_v15, %v10421_v27 }
 0x573   : >> { %v2991_v48 = vadd.f32 %v2982_v41, %v2919_v0  ;;  %v2766_v2 = vmul.f32 %v2614_v15, %v10422_v28  ;;  %v8500_v5 = vadd.f32 %v2971_v8, %v2965_v55  ;;  %v2898_v13 = vmul.f32 %v2614_v15, %v10424_v60 }
 0x574   : >> { %v8498_v59 = vmul.f32 %v2992_v31, %v10439_v21  ;;  %v2964_v0 = vadd.f32 %v8372_v43, %v10440_v12  ;;  %v2706_v6 = vadd.f32 %v2700_v50, %v2694_v36  ;;  %v2970_v30 = vmul.f32 %v2614_v15, %v10425_v3  ;;  %v10443_v50 = vld [vmem:[#allocation125_spill] sm:$0xff] }
 0x575   : >> { %v8495_v46 = vmul.f32 %v2991_v48, %v10438_v54  ;;  %v2772_v9 = vadd.f32 %v2766_v2, %v2760_v57  ;;  %v2838_v23 = vmul.f32 %v2614_v15, %v10423_v53  ;;  %v2904_v41 = vadd.f32 %v2898_v13, %v2892_v58  ;;  %v10442_v15 = vld [vmem:[#allocation124_spill] sm:$0xff] }
 0x576   : >> { %v2696_v48 = vadd.f32 %v8381_v29, %v10441_v24  ;;  %v2702_v31 = vmul.f32 %v2618_v45, %v10421_v27  ;;  %3005 = vrot.lane.b32.xlu1 %v8498_v59, %s4199_s18  ;;  %v2714_v8 = vrot.slane %v2706_v6, 2  ;;  %v2976_v26 = vadd.f32 %v2970_v30, %v2964_v0  ;;  %v10444_v6 = vld [vmem:[#allocation126_spill] sm:$0xff] }
 0x577   : >> { %v2780_v55 = vrot.slane %v2772_v9, 1  ;;  %v2768_v43 = vmul.f32 %v2618_v45, %v10422_v28  ;;  %3003 = vrot.lane.b32.xlu0 %v8495_v46, %s4199_s18  ;;  %v2912_v36 = vrot.slane %v2904_v41, 7  ;;  %v2762_v62 = vadd.f32 %v8385_v32, %v10442_v15 }
 0x578   : >> { %v2708_v16 = vadd.f32 %v2702_v31, %v2696_v48  ;;  %v2840_v29 = vmul.f32 %v2618_v45, %v10423_v53  ;;  %v2715_v57 = vsel %vm688_vm0, %v2713_v33, %v2714_v8  ;;  %v2716_v20 = vsel %vm688_vm0, %v2714_v8, %v2713_v33 }
 0x579   : >> { %v2781_v17 = vsel %vm610_vm1, %v2779_v49, %v2780_v55  ;;  %v2782_v32 = vsel %vm610_vm1, %v2780_v55, %v2779_v49  ;;  %v2844_v58 = vadd.f32 %v2838_v23, %v2832_v42  ;;  %v2834_v2 = vadd.f32 %v8391_v39, %v10443_v50 }
 0x57a   : >> { %v2789_v56 = vadd.f32 %v2781_v17, %v2715_v57  ;;  %v2790_v47 = vadd.f32 %v2782_v32, %v2716_v20  ;;  %v2913_v18 = vsel %vm467_vm2, %v2911_v34, %v2912_v36  ;;  %v2984_v33 = vrot.slane %v2976_v26, 6 }
 0x57b   : >> { %v2718_v13 = vrot.slane %v2708_v16, 2  ;;  %v2774_v12 = vadd.f32 %v2768_v43, %v2762_v62  ;;  %v2894_v49 = vadd.f32 %v8395_v14, %v10444_v6  ;;  %v2900_v9 = vmul.f32 %v2618_v45, %v10424_v60  ;;  %v10513_v60 = vld [vmem:[#allocation37_spill] sm:$0xff] }
 0x57c   : >> { %v2849_v0 = vadd.f32 %v8417_v4, %v2789_v56  ;;  %v2850_v11 = vadd.f32 %v2844_v58, %v2790_v47  ;;  %v2914_v39 = vsel %vm467_vm2, %v2912_v36, %v2911_v34  ;;  %v2846_v23 = vadd.f32 %v2840_v29, %v2834_v2  ;;  %v10445_v34 = vld [vmem:[#allocation127_spill] sm:$0xff] }
 0x57d   : >> { %v2719_v42 = vsel %vm688_vm0, %v2717_v35, %v2718_v13  ;;  %v2720_v30 = vsel %vm688_vm0, %v2718_v13, %v2717_v35  ;;  %v2784_v24 = vrot.slane %v2774_v12, 1  ;;  %v2906_v48 = vadd.f32 %v2900_v9, %v2894_v49 }
 0x57e   : >> { %v2921_v41 = vadd.f32 %v2914_v39, %v2849_v0  ;;  %v2922_v4 = vadd.f32 %v2913_v18, %v2850_v11  ;;  %v2985_v14 = vsel %vm395_vm3, %v2983_v51, %v2984_v33  ;;  %v2986_v37 = vsel %vm395_vm3, %v2984_v33, %v2983_v51  ;;  %v10448_v33 = vld [vmem:[#allocation113_spill] sm:$0xff]  ;;  %v10450_v0 = vld [vmem:[#allocation68_spill] sm:$0xff] }
 0x57f   : >> { %v2966_v31 = vadd.f32 %v8399_v38, %v10445_v34  ;;  %v2972_v35 = vmul.f32 %v2618_v45, %v10425_v3  ;;  %v2785_v26 = vsel %vm610_vm1, %v2783_v40, %v2784_v24  ;;  %v2786_v22 = vsel %vm610_vm1, %v2784_v24, %v2783_v40 }
 0x580   : >> { %v2993_v8 = vadd.f32 %v2986_v37, %v2921_v41  ;;  %v2994_v55 = vadd.f32 %v2985_v14, %v2922_v4  ;;  %v2791_v43 = vadd.f32 %v2785_v26, %v2719_v42  ;;  %v2792_v36 = vadd.f32 %v2786_v22, %v2720_v30  ;;  %v10455_v37 = vld [vmem:[#allocation82_spill] sm:$0xff]  ;;  %v10458_v22 = vld [vmem:[#allocation95_spill] sm:$0xff] }
 0x581   : >> { %v2916_v51 = vrot.slane %v2906_v48, 7  ;;  %v2978_v16 = vadd.f32 %v2972_v35, %v2966_v31  ;;  %v2915_v38 = vrot.slane %v8480_v7, 7  ;;  %v2987_v25 = vrot.slane %v8500_v5, 6  ;;  %v10449_v31 = vld [vmem:[#allocation115_spill] sm:$0xff] }
 0x582   : >> { %v8573_v45 = vmul.f32 %v2993_v8, %v10438_v54  ;;  %v8576_v15 = vmul.f32 %v2994_v55, %v10439_v21  ;;  %v2851_v62 = vadd.f32 %v8466_v1, %v2791_v43  ;;  %v2852_v29 = vadd.f32 %v2846_v23, %v2792_v36  ;;  %v10460_v36 = vld [vmem:[#allocation141_spill] sm:$0xff] }
 0x583   : >> { %v2917_v40 = vsel %vm467_vm2, %v2915_v38, %v2916_v51  ;;  %v2918_v57 = vsel %vm467_vm2, %v2916_v51, %v2915_v38  ;;  %v2988_v20 = vrot.slane %v2978_v16, 6  ;;  %v3403_v13 = vrot.slane %v10448_v33, 1  ;;  %v10453_v38 = vld [vmem:[#allocation114_spill] sm:$0xff] }
 0x584   : >> { %3009 = vrot.lane.b32.xlu1 %v8576_v15, %s4199_s18  ;;  %3007 = vrot.lane.b32.xlu0 %v8573_v45, %s4199_s18  ;;  %v2923_v7 = vadd.f32 %v2918_v57, %v2851_v62  ;;  %v2924_v17 = vadd.f32 %v2917_v40, %v2852_v29  ;;  %v10446_v62 = vld [vmem:[#allocation111_spill] sm:$0xff]  ;;  %v3404_v12 = vrot.slane %v10449_v31, 1  ;;  %v3421_v6 = vrot.slane %v10448_v33, 7  ;;  %v10461_v51 = vld [vmem:[#allocation118_spill] sm:$0xff]  ;;  %v10462_v29 = vld [vmem:[#allocation120_spill] sm:$0xff] }
 0x585   : >> { %v2989_v1 = vsel %vm395_vm3, %v2987_v25, %v2988_v20  ;;  %v2990_v5 = vsel %vm395_vm3, %v2988_v20, %v2987_v25  ;;  %v3417_v2 = vrot.slane %v10446_v62, 7  ;;  %v8646_v11 = vmul.f32 %v10446_v62, %v10450_v0  ;;  %v10463_v25 = vld [vmem:[#allocation117_spill] sm:$0xff]  ;;  %v10464_v57 = vld [vmem:[#allocation142_spill] sm:$0xff]  ;;  %v10465_v20 = vld [vmem:[#allocation123_spill] sm:$0xff] }
 0x586   : >> { %v2995_v32 = vadd.f32 %v2990_v5, %v2923_v7  ;;  %v2996_v56 = vadd.f32 %v2989_v1, %v2924_v17  ;;  %v3422_v49 = vrot.slane %v10449_v31, 7  ;;  %v3407_v42 = vrot.slane %v10453_v38, 1  ;;  %v10466_v1 = vld [vmem:[#allocation17_spill] sm:$0xff] }
 0x587   : >> { %10451 = vst [vmem:[#allocation137_spill] sm:$0xff] %v8646_v11  ;;  %v3425_v4 = vrot.slane %v10453_v38, 7  ;;  %v3405_v14 = vsel %vm610_vm1, %v3403_v13, %v3404_v12  ;;  %v8670_v34 = vmul.f32 %v10448_v33, %v10455_v37  ;;  %v3406_v35 = vsel %vm610_vm1, %v3404_v12, %v3403_v13  ;;  %v10469_v13 = vld [vmem:[#allocation27_spill] sm:$0xff]  ;;  %v10490_v33 = vld [vmem:[#allocation128_spill] sm:$0xff] }
 0x588   : >> { %v8593_v47 = vmul.f32 %v2995_v32, %v10438_v54  ;;  %v8596_v58 = vmul.f32 %v2996_v56, %v10439_v21  ;;  %v3399_v54 = vrot.slane %v10446_v62, 1  ;;  %v10447_v21 = vld [vmem:[#allocation112_spill] sm:$0xff]  ;;  %v3424_v8 = vsel %vm467_vm2, %v3422_v49, %v3421_v6 }
 0x589   : >> { %v3400_v50 = vrot.slane %v10447_v21, 1  ;;  %v3418_v18 = vrot.slane %v10447_v21, 7  ;;  %v8654_v39 = vmul.f32 %v10447_v21, %v10450_v0  ;;  %v10454_v56 = vld [vmem:[#allocation116_spill] sm:$0xff]  ;;  %10456 = vst [vmem:[#allocation139_spill] sm:$0xff] %v8670_v34  ;;  %v3423_v55 = vsel %vm467_vm2, %v3421_v6, %v3422_v49  ;;  %v10470_v0 = vld [vmem:[#allocation30_spill] sm:$0xff]  ;;  %v10471_v49 = vld [vmem:[#allocation35_spill] sm:$0xff] }
 0x58a   : >> { %3013 = vrot.lane.b32.xlu1 %v8596_v58, %s4199_s18  ;;  %3011 = vrot.lane.b32.xlu0 %v8593_v47, %s4199_s18  ;;  %v3408_v30 = vrot.slane %v10454_v56, 1  ;;  %v3426_v24 = vrot.slane %v10454_v56, 7  ;;  %v8680_v26 = vmul.f32 %v10449_v31, %v10455_v37  ;;  %v8684_v43 = vmul.f32 %v10454_v56, %v10458_v22  ;;  %v10479_v56 = vld [vmem:[#allocation132_spill] sm:$0xff]  ;;  %v10480_v22 = vld [vmem:[#allocation133_spill] sm:$0xff] }
 0x58b   : >> { %v3401_v9 = vsel %vm610_vm1, %v3399_v54, %v3400_v50  ;;  %10452 = vst [vmem:[#allocation138_spill] sm:$0xff] %v8654_v39  ;;  %v3420_v23 = vsel %vm467_vm2, %v3418_v18, %v3417_v2  ;;  %v3402_v41 = vsel %vm610_vm1, %v3400_v50, %v3399_v54  ;;  %v3419_v48 = vsel %vm467_vm2, %v3417_v2, %v3418_v18  ;;  %v10468_v2 = vld [vmem:[#allocation23_spill] sm:$0xff] }
 0x58c   : >> { %10457 = vst [vmem:[#allocation119_spill] sm:$0xff] %v8680_v26  ;;  %10459 = vst [vmem:[#allocation129_spill] sm:$0xff] %v8684_v43  ;;  %v3393_v16 = vadd.f32 %v10461_v51, %v10460_v36  ;;  %v3394_v40 = vadd.f32 %v10463_v25, %v10462_v29  ;;  %v3395_v7 = vadd.f32 %v10465_v20, %v10464_v57 }
 0x58d   : >> { %v3410_v17 = vsel %vm610_vm1, %v3408_v30, %v3407_v42  ;;  %v8696_v5 = vmul.f32 %v8498_v59, %v10466_v1  ;;  %v3427_v32 = vsel %vm467_vm2, %v3425_v4, %v3426_v24  ;;  %v3409_v54 = vsel %vm610_vm1, %v3407_v42, %v3408_v30 }
 0x58e   : >> { %3017 = vrot.lane.b32.xlu1 %v8498_v59, %s4198_s11  ;;  %3015 = vrot.lane.b32.xlu0 %v8495_v46, %s4198_s11  ;;  %v8704_v50 = vsel %vm467_vm2, %v3426_v24, %v3425_v4  ;;  %v8708_v18 = vmul.f32 %v8498_v59, %v10468_v2  ;;  %v8712_v12 = vmul.f32 %v8498_v59, %v10469_v13 }
 0x58f   : >> { %10467 = vst [vmem:[#allocation135_spill] sm:$0xff] %v8704_v50  ;;  %v8716_v6 = vmul.f32 %v8498_v59, %v10470_v0  ;;  %v8720_v37 = vmul.f32 %v8498_v59, %v10471_v49  ;;  %v8724_v42 = vmul.f32 %v8495_v46, %v10466_v1  ;;  %v8728_v30 = vmul.f32 %v8495_v46, %v10468_v2 }
 0x590   : >> { %v8732_v4 = vmul.f32 %v8495_v46, %v10469_v13  ;;  %v8736_v24 = vmul.f32 %v8495_v46, %v10470_v0  ;;  %v3411_v29 = vadd.f32 %v3401_v9, %v3393_v16  ;;  %v3412_v25 = vadd.f32 %v3402_v41, %v3394_v40 }
 0x591   : >> { %10472 = vst [vmem:[#allocation130_spill] sm:$0xff] %v8724_v42  ;;  %10473 = vst [vmem:[#allocation136_spill] sm:$0xff] %v8728_v30  ;;  %v3413_v57 = vadd.f32 %v3405_v14, %v3395_v7  ;;  %v8744_v20 = vmul.f32 %v8576_v15, %v10466_v1  ;;  %v8748_v31 = vmul.f32 %v8576_v15, %v10468_v2  ;;  %v10489_v7 = vld [vmem:[#allocation134_spill] sm:$0xff] }
 0x592   : >> { %3021 = vrot.lane.b32.xlu1 %v8576_v15, %s4198_s11  ;;  %3019 = vrot.lane.b32.xlu0 %v8573_v45, %s4198_s11  ;;  %10474 = vst [vmem:[#allocation131_spill] sm:$0xff] %v8732_v4  ;;  %10475 = vst [vmem:[#allocation140_spill] sm:$0xff] %v8736_v24  ;;  %v3396_v38 = vadd.f32 %v10479_v56, %v8296_v52  ;;  %v3398_v43 = vadd.f32 %v10480_v22, %v8364_v61 }
 0x593   : >> { %10477 = vst [vmem:[#allocation121_spill] sm:$0xff] %v8744_v20  ;;  %10478 = vst [vmem:[#allocation122_spill] sm:$0xff] %v8748_v31  ;;  %v8760_v9 = vmul.f32 %v8576_v15, %v10470_v0  ;;  %v8764_v41 = vmul.f32 %v8576_v15, %v10471_v49  ;;  %v8768_v14 = vmul.f32 %v8573_v45, %v10466_v1 }
 0x594   : >> { %v8772_v52 = vmul.f32 %v8573_v45, %v10468_v2  ;;  %v8776_v61 = vmul.f32 %v8573_v45, %v10469_v13  ;;  %v8780_v56 = vmul.f32 %v8573_v45, %v10470_v0  ;;  %v3429_v22 = vadd.f32 %v3420_v23, %v3411_v29 }
 0x595   : >> { %10482 = vst [vmem:[#allocation125_spill] sm:$0xff] %v8760_v9  ;;  %10483 = vst [vmem:[#allocation126_spill] sm:$0xff] %v8764_v41  ;;  %v3430_v16 = vadd.f32 %v3419_v48, %v3412_v25  ;;  %v3431_v40 = vadd.f32 %v3424_v8, %v3413_v57  ;;  %v3397_v26 = vadd.f32 %v10490_v33, %v10489_v7  ;;  %v10508_v7 = vld [vmem:[#allocation26_spill] sm:$0xff] }
 0x596   : >> { %3025 = vrot.lane.b32.xlu1 %v8596_v58, %s4198_s11  ;;  %3023 = vrot.lane.b32.xlu0 %v8593_v47, %s4198_s11  ;;  %10484 = vst [vmem:[#allocation127_spill] sm:$0xff] %v8768_v14  ;;  %10485 = vst [vmem:[#allocation141_spill] sm:$0xff] %v8772_v52  ;;  %v8790_v21 = vmul.f32 %v8596_v58, %v10466_v1  ;;  %v8794_v50 = vmul.f32 %v8596_v58, %v10468_v2  ;;  %v10518_v52 = vld [vmem:[#allocation24_spill] sm:$0xff] }
 0x597   : >> { %10486 = vst [vmem:[#allocation118_spill] sm:$0xff] %v8776_v61  ;;  %10487 = vst [vmem:[#allocation120_spill] sm:$0xff] %v8780_v56  ;;  %v3414_v62 = vadd.f32 %v3406_v35, %v3396_v38  ;;  %v3416_v34 = vadd.f32 %v3410_v17, %v3398_v43  ;;  %v8802_v23 = vmul.f32 %v8596_v58, %v10470_v0  ;;  %v10501_v43 = vld [vmem:[#allocation66_spill] sm:$0xff]  ;;  %v10517_v61 = vld [vmem:[#allocation20_spill] sm:$0xff] }
 0x598   : >> { %10491 = vst [vmem:[#allocation142_spill] sm:$0xff] %v8790_v21  ;;  %10492 = vst [vmem:[#allocation123_spill] sm:$0xff] %v8794_v50  ;;  %v8806_v33 = vmul.f32 %v8596_v58, %v10471_v49  ;;  %v8810_v48 = vmul.f32 %v8593_v47, %v10466_v1  ;;  %v8814_v38 = vmul.f32 %v8593_v47, %v10468_v2  ;;  %v10504_v2 = vld [vmem:[#allocation73_spill] sm:$0xff]  ;;  %v10514_v50 = vld [vmem:[#allocation16_spill] sm:$0xff] }
 0x599   : >> { %10494 = vst [vmem:[#allocation133_spill] sm:$0xff] %v8802_v23  ;;  %v8818_v35 = vmul.f32 %v8593_v47, %v10469_v13  ;;  %v8822_v8 = vmul.f32 %v8593_v47, %v10470_v0  ;;  %v8829_v17 = vmul.f32 %v3429_v22, %v10501_v43  ;;  %v8832_v1 = vmul.f32 %v3430_v16, %v10501_v43  ;;  %v10512_v22 = vld [vmem:[#allocation33_spill] sm:$0xff]  ;;  %v10515_v21 = vld [vmem:[#allocation18_spill] sm:$0xff] }
 0x59a   : >> { %3029 = vrot.lane.b32.xlu1 %v8498_v59, %s4196_s16  ;;  %3027 = vrot.lane.b32.xlu0 %v8495_v46, %s4196_s16  ;;  %10495 = vst [vmem:[#allocation134_spill] sm:$0xff] %v8806_v33  ;;  %10496 = vst [vmem:[#allocation128_spill] sm:$0xff] %v8810_v48  ;;  %v8835_v29 = vmul.f32 %v3431_v40, %v10504_v2  ;;  %v8837_v25 = vadd.f32 %v3409_v54, %v3397_v26 }
 0x59b   : >> { %10497 = vst [vmem:[#allocation144_spill] sm:$0xff] %v8814_v38  ;;  %10498 = vst [vmem:[#allocation145_spill] sm:$0xff] %v8818_v35  ;;  %v8841_v19 = vadd.f32 %v3423_v55, %v3414_v62  ;;  %v8843_v3 = vadd.f32 %v3427_v32, %v3416_v34 }
 0x59c   : >> { %10499 = vst [vmem:[#allocation146_spill] sm:$0xff] %v8822_v8  ;;  %10502 = vst [vmem:[#allocation148_spill] sm:$0xff] %v8829_v17 }
 0x59d   : >> { %10503 = vst [vmem:[#allocation149_spill] sm:$0xff] %v8832_v1  ;;  %10505 = vst [vmem:[#allocation150_spill] sm:$0xff] %v8835_v29 }
 0x59e   : >> { %3033 = vrot.lane.b32.xlu1 %v8576_v15, %s4196_s16  ;;  %3031 = vrot.lane.b32.xlu0 %v8573_v45, %s4196_s16  ;;  %10506 = vst [vmem:[#allocation151_spill] sm:$0xff] %v8837_v25  ;;  %10509 = vst [vmem:[#allocation152_spill] sm:$0xff] %v8841_v19 }
 0x59f   : >> { %10510 = vst [vmem:[#allocation153_spill] sm:$0xff] %v8843_v3 }
 0x5a2   : >> { %3037 = vrot.lane.b32.xlu1 %v8596_v58, %s4196_s16  ;;  %3035 = vrot.lane.b32.xlu0 %v8593_v47, %s4196_s16 }
 0x5a6   : >> { %3041 = vrot.lane.b32.xlu1 %v8498_v59, %s4197_s17  ;;  %3039 = vrot.lane.b32.xlu0 %v8495_v46, %s4197_s17  ;;  %v8740_v59 = vmul.f32 %v8495_v46, %v10471_v49  ;;  %v8756_v46 = vmul.f32 %v8576_v15, %v10469_v13 }
 0x5a8   : >> { %10476 = vst [vmem:[#allocation143_spill] sm:$0xff] %v8740_v59  ;;  %10481 = vst [vmem:[#allocation124_spill] sm:$0xff] %v8756_v46 }
 0x5aa   : >> { %3045 = vrot.lane.b32.xlu1 %v8576_v15, %s4197_s17  ;;  %3043 = vrot.lane.b32.xlu0 %v8573_v45, %s4197_s17  ;;  %v8784_v15 = vmul.f32 %v8573_v45, %v10471_v49  ;;  %v8798_v45 = vmul.f32 %v8596_v58, %v10469_v13  ;;  %v10507_v13 = vld [vmem:[#allocation25_spill] sm:$0xff] }
 0x5ac   : >> { %10488 = vst [vmem:[#allocation117_spill] sm:$0xff] %v8784_v15  ;;  %10493 = vst [vmem:[#allocation132_spill] sm:$0xff] %v8798_v45 }
 0x5ae   : >> { %3049 = vrot.lane.b32.xlu1 %v8596_v58, %s4197_s17  ;;  %3047 = vrot.lane.b32.xlu0 %v8593_v47, %s4197_s17  ;;  %v8826_v58 = vmul.f32 %v8593_v47, %v10471_v49  ;;  %v10511_v47 = vld [vmem:[#allocation29_spill] sm:$0xff] }
 0x5b0   : >> { %10500 = vst [vmem:[#allocation147_spill] sm:$0xff] %v8826_v58 }
 0x5e8   : >> { %v3006_v36 = vpop.permute.xlu1 %3005 }
 0x5e9   : >> { %v3004_v51 = vpop.permute.xlu0 %3003  ;;  %v3052_v57 = vmul.f32 %v3006_v36, %v10507_v13  ;;  %v3118_v0 = vmul.f32 %v3006_v36, %v10508_v7  ;;  %v3190_v49 = vmul.f32 %v3006_v36, %v10511_v47  ;;  %v3250_v17 = vmul.f32 %v3006_v36, %v10512_v22 }
 0x5ea   : >> { %v3322_v16 = vmul.f32 %v3006_v36, %v10513_v60  ;;  %v3051_v43 = vmul.f32 %v3004_v51, %v10507_v13  ;;  %v3117_v40 = vmul.f32 %v3004_v51, %v10508_v7  ;;  %v3189_v26 = vmul.f32 %v3004_v51, %v10511_v47 }
 0x5eb   : >> { %v3249_v54 = vmul.f32 %v3004_v51, %v10512_v22  ;;  %v3321_v2 = vmul.f32 %v3004_v51, %v10513_v60 }
 0x5f6   : >> { %v3010_v39 = vpop.permute.xlu1 %3009  ;;  %v3008_v11 = vpop.permute.xlu0 %3007 }
 0x5f7   : >> { %v3054_v62 = vmul.f32 %v3010_v39, %v10507_v13  ;;  %v3120_v34 = vmul.f32 %v3010_v39, %v10508_v7  ;;  %v3192_v55 = vmul.f32 %v3010_v39, %v10511_v47  ;;  %v3252_v32 = vmul.f32 %v3010_v39, %v10512_v22 }
 0x5f8   : >> { %v3324_v19 = vmul.f32 %v3010_v39, %v10513_v60  ;;  %v3053_v25 = vmul.f32 %v3008_v11, %v10507_v13  ;;  %v3119_v29 = vmul.f32 %v3008_v11, %v10508_v7  ;;  %v3191_v1 = vmul.f32 %v3008_v11, %v10511_v47 }
 0x5f9   : >> { %v3251_v51 = vmul.f32 %v3008_v11, %v10512_v22  ;;  %v3323_v53 = vmul.f32 %v3008_v11, %v10513_v60 }
 0x5fc   : >> { %v3014_v3 = vpop.permute.xlu1 %3013  ;;  %v3012_v36 = vpop.permute.xlu0 %3011 }
 0x5fd   : >> { %v3056_v28 = vmul.f32 %v3014_v3, %v10507_v13  ;;  %v3122_v27 = vmul.f32 %v3014_v3, %v10508_v7  ;;  %v3194_v58 = vmul.f32 %v3014_v3, %v10511_v47  ;;  %v3254_v8 = vmul.f32 %v3014_v3, %v10512_v22 }
 0x5fe   : >> { %v8868_v39 = vmul.f32 %v3014_v3, %v10513_v60  ;;  %v8871_v35 = vmul.f32 %v3012_v36, %v10507_v13  ;;  %v8874_v38 = vmul.f32 %v3012_v36, %v10508_v7  ;;  %v8877_v48 = vmul.f32 %v3012_v36, %v10511_v47  ;;  %v10516_v13 = vld [vmem:[#allocation19_spill] sm:$0xff] }
 0x5ff   : >> { %v8880_v11 = vmul.f32 %v3012_v36, %v10512_v22  ;;  %v8883_v33 = vmul.f32 %v3012_v36, %v10513_v60 }
 0x600   : >> { %v3018_v23 = vpop.permute.xlu1 %3017  ;;  %v3016_v45 = vpop.permute.xlu0 %3015 }
 0x601   : >> { %v3058_v3 = vmul.f32 %v3018_v23, %v10514_v50  ;;  %v3124_v15 = vmul.f32 %v3018_v23, %v10515_v21  ;;  %v3196_v56 = vmul.f32 %v3018_v23, %v10516_v13  ;;  %v3256_v7 = vmul.f32 %v3018_v23, %v10517_v61 }
 0x602   : >> { %v3328_v14 = vmul.f32 %v3018_v23, %v10518_v52  ;;  %v3057_v47 = vmul.f32 %v3016_v45, %v10514_v50  ;;  %v3123_v22 = vmul.f32 %v3016_v45, %v10515_v21  ;;  %v3195_v41 = vmul.f32 %v3016_v45, %v10516_v13 }
 0x603   : >> { %v3064_v60 = vadd.f32 %v3058_v3, %v3052_v57  ;;  %v3130_v36 = vadd.f32 %v3124_v15, %v3118_v0  ;;  %v3202_v9 = vadd.f32 %v3196_v56, %v3190_v49  ;;  %v3262_v46 = vadd.f32 %v3256_v7, %v3250_v17 }
 0x604   : >> { %v3334_v31 = vadd.f32 %v3328_v14, %v3322_v16  ;;  %v3063_v20 = vadd.f32 %v3057_v47, %v3051_v43  ;;  %v3129_v59 = vadd.f32 %v3123_v22, %v3117_v40  ;;  %v8893_v24 = vadd.f32 %v3195_v41, %v3189_v26  ;;  %v3022_v4 = vpop.permute.xlu1 %3021  ;;  %v3020_v30 = vpop.permute.xlu0 %3019 }
 0x605   : >> { %v3255_v42 = vmul.f32 %v3016_v45, %v10517_v61  ;;  %v3327_v23 = vmul.f32 %v3016_v45, %v10518_v52  ;;  %v3060_v44 = vmul.f32 %v3022_v4, %v10514_v50  ;;  %v3126_v63 = vmul.f32 %v3022_v4, %v10515_v21 }
 0x606   : >> { %v3198_v57 = vmul.f32 %v3022_v4, %v10516_v13  ;;  %v3258_v56 = vmul.f32 %v3022_v4, %v10517_v61  ;;  %v3330_v14 = vmul.f32 %v3022_v4, %v10518_v52  ;;  %v3059_v15 = vmul.f32 %v3020_v30, %v10514_v50 }
 0x607   : >> { %v3261_v41 = vadd.f32 %v3255_v42, %v3249_v54  ;;  %v3333_v17 = vadd.f32 %v3327_v23, %v3321_v2  ;;  %v8903_v0 = vadd.f32 %v3060_v44, %v3054_v62  ;;  %v8905_v49 = vadd.f32 %v3126_v63, %v3120_v34 }
 0x608   : >> { %v8907_v16 = vadd.f32 %v3198_v57, %v3192_v55  ;;  %v8909_v45 = vadd.f32 %v3258_v56, %v3252_v32  ;;  %v8911_v43 = vadd.f32 %v3330_v14, %v3324_v19  ;;  %v8913_v40 = vadd.f32 %v3059_v15, %v3053_v25  ;;  %v3026_v26 = vpop.permute.xlu1 %3025  ;;  %v3024_v62 = vpop.permute.xlu0 %3023  ;;  %v10522_v15 = vld [vmem:[#allocation58_spill] sm:$0xff] }
 0x609   : >> { %v3125_v3 = vmul.f32 %v3020_v30, %v10515_v21  ;;  %v3197_v4 = vmul.f32 %v3020_v30, %v10516_v13  ;;  %v3257_v42 = vmul.f32 %v3020_v30, %v10517_v61  ;;  %v3329_v44 = vmul.f32 %v3020_v30, %v10518_v52 }
 0x60a   : >> { %v3062_v63 = vmul.f32 %v3026_v26, %v10514_v50  ;;  %v3128_v2 = vmul.f32 %v3026_v26, %v10515_v21  ;;  %v3200_v54 = vmul.f32 %v3026_v26, %v10516_v13  ;;  %v3260_v19 = vmul.f32 %v3026_v26, %v10517_v61 }
 0x60b   : >> { %v8923_v25 = vadd.f32 %v3125_v3, %v3119_v29  ;;  %v8925_v34 = vadd.f32 %v3197_v4, %v3191_v1  ;;  %v8927_v55 = vadd.f32 %v3257_v42, %v3251_v51  ;;  %v8929_v32 = vadd.f32 %v3329_v44, %v3323_v53 }
 0x60c   : >> { %v8931_v7 = vadd.f32 %v3062_v63, %v3056_v28  ;;  %v8933_v30 = vadd.f32 %v3128_v2, %v3122_v27  ;;  %v8935_v47 = vadd.f32 %v3200_v54, %v3194_v58  ;;  %v8937_v22 = vadd.f32 %v3260_v19, %v3254_v8  ;;  %v3030_v58 = vpop.permute.xlu1 %3029  ;;  %v3028_v42 = vpop.permute.xlu0 %3027  ;;  %v10526_v63 = vld [vmem:[#allocation140_spill] sm:$0xff]  ;;  %v10527_v54 = vld [vmem:[#allocation143_spill] sm:$0xff] }
 0x60d   : >> { %v3332_v23 = vmul.f32 %v3026_v26, %v10518_v52  ;;  %v3061_v57 = vmul.f32 %v3024_v62, %v10514_v50  ;;  %v3127_v29 = vmul.f32 %v3024_v62, %v10515_v21  ;;  %v3199_v1 = vmul.f32 %v3024_v62, %v10516_v13  ;;  %v10519_v13 = vld [vmem:[#allocation55_spill] sm:$0xff]  ;;  %v10523_v26 = vld [vmem:[#allocation130_spill] sm:$0xff] }
 0x60e   : >> { %v3259_v51 = vmul.f32 %v3024_v62, %v10517_v61  ;;  %v3331_v53 = vmul.f32 %v3024_v62, %v10518_v52  ;;  %v3076_v28 = vadd.f32 %v8696_v5, %v3064_v60  ;;  %v3142_v27 = vadd.f32 %v8708_v18, %v3130_v36  ;;  %v10520_v60 = vld [vmem:[#allocation56_spill] sm:$0xff] }
 0x60f   : >> { %v8948_v8 = vadd.f32 %v3332_v23, %v8868_v39  ;;  %v8951_v56 = vadd.f32 %v3061_v57, %v8871_v35  ;;  %v8954_v50 = vadd.f32 %v3127_v29, %v8874_v38  ;;  %v8957_v21 = vadd.f32 %v3199_v1, %v8877_v48  ;;  %v10521_v48 = vld [vmem:[#allocation57_spill] sm:$0xff] }
 0x610   : >> { %v8960_v61 = vadd.f32 %v3259_v51, %v8880_v11  ;;  %v8963_v5 = vadd.f32 %v3331_v53, %v8883_v33  ;;  %v3214_v18 = vadd.f32 %v8712_v12, %v3202_v9  ;;  %v3274_v52 = vadd.f32 %v8716_v6, %v3262_v46  ;;  %v10524_v33 = vld [vmem:[#allocation136_spill] sm:$0xff]  ;;  %v3034_v57 = vpop.permute.xlu1 %3033  ;;  %v10529_v51 = vld [vmem:[#allocation122_spill] sm:$0xff] }
 0x611   : >> { %v3346_v39 = vadd.f32 %v8720_v37, %v3334_v31  ;;  %v3082_v35 = vmul.f32 %v3030_v58, %v10387_v10  ;;  %v3148_v38 = vmul.f32 %v3030_v58, %v10519_v13  ;;  %v3220_v36 = vmul.f32 %v3030_v58, %v10520_v60  ;;  %v10525_v37 = vld [vmem:[#allocation131_spill] sm:$0xff] }
 0x612   : >> { %v3280_v14 = vmul.f32 %v3030_v58, %v10521_v48  ;;  %v3352_v11 = vmul.f32 %v3030_v58, %v10522_v15  ;;  %v3075_v3 = vadd.f32 %v10523_v26, %v3063_v20  ;;  %v3141_v4 = vadd.f32 %v10524_v33, %v3129_v59  ;;  %v3032_v26 = vpop.permute.xlu0 %3031  ;;  %v10533_v33 = vld [vmem:[#allocation127_spill] sm:$0xff] }
 0x613   : >> { %v8975_v12 = vadd.f32 %v3082_v35, %v3076_v28  ;;  %v8977_v6 = vadd.f32 %v3148_v38, %v3142_v27  ;;  %v8979_v31 = vadd.f32 %v3220_v36, %v3214_v18  ;;  %v3213_v46 = vadd.f32 %v10525_v37, %v8893_v24  ;;  %v10528_v24 = vld [vmem:[#allocation121_spill] sm:$0xff] }
 0x614   : >> { %v8983_v9 = vadd.f32 %v3280_v14, %v3274_v52  ;;  %v8985_v44 = vadd.f32 %v3352_v11, %v3346_v39  ;;  %v3273_v2 = vadd.f32 %v10526_v63, %v3261_v41  ;;  %v3345_v20 = vadd.f32 %v10527_v54, %v3333_v17  ;;  %v10530_v41 = vld [vmem:[#allocation124_spill] sm:$0xff]  ;;  %v10531_v39 = vld [vmem:[#allocation125_spill] sm:$0xff] }
 0x615   : >> { %v3081_v59 = vmul.f32 %v3028_v42, %v10387_v10  ;;  %v3147_v19 = vmul.f32 %v3028_v42, %v10519_v13  ;;  %v3219_v62 = vmul.f32 %v3028_v42, %v10520_v60  ;;  %v3279_v23 = vmul.f32 %v3028_v42, %v10521_v48 }
 0x616   : >> { %v3351_v29 = vmul.f32 %v3028_v42, %v10522_v15  ;;  %v3078_v1 = vadd.f32 %v10528_v24, %v8903_v0  ;;  %v3144_v53 = vadd.f32 %v10529_v51, %v8905_v49  ;;  %v3216_v17 = vadd.f32 %v10530_v41, %v8907_v16  ;;  %v10532_v0 = vld [vmem:[#allocation126_spill] sm:$0xff] }
 0x617   : >> { %v9000_v28 = vadd.f32 %v3081_v59, %v3075_v3  ;;  %v9002_v27 = vadd.f32 %v3147_v19, %v3141_v4  ;;  %v9004_v58 = vadd.f32 %v3219_v62, %v3213_v46  ;;  %v9006_v18 = vadd.f32 %v3279_v23, %v3273_v2  ;;  %v10536_v59 = vld [vmem:[#allocation120_spill] sm:$0xff]  ;;  %v10538_v24 = vld [vmem:[#allocation142_spill] sm:$0xff] }
 0x618   : >> { %v9008_v52 = vadd.f32 %v3351_v29, %v3345_v20  ;;  %v3276_v35 = vadd.f32 %v10531_v39, %v8909_v45  ;;  %v3348_v38 = vadd.f32 %v10532_v0, %v8911_v43  ;;  %v3084_v49 = vmul.f32 %v3034_v57, %v10387_v10  ;;  %v10534_v45 = vld [vmem:[#allocation141_spill] sm:$0xff]  ;;  %v10535_v43 = vld [vmem:[#allocation118_spill] sm:$0xff]  ;;  %v3038_v20 = vpop.permute.xlu1 %3037 }
 0x619   : >> { %v3150_v16 = vmul.f32 %v3034_v57, %v10519_v13  ;;  %v3222_v36 = vmul.f32 %v3034_v57, %v10520_v60  ;;  %v3282_v14 = vmul.f32 %v3034_v57, %v10521_v48  ;;  %v3354_v11 = vmul.f32 %v3034_v57, %v10522_v15 }
 0x61a   : >> { %v9019_v3 = vadd.f32 %v3084_v49, %v3078_v1  ;;  %v3077_v4 = vadd.f32 %v10533_v33, %v8913_v40  ;;  %v3143_v42 = vadd.f32 %v10534_v45, %v8923_v25  ;;  %v3215_v37 = vadd.f32 %v10535_v43, %v8925_v34  ;;  %v10537_v40 = vld [vmem:[#allocation117_spill] sm:$0xff]  ;;  %v10542_v33 = vld [vmem:[#allocation134_spill] sm:$0xff]  ;;  %v10543_v43 = vld [vmem:[#allocation128_spill] sm:$0xff] }
 0x61b   : >> { %v9027_v46 = vadd.f32 %v3150_v16, %v3144_v53  ;;  %v9029_v63 = vadd.f32 %v3222_v36, %v3216_v17  ;;  %v9031_v2 = vadd.f32 %v3282_v14, %v3276_v35  ;;  %v9033_v54 = vadd.f32 %v3354_v11, %v3348_v38  ;;  %v3036_v38 = vpop.permute.xlu0 %3035  ;;  %v10541_v14 = vld [vmem:[#allocation133_spill] sm:$0xff] }
 0x61c   : >> { %v3275_v19 = vadd.f32 %v10536_v59, %v8927_v55  ;;  %v3347_v62 = vadd.f32 %v10537_v40, %v8929_v32  ;;  %v3083_v25 = vmul.f32 %v3032_v26, %v10387_v10  ;;  %v3149_v23 = vmul.f32 %v3032_v26, %v10519_v13  ;;  %v10539_v32 = vld [vmem:[#allocation123_spill] sm:$0xff]  ;;  %v10544_v59 = vld [vmem:[#allocation144_spill] sm:$0xff] }
 0x61d   : >> { %v3221_v34 = vmul.f32 %v3032_v26, %v10520_v60  ;;  %v3281_v57 = vmul.f32 %v3032_v26, %v10521_v48  ;;  %v3353_v29 = vmul.f32 %v3032_v26, %v10522_v15  ;;  %v3080_v1 = vadd.f32 %v10538_v24, %v8931_v7  ;;  %v10540_v7 = vld [vmem:[#allocation132_spill] sm:$0xff] }
 0x61e   : >> { %v9046_v51 = vadd.f32 %v3083_v25, %v3077_v4  ;;  %v9048_v53 = vadd.f32 %v3149_v23, %v3143_v42  ;;  %v3086_v55 = vmul.f32 %v3038_v20, %v10387_v10  ;;  %v3146_v41 = vadd.f32 %v10539_v32, %v8933_v30 }
 0x61f   : >> { %v9053_v17 = vadd.f32 %v3221_v34, %v3215_v37  ;;  %v9055_v39 = vadd.f32 %v3281_v57, %v3275_v19  ;;  %v9057_v35 = vadd.f32 %v3353_v29, %v3347_v62  ;;  %v3152_v0 = vmul.f32 %v3038_v20, %v10519_v13  ;;  %v10547_v29 = vld [vmem:[#allocation147_spill] sm:$0xff]  ;;  %v3040_v32 = vpop.permute.xlu0 %3039 }
 0x620   : >> { %v9060_v49 = vadd.f32 %v3086_v55, %v3080_v1  ;;  %v3218_v16 = vadd.f32 %v10540_v7, %v8935_v47  ;;  %v3224_v36 = vmul.f32 %v3038_v20, %v10520_v60  ;;  %v3278_v11 = vadd.f32 %v10541_v14, %v8937_v22  ;;  %v3042_v22 = vpop.permute.xlu1 %3041  ;;  %v10550_v7 = vld [vmem:[#allocation61_spill] sm:$0xff] }
 0x621   : >> { %v9067_v30 = vadd.f32 %v3152_v0, %v3146_v41  ;;  %v3284_v26 = vmul.f32 %v3038_v20, %v10521_v48  ;;  %v3350_v4 = vadd.f32 %v10542_v33, %v8948_v8  ;;  %v3356_v45 = vmul.f32 %v3038_v20, %v10522_v15  ;;  %v10545_v8 = vld [vmem:[#allocation145_spill] sm:$0xff] }
 0x622   : >> { %v9073_v42 = vadd.f32 %v3224_v36, %v3218_v16  ;;  %v3079_v37 = vadd.f32 %v10543_v43, %v8951_v56  ;;  %v3085_v47 = vmul.f32 %v3036_v38, %v10387_v10  ;;  %v3145_v19 = vadd.f32 %v10544_v59, %v8954_v50  ;;  %v10546_v56 = vld [vmem:[#allocation146_spill] sm:$0xff] }
 0x623   : >> { %v9080_v40 = vadd.f32 %v3284_v26, %v3278_v11  ;;  %v9082_v62 = vadd.f32 %v3356_v45, %v3350_v4  ;;  %v3151_v25 = vmul.f32 %v3036_v38, %v10519_v13  ;;  %v3217_v20 = vadd.f32 %v10545_v8, %v8957_v21  ;;  %v10548_v13 = vld [vmem:[#allocation59_spill] sm:$0xff]  ;;  %v10551_v36 = vld [vmem:[#allocation62_spill] sm:$0xff] }
 0x624   : >> { %v9087_v23 = vadd.f32 %v3085_v47, %v3079_v37  ;;  %v3223_v34 = vmul.f32 %v3036_v38, %v10520_v60  ;;  %v3277_v10 = vadd.f32 %v10546_v56, %v8960_v61  ;;  %v3283_v57 = vmul.f32 %v3036_v38, %v10521_v48  ;;  %v10549_v60 = vld [vmem:[#allocation60_spill] sm:$0xff]  ;;  %v3046_v4 = vpop.permute.xlu1 %3045 }
 0x625   : >> { %v9093_v50 = vadd.f32 %v3151_v25, %v3145_v19  ;;  %v3349_v24 = vadd.f32 %v10547_v29, %v8963_v5  ;;  %v3355_v1 = vmul.f32 %v3036_v38, %v10522_v15  ;;  %v3094_v55 = vmul.f32 %v3042_v22, %v10548_v13  ;;  %v10552_v5 = vld [vmem:[#allocation63_spill] sm:$0xff] }
 0x626   : >> { %v9099_v21 = vadd.f32 %v3223_v34, %v3217_v20  ;;  %v9101_v41 = vadd.f32 %v3283_v57, %v3277_v10  ;;  %v3160_v0 = vmul.f32 %v3042_v22, %v10549_v60  ;;  %v3232_v61 = vmul.f32 %v3042_v22, %v10550_v7  ;;  %v3044_v10 = vpop.permute.xlu0 %3043  ;;  %v10569_v57 = vld [vmem:[#allocation28_spill] sm:$0xff] }
 0x627   : >> { %v9105_v16 = vadd.f32 %v3355_v1, %v3349_v24  ;;  %v3100_v48 = vadd.f32 %v3094_v55, %v8975_v12  ;;  %v3292_v14 = vmul.f32 %v3042_v22, %v10551_v36  ;;  %v3364_v11 = vmul.f32 %v3042_v22, %v10552_v5 }
 0x628   : >> { %v3166_v15 = vadd.f32 %v3160_v0, %v8977_v6  ;;  %v9112_v38 = vadd.f32 %v3232_v61, %v8979_v31  ;;  %v3093_v26 = vmul.f32 %v3040_v32, %v10548_v13  ;;  %v3159_v33 = vmul.f32 %v3040_v32, %v10549_v60 }
 0x629   : >> { %v3106_v45 = vrot.slane %v3100_v48, 6  ;;  %v9117_v43 = vadd.f32 %v3292_v14, %v8983_v9  ;;  %v9120_v12 = vadd.f32 %v3364_v11, %v8985_v44  ;;  %v3231_v37 = vmul.f32 %v3040_v32, %v10550_v7  ;;  %v3050_v11 = vpop.permute.xlu1 %3049 }
 0x62a   : >> { %v3172_v47 = vrot.slane %v3166_v15, 7  ;;  %v3099_v6 = vadd.f32 %v3093_v26, %v9000_v28  ;;  %v3165_v31 = vadd.f32 %v3159_v33, %v9002_v27  ;;  %v3291_v59 = vmul.f32 %v3040_v32, %v10551_v36 }
 0x62b   : >> { %v3304_v19 = vrot.slane %v9117_v43, 1  ;;  %v9128_v22 = vadd.f32 %v3231_v37, %v9004_v58  ;;  %v3363_v9 = vmul.f32 %v3040_v32, %v10552_v5  ;;  %v3096_v25 = vmul.f32 %v3046_v4, %v10548_v13 }
 0x62c   : >> { %v3105_v44 = vrot.slane %v3099_v6, 6  ;;  %v3171_v8 = vrot.slane %v3165_v31, 7  ;;  %v9133_v20 = vadd.f32 %v3291_v59, %v9006_v18  ;;  %v3162_v28 = vmul.f32 %v3046_v4, %v10549_v60 }
 0x62d   : >> { %v9137_v27 = vadd.f32 %v3363_v9, %v9008_v52  ;;  %v3102_v34 = vadd.f32 %v3096_v25, %v9019_v3  ;;  %v3234_v56 = vmul.f32 %v3046_v4, %v10550_v7  ;;  %v3294_v58 = vmul.f32 %v3046_v4, %v10551_v36 }
 0x62e   : >> { %v9144_v29 = vsel %vm395_vm3, %v3105_v44, %v3106_v45  ;;  %v3108_v18 = vsel %vm395_vm3, %v3106_v45, %v3105_v44  ;;  %v3173_v24 = vsel %vm467_vm2, %v3171_v8, %v3172_v47  ;;  %v3174_v52 = vsel %vm467_vm2, %v3172_v47, %v3171_v8  ;;  %v3048_v8 = vpop.permute.xlu0 %3047 }
 0x62f   : >> { %v3303_v3 = vrot.slane %v9133_v20, 1  ;;  %v3110_v1 = vrot.slane %v3102_v34, 6  ;;  %v3168_v55 = vadd.f32 %v3162_v28, %v9027_v46  ;;  %v9155_v32 = vadd.f32 %v3234_v56, %v9029_v63 }
 0x630   : >> { %v9158_v0 = vadd.f32 %v3294_v58, %v9031_v2  ;;  %v3366_v61 = vmul.f32 %v3046_v4, %v10552_v5  ;;  %v3095_v48 = vmul.f32 %v3044_v10, %v10548_v13  ;;  %v3161_v14 = vmul.f32 %v3044_v10, %v10549_v60 }
 0x631   : >> { %v3176_v15 = vrot.slane %v3168_v55, 7  ;;  %v3233_v26 = vmul.f32 %v3044_v10, %v10550_v7  ;;  %v3293_v33 = vmul.f32 %v3044_v10, %v10551_v36  ;;  %v3365_v46 = vmul.f32 %v3044_v10, %v10552_v5 }
 0x632   : >> { %v3308_v63 = vrot.slane %v9158_v0, 1  ;;  %v9168_v45 = vadd.f32 %v3366_v61, %v9033_v54  ;;  %v3101_v2 = vadd.f32 %v3095_v48, %v9046_v51  ;;  %v3167_v4 = vadd.f32 %v3161_v14, %v9048_v53 }
 0x633   : >> { %v3239_v37 = vadd.f32 %v3233_v26, %v9053_v17  ;;  %v3299_v47 = vadd.f32 %v3293_v33, %v9055_v39  ;;  %v9175_v6 = vadd.f32 %v3365_v46, %v9057_v35  ;;  %v3098_v31 = vmul.f32 %v3050_v11, %v10548_v13 }
 0x634   : >> { %v3109_v59 = vrot.slane %v3101_v2, 6  ;;  %v3175_v9 = vrot.slane %v3167_v4, 7  ;;  %v3164_v25 = vmul.f32 %v3050_v11, %v10549_v60  ;;  %v3236_v54 = vmul.f32 %v3050_v11, %v10550_v7 }
 0x635   : >> { %v3307_v44 = vrot.slane %v3299_v47, 1  ;;  %v3104_v51 = vadd.f32 %v3098_v31, %v9060_v49  ;;  %v3296_v53 = vmul.f32 %v3050_v11, %v10551_v36  ;;  %v3368_v17 = vmul.f32 %v3050_v11, %v10552_v5 }
 0x636   : >> { %v3111_v39 = vsel %vm395_vm3, %v3109_v59, %v3110_v1  ;;  %v3112_v35 = vsel %vm395_vm3, %v3110_v1, %v3109_v59  ;;  %v3177_v20 = vsel %vm467_vm2, %v3175_v9, %v3176_v15  ;;  %v3178_v28 = vsel %vm467_vm2, %v3176_v15, %v3175_v9 }
 0x637   : >> { %v3114_v34 = vrot.slane %v3104_v51, 6  ;;  %v3170_v49 = vadd.f32 %v3164_v25, %v9067_v30  ;;  %v3242_v56 = vadd.f32 %v3236_v54, %v9073_v42  ;;  %v3302_v58 = vadd.f32 %v3296_v53, %v9080_v40  ;;  %v10554_v54 = vld [vmem:[#allocation137_spill] sm:$0xff] }
 0x638   : >> { %v9195_v10 = vadd.f32 %v3368_v17, %v9082_v62  ;;  %v3097_v55 = vmul.f32 %v3048_v8, %v10548_v13  ;;  %v3163_v1 = vmul.f32 %v3048_v8, %v10549_v60  ;;  %v3235_v61 = vmul.f32 %v3048_v8, %v10550_v7 }
 0x639   : >> { %v3180_v48 = vrot.slane %v3170_v49, 7  ;;  %v3312_v14 = vrot.slane %v3302_v58, 1  ;;  %v3295_v11 = vmul.f32 %v3048_v8, %v10551_v36  ;;  %v3367_v15 = vmul.f32 %v3048_v8, %v10552_v5  ;;  %v10557_v49 = vld [vmem:[#allocation139_spill] sm:$0xff] }
 0x63a   : >> { %v3103_v30 = vadd.f32 %v3097_v55, %v9087_v23  ;;  %v3169_v42 = vadd.f32 %v3163_v1, %v9093_v50  ;;  %v3241_v40 = vadd.f32 %v3235_v61, %v9099_v21  ;;  %v3183_v62 = vadd.f32 %v3174_v52, %v3108_v18 }
 0x63b   : >> { %v3301_v26 = vadd.f32 %v3295_v11, %v9101_v41  ;;  %v3373_v13 = vadd.f32 %v3367_v15, %v9105_v16  ;;  %v3305_v60 = vsel %vm610_vm1, %v3303_v3, %v3304_v19  ;;  %v3375_v7 = vrot.slane %v9137_v27, 2  ;;  %v10560_v15 = vld [vmem:[#allocation150_spill] sm:$0xff] }
 0x63c   : >> { %v3113_v36 = vrot.slane %v3103_v30, 6  ;;  %v3179_v5 = vrot.slane %v3169_v42, 7  ;;  %v3243_v23 = vadd.f32 %v9128_v22, %v3183_v62  ;;  %v3376_v50 = vrot.slane %v9120_v12, 2  ;;  %v10558_v62 = vld [vmem:[#allocation111_spill] sm:$0xff] }
 0x63d   : >> { %v3311_v33 = vrot.slane %v3301_v26, 1  ;;  %v3184_v21 = vadd.f32 %v3173_v24, %v9144_v29  ;;  %v3306_v41 = vsel %vm610_vm1, %v3304_v19, %v3303_v3  ;;  %v3185_v16 = vadd.f32 %v3178_v28, %v3112_v35  ;;  %v10556_v35 = vld [vmem:[#allocation138_spill] sm:$0xff] }
 0x63e   : >> { %v3115_v18 = vsel %vm395_vm3, %v3113_v36, %v3114_v34  ;;  %v3116_v27 = vsel %vm395_vm3, %v3114_v34, %v3113_v36  ;;  %v3181_v22 = vsel %vm467_vm2, %v3179_v5, %v3180_v48  ;;  %v3182_v12 = vsel %vm467_vm2, %v3180_v48, %v3179_v5  ;;  %v10564_v36 = vld [vmem:[#allocation119_spill] sm:$0xff] }
 0x63f   : >> { %v3315_v52 = vadd.f32 %v3305_v60, %v3243_v23  ;;  %v3377_v43 = vsel %vm688_vm0, %v3375_v7, %v3376_v50  ;;  %v3244_v29 = vadd.f32 %v9112_v38, %v3184_v21  ;;  %v3378_v19 = vsel %vm688_vm0, %v3376_v50, %v3375_v7  ;;  %v10562_v60 = vld [vmem:[#allocation135_spill] sm:$0xff]  ;;  %v10563_v21 = vld [vmem:[#allocation112_spill] sm:$0xff]  ;;  %v10565_v23 = vld [vmem:[#allocation73_spill] sm:$0xff] }
 0x640   : >> { %v3245_v24 = vadd.f32 %v3239_v37, %v3185_v16  ;;  %v3309_v3 = vsel %vm610_vm1, %v3307_v44, %v3308_v63  ;;  %v3379_v46 = vrot.slane %v9175_v6, 2  ;;  %v3380_v2 = vrot.slane %v9168_v45, 2  ;;  %v10566_v50 = vld [vmem:[#allocation152_spill] sm:$0xff]  ;;  %v10568_v16 = vld [vmem:[#allocation129_spill] sm:$0xff] }
 0x641   : >> { %v3387_v4 = vadd.f32 %v3377_v43, %v3315_v52  ;;  %v3316_v47 = vadd.f32 %v3306_v41, %v3244_v29  ;;  %v3186_v31 = vadd.f32 %v3177_v20, %v3111_v39  ;;  %v3310_v38 = vsel %vm610_vm1, %v3308_v63, %v3307_v44  ;;  %v10555_v44 = vld [vmem:[#allocation148_spill] sm:$0xff]  ;;  %v10571_v43 = vld [vmem:[#allocation95_spill] sm:$0xff] }
 0x642   : >> { %v3317_v59 = vadd.f32 %v3309_v3, %v3245_v24  ;;  %v3381_v37 = vsel %vm688_vm0, %v3379_v46, %v3380_v2  ;;  %v3382_v9 = vsel %vm688_vm0, %v3380_v2, %v3379_v46  ;;  %v3188_v25 = vadd.f32 %v3181_v22, %v3115_v18 }
 0x643   : >> { %v3441_v6 = vadd.f32 %v10554_v54, %v3387_v4  ;;  %v3388_v51 = vadd.f32 %v3378_v19, %v3316_v47  ;;  %v3246_v45 = vadd.f32 %v9155_v32, %v3186_v31  ;;  %v3314_v53 = vsel %vm610_vm1, %v3312_v14, %v3311_v33  ;;  %v10574_v31 = vld [vmem:[#allocation115_spill] sm:$0xff] }
 0x644   : >> { %v3389_v0 = vadd.f32 %v3381_v37, %v3317_v59  ;;  %v3248_v17 = vadd.f32 %v3242_v56, %v3188_v25  ;;  %v3383_v8 = vrot.slane %v3373_v13, 2  ;;  %v3384_v63 = vrot.slane %v9195_v10, 2  ;;  %v10559_v10 = vld [vmem:[#allocation149_spill] sm:$0xff]  ;;  %v10561_v13 = vld [vmem:[#allocation151_spill] sm:$0xff] }
 0x645   : >> { %v9252_v39 = vsub.f32 %v3441_v6, %v10555_v44  ;;  %v3442_v20 = vadd.f32 %v10556_v35, %v3388_v51  ;;  %v3318_v28 = vadd.f32 %v3310_v38, %v3246_v45  ;;  %v3187_v34 = vadd.f32 %v3182_v12, %v3116_v27  ;;  %v10570_v27 = vld [vmem:[#allocation153_spill] sm:$0xff]  ;;  %v10572_v38 = vld [vmem:[#allocation114_spill] sm:$0xff] }
 0x646   : >> { %v3443_v58 = vadd.f32 %v10557_v49, %v3389_v0  ;;  %v3320_v55 = vadd.f32 %v3314_v53, %v3248_v17  ;;  %v3386_v32 = vsel %vm688_vm0, %v3384_v63, %v3383_v8  ;;  %v3313_v1 = vsel %vm610_vm1, %v3311_v33, %v3312_v14 }
 0x647   : >> { %v3459_v56 = vmul.f32 %v9252_v39, %v10558_v62  ;;  %v9263_v61 = vsub.f32 %v3442_v20, %v10559_v10  ;;  %v3390_v48 = vadd.f32 %v3382_v9, %v3318_v28  ;;  %v3247_v11 = vadd.f32 %v3241_v40, %v3187_v34 }
 0x648   : >> { %v9266_v30 = vsub.f32 %v3443_v58, %v10560_v15  ;;  %v3392_v42 = vadd.f32 %v3386_v32, %v3320_v55  ;;  %v3385_v26 = vsel %vm688_vm0, %v3383_v8, %v3384_v63  ;;  %v3433_v7 = vadd.f32 %v10562_v60, %v10561_v13  ;;  %v10567_v60 = vld [vmem:[#allocation113_spill] sm:$0xff] }
 0x649   : >> { %3465 = vadd.xlane.f32.xlu0 %v3459_v56  ;;  %v3460_v14 = vmul.f32 %v9263_v61, %v10563_v21  ;;  %v3444_v5 = vadd.f32 %v10564_v36, %v3390_v48  ;;  %v3450_v33 = vmul.f32 %v10566_v50, %v10565_v23  ;;  %v3319_v40 = vadd.f32 %v3313_v1, %v3247_v11  ;;  %v10573_v56 = vld [vmem:[#allocation116_spill] sm:$0xff]  ;;  %v10577_v50 = vld [vmem:[#allocation106_spill] sm:$0xff] }
 0x64a   : >> { %v3461_v41 = vmul.f32 %v9266_v30, %v10567_v60  ;;  %v3446_v18 = vadd.f32 %v10568_v16, %v3392_v42  ;;  %v3452_v22 = vmul.f32 %v10570_v27, %v10569_v57  ;;  %v3439_v29 = vmul.f32 %v10572_v38, %v10571_v43 }
 0x64b   : >> { %3467 = vadd.xlane.f32.xlu1 %v3460_v14  ;;  %v3456_v12 = vsub.f32 %v3444_v5, %v3450_v33  ;;  %v3391_v52 = vadd.f32 %v3385_v26, %v3319_v40  ;;  %v3451_v3 = vmul.f32 %v3433_v7, %v10569_v57  ;;  %v10576_v5 = vld [vmem:[#allocation107_spill] sm:$0xff]  ;;  %v10578_v40 = vld [vmem:[#allocation101_spill] sm:$0xff] }
 0x64c   : >> { %v9284_v19 = vsub.f32 %v3446_v18, %v3452_v22 }
 0x64d   : >> { %3469 = vadd.xlane.f32.xlu0 %v3461_v41  ;;  %v3445_v24 = vadd.f32 %v3439_v29, %v3391_v52  ;;  %v3462_v2 = vmul.f32 %v3456_v12, %v10574_v31  ;;  %v10579_v41 = vld [vmem:[#allocation100_spill] sm:$0xff] }
 0x64e   : >> { %v3464_v46 = vmul.f32 %v9284_v19, %v10573_v56  ;;  %v10582_v29 = vld [vmem:[#allocation104_spill] sm:$0xff] }
 0x64f   : >> { %v3457_v4 = vsub.f32 %v3445_v24, %v3451_v3  ;;  %v10575_v24 = vld [vmem:[#allocation108_spill] sm:$0xff] }
 0x650   : >> { %3475 = vadd.xlane.f32.xlu1 %v3464_v46  ;;  %v10583_v46 = vld [vmem:[#allocation99_spill] sm:$0xff] }
 0x651   : >> { %3471 = vadd.xlane.f32.xlu0 %v3462_v2  ;;  %v3463_v47 = vmul.f32 %v3457_v4, %v10572_v38  ;;  %v10584_v2 = vld [vmem:[#allocation98_spill] sm:$0xff] }
 0x655   : >> { %3473 = vadd.xlane.f32.xlu0 %v3463_v47 }
 0x6d2   : >> { %v3466_v59 = vpop.xlane.xlu0 %3465 }
 0x6d4   : >> { %v3468_v37 = vpop.xlane.xlu1 %3467 }
 0x6d5   : >> { %v3477_v9 = vadd.f32 %v3468_v37, %v3466_v59  ;;  %v10580_v37 = vld [vmem:[#allocation109_spill] sm:$0xff] }
 0x6d6   : >> { %v3470_v25 = vpop.xlane.xlu0 %3469 }
 0x6d7   : >> { %v3478_v54 = vrot.slane %v3477_v9, 4 }
 0x6d9   : >> { %v3479_v6 = vadd.f32 %v3478_v54, %v3477_v9  ;;  %v3476_v8 = vpop.xlane.xlu1 %3475 }
 0x6da   : >> { %v3472_v51 = vpop.xlane.xlu0 %3471 }
 0x6db   : >> { %v3480_v45 = vrot.slane %v3479_v6, 2  ;;  %v3484_v53 = vadd.f32 %v3472_v51, %v3470_v25 }
 0x6dd   : >> { %v3481_v0 = vadd.f32 %v3480_v45, %v3479_v6  ;;  %v3485_v17 = vrot.slane %v3484_v53, 4  ;;  %v10587_v6 = vld [vmem:[#allocation102_spill] sm:$0xff]  ;;  %v10588_v45 = vld [vmem:[#allocation97_spill] sm:$0xff] }
 0x6de   : >> { %v3474_v63 = vpop.xlane.xlu0 %3473 }
 0x6df   : >> { %v3482_v44 = vrot.slane %v3481_v0, 1  ;;  %v3486_v35 = vadd.f32 %v3485_v17, %v3484_v53  ;;  %v3491_v20 = vadd.f32 %v3476_v8, %v3474_v63  ;;  %v10585_v8 = vld [vmem:[#allocation110_spill] sm:$0xff]  ;;  %v10589_v53 = vld [vmem:[#allocation96_spill] sm:$0xff] }
 0x6e1   : >> { %v3483_v28 = vadd.f32 %v3482_v44, %v3481_v0  ;;  %v3487_v34 = vrot.slane %v3486_v35, 2  ;;  %v3492_v49 = vrot.slane %v3491_v20, 4 }
 0x6e3   : >> { %3962 = vrcp.f32 %v3483_v28  ;;  %v3488_v58 = vadd.f32 %v3487_v34, %v3486_v35  ;;  %v3493_v55 = vadd.f32 %v3492_v49, %v3491_v20 }
 0x6e5   : >> { %v3489_v32 = vrot.slane %v3488_v58, 1  ;;  %v3494_v1 = vrot.slane %v3493_v55, 2 }
 0x6e7   : >> { %v3490_v10 = vadd.f32 %v3489_v32, %v3488_v58  ;;  %v3495_v48 = vadd.f32 %v3494_v1, %v3493_v55 }
 0x6e9   : >> { %3964 = vrcp.f32 %v3490_v10  ;;  %v3496_v11 = vrot.slane %v3495_v48, 1 }
 0x6eb   : >> { %v3497_v15 = vadd.f32 %v3496_v11, %v3495_v48 }
 0x6ed   : >> { %3966 = vrcp.f32 %v3497_v15 }
 0x6f0   : >> { %v3963_v42 = vpop.eup %3962 }
 0x6f1   : >> { %v3499_v26 = vmul.f32 %v3963_v42, %v10575_v24 }
 0x6f3   : >> { %v3504_v13 = vmul.f32 %v3499_v26, %v10558_v62  ;;  %v3505_v7 = vmul.f32 %v3499_v26, %v10563_v21  ;;  %v3516_v14 = vmul.f32 %v3499_v26, %v9252_v39  ;;  %v3517_v36 = vmul.f32 %v3499_v26, %v9263_v61  ;;  %v10581_v61 = vld [vmem:[#allocation105_spill] sm:$0xff] }
 0x6f5   : >> { %v3510_v23 = vadd.f32 %v10576_v5, %v3504_v13   ;;  %v3511_v33 = vadd.f32 %v10577_v50, %v3505_v7   ;;  %v3522_v35 = vsub.f32 %v10578_v40, %v3516_v14   ;;  %v3523_v32 = vsub.f32 %v10579_v41, %v3517_v36  }
 0x6f6   : >> { %v3965_v16 = vpop.eup %3964 }
 0x6f7   : >> { %v3501_v18 = vmul.f32 %v3965_v16, %v10580_v37  ;;  %v10595_v10 = vmov %v3511_v33  ;;  %v10596_v48 = vmov %v3510_v23  ;;  %3528 = vst [vmem:[%s4287_s12] sm:$0xff] (%p9317_p3), %v3510_v23  ;;  %3529 = vst [vmem:[%s4287_s12 + $0x8] sm:$0xff] (%p9317_p3), %v3511_v33 }
 0x6f9   : >> { %v3506_v57 = vmul.f32 %v3501_v18, %v10567_v60  ;;  %v3507_v27 = vmul.f32 %v3501_v18, %v10574_v31  ;;  %v3518_v22 = vmul.f32 %v3501_v18, %v9266_v30  ;;  %v3519_v39 = vmul.f32 %v3501_v18, %v3456_v12  ;;  %v10586_v30 = vld [vmem:[#allocation103_spill] sm:$0xff] }
 0x6fa   : >> { %v3967_v52 = vpop.eup %3966 }
 0x6fb   : >> { %v3512_v43 = vadd.f32 %v10581_v61, %v3506_v57   ;;  %v3513_v3 = vadd.f32 %v10582_v29, %v3507_v27   ;;  %v3524_v29 = vsub.f32 %v10583_v46, %v3518_v22   ;;  %v3525_v2 = vsub.f32 %v10584_v2, %v3519_v39  }
 0x6fc   : >> { %v3503_v47 = vmul.f32 %v3967_v52, %v10585_v8 }
 0x6fd   : >> { %v10593_v5 = vmov %v3513_v3  ;;  %v10594_v17 = vmov %v3512_v43  ;;  %3530 = vst [vmem:[%s4287_s12 + $0x10] sm:$0xff] (%p9317_p3), %v3512_v43  ;;  %3531 = vst [vmem:[%s4287_s12 + $0x18] sm:$0xff] (%p9317_p3), %v3513_v3 }
 0x6fe   : >> { %v3508_v59 = vmul.f32 %v3503_v47, %v10572_v38  ;;  %v3509_v9 = vmul.f32 %v3503_v47, %v10573_v56  ;;  %v3520_v25 = vmul.f32 %v3503_v47, %v3457_v4  ;;  %v3521_v54 = vmul.f32 %v3503_v47, %v9284_v19  ;;  %2527 = sbr.rel (!%p9317_p3) target bundleno = 1050 (0x41a), region = 82 }
 0x700   : >> { %v3514_v12 = vadd.f32 %v10586_v30, %v3508_v59   ;;  %v3515_v51 = vadd.f32 %v10587_v6, %v3509_v9   ;;  %v3526_v11 = vsub.f32 %v10588_v45, %v3520_v25   ;;  %v3527_v63 = vsub.f32 %v10589_v53, %v3521_v54  }
 0x702   : >> { %v10591_v0 = vmov %v3515_v51  ;;  %v10592_v49 = vmov %v3514_v12  ;;  %3532 = vst [vmem:[%s4287_s12 + $0x20] sm:$0xff] (%p9317_p3), %v3514_v12  ;;  %3533 = vst [vmem:[%s4287_s12 + $0x28] sm:$0xff] (%p9317_p3), %v3515_v51 }
 0x703 PF: > { %s16_s15 = sadd.s32 1, %s4100_s15  }
 0x704   : > { %p13_p5 = scmp.ge.s32.totalorder %s16_s15, 4  }
 0x706   :  { %15 = sbr.rel (!%p13_p5) target bundleno = 2 (0x2), region = 93 }
 0x70b   :  { %3558 = vsyncpa [#allocation3], 1 }
 0x70c   :  { %3560 = vsyncpa [#allocation3 + $0x1], 1 }
 0x70d   :  { %3561 = vsyncpa [#allocation5], 1 }

</bundles_post_ra>
